<compile_context>
chip_gen: v6e
topology: v6e:2x2x1
jax: 0.10.0
libtpu: 0.0.40
codegen_flags: <defaults>
</compile_context>

<pallas_src>
import math

import jax
import jax.numpy as jnp
from jax import lax
from jax.experimental import pallas as pl
from jax.experimental.pallas import tpu as pltpu


# ----------------------------- Pallas kernel ---------------------------------
def _block_kernel(xp_ref, xpool_ref, w1_ref, w2_ref, wsc_ref, o_ref,
                  h1p_ref, p00, p01, p10, p11):
    # xp_ref   : (H+2, W+2, Cpi) bf16  zero-padded input image (1-px halo)
    # xpool_ref: (Ho,  Wo,  Cpi) bf16  2x2 avg-pooled input (shortcut branch)
    # w1_ref   : (9,  Cpi, Cpo)  bf16  conv1 weights, one (Cpi,Cpo) matrix per tap
    # w2_ref   : (16, Cpo, Cpo)  bf16  conv2 with 2x2 avg-pool folded in (4x4 s2 taps)
    # wsc_ref  : (Cpi, Cpo)      bf16  1x1 shortcut weights
    # o_ref    : (Ho, Wo, Cpo)   f32   output image
    # h1p_ref  : (H+2, W+2, Cpo) f32   relu(conv1) with a 1-px zero halo
    # p00..p11 : (Ho+1, Wo+1, Cpo) bf16  parity phase planes of h1p
    Hp, Wp, Cpi = xp_ref.shape
    H, W = Hp - 2, Wp - 2
    Ho, Wo, Cpo = o_ref.shape
    f32 = jnp.float32

    # Zero the halo scratch once; the interior is overwritten every grid step
    # and the 1-px border is never touched again (scratch persists across steps).
    @pl.when(pl.program_id(0) == 0)
    def _():
        h1p_ref[...] = jnp.zeros_like(h1p_ref)

    # ---- conv1 (3x3, pad 1, no bias): 9 per-tap MXU matmuls, f32 accumulate --
    acc1 = jnp.zeros((H * W, Cpo), f32)
    for t in range(9):
        dy, dx = divmod(t, 3)
        win = xp_ref[dy:dy + H, dx:dx + W, :].reshape(H * W, Cpi)   # bf16
        acc1 = acc1 + jnp.dot(win, w1_ref[t], preferred_element_type=f32)
    h1 = jnp.maximum(acc1, 0.0).reshape(H, W, Cpo)                  # ReLU, f32
    h1p_ref[1:H + 1, 1:W + 1, :] = h1

    # ---- deinterleave relu(conv1)+halo into 4 parity phase planes (4 strided
    #      passes instead of 16 stride-2 gathers on the conv2 taps) -----------
    planes = (p00, p01, p10, p11)
    for pa in range(2):
        for pb in range(2):
            v = h1p_ref[pl.ds(pa, Ho + 1, stride=2),
                        pl.ds(pb, Wo + 1, stride=2), :]
            planes[2 * pa + pb][...] = v.astype(jnp.bfloat16)

    # ---- conv2 (3x3, pad 1) fused with trailing 2x2 avg-pool == effective
    #      4x4 stride-2 conv: 16 per-tap matmuls on UNIT-stride plane windows --
    acc2 = jnp.zeros((Ho * Wo, Cpo), f32)
    for a in range(4):
        da, pa = divmod(a, 2)            # a = 2*da + pa
        for b in range(4):
            db, pb = divmod(b, 2)        # b = 2*db + pb
            win = planes[2 * pa + pb][da:da + Ho, db:db + Wo, :]
            win = win.reshape(Ho * Wo, Cpo)                         # bf16
            acc2 = acc2 + jnp.dot(win, w2_ref[4 * a + b],
                                  preferred_element_type=f32)

    # ---- shortcut: 1x1 conv of the (pre-pooled) input -------------------------
    acc2 = acc2 + jnp.dot(xpool_ref[...].reshape(Ho * Wo, Cpi), wsc_ref[...],
                          preferred_element_type=f32)

    o_ref[...] = acc2.reshape(Ho, Wo, Cpo).astype(o_ref.dtype)


# ------------------------------ JAX wrapper ----------------------------------
def _round_up(v, m):
    return (v + m - 1) // m * m


def optimized_block_fwd(x_nchw, w1, w2, wsc):
    """x_nchw: (N, Cin, H, W); w1: (Cout, Cin, 3, 3); w2: (Cout, Cout, 3, 3);
    wsc: (Cout, Cin, 1, 1).  Returns (N, Cout, H//2, W//2) — matches PyTorch."""
    N, Cin, H, W = x_nchw.shape
    Cout = w1.shape[0]
    assert H % 2 == 0 and W % 2 == 0, "2x2 avg-pool fusion assumes even H, W"
    Ho, Wo = H // 2, W // 2

    # Output channels -> 128-lane multiple (lane-dense stores / matmul N);
    # input channels only to a small sublane multiple (no 128x inflation).
    Cpi = _round_up(Cin, 16)
    Cpo = _round_up(Cout, 128)

    # NCHW -> NHWC, bf16 activations, tiny channel pad, 1-px spatial halo.
    x = jnp.transpose(x_nchw, (0, 2, 3, 1))
    x = jnp.pad(x, ((0, 0), (0, 0), (0, 0), (0, Cpi - Cin)))
    x_bf = x.astype(jnp.bfloat16)
    xp = jnp.pad(x_bf, ((0, 0), (1, 1), (1, 1), (0, 0)))            # (N,H+2,W+2,Cpi)
    # Shortcut 2x2 avg-pool done once here (XLA); kernel does a single 1x1 dot
    # and needs no stride-2 reads of the input.
    xpool = x_bf.astype(jnp.float32).reshape(N, Ho, 2, Wo, 2, Cpi)
    xpool = xpool.mean(axis=(2, 4)).astype(jnp.bfloat16)            # (N,Ho,Wo,Cpi)

    # conv1 weights -> (9, Cpi, Cpo) per-tap matrices, bf16.
    w1t = jnp.transpose(w1, (2, 3, 1, 0))                           # (3,3,Cin,Cout)
    w1t = jnp.pad(w1t, ((0, 0), (0, 0), (0, Cpi - Cin), (0, Cpo - Cout)))
    w1_taps = w1t.reshape(9, Cpi, Cpo).astype(jnp.bfloat16)

    # conv2 with the trailing 2x2 avg-pool folded in: effective 4x4 stride-2 taps
    #   w2e[a,b] = 0.25 * sum_{dy: a-dy in {0,1}} sum_{dx: b-dx in {0,1}} w2[dy,dx]
    w2t = jnp.transpose(w2, (2, 3, 1, 0)).astype(jnp.float32)       # (3,3,Cin,Cout)
    taps = []
    for a in range(4):
        for b in range(4):
            acc = jnp.zeros((Cout, Cout), jnp.float32)
            for dy in range(3):
                if a - dy not in (0, 1):
                    continue
                for dx in range(3):
                    if b - dx not in (0, 1):
                        continue
                    acc = acc + w2t[dy, dx]
            taps.append(0.25 * acc)
    w2e = jnp.stack(taps, axis=0)                                   # (16,Cout,Cout)
    w2e = jnp.pad(w2e, ((0, 0), (0, Cpo - Cout), (0, Cpo - Cout)))
    w2_taps = w2e.astype(jnp.bfloat16)

    # 1x1 shortcut weights -> (Cpi, Cpo) bf16.
    wsct = jnp.transpose(wsc[:, :, 0, 0], (1, 0))                   # (Cin, Cout)
    wsc_2d = jnp.pad(wsct, ((0, Cpi - Cin), (0, Cpo - Cout))).astype(jnp.bfloat16)

    # VMEM budget: double-buffered in/out blocks + weights + scratch + live f32
    # accumulators; modest headroom, capped below v7x's 64 MiB physical VMEM.
    tile_bytes = (
        2 * (H + 2) * (W + 2) * Cpi * 2              # xp block (dbl-buffered, bf16)
        + 2 * Ho * Wo * Cpi * 2                      # xpool block (bf16)
        + 2 * (9 * Cpi + 16 * Cpo + Cpi) * Cpo * 2   # weights (bf16, dbl-buffered)
        + 2 * Ho * Wo * Cpo * 4                      # output block (f32)
        + (H + 2) * (W + 2) * Cpo * 4                # relu(conv1) halo scratch (f32)
        + 4 * (Ho + 1) * (Wo + 1) * Cpo * 2          # phase planes (bf16)
        + (H * W + Ho * Wo) * Cpo * 4                # live f32 accumulators
    )
    vmem_limit = int(min(max(tile_bytes + (4 << 20), 16 << 20), 48 << 20))

    flops = 2 * N * (H * W * 9 * Cin * Cout
                     + Ho * Wo * 16 * Cout * Cout
                     + Ho * Wo * Cin * Cout)
    bytes_accessed = (xp.size * 2 + xpool.size * 2
                      + (w1_taps.size + w2_taps.size + wsc_2d.size) * 2
                      + N * Ho * Wo * Cpo * 4)

    out_nhwc = pl.pallas_call(
        _block_kernel,
        out_shape=jax.ShapeDtypeStruct((N, Ho, Wo, Cpo), jnp.float32),
        grid=(N,),
        in_specs=[
            pl.BlockSpec((None, H + 2, W + 2, Cpi), lambda n: (n, 0, 0, 0)),
            pl.BlockSpec((None, Ho, Wo, Cpi), lambda n: (n, 0, 0, 0)),
            pl.BlockSpec((9, Cpi, Cpo), lambda n: (0, 0, 0)),
            pl.BlockSpec((16, Cpo, Cpo), lambda n: (0, 0, 0)),
            pl.BlockSpec((Cpi, Cpo), lambda n: (0, 0)),
        ],
        out_specs=pl.BlockSpec((None, Ho, Wo, Cpo), lambda n: (n, 0, 0, 0)),
        scratch_shapes=[
            pltpu.VMEM((H + 2, W + 2, Cpo), jnp.float32),      # relu(conv1) + halo
            pltpu.VMEM((Ho + 1, Wo + 1, Cpo), jnp.bfloat16),   # phase plane (0,0)
            pltpu.VMEM((Ho + 1, Wo + 1, Cpo), jnp.bfloat16),   # phase plane (0,1)
            pltpu.VMEM((Ho + 1, Wo + 1, Cpo), jnp.bfloat16),   # phase plane (1,0)
            pltpu.VMEM((Ho + 1, Wo + 1, Cpo), jnp.bfloat16),   # phase plane (1,1)
        ],
        compiler_params=pltpu.CompilerParams(
            dimension_semantics=("parallel",),   # batch shards across TCs on v7x
            vmem_limit_bytes=vmem_limit,
        ),
        cost_estimate=pl.CostEstimate(
            flops=int(flops), transcendentals=0,
            bytes_accessed=int(bytes_accessed)),
    )(xp, xpool, w1_taps, w2_taps, wsc_2d)

    # Strip channel padding, back to NCHW.
    return jnp.transpose(out_nhwc[:, :, :, :Cout], (0, 3, 1, 2))


# --------------------- deterministic parameter init --------------------------
def xavier_uniform(key, shape, gain):
    # PyTorch nn.init.xavier_uniform_ for Conv2d weight (out, in, kh, kw)
    fan_in = shape[1] * shape[2] * shape[3]
    fan_out = shape[0] * shape[2] * shape[3]
    bound = gain * math.sqrt(6.0 / (fan_in + fan_out))
    return jax.random.uniform(key, shape, jnp.float32, -bound, bound)


# --------------------------- pure-JAX reference -------------------------------
def _ref_forward(x, w1, w2, wsc):
    # Same operand precision as the kernel (bf16 operands, f32 accumulation).
    rt = lambda t: t.astype(jnp.bfloat16).astype(jnp.float32)
    x, w1, w2, wsc = rt(x), rt(w1), rt(w2), rt(wsc)
    dn = ("NCHW", "OIHW", "NCHW")

    def pool2(t):
        n, c, h, w = t.shape
        return t.reshape(n, c, h // 2, 2, w // 2, 2).mean(axis=(3, 5))

    h = lax.conv_general_dilated(x, w1, (1, 1), ((1, 1), (1, 1)), dimension_numbers=dn)
    h = jnp.maximum(h, 0.0)
    h = lax.conv_general_dilated(h, w2, (1, 1), ((1, 1), (1, 1)), dimension_numbers=dn)
    h = pool2(h)
    s = lax.conv_general_dilated(pool2(x), wsc, (1, 1), ((0, 0), (0, 0)),
                                 dimension_numbers=dn)
    return h + s


if __name__ == "__main__":
    key = jax.random.PRNGKey(0)
    kx, k1, k2, k3 = jax.random.split(key, 4)

    N, Cin, Cout, H, W = 2, 4, 8, 16, 16
    x = jax.random.normal(kx, (N, Cin, H, W), jnp.float32)
    w1 = xavier_uniform(k1, (Cout, Cin, 3, 3), math.sqrt(2.0))
    w2 = xavier_uniform(k2, (Cout, Cout, 3, 3), math.sqrt(2.0))
    wsc = xavier_uniform(k3, (Cout, Cin, 1, 1), 1.0)

    out = jax.block_until_ready(optimized_block_fwd(x, w1, w2, wsc))
    ref = _ref_forward(x, w1, w2, wsc)

    assert out.shape == (N, Cout, H // 2, W // 2), out.shape
    max_err = float(jnp.max(jnp.abs(out - ref)))
    assert jnp.allclose(out, ref, atol=5e-2, rtol=5e-2), max_err

    print("KERNEL_OK")
</pallas_src>

<mosaic_0001>
module attributes {stable_mosaic.version = 11 : i64} {
  func.func @_block_kernel(%arg0: i32, %arg1: memref<1x18x18x16xbf16, #tpu.memory_space<vmem>>, %arg2: memref<1x8x8x16xbf16, #tpu.memory_space<vmem>>, %arg3: memref<9x16x128xbf16, #tpu.memory_space<vmem>>, %arg4: memref<16x128x128xbf16, #tpu.memory_space<vmem>>, %arg5: memref<16x128xbf16, #tpu.memory_space<vmem>>, %arg6: memref<1x8x8x128xf32, #tpu.memory_space<vmem>>, %arg7: memref<18x18x128xf32, #tpu.memory_space<vmem>>, %arg8: memref<9x9x128xbf16, #tpu.memory_space<vmem>>, %arg9: memref<9x9x128xbf16, #tpu.memory_space<vmem>>, %arg10: memref<9x9x128xbf16, #tpu.memory_space<vmem>>, %arg11: memref<9x9x128xbf16, #tpu.memory_space<vmem>>) attributes {dimension_semantics = [#tpu.dimension_semantics<parallel>], iteration_bounds = array<i64: 2>, scalar_prefetch = 0 : i64, scratch_operands = 5 : i64, tpu.core_type = #tpu.core_type<tc>, window_params = [{transform_indices = @transform_0, window_bounds = array<i64: 1, 18, 18, 16>}, {transform_indices = @transform_1, window_bounds = array<i64: 1, 8, 8, 16>}, {pipeline_mode = #tpu.pipeline_mode<synchronous>, transform_indices = @transform_2, window_bounds = array<i64: 9, 16, 128>}, {pipeline_mode = #tpu.pipeline_mode<synchronous>, transform_indices = @transform_3, window_bounds = array<i64: 16, 128, 128>}, {pipeline_mode = #tpu.pipeline_mode<synchronous>, transform_indices = @transform_4, window_bounds = array<i64: 16, 128>}, {transform_indices = @transform_5, window_bounds = array<i64: 1, 8, 8, 128>}]} {
    %c0_i32 = arith.constant 0 : i32
    %0 = arith.cmpi eq, %arg0, %c0_i32 : i32
    %1 = arith.extui %0 : i1 to i32
    %c0_i32_0 = arith.constant 0 : i32
    %2 = arith.cmpi ne, %1, %c0_i32_0 : i32
    scf.if %2 {
      %cst_209 = arith.constant 0.000000e+00 : f32
      %190 = vector.broadcast %cst_209 : f32 to vector<18x18x128xf32>
      %c0_210 = arith.constant 0 : index
      %c0_211 = arith.constant 0 : index
      %c0_212 = arith.constant 0 : index
      %191 = vector.load %arg7[%c0_210, %c0_211, %c0_212] : memref<18x18x128xf32, #tpu.memory_space<vmem>>, vector<18x18x128xf32>
      tpu.vector_store %arg7[%c0_210, %c0_211, %c0_212], %190 {strides = array<i32>} : memref<18x18x128xf32, #tpu.memory_space<vmem>>, vector<18x18x128xf32>,
    } else {
    }
    %cst = arith.constant 0.000000e+00 : f32
    %3 = vector.broadcast %cst : f32 to vector<256x128xf32>
    %c0 = arith.constant 0 : index
    %c0_1 = arith.constant 0 : index
    %c0_2 = arith.constant 0 : index
    %c0_3 = arith.constant 0 : index
    %4 = vector.load %arg1[%c0, %c0_1, %c0_2, %c0_3] : memref<1x18x18x16xbf16, #tpu.memory_space<vmem>>, vector<1x16x16x16xbf16>
    %5 = vector.shape_cast %4 : vector<1x16x16x16xbf16> to vector<16x16x16xbf16>
    %6 = vector.shape_cast %5 : vector<16x16x16xbf16> to vector<256x16xbf16>
    %c0_4 = arith.constant 0 : index
    %c0_5 = arith.constant 0 : index
    %c0_6 = arith.constant 0 : index
    %7 = vector.load %arg3[%c0_4, %c0_5, %c0_6] : memref<9x16x128xbf16, #tpu.memory_space<vmem>>, vector<1x16x128xbf16>
    %8 = vector.shape_cast %7 : vector<1x16x128xbf16> to vector<16x128xbf16>
    %cst_7 = arith.constant dense<0.000000e+00> : vector<256x128xf32>
    %9 = tpu.matmul %6, %8, %cst_7 {dimension_numbers = #tpu.dot_dimension_numbers<[1], [0], [0], [1], [0, 0, 1, 1], [], []>} : vector<256x16xbf16>, vector<16x128xbf16>, vector<256x128xf32> -> vector<256x128xf32>
    %10 = arith.addf %3, %9 : vector<256x128xf32>
    %c0_8 = arith.constant 0 : index
    %c0_9 = arith.constant 0 : index
    %c1 = arith.constant 1 : index
    %c0_10 = arith.constant 0 : index
    %11 = vector.load %arg1[%c0_8, %c0_9, %c1, %c0_10] : memref<1x18x18x16xbf16, #tpu.memory_space<vmem>>, vector<1x16x16x16xbf16>
    %12 = vector.shape_cast %11 : vector<1x16x16x16xbf16> to vector<16x16x16xbf16>
    %13 = vector.shape_cast %12 : vector<16x16x16xbf16> to vector<256x16xbf16>
    %c1_11 = arith.constant 1 : index
    %c0_12 = arith.constant 0 : index
    %c0_13 = arith.constant 0 : index
    %14 = vector.load %arg3[%c1_11, %c0_12, %c0_13] : memref<9x16x128xbf16, #tpu.memory_space<vmem>>, vector<1x16x128xbf16>
    %15 = vector.shape_cast %14 : vector<1x16x128xbf16> to vector<16x128xbf16>
    %cst_14 = arith.constant dense<0.000000e+00> : vector<256x128xf32>
    %16 = tpu.matmul %13, %15, %cst_14 {dimension_numbers = #tpu.dot_dimension_numbers<[1], [0], [0], [1], [0, 0, 1, 1], [], []>} : vector<256x16xbf16>, vector<16x128xbf16>, vector<256x128xf32> -> vector<256x128xf32>
    %17 = arith.addf %10, %16 : vector<256x128xf32>
    %c0_15 = arith.constant 0 : index
    %c0_16 = arith.constant 0 : index
    %c2 = arith.constant 2 : index
    %c0_17 = arith.constant 0 : index
    %18 = vector.load %arg1[%c0_15, %c0_16, %c2, %c0_17] : memref<1x18x18x16xbf16, #tpu.memory_space<vmem>>, vector<1x16x16x16xbf16>
    %19 = vector.shape_cast %18 : vector<1x16x16x16xbf16> to vector<16x16x16xbf16>
    %20 = vector.shape_cast %19 : vector<16x16x16xbf16> to vector<256x16xbf16>
    %c2_18 = arith.constant 2 : index
    %c0_19 = arith.constant 0 : index
    %c0_20 = arith.constant 0 : index
    %21 = vector.load %arg3[%c2_18, %c0_19, %c0_20] : memref<9x16x128xbf16, #tpu.memory_space<vmem>>, vector<1x16x128xbf16>
    %22 = vector.shape_cast %21 : vector<1x16x128xbf16> to vector<16x128xbf16>
    %cst_21 = arith.constant dense<0.000000e+00> : vector<256x128xf32>
    %23 = tpu.matmul %20, %22, %cst_21 {dimension_numbers = #tpu.dot_dimension_numbers<[1], [0], [0], [1], [0, 0, 1, 1], [], []>} : vector<256x16xbf16>, vector<16x128xbf16>, vector<256x128xf32> -> vector<256x128xf32>
    %24 = arith.addf %17, %23 : vector<256x128xf32>
    %c0_22 = arith.constant 0 : index
    %c1_23 = arith.constant 1 : index
    %c0_24 = arith.constant 0 : index
    %c0_25 = arith.constant 0 : index
    %25 = vector.load %arg1[%c0_22, %c1_23, %c0_24, %c0_25] : memref<1x18x18x16xbf16, #tpu.memory_space<vmem>>, vector<1x16x16x16xbf16>
    %26 = vector.shape_cast %25 : vector<1x16x16x16xbf16> to vector<16x16x16xbf16>
    %27 = vector.shape_cast %26 : vector<16x16x16xbf16> to vector<256x16xbf16>
    %c3 = arith.constant 3 : index
    %c0_26 = arith.constant 0 : index
    %c0_27 = arith.constant 0 : index
    %28 = vector.load %arg3[%c3, %c0_26, %c0_27] : memref<9x16x128xbf16, #tpu.memory_space<vmem>>, vector<1x16x128xbf16>
    %29 = vector.shape_cast %28 : vector<1x16x128xbf16> to vector<16x128xbf16>
    %cst_28 = arith.constant dense<0.000000e+00> : vector<256x128xf32>
    %30 = tpu.matmul %27, %29, %cst_28 {dimension_numbers = #tpu.dot_dimension_numbers<[1], [0], [0], [1], [0, 0, 1, 1], [], []>} : vector<256x16xbf16>, vector<16x128xbf16>, vector<256x128xf32> -> vector<256x128xf32>
    %31 = arith.addf %24, %30 : vector<256x128xf32>
    %c0_29 = arith.constant 0 : index
    %c1_30 = arith.constant 1 : index
    %c1_31 = arith.constant 1 : index
    %c0_32 = arith.constant 0 : index
    %32 = vector.load %arg1[%c0_29, %c1_30, %c1_31, %c0_32] : memref<1x18x18x16xbf16, #tpu.memory_space<vmem>>, vector<1x16x16x16xbf16>
    %33 = vector.shape_cast %32 : vector<1x16x16x16xbf16> to vector<16x16x16xbf16>
    %34 = vector.shape_cast %33 : vector<16x16x16xbf16> to vector<256x16xbf16>
    %c4 = arith.constant 4 : index
    %c0_33 = arith.constant 0 : index
    %c0_34 = arith.constant 0 : index
    %35 = vector.load %arg3[%c4, %c0_33, %c0_34] : memref<9x16x128xbf16, #tpu.memory_space<vmem>>, vector<1x16x128xbf16>
    %36 = vector.shape_cast %35 : vector<1x16x128xbf16> to vector<16x128xbf16>
    %cst_35 = arith.constant dense<0.000000e+00> : vector<256x128xf32>
    %37 = tpu.matmul %34, %36, %cst_35 {dimension_numbers = #tpu.dot_dimension_numbers<[1], [0], [0], [1], [0, 0, 1, 1], [], []>} : vector<256x16xbf16>, vector<16x128xbf16>, vector<256x128xf32> -> vector<256x128xf32>
    %38 = arith.addf %31, %37 : vector<256x128xf32>
    %c0_36 = arith.constant 0 : index
    %c1_37 = arith.constant 1 : index
    %c2_38 = arith.constant 2 : index
    %c0_39 = arith.constant 0 : index
    %39 = vector.load %arg1[%c0_36, %c1_37, %c2_38, %c0_39] : memref<1x18x18x16xbf16, #tpu.memory_space<vmem>>, vector<1x16x16x16xbf16>
    %40 = vector.shape_cast %39 : vector<1x16x16x16xbf16> to vector<16x16x16xbf16>
    %41 = vector.shape_cast %40 : vector<16x16x16xbf16> to vector<256x16xbf16>
    %c5 = arith.constant 5 : index
    %c0_40 = arith.constant 0 : index
    %c0_41 = arith.constant 0 : index
    %42 = vector.load %arg3[%c5, %c0_40, %c0_41] : memref<9x16x128xbf16, #tpu.memory_space<vmem>>, vector<1x16x128xbf16>
    %43 = vector.shape_cast %42 : vector<1x16x128xbf16> to vector<16x128xbf16>
    %cst_42 = arith.constant dense<0.000000e+00> : vector<256x128xf32>
    %44 = tpu.matmul %41, %43, %cst_42 {dimension_numbers = #tpu.dot_dimension_numbers<[1], [0], [0], [1], [0, 0, 1, 1], [], []>} : vector<256x16xbf16>, vector<16x128xbf16>, vector<256x128xf32> -> vector<256x128xf32>
    %45 = arith.addf %38, %44 : vector<256x128xf32>
    %c0_43 = arith.constant 0 : index
    %c2_44 = arith.constant 2 : index
    %c0_45 = arith.constant 0 : index
    %c0_46 = arith.constant 0 : index
    %46 = vector.load %arg1[%c0_43, %c2_44, %c0_45, %c0_46] : memref<1x18x18x16xbf16, #tpu.memory_space<vmem>>, vector<1x16x16x16xbf16>
    %47 = vector.shape_cast %46 : vector<1x16x16x16xbf16> to vector<16x16x16xbf16>
    %48 = vector.shape_cast %47 : vector<16x16x16xbf16> to vector<256x16xbf16>
    %c6 = arith.constant 6 : index
    %c0_47 = arith.constant 0 : index
    %c0_48 = arith.constant 0 : index
    %49 = vector.load %arg3[%c6, %c0_47, %c0_48] : memref<9x16x128xbf16, #tpu.memory_space<vmem>>, vector<1x16x128xbf16>
    %50 = vector.shape_cast %49 : vector<1x16x128xbf16> to vector<16x128xbf16>
    %cst_49 = arith.constant dense<0.000000e+00> : vector<256x128xf32>
    %51 = tpu.matmul %48, %50, %cst_49 {dimension_numbers = #tpu.dot_dimension_numbers<[1], [0], [0], [1], [0, 0, 1, 1], [], []>} : vector<256x16xbf16>, vector<16x128xbf16>, vector<256x128xf32> -> vector<256x128xf32>
    %52 = arith.addf %45, %51 : vector<256x128xf32>
    %c0_50 = arith.constant 0 : index
    %c2_51 = arith.constant 2 : index
    %c1_52 = arith.constant 1 : index
    %c0_53 = arith.constant 0 : index
    %53 = vector.load %arg1[%c0_50, %c2_51, %c1_52, %c0_53] : memref<1x18x18x16xbf16, #tpu.memory_space<vmem>>, vector<1x16x16x16xbf16>
    %54 = vector.shape_cast %53 : vector<1x16x16x16xbf16> to vector<16x16x16xbf16>
    %55 = vector.shape_cast %54 : vector<16x16x16xbf16> to vector<256x16xbf16>
    %c7 = arith.constant 7 : index
    %c0_54 = arith.constant 0 : index
    %c0_55 = arith.constant 0 : index
    %56 = vector.load %arg3[%c7, %c0_54, %c0_55] : memref<9x16x128xbf16, #tpu.memory_space<vmem>>, vector<1x16x128xbf16>
    %57 = vector.shape_cast %56 : vector<1x16x128xbf16> to vector<16x128xbf16>
    %cst_56 = arith.constant dense<0.000000e+00> : vector<256x128xf32>
    %58 = tpu.matmul %55, %57, %cst_56 {dimension_numbers = #tpu.dot_dimension_numbers<[1], [0], [0], [1], [0, 0, 1, 1], [], []>} : vector<256x16xbf16>, vector<16x128xbf16>, vector<256x128xf32> -> vector<256x128xf32>
    %59 = arith.addf %52, %58 : vector<256x128xf32>
    %c0_57 = arith.constant 0 : index
    %c2_58 = arith.constant 2 : index
    %c2_59 = arith.constant 2 : index
    %c0_60 = arith.constant 0 : index
    %60 = vector.load %arg1[%c0_57, %c2_58, %c2_59, %c0_60] : memref<1x18x18x16xbf16, #tpu.memory_space<vmem>>, vector<1x16x16x16xbf16>
    %61 = vector.shape_cast %60 : vector<1x16x16x16xbf16> to vector<16x16x16xbf16>
    %62 = vector.shape_cast %61 : vector<16x16x16xbf16> to vector<256x16xbf16>
    %c8 = arith.constant 8 : index
    %c0_61 = arith.constant 0 : index
    %c0_62 = arith.constant 0 : index
    %63 = vector.load %arg3[%c8, %c0_61, %c0_62] : memref<9x16x128xbf16, #tpu.memory_space<vmem>>, vector<1x16x128xbf16>
    %64 = vector.shape_cast %63 : vector<1x16x128xbf16> to vector<16x128xbf16>
    %cst_63 = arith.constant dense<0.000000e+00> : vector<256x128xf32>
    %65 = tpu.matmul %62, %64, %cst_63 {dimension_numbers = #tpu.dot_dimension_numbers<[1], [0], [0], [1], [0, 0, 1, 1], [], []>} : vector<256x16xbf16>, vector<16x128xbf16>, vector<256x128xf32> -> vector<256x128xf32>
    %66 = arith.addf %59, %65 : vector<256x128xf32>
    %cst_64 = arith.constant 0.000000e+00 : f32
    %67 = vector.broadcast %cst_64 : f32 to vector<256x128xf32>
    %68 = arith.maximumf %66, %67 : vector<256x128xf32>
    %69 = vector.shape_cast %68 : vector<256x128xf32> to vector<16x16x128xf32>
    %c1_65 = arith.constant 1 : index
    %c1_66 = arith.constant 1 : index
    %c0_67 = arith.constant 0 : index
    %70 = vector.load %arg7[%c1_65, %c1_66, %c0_67] : memref<18x18x128xf32, #tpu.memory_space<vmem>>, vector<16x16x128xf32>
    tpu.vector_store %arg7[%c1_65, %c1_66, %c0_67], %69 {strides = array<i32>} : memref<18x18x128xf32, #tpu.memory_space<vmem>>, vector<16x16x128xf32>,
    %c0_68 = arith.constant 0 : index
    %c0_69 = arith.constant 0 : index
    %c0_70 = arith.constant 0 : index
    %71 = tpu.strided_load %arg7[%c0_68, %c0_69, %c0_70] {strides = array<i32: 2, 2, 1>} : memref<18x18x128xf32, #tpu.memory_space<vmem>>, vector<9x9x128xf32>
    %72 = arith.truncf %71 : vector<9x9x128xf32> to vector<9x9x128xbf16>
    %c0_71 = arith.constant 0 : index
    %c0_72 = arith.constant 0 : index
    %c0_73 = arith.constant 0 : index
    %73 = vector.load %arg8[%c0_71, %c0_72, %c0_73] : memref<9x9x128xbf16, #tpu.memory_space<vmem>>, vector<9x9x128xbf16>
    tpu.vector_store %arg8[%c0_71, %c0_72, %c0_73], %72 {strides = array<i32>} : memref<9x9x128xbf16, #tpu.memory_space<vmem>>, vector<9x9x128xbf16>,
    %c0_74 = arith.constant 0 : index
    %c1_75 = arith.constant 1 : index
    %c0_76 = arith.constant 0 : index
    %74 = tpu.strided_load %arg7[%c0_74, %c1_75, %c0_76] {strides = array<i32: 2, 2, 1>} : memref<18x18x128xf32, #tpu.memory_space<vmem>>, vector<9x9x128xf32>
    %75 = arith.truncf %74 : vector<9x9x128xf32> to vector<9x9x128xbf16>
    %c0_77 = arith.constant 0 : index
    %c0_78 = arith.constant 0 : index
    %c0_79 = arith.constant 0 : index
    %76 = vector.load %arg9[%c0_77, %c0_78, %c0_79] : memref<9x9x128xbf16, #tpu.memory_space<vmem>>, vector<9x9x128xbf16>
    tpu.vector_store %arg9[%c0_77, %c0_78, %c0_79], %75 {strides = array<i32>} : memref<9x9x128xbf16, #tpu.memory_space<vmem>>, vector<9x9x128xbf16>,
    %c1_80 = arith.constant 1 : index
    %c0_81 = arith.constant 0 : index
    %c0_82 = arith.constant 0 : index
    %77 = tpu.strided_load %arg7[%c1_80, %c0_81, %c0_82] {strides = array<i32: 2, 2, 1>} : memref<18x18x128xf32, #tpu.memory_space<vmem>>, vector<9x9x128xf32>
    %78 = arith.truncf %77 : vector<9x9x128xf32> to vector<9x9x128xbf16>
    %c0_83 = arith.constant 0 : index
    %c0_84 = arith.constant 0 : index
    %c0_85 = arith.constant 0 : index
    %79 = vector.load %arg10[%c0_83, %c0_84, %c0_85] : memref<9x9x128xbf16, #tpu.memory_space<vmem>>, vector<9x9x128xbf16>
    tpu.vector_store %arg10[%c0_83, %c0_84, %c0_85], %78 {strides = array<i32>} : memref<9x9x128xbf16, #tpu.memory_space<vmem>>, vector<9x9x128xbf16>,
    %c1_86 = arith.constant 1 : index
    %c1_87 = arith.constant 1 : index
    %c0_88 = arith.constant 0 : index
    %80 = tpu.strided_load %arg7[%c1_86, %c1_87, %c0_88] {strides = array<i32: 2, 2, 1>} : memref<18x18x128xf32, #tpu.memory_space<vmem>>, vector<9x9x128xf32>
    %81 = arith.truncf %80 : vector<9x9x128xf32> to vector<9x9x128xbf16>
    %c0_89 = arith.constant 0 : index
    %c0_90 = arith.constant 0 : index
    %c0_91 = arith.constant 0 : index
    %82 = vector.load %arg11[%c0_89, %c0_90, %c0_91] : memref<9x9x128xbf16, #tpu.memory_space<vmem>>, vector<9x9x128xbf16>
    tpu.vector_store %arg11[%c0_89, %c0_90, %c0_91], %81 {strides = array<i32>} : memref<9x9x128xbf16, #tpu.memory_space<vmem>>, vector<9x9x128xbf16>,
    %cst_92 = arith.constant 0.000000e+00 : f32
    %83 = vector.broadcast %cst_92 : f32 to vector<64x128xf32>
    %c0_93 = arith.constant 0 : index
    %c0_94 = arith.constant 0 : index
    %c0_95 = arith.constant 0 : index
    %84 = vector.load %arg8[%c0_93, %c0_94, %c0_95] : memref<9x9x128xbf16, #tpu.memory_space<vmem>>, vector<8x8x128xbf16>
    %85 = vector.shape_cast %84 : vector<8x8x128xbf16> to vector<64x128xbf16>
    %c0_96 = arith.constant 0 : index
    %c0_97 = arith.constant 0 : index
    %c0_98 = arith.constant 0 : index
    %86 = vector.load %arg4[%c0_96, %c0_97, %c0_98] : memref<16x128x128xbf16, #tpu.memory_space<vmem>>, vector<1x128x128xbf16>
    %87 = vector.shape_cast %86 : vector<1x128x128xbf16> to vector<128x128xbf16>
    %cst_99 = arith.constant dense<0.000000e+00> : vector<64x128xf32>
    %88 = tpu.matmul %85, %87, %cst_99 {dimension_numbers = #tpu.dot_dimension_numbers<[1], [0], [0], [1], [0, 0, 1, 1], [], []>} : vector<64x128xbf16>, vector<128x128xbf16>, vector<64x128xf32> -> vector<64x128xf32>
    %89 = arith.addf %83, %88 : vector<64x128xf32>
    %c0_100 = arith.constant 0 : index
    %c0_101 = arith.constant 0 : index
    %c0_102 = arith.constant 0 : index
    %90 = vector.load %arg9[%c0_100, %c0_101, %c0_102] : memref<9x9x128xbf16, #tpu.memory_space<vmem>>, vector<8x8x128xbf16>
    %91 = vector.shape_cast %90 : vector<8x8x128xbf16> to vector<64x128xbf16>
    %c1_103 = arith.constant 1 : index
    %c0_104 = arith.constant 0 : index
    %c0_105 = arith.constant 0 : index
    %92 = vector.load %arg4[%c1_103, %c0_104, %c0_105] : memref<16x128x128xbf16, #tpu.memory_space<vmem>>, vector<1x128x128xbf16>
    %93 = vector.shape_cast %92 : vector<1x128x128xbf16> to vector<128x128xbf16>
    %cst_106 = arith.constant dense<0.000000e+00> : vector<64x128xf32>
    %94 = tpu.matmul %91, %93, %cst_106 {dimension_numbers = #tpu.dot_dimension_numbers<[1], [0], [0], [1], [0, 0, 1, 1], [], []>} : vector<64x128xbf16>, vector<128x128xbf16>, vector<64x128xf32> -> vector<64x128xf32>
    %95 = arith.addf %89, %94 : vector<64x128xf32>
    %c0_107 = arith.constant 0 : index
    %c1_108 = arith.constant 1 : index
    %c0_109 = arith.constant 0 : index
    %96 = vector.load %arg8[%c0_107, %c1_108, %c0_109] : memref<9x9x128xbf16, #tpu.memory_space<vmem>>, vector<8x8x128xbf16>
    %97 = vector.shape_cast %96 : vector<8x8x128xbf16> to vector<64x128xbf16>
    %c2_110 = arith.constant 2 : index
    %c0_111 = arith.constant 0 : index
    %c0_112 = arith.constant 0 : index
    %98 = vector.load %arg4[%c2_110, %c0_111, %c0_112] : memref<16x128x128xbf16, #tpu.memory_space<vmem>>, vector<1x128x128xbf16>
    %99 = vector.shape_cast %98 : vector<1x128x128xbf16> to vector<128x128xbf16>
    %cst_113 = arith.constant dense<0.000000e+00> : vector<64x128xf32>
    %100 = tpu.matmul %97, %99, %cst_113 {dimension_numbers = #tpu.dot_dimension_numbers<[1], [0], [0], [1], [0, 0, 1, 1], [], []>} : vector<64x128xbf16>, vector<128x128xbf16>, vector<64x128xf32> -> vector<64x128xf32>
    %101 = arith.addf %95, %100 : vector<64x128xf32>
    %c0_114 = arith.constant 0 : index
    %c1_115 = arith.constant 1 : index
    %c0_116 = arith.constant 0 : index
    %102 = vector.load %arg9[%c0_114, %c1_115, %c0_116] : memref<9x9x128xbf16, #tpu.memory_space<vmem>>, vector<8x8x128xbf16>
    %103 = vector.shape_cast %102 : vector<8x8x128xbf16> to vector<64x128xbf16>
    %c3_117 = arith.constant 3 : index
    %c0_118 = arith.constant 0 : index
    %c0_119 = arith.constant 0 : index
    %104 = vector.load %arg4[%c3_117, %c0_118, %c0_119] : memref<16x128x128xbf16, #tpu.memory_space<vmem>>, vector<1x128x128xbf16>
    %105 = vector.shape_cast %104 : vector<1x128x128xbf16> to vector<128x128xbf16>
    %cst_120 = arith.constant dense<0.000000e+00> : vector<64x128xf32>
    %106 = tpu.matmul %103, %105, %cst_120 {dimension_numbers = #tpu.dot_dimension_numbers<[1], [0], [0], [1], [0, 0, 1, 1], [], []>} : vector<64x128xbf16>, vector<128x128xbf16>, vector<64x128xf32> -> vector<64x128xf32>
    %107 = arith.addf %101, %106 : vector<64x128xf32>
    %c0_121 = arith.constant 0 : index
    %c0_122 = arith.constant 0 : index
    %c0_123 = arith.constant 0 : index
    %108 = vector.load %arg10[%c0_121, %c0_122, %c0_123] : memref<9x9x128xbf16, #tpu.memory_space<vmem>>, vector<8x8x128xbf16>
    %109 = vector.shape_cast %108 : vector<8x8x128xbf16> to vector<64x128xbf16>
    %c4_124 = arith.constant 4 : index
    %c0_125 = arith.constant 0 : index
    %c0_126 = arith.constant 0 : index
    %110 = vector.load %arg4[%c4_124, %c0_125, %c0_126] : memref<16x128x128xbf16, #tpu.memory_space<vmem>>, vector<1x128x128xbf16>
    %111 = vector.shape_cast %110 : vector<1x128x128xbf16> to vector<128x128xbf16>
    %cst_127 = arith.constant dense<0.000000e+00> : vector<64x128xf32>
    %112 = tpu.matmul %109, %111, %cst_127 {dimension_numbers = #tpu.dot_dimension_numbers<[1], [0], [0], [1], [0, 0, 1, 1], [], []>} : vector<64x128xbf16>, vector<128x128xbf16>, vector<64x128xf32> -> vector<64x128xf32>
    %113 = arith.addf %107, %112 : vector<64x128xf32>
    %c0_128 = arith.constant 0 : index
    %c0_129 = arith.constant 0 : index
    %c0_130 = arith.constant 0 : index
    %114 = vector.load %arg11[%c0_128, %c0_129, %c0_130] : memref<9x9x128xbf16, #tpu.memory_space<vmem>>, vector<8x8x128xbf16>
    %115 = vector.shape_cast %114 : vector<8x8x128xbf16> to vector<64x128xbf16>
    %c5_131 = arith.constant 5 : index
    %c0_132 = arith.constant 0 : index
    %c0_133 = arith.constant 0 : index
    %116 = vector.load %arg4[%c5_131, %c0_132, %c0_133] : memref<16x128x128xbf16, #tpu.memory_space<vmem>>, vector<1x128x128xbf16>
    %117 = vector.shape_cast %116 : vector<1x128x128xbf16> to vector<128x128xbf16>
    %cst_134 = arith.constant dense<0.000000e+00> : vector<64x128xf32>
    %118 = tpu.matmul %115, %117, %cst_134 {dimension_numbers = #tpu.dot_dimension_numbers<[1], [0], [0], [1], [0, 0, 1, 1], [], []>} : vector<64x128xbf16>, vector<128x128xbf16>, vector<64x128xf32> -> vector<64x128xf32>
    %119 = arith.addf %113, %118 : vector<64x128xf32>
    %c0_135 = arith.constant 0 : index
    %c1_136 = arith.constant 1 : index
    %c0_137 = arith.constant 0 : index
    %120 = vector.load %arg10[%c0_135, %c1_136, %c0_137] : memref<9x9x128xbf16, #tpu.memory_space<vmem>>, vector<8x8x128xbf16>
    %121 = vector.shape_cast %120 : vector<8x8x128xbf16> to vector<64x128xbf16>
    %c6_138 = arith.constant 6 : index
    %c0_139 = arith.constant 0 : index
    %c0_140 = arith.constant 0 : index
    %122 = vector.load %arg4[%c6_138, %c0_139, %c0_140] : memref<16x128x128xbf16, #tpu.memory_space<vmem>>, vector<1x128x128xbf16>
    %123 = vector.shape_cast %122 : vector<1x128x128xbf16> to vector<128x128xbf16>
    %cst_141 = arith.constant dense<0.000000e+00> : vector<64x128xf32>
    %124 = tpu.matmul %121, %123, %cst_141 {dimension_numbers = #tpu.dot_dimension_numbers<[1], [0], [0], [1], [0, 0, 1, 1], [], []>} : vector<64x128xbf16>, vector<128x128xbf16>, vector<64x128xf32> -> vector<64x128xf32>
    %125 = arith.addf %119, %124 : vector<64x128xf32>
    %c0_142 = arith.constant 0 : index
    %c1_143 = arith.constant 1 : index
    %c0_144 = arith.constant 0 : index
    %126 = vector.load %arg11[%c0_142, %c1_143, %c0_144] : memref<9x9x128xbf16, #tpu.memory_space<vmem>>, vector<8x8x128xbf16>
    %127 = vector.shape_cast %126 : vector<8x8x128xbf16> to vector<64x128xbf16>
    %c7_145 = arith.constant 7 : index
    %c0_146 = arith.constant 0 : index
    %c0_147 = arith.constant 0 : index
    %128 = vector.load %arg4[%c7_145, %c0_146, %c0_147] : memref<16x128x128xbf16, #tpu.memory_space<vmem>>, vector<1x128x128xbf16>
    %129 = vector.shape_cast %128 : vector<1x128x128xbf16> to vector<128x128xbf16>
    %cst_148 = arith.constant dense<0.000000e+00> : vector<64x128xf32>
    %130 = tpu.matmul %127, %129, %cst_148 {dimension_numbers = #tpu.dot_dimension_numbers<[1], [0], [0], [1], [0, 0, 1, 1], [], []>} : vector<64x128xbf16>, vector<128x128xbf16>, vector<64x128xf32> -> vector<64x128xf32>
    %131 = arith.addf %125, %130 : vector<64x128xf32>
    %c1_149 = arith.constant 1 : index
    %c0_150 = arith.constant 0 : index
    %c0_151 = arith.constant 0 : index
    %132 = vector.load %arg8[%c1_149, %c0_150, %c0_151] : memref<9x9x128xbf16, #tpu.memory_space<vmem>>, vector<8x8x128xbf16>
    %133 = vector.shape_cast %132 : vector<8x8x128xbf16> to vector<64x128xbf16>
    %c8_152 = arith.constant 8 : index
    %c0_153 = arith.constant 0 : index
    %c0_154 = arith.constant 0 : index
    %134 = vector.load %arg4[%c8_152, %c0_153, %c0_154] : memref<16x128x128xbf16, #tpu.memory_space<vmem>>, vector<1x128x128xbf16>
    %135 = vector.shape_cast %134 : vector<1x128x128xbf16> to vector<128x128xbf16>
    %cst_155 = arith.constant dense<0.000000e+00> : vector<64x128xf32>
    %136 = tpu.matmul %133, %135, %cst_155 {dimension_numbers = #tpu.dot_dimension_numbers<[1], [0], [0], [1], [0, 0, 1, 1], [], []>} : vector<64x128xbf16>, vector<128x128xbf16>, vector<64x128xf32> -> vector<64x128xf32>
    %137 = arith.addf %131, %136 : vector<64x128xf32>
    %c1_156 = arith.constant 1 : index
    %c0_157 = arith.constant 0 : index
    %c0_158 = arith.constant 0 : index
    %138 = vector.load %arg9[%c1_156, %c0_157, %c0_158] : memref<9x9x128xbf16, #tpu.memory_space<vmem>>, vector<8x8x128xbf16>
    %139 = vector.shape_cast %138 : vector<8x8x128xbf16> to vector<64x128xbf16>
    %c9 = arith.constant 9 : index
    %c0_159 = arith.constant 0 : index
    %c0_160 = arith.constant 0 : index
    %140 = vector.load %arg4[%c9, %c0_159, %c0_160] : memref<16x128x128xbf16, #tpu.memory_space<vmem>>, vector<1x128x128xbf16>
    %141 = vector.shape_cast %140 : vector<1x128x128xbf16> to vector<128x128xbf16>
    %cst_161 = arith.constant dense<0.000000e+00> : vector<64x128xf32>
    %142 = tpu.matmul %139, %141, %cst_161 {dimension_numbers = #tpu.dot_dimension_numbers<[1], [0], [0], [1], [0, 0, 1, 1], [], []>} : vector<64x128xbf16>, vector<128x128xbf16>, vector<64x128xf32> -> vector<64x128xf32>
    %143 = arith.addf %137, %142 : vector<64x128xf32>
    %c1_162 = arith.constant 1 : index
    %c1_163 = arith.constant 1 : index
    %c0_164 = arith.constant 0 : index
    %144 = vector.load %arg8[%c1_162, %c1_163, %c0_164] : memref<9x9x128xbf16, #tpu.memory_space<vmem>>, vector<8x8x128xbf16>
    %145 = vector.shape_cast %144 : vector<8x8x128xbf16> to vector<64x128xbf16>
    %c10 = arith.constant 10 : index
    %c0_165 = arith.constant 0 : index
    %c0_166 = arith.constant 0 : index
    %146 = vector.load %arg4[%c10, %c0_165, %c0_166] : memref<16x128x128xbf16, #tpu.memory_space<vmem>>, vector<1x128x128xbf16>
    %147 = vector.shape_cast %146 : vector<1x128x128xbf16> to vector<128x128xbf16>
    %cst_167 = arith.constant dense<0.000000e+00> : vector<64x128xf32>
    %148 = tpu.matmul %145, %147, %cst_167 {dimension_numbers = #tpu.dot_dimension_numbers<[1], [0], [0], [1], [0, 0, 1, 1], [], []>} : vector<64x128xbf16>, vector<128x128xbf16>, vector<64x128xf32> -> vector<64x128xf32>
    %149 = arith.addf %143, %148 : vector<64x128xf32>
    %c1_168 = arith.constant 1 : index
    %c1_169 = arith.constant 1 : index
    %c0_170 = arith.constant 0 : index
    %150 = vector.load %arg9[%c1_168, %c1_169, %c0_170] : memref<9x9x128xbf16, #tpu.memory_space<vmem>>, vector<8x8x128xbf16>
    %151 = vector.shape_cast %150 : vector<8x8x128xbf16> to vector<64x128xbf16>
    %c11 = arith.constant 11 : index
    %c0_171 = arith.constant 0 : index
    %c0_172 = arith.constant 0 : index
    %152 = vector.load %arg4[%c11, %c0_171, %c0_172] : memref<16x128x128xbf16, #tpu.memory_space<vmem>>, vector<1x128x128xbf16>
    %153 = vector.shape_cast %152 : vector<1x128x128xbf16> to vector<128x128xbf16>
    %cst_173 = arith.constant dense<0.000000e+00> : vector<64x128xf32>
    %154 = tpu.matmul %151, %153, %cst_173 {dimension_numbers = #tpu.dot_dimension_numbers<[1], [0], [0], [1], [0, 0, 1, 1], [], []>} : vector<64x128xbf16>, vector<128x128xbf16>, vector<64x128xf32> -> vector<64x128xf32>
    %155 = arith.addf %149, %154 : vector<64x128xf32>
    %c1_174 = arith.constant 1 : index
    %c0_175 = arith.constant 0 : index
    %c0_176 = arith.constant 0 : index
    %156 = vector.load %arg10[%c1_174, %c0_175, %c0_176] : memref<9x9x128xbf16, #tpu.memory_space<vmem>>, vector<8x8x128xbf16>
    %157 = vector.shape_cast %156 : vector<8x8x128xbf16> to vector<64x128xbf16>
    %c12 = arith.constant 12 : index
    %c0_177 = arith.constant 0 : index
    %c0_178 = arith.constant 0 : index
    %158 = vector.load %arg4[%c12, %c0_177, %c0_178] : memref<16x128x128xbf16, #tpu.memory_space<vmem>>, vector<1x128x128xbf16>
    %159 = vector.shape_cast %158 : vector<1x128x128xbf16> to vector<128x128xbf16>
    %cst_179 = arith.constant dense<0.000000e+00> : vector<64x128xf32>
    %160 = tpu.matmul %157, %159, %cst_179 {dimension_numbers = #tpu.dot_dimension_numbers<[1], [0], [0], [1], [0, 0, 1, 1], [], []>} : vector<64x128xbf16>, vector<128x128xbf16>, vector<64x128xf32> -> vector<64x128xf32>
    %161 = arith.addf %155, %160 : vector<64x128xf32>
    %c1_180 = arith.constant 1 : index
    %c0_181 = arith.constant 0 : index
    %c0_182 = arith.constant 0 : index
    %162 = vector.load %arg11[%c1_180, %c0_181, %c0_182] : memref<9x9x128xbf16, #tpu.memory_space<vmem>>, vector<8x8x128xbf16>
    %163 = vector.shape_cast %162 : vector<8x8x128xbf16> to vector<64x128xbf16>
    %c13 = arith.constant 13 : index
    %c0_183 = arith.constant 0 : index
    %c0_184 = arith.constant 0 : index
    %164 = vector.load %arg4[%c13, %c0_183, %c0_184] : memref<16x128x128xbf16, #tpu.memory_space<vmem>>, vector<1x128x128xbf16>
    %165 = vector.shape_cast %164 : vector<1x128x128xbf16> to vector<128x128xbf16>
    %cst_185 = arith.constant dense<0.000000e+00> : vector<64x128xf32>
    %166 = tpu.matmul %163, %165, %cst_185 {dimension_numbers = #tpu.dot_dimension_numbers<[1], [0], [0], [1], [0, 0, 1, 1], [], []>} : vector<64x128xbf16>, vector<128x128xbf16>, vector<64x128xf32> -> vector<64x128xf32>
    %167 = arith.addf %161, %166 : vector<64x128xf32>
    %c1_186 = arith.constant 1 : index
    %c1_187 = arith.constant 1 : index
    %c0_188 = arith.constant 0 : index
    %168 = vector.load %arg10[%c1_186, %c1_187, %c0_188] : memref<9x9x128xbf16, #tpu.memory_space<vmem>>, vector<8x8x128xbf16>
    %169 = vector.shape_cast %168 : vector<8x8x128xbf16> to vector<64x128xbf16>
    %c14 = arith.constant 14 : index
    %c0_189 = arith.constant 0 : index
    %c0_190 = arith.constant 0 : index
    %170 = vector.load %arg4[%c14, %c0_189, %c0_190] : memref<16x128x128xbf16, #tpu.memory_space<vmem>>, vector<1x128x128xbf16>
    %171 = vector.shape_cast %170 : vector<1x128x128xbf16> to vector<128x128xbf16>
    %cst_191 = arith.constant dense<0.000000e+00> : vector<64x128xf32>
    %172 = tpu.matmul %169, %171, %cst_191 {dimension_numbers = #tpu.dot_dimension_numbers<[1], [0], [0], [1], [0, 0, 1, 1], [], []>} : vector<64x128xbf16>, vector<128x128xbf16>, vector<64x128xf32> -> vector<64x128xf32>
    %173 = arith.addf %167, %172 : vector<64x128xf32>
    %c1_192 = arith.constant 1 : index
    %c1_193 = arith.constant 1 : index
    %c0_194 = arith.constant 0 : index
    %174 = vector.load %arg11[%c1_192, %c1_193, %c0_194] : memref<9x9x128xbf16, #tpu.memory_space<vmem>>, vector<8x8x128xbf16>
    %175 = vector.shape_cast %174 : vector<8x8x128xbf16> to vector<64x128xbf16>
    %c15 = arith.constant 15 : index
    %c0_195 = arith.constant 0 : index
    %c0_196 = arith.constant 0 : index
    %176 = vector.load %arg4[%c15, %c0_195, %c0_196] : memref<16x128x128xbf16, #tpu.memory_space<vmem>>, vector<1x128x128xbf16>
    %177 = vector.shape_cast %176 : vector<1x128x128xbf16> to vector<128x128xbf16>
    %cst_197 = arith.constant dense<0.000000e+00> : vector<64x128xf32>
    %178 = tpu.matmul %175, %177, %cst_197 {dimension_numbers = #tpu.dot_dimension_numbers<[1], [0], [0], [1], [0, 0, 1, 1], [], []>} : vector<64x128xbf16>, vector<128x128xbf16>, vector<64x128xf32> -> vector<64x128xf32>
    %179 = arith.addf %173, %178 : vector<64x128xf32>
    %c0_198 = arith.constant 0 : index
    %c0_199 = arith.constant 0 : index
    %c0_200 = arith.constant 0 : index
    %c0_201 = arith.constant 0 : index
    %180 = vector.load %arg2[%c0_198, %c0_199, %c0_200, %c0_201] : memref<1x8x8x16xbf16, #tpu.memory_space<vmem>>, vector<1x8x8x16xbf16>
    %181 = vector.shape_cast %180 : vector<1x8x8x16xbf16> to vector<8x8x16xbf16>
    %182 = vector.shape_cast %181 : vector<8x8x16xbf16> to vector<64x16xbf16>
    %c0_202 = arith.constant 0 : index
    %c0_203 = arith.constant 0 : index
    %183 = vector.load %arg5[%c0_202, %c0_203] : memref<16x128xbf16, #tpu.memory_space<vmem>>, vector<16x128xbf16>
    %cst_204 = arith.constant dense<0.000000e+00> : vector<64x128xf32>
    %184 = tpu.matmul %182, %183, %cst_204 {dimension_numbers = #tpu.dot_dimension_numbers<[1], [0], [0], [1], [0, 0, 1, 1], [], []>} : vector<64x16xbf16>, vector<16x128xbf16>, vector<64x128xf32> -> vector<64x128xf32>
    %185 = arith.addf %179, %184 : vector<64x128xf32>
    %186 = vector.shape_cast %185 : vector<64x128xf32> to vector<8x8x128xf32>
    %c0_205 = arith.constant 0 : index
    %c0_206 = arith.constant 0 : index
    %c0_207 = arith.constant 0 : index
    %c0_208 = arith.constant 0 : index
    %187 = vector.load %arg6[%c0_205, %c0_206, %c0_207, %c0_208] : memref<1x8x8x128xf32, #tpu.memory_space<vmem>>, vector<1x8x8x128xf32>
    %188 = vector.shape_cast %187 : vector<1x8x8x128xf32> to vector<8x8x128xf32>
    %189 = vector.shape_cast %186 : vector<8x8x128xf32> to vector<1x8x8x128xf32>
    tpu.vector_store %arg6[%c0_205, %c0_206, %c0_207, %c0_208], %189 {strides = array<i32>} : memref<1x8x8x128xf32, #tpu.memory_space<vmem>>, vector<1x8x8x128xf32>,
    return
  }
  func.func @transform_0(%arg0: i32) -> (i32, i32, i32, i32) {
    %c0_i32 = arith.constant 0 : i32
    %c0_i32_0 = arith.constant 0 : i32
    %c0_i32_1 = arith.constant 0 : i32
    %c0_i32_2 = arith.constant 0 : i32
    return %arg0, %c0_i32, %c0_i32_0, %c0_i32_1 : i32, i32, i32, i32
  }
  func.func @transform_1(%arg0: i32) -> (i32, i32, i32, i32) {
    %c0_i32 = arith.constant 0 : i32
    %c0_i32_0 = arith.constant 0 : i32
    %c0_i32_1 = arith.constant 0 : i32
    %c0_i32_2 = arith.constant 0 : i32
    return %arg0, %c0_i32, %c0_i32_0, %c0_i32_1 : i32, i32, i32, i32
  }
  func.func @transform_2(%arg0: i32) -> (i32, i32, i32) {
    %c0_i32 = arith.constant 0 : i32
    %c0_i32_0 = arith.constant 0 : i32
    %c0_i32_1 = arith.constant 0 : i32
    %c0_i32_2 = arith.constant 0 : i32
    return %c0_i32, %c0_i32_0, %c0_i32_1 : i32, i32, i32
  }
  func.func @transform_3(%arg0: i32) -> (i32, i32, i32) {
    %c0_i32 = arith.constant 0 : i32
    %c0_i32_0 = arith.constant 0 : i32
    %c0_i32_1 = arith.constant 0 : i32
    %c0_i32_2 = arith.constant 0 : i32
    return %c0_i32, %c0_i32_0, %c0_i32_1 : i32, i32, i32
  }
  func.func @transform_4(%arg0: i32) -> (i32, i32) {
    %c0_i32 = arith.constant 0 : i32
    %c0_i32_0 = arith.constant 0 : i32
    %c0_i32_1 = arith.constant 0 : i32
    return %c0_i32, %c0_i32_0 : i32, i32
  }
  func.func @transform_5(%arg0: i32) -> (i32, i32, i32, i32) {
    %c0_i32 = arith.constant 0 : i32
    %c0_i32_0 = arith.constant 0 : i32
    %c0_i32_1 = arith.constant 0 : i32
    %c0_i32_2 = arith.constant 0 : i32
    return %arg0, %c0_i32, %c0_i32_0, %c0_i32_1 : i32, i32, i32, i32
  }
}

</mosaic_0001>

<bundles_post_ra>
// kernel: tpu_custom_call.1
= control target key start
LH: loop header
LB: loop body
LE: loop exit
PB: predicated region body
PF: predicated region fallthrough
CT: control target
= control target key end

     0   :  { %10 = vsyncpa [#allocation8], 0  ;;  %s14961_s0 = inlined_call_operand.vmem [shape: bf16[2,18,18,16], index: 0, kind: input, shape index: {}]   ;;  %s14962_s1 = inlined_call_operand.vmem [shape: bf16[2,8,8,16], index: 1, kind: input, shape index: {}]   ;;  %s14963_s2 = inlined_call_operand.vmem [shape: bf16[9,16,128], index: 2, kind: input, shape index: {}]   ;;  %s14964_s3 = inlined_call_operand.hbm [shape: bf16[16,128,128], index: 3, kind: input, shape index: {}]   ;;  %s14965_s4 = inlined_call_operand.vmem [shape: bf16[16,128], index: 4, kind: input, shape index: {}]   ;;  %s14966_s5 = inlined_call_operand.hbm [shape: f32[2,8,8,128], index: 5, kind: output, shape index: {}]  }
   0x1   :  { %11 = vsyncpa [#allocation9], 0 }
   0x2   :  { %13 = vsyncpa [#allocation9 + $0x1], 0  ;;  %s11800_s18 = smov 0   ;;  %s11802_s19 = smov 0  }
   0x3   :  { %s11804_s20 = smov 0   ;;  %s11806_s21 = smov 0  }
   0x4 LB: > { %s11821_s22 = sadd.s32 4294967295, %s11761_s21   ;;  %s9420_s23 = sadd.s32 4294967294, %s11761_s21   ;;  %s11761_s21 = sphi %s11806_s21, %s15255_s21   ;;  %s11757_s20 = sphi %s11804_s20, %s15254_s20   ;;  %s11753_s19 = sphi %s11802_s19, %s15253_s19   ;;  %s11749_s18 = sphi %s11800_s18, %s15252_s18  }
   0x5   : > { %s11825_s24 = sadd.s32 1, %s11761_s21   ;;  %s141_s25 = sadd.s32 1, %s11757_s20 }
   0x6   : > { %s138_s26 = ssub.s32 %s11761_s21, %s11825_s24  ;;  %p151_p0 = scmp.ne.s32.totalorder %s11757_s20, %s11753_s19 }
   0x7   : > { %p139_p1 = scmp.eq.s32.totalorder %s138_s26, 0  ;;  %p152_p2 = scmp.eq.s32.totalorder %s11821_s22, 1 }
   0x8   : > { %p157_p3 = scmp.ne.s32.totalorder %s11753_s19, %s11749_s18  ;;  %p158_p4 = scmp.eq.s32.totalorder %s9420_s23, 1 }
   0x9   : > { %s11836_s27 = scalar_select %p139_p1, %s11757_s20, %s141_s25  }
   0xa   : > { %p11838_p5 = por %p152_p2, %p151_p0  ;;  %p11842_p6 = por %p158_p4, %p157_p3 }
   0xb   : > { %p9421_p7 = scmp.ge.s32.totalorder %s11761_s21, 1  ;;  %p165_p8 = scmp.lt.s32.totalorder %s11761_s21, 3 }
   0xc   : > { %s14977_s29 = scalar_select %p11842_p6, 1, 0 }
   0xd   : > { %p11403_p10 = scmp.eq.s32.totalorder %s11821_s22, 0  ;;  %p11850_p11 = pnand %p9421_p7, %p165_p8 }
   0xe   : > { %s11763_s6 = smov [#allocation7]  }
   0xf   : > { %s180_s7 = sshll.u32 %s11763_s6, 4  ;;  %p11395_p12 = pneg %p11850_p11  ;;  %s181_s7 = int_to_ptr.vmem [resolvable:$true] %s180_s7 }
  0x10   : > { %s11682_s8 = scalar_lea.vmem %s181_s7, 16384  ;;  %p11690_p4 = scmp.lt.s32.totalorder %s181_s7, %s181_s7 }
  0x11   : > { %p11396_p13 = pnand %p11403_p10, %p11395_p12  ;;  %p11683_p1 = scmp.ne.s32.totalorder %s181_s7, %s11682_s8 }
  0x12   : > { %p11691_p9 = scmp.lt.s32.totalorder %s11682_s8, %s11682_s8 }
  0x13   : > { %p11673_p0 = pneg %p11396_p13 }
  0x14   : > { %p11692_p6 = por %p11691_p9, %p11690_p4 }
  0x15   : > { %p11685_p2 = pnand %p11683_p1, %p11673_p0 }
  0x17   : > { %p11686_p3 = pneg %p11685_p2 }
  0x19   : > { %p11693_p7 = pnand %p11692_p6, %p11686_p3 }
  0x1b   : > { %11696 = shalt.err (!%p11693_p7)
}
  0x1c   : > { %s11764_s9 = smov 64   ;;  %s11765_s10 = smov 4  }
  0x1d   : > { %11398 = dma.hbm_to_vmem [thread:$0]  (!%p11396_p13), %s14964_s3, 16384, %s181_s7, [#allocation8], %s11764_s9, %s11764_s9, %s11765_s10  }
  0x1e   : > { %215 = sbr.rel (%p11850_p11) target bundleno = 1089 (0x441), region = 40 }
  0x23   : > { %11740 = dma.done.wait (%p11403_p10), [#allocation8], 16384  }
  0x24   : > { %11742 = vsyncadd (%p11403_p10), [#allocation8], 4294950912  ;;  %s245_s13 = sand.u32 1, %s11753_s19   ;;  %p248_p6 = scmp.lt.s32.totalorder %s11821_s22, 1 }
  0x25   : > { %s9426_s14 = sshll.u32 %s245_s13, 6  ;;  %p14979_p8 = scmp.ne.s32.totalorder %s11821_s22, 0 }
  0x26   : > { %s249_s15 = scalar_select %p248_p6, %s11821_s22, 1 }
  0x27   : > { %s11882_s8 = scalar_lea.vmem [#allocation10], %s9426_s14  ;;  %262 = sbr.rel (%p14979_p8) target bundleno = 72 (0x48), region = 48 }
  0x28   : > { %s11388_s16 = smul.u32 216, %s249_s15  ;;  %s10262_s17 = sshll.u32 %s249_s15, 5 }
  0x29   : > { %s11875_s26 = scalar_lea.vmem %s14962_s1, %s10262_s17 }
  0x2a   : > { %s11880_s7 = scalar_lea.vmem %s14961_s0, %s11388_s16 }
  0x2c   : > { %v11766_v0 = vmov 0.0  }
  0x2d   : > { %263 = vst [vmem:[#allocation2] sm:$0xff] %v11766_v0  ;;  %264 = vst [vmem:[#allocation2 + $0x8] sm:$0xff] %v11766_v0 }
  0x2e   : > { %265 = vst [vmem:[#allocation2 + $0x10] sm:$0x3] %v11766_v0  ;;  %266 = vst [vmem:[#allocation2 + $0x18] sm:$0xff] %v11766_v0 }
  0x2f   : > { %267 = vst [vmem:[#allocation2 + $0x20] sm:$0xff] %v11766_v0  ;;  %268 = vst [vmem:[#allocation2 + $0x28] sm:$0x3] %v11766_v0 }
  0x30   : > { %269 = vst [vmem:[#allocation2 + $0x30] sm:$0xff] %v11766_v0  ;;  %270 = vst [vmem:[#allocation2 + $0x38] sm:$0xff] %v11766_v0 }
  0x31   : > { %271 = vst [vmem:[#allocation2 + $0x40] sm:$0x3] %v11766_v0  ;;  %272 = vst [vmem:[#allocation2 + $0x48] sm:$0xff] %v11766_v0 }
  0x32   : > { %273 = vst [vmem:[#allocation2 + $0x50] sm:$0xff] %v11766_v0  ;;  %274 = vst [vmem:[#allocation2 + $0x58] sm:$0x3] %v11766_v0 }
  0x33   : > { %275 = vst [vmem:[#allocation2 + $0x60] sm:$0xff] %v11766_v0  ;;  %276 = vst [vmem:[#allocation2 + $0x68] sm:$0xff] %v11766_v0 }
  0x34   : > { %277 = vst [vmem:[#allocation2 + $0x70] sm:$0x3] %v11766_v0  ;;  %278 = vst [vmem:[#allocation2 + $0x78] sm:$0xff] %v11766_v0 }
  0x35   : > { %279 = vst [vmem:[#allocation2 + $0x80] sm:$0xff] %v11766_v0  ;;  %280 = vst [vmem:[#allocation2 + $0x88] sm:$0x3] %v11766_v0 }
  0x36   : > { %281 = vst [vmem:[#allocation2 + $0x90] sm:$0xff] %v11766_v0  ;;  %282 = vst [vmem:[#allocation2 + $0x98] sm:$0xff] %v11766_v0 }
  0x37   : > { %283 = vst [vmem:[#allocation2 + $0xa0] sm:$0x3] %v11766_v0  ;;  %284 = vst [vmem:[#allocation2 + $0xa8] sm:$0xff] %v11766_v0 }
  0x38   : > { %285 = vst [vmem:[#allocation2 + $0xb0] sm:$0xff] %v11766_v0  ;;  %286 = vst [vmem:[#allocation2 + $0xb8] sm:$0x3] %v11766_v0 }
  0x39   : > { %287 = vst [vmem:[#allocation2 + $0xc0] sm:$0xff] %v11766_v0  ;;  %288 = vst [vmem:[#allocation2 + $0xc8] sm:$0xff] %v11766_v0 }
  0x3a   : > { %289 = vst [vmem:[#allocation2 + $0xd0] sm:$0x3] %v11766_v0  ;;  %290 = vst [vmem:[#allocation2 + $0xd8] sm:$0xff] %v11766_v0 }
  0x3b   : > { %291 = vst [vmem:[#allocation2 + $0xe0] sm:$0xff] %v11766_v0  ;;  %292 = vst [vmem:[#allocation2 + $0xe8] sm:$0x3] %v11766_v0 }
  0x3c   : > { %293 = vst [vmem:[#allocation2 + $0xf0] sm:$0xff] %v11766_v0  ;;  %294 = vst [vmem:[#allocation2 + $0xf8] sm:$0xff] %v11766_v0 }
  0x3d   : > { %295 = vst [vmem:[#allocation2 + $0x100] sm:$0x3] %v11766_v0  ;;  %296 = vst [vmem:[#allocation2 + $0x108] sm:$0xff] %v11766_v0 }
  0x3e   : > { %297 = vst [vmem:[#allocation2 + $0x110] sm:$0xff] %v11766_v0  ;;  %298 = vst [vmem:[#allocation2 + $0x118] sm:$0x3] %v11766_v0 }
  0x3f   : > { %299 = vst [vmem:[#allocation2 + $0x120] sm:$0xff] %v11766_v0  ;;  %300 = vst [vmem:[#allocation2 + $0x128] sm:$0xff] %v11766_v0 }
  0x40   : > { %301 = vst [vmem:[#allocation2 + $0x130] sm:$0x3] %v11766_v0  ;;  %302 = vst [vmem:[#allocation2 + $0x138] sm:$0xff] %v11766_v0 }
  0x41   : > { %303 = vst [vmem:[#allocation2 + $0x140] sm:$0xff] %v11766_v0  ;;  %304 = vst [vmem:[#allocation2 + $0x148] sm:$0x3] %v11766_v0 }
  0x42   : > { %305 = vst [vmem:[#allocation2 + $0x150] sm:$0xff] %v11766_v0  ;;  %306 = vst [vmem:[#allocation2 + $0x158] sm:$0xff] %v11766_v0 }
  0x43   : > { %307 = vst [vmem:[#allocation2 + $0x160] sm:$0x3] %v11766_v0  ;;  %308 = vst [vmem:[#allocation2 + $0x168] sm:$0xff] %v11766_v0 }
  0x44   : > { %309 = vst [vmem:[#allocation2 + $0x170] sm:$0xff] %v11766_v0  ;;  %310 = vst [vmem:[#allocation2 + $0x178] sm:$0x3] %v11766_v0 }
  0x45   : > { %311 = vst [vmem:[#allocation2 + $0x180] sm:$0xff] %v11766_v0  ;;  %312 = vst [vmem:[#allocation2 + $0x188] sm:$0xff] %v11766_v0 }
  0x46   : > { %313 = vst [vmem:[#allocation2 + $0x190] sm:$0x3] %v11766_v0  ;;  %314 = vst [vmem:[#allocation2 + $0x198] sm:$0xff] %v11766_v0 }
  0x47   : > { %315 = vst [vmem:[#allocation2 + $0x1a0] sm:$0xff] %v11766_v0  ;;  %316 = vst [vmem:[#allocation2 + $0x1a8] sm:$0x3] %v11766_v0 }
  0x48 PF: > { %v11444_v1 = vld [vmem:[%s14963_s2 + $0x8] sm:$0xff]   ;;  %v11890_v2 = vld [vmem:[%s11880_s7] sm:$0xf]  ;;  %v11893_v3 = vld [vmem:[%s11880_s7 + $0x4] sm:$0xf]  ;;  %vm811_vm2 = vcmask 130048  }
  0x49   : > { %v11896_v4 = vld [vmem:[%s11880_s7 + $0x8] sm:$0x1]  ;;  %10686 = vmatprep.subr.bf16.mxu0 %v11444_v1  ;;  %11386 = vmatprep.subr.bf16.mxu1 %v11444_v1  ;;  %vm367_vm0 = vsmask.f32 3328  ;;  %vm368_vm1 = vsmask.f32 7440  ;;  %v9466_v19 = vcombine.low %v11890_v2, %v11893_v3 }
  0x4a   : > { %v371_v5 = vshrl.u32 %v11890_v2, 16  ;;  %v374_v6 = vshll.u32 %v11890_v2, 16  ;;  %10687 = vmatpush3.bf16.msra.mxu0 %v11444_v1  ;;  %11387 = vmatpush3.bf16.msra.mxu1 %v11444_v1  ;;  %v380_v7 = vshll.u32 %v11893_v3, 16  ;;  %v384_v8 = vshrl.u32 %v11893_v3, 16  ;;  %v11905_v11 = vld [vmem:[%s11880_s7 + $0xa8] sm:$0xf]  ;;  %vm11926_vm3 = vmor %vm367_vm0, %vm368_vm1 }
  0x4b   : > { %v390_v9 = vshll.u32 %v11896_v4, 16  ;;  %v11908_v14 = vld [vmem:[%s11880_s7 + $0xac] sm:$0xf]  ;;  %v11911_v15 = vld [vmem:[%s11880_s7 + $0xb0] sm:$0x1]  ;;  %v707_v18 = vshrl.u32 %v11905_v11, 16 }
  0x4c   : > { %v373_v12 = vrot.slane %v371_v5, 4  ;;  %v376_v13 = vrot.slane %v374_v6, 5  ;;  %v382_v16 = vrot.slane %v380_v7, 5  ;;  %v386_v17 = vrot.slane %v384_v8, 4  ;;  %v11922_v24 = vld [vmem:[%s14963_s2 + $0x10] sm:$0xff]   ;;  %v11937_v31 = vld [vmem:[%s14963_s2] sm:$0xff]  }
  0x4d   : > { %v710_v21 = vshll.u32 %v11905_v11, 16  ;;  %v716_v22 = vshll.u32 %v11908_v14, 16  ;;  %v720_v23 = vshrl.u32 %v11908_v14, 16  ;;  %v14980_v25 = vmov 0  ;;  %v11932_v30 = vld [vmem:[%s11880_s7 + $0xc] sm:$0xf]  ;;  %10754 = vmatprep.subr.bf16.mxu0 %v11922_v24  ;;  %10720 = vmatprep.subr.bf16.mxu1 %v11937_v31 }
  0x4e   : > { %v377_v20 = vor.u32 %v376_v13, %v373_v12  ;;  %v14981_v25 = vsel %vm11926_vm3, 4294967295, %v14980_v25  ;;  %v387_v26 = vor.u32 %v386_v17, %v382_v16  ;;  %v392_v27 = vrot.slane %v390_v9, 5  ;;  %v11941_v36 = vld [vmem:[%s11880_s7 + $0x10] sm:$0xf]  ;;  %v11949_v44 = vld [vmem:[%s11880_s7 + $0x14] sm:$0x1] }
  0x4f   : > { %14982 = vst [vmem:[#allocation13_spill] sm:$0xff] %v14981_v25  ;;  %v709_v28 = vrot.slane %v707_v18, 4  ;;  %v726_v29 = vshll.u32 %v11911_v15, 16  ;;  %v712_v33 = vrot.slane %v710_v21, 5  ;;  %v718_v34 = vrot.slane %v716_v22, 5  ;;  %s9299_s17 = sshll.u32 %s11882_s8, 4  ;;  %s14915_s17 = int_to_ptr.vmem [resolvable:$true] %s9299_s17 }
  0x50   : > { %v378_v32 = vrot.slane %v377_v20, 4  ;;  %v722_v35 = vrot.slane %v720_v23, 4  ;;  %v388_v37 = vrot.slane %v387_v26, 4  ;;  %v395_v39 = vshrl.u32 %v11932_v30, 16  ;;  %v11953_v46 = vld [vmem:[%s11880_s7 + $0xb4] sm:$0xf] }
  0x51   : > { %v728_v38 = vrot.slane %v726_v29, 5  ;;  %v398_v40 = vshll.u32 %v11932_v30, 16  ;;  %v713_v42 = vor.u32 %v712_v33, %v709_v28  ;;  %v404_v45 = vshll.u32 %v11941_v36, 16  ;;  %v11959_v51 = vld [vmem:[%s11880_s7 + $0xb8] sm:$0xf]  ;;  %s11697_s6 = scalar_lea.vmem %s14915_s17, 1024 }
  0x52   : > { %v383_v41 = vsel %vm11926_vm3, %v378_v32, %v382_v16  ;;  %v723_v43 = vor.u32 %v722_v35, %v718_v34  ;;  %v393_v47 = vsel %vm11926_vm3, %v388_v37, %v392_v27  ;;  %v397_v48 = vrot.slane %v395_v39, 4  ;;  %v11970_v63 = vld [vmem:[%s11880_s7 + $0xbc] sm:$0x1]  ;;  %v11974_v1 = vld [vmem:[%s11880_s7 + $0x18] sm:$0xf]  ;;  %p11698_p9 = scmp.ne.s32.totalorder %s14915_s17, %s11697_s6  ;;  %s11767_s9 = smov [#allocation10]  }
  0x53   : > { %v400_v49 = vrot.slane %v398_v40, 5  ;;  %v408_v50 = vshrl.u32 %v11941_v36, 16  ;;  %v9433_v52 = vcombine.low %v383_v41, %v393_v47  ;;  %v714_v53 = vrot.slane %v713_v42, 4  ;;  %v11980_v17 = vld [vmem:[%s11880_s7 + $0x1c] sm:$0xf]  ;;  %s11701_s10 = sshll.u32 %s11767_s9, 4  ;;  %s11702_s10 = int_to_ptr.vmem [resolvable:$false] %s11701_s10 }
  0x54   : > { %v724_v54 = vrot.slane %v723_v43, 4  ;;  %v406_v55 = vrot.slane %v404_v45, 5  ;;  %v414_v58 = vshll.u32 %v11949_v44, 16  ;;  %v731_v0 = vshrl.u32 %v11953_v46, 16  ;;  %v11987_v22 = vld [vmem:[%s11880_s7 + $0x20] sm:$0x1]  ;;  %p11699_p10 = pnand %p11698_p9, %p11838_p5  ;;  %p11704_p12 = scmp.lt.s32.totalorder %s14915_s17, %s11702_s10 }
  0x55   : > { %v401_v56 = vor.u32 %v400_v49, %v397_v48  ;;  %v410_v57 = vrot.slane %v408_v50, 4  ;;  %10688 = vmatprep.mubr.msk.bf16.mxu0 %vm811_vm2, %v9433_v52  ;;  %v719_v60 = vsel %vm11926_vm3, %v714_v53, %v718_v34  ;;  %v734_v12 = vshll.u32 %v11953_v46, 16  ;;  %v11992_v32 = vld [vmem:[%s11880_s7 + $0x24] sm:$0xf]  ;;  %v11998_v42 = vld [vmem:[%s11880_s7 + $0x28] sm:$0xf] }
  0x56   : > { %v729_v61 = vsel %vm11926_vm3, %v724_v54, %v728_v38  ;;  %v416_v8 = vrot.slane %v414_v58, 5  ;;  %v733_v9 = vrot.slane %v731_v0, 4  ;;  %v740_v13 = vshll.u32 %v11959_v51, 16  ;;  %v12003_v43 = vld [vmem:[%s14963_s2 + $0x20] sm:$0xff]   ;;  %p11700_p11 = pneg %p11699_p10  ;;  %s11703_s11 = scalar_lea.vmem %s11702_s10, 2048 }
  0x57   : > { %v9447_v5 = vcombine.low %v719_v60, %v729_v61  ;;  %v402_v6 = vrot.slane %v401_v56, 4  ;;  %v411_v7 = vor.u32 %v410_v57, %v406_v55  ;;  %v744_v16 = vshrl.u32 %v11959_v51, 16  ;;  %v12012_v57 = vld [vmem:[%s11880_s7 + $0x2c] sm:$0x1]  ;;  %v12056_v2 = vld [vmem:[%s11880_s7 + $0x40] sm:$0xf]  ;;  %p11705_p13 = scmp.lt.s32.totalorder %s11703_s11, %s11697_s6 }
  0x58   : > { %v750_v21 = vshll.u32 %v11970_v63, 16  ;;  %v419_v23 = vshrl.u32 %v11974_v1, 16  ;;  %v736_v26 = vrot.slane %v734_v12, 5  ;;  %v742_v27 = vrot.slane %v740_v13, 5  ;;  %v12025_v13 = vld [vmem:[%s11880_s7 + $0x34] sm:$0xf] }
  0x59   : > { %10716 = vmatprep.mubr.msk.bf16.mxu1 %vm811_vm2, %v9447_v5  ;;  %v407_v18 = vsel %vm11926_vm3, %v402_v6, %v406_v55  ;;  %v412_v20 = vrot.slane %v411_v7, 4  ;;  %v746_v28 = vrot.slane %v744_v16, 4  ;;  %v422_v29 = vshll.u32 %v11974_v1, 16  ;;  %v12020_v7 = vld [vmem:[%s11880_s7 + $0x30] sm:$0xf]  ;;  %v12030_v16 = vld [vmem:[%s14963_s2 + $0x18] sm:$0xff]   ;;  %p11706_p0 = por %p11705_p13, %p11704_p12 }
  0x5a   : > { %v752_v34 = vrot.slane %v750_v21, 5  ;;  %v421_v35 = vrot.slane %v419_v23, 4  ;;  %v428_v37 = vshll.u32 %v11980_v17, 16  ;;  %v737_v39 = vor.u32 %v736_v26, %v733_v9 }
  0x5b   : > { %v417_v33 = vsel %vm11926_vm3, %v412_v20, %v416_v8  ;;  %v747_v40 = vor.u32 %v746_v28, %v742_v27  ;;  %v424_v41 = vrot.slane %v422_v29, 5  ;;  %v432_v47 = vshrl.u32 %v11980_v17, 16  ;;  %p11707_p1 = pnand %p11706_p0, %p11700_p11 }
  0x5c   : > { %v9434_v38 = vcombine.low %v407_v18, %v417_v33  ;;  %v430_v45 = vrot.slane %v428_v37, 5  ;;  %v438_v48 = vshll.u32 %v11987_v22, 16  ;;  %v443_v49 = vshrl.u32 %v11992_v32, 16 }
  0x5d   : > { %v738_v50 = vrot.slane %v737_v39, 4  ;;  %v748_v52 = vrot.slane %v747_v40, 4  ;;  %v425_v53 = vor.u32 %v424_v41, %v421_v35  ;;  %v446_v54 = vshll.u32 %v11992_v32, 16  ;;  %v12053_v41 = vld [vmem:[%s11880_s7 + $0x3c] sm:$0xf] }
  0x5e   : > { %10689 = vmatmul.mubr.msk.bf16.vlgmr.msra.gmra.mxu0 %vm811_vm2, %v9434_v38  ;;  %v434_v55 = vrot.slane %v432_v47, 4  ;;  %v440_v56 = vrot.slane %v438_v48, 5  ;;  %v445_v58 = vrot.slane %v443_v49, 4  ;;  %v452_v60 = vshll.u32 %v11998_v42, 16 }
  0x5f   : > { %10755 = vmatpush3.bf16.msra.mxu0 %v11922_v24  ;;  %v743_v61 = vsel %vm11926_vm3, %v738_v50, %v742_v27  ;;  %v753_v0 = vsel %vm11926_vm3, %v748_v52, %v752_v34  ;;  %v426_v5 = vrot.slane %v425_v53, 4  ;;  %v448_v6 = vrot.slane %v446_v54, 5 }
  0x60   : > { %10822 = vmatprep.subr.bf16.mxu0 %v12003_v43  ;;  %v9448_v24 = vcombine.low %v743_v61, %v753_v0  ;;  %v435_v8 = vor.u32 %v434_v55, %v430_v45  ;;  %v454_v9 = vrot.slane %v452_v60, 5  ;;  %v456_v12 = vshrl.u32 %v11998_v42, 16  ;;  %v12066_v55 = vld [vmem:[%s11880_s7 + $0x44] sm:$0x1] }
  0x61   : > { %v431_v18 = vsel %vm11926_vm3, %v426_v5, %v430_v45  ;;  %v449_v20 = vor.u32 %v448_v6, %v445_v58  ;;  %v462_v21 = vshll.u32 %v12012_v57, 16  ;;  %v9467_v23 = vcombine.low %v11932_v30, %v11941_v36  ;;  %v12046_v30 = vld [vmem:[%s11880_s7 + $0x38] sm:$0x1] }
  0x62   : > { %10717 = vmatmul.mubr.msk.bf16.vlgmr.msra.gmra.mxu1 %vm811_vm2, %v9448_v24  ;;  %v436_v26 = vrot.slane %v435_v8, 4  ;;  %v458_v27 = vrot.slane %v456_v12, 4  ;;  %v467_v28 = vshrl.u32 %v12020_v7, 16  ;;  %v470_v29 = vshll.u32 %v12020_v7, 16 }
  0x63   : > { %10721 = vmatpush3.bf16.msra.mxu1 %v11937_v31  ;;  %10722 = vmatprep.mubr.msk.bf16.mxu1 %vm811_vm2, %v9466_v19  ;;  %v450_v33 = vrot.slane %v449_v20, 4  ;;  %v464_v34 = vrot.slane %v462_v21, 5  ;;  %v476_v35 = vshll.u32 %v12025_v13, 16  ;;  %v480_v37 = vshrl.u32 %v12025_v13, 16 }
  0x64   : > { %v441_v38 = vsel %vm11926_vm3, %v436_v26, %v440_v56  ;;  %v459_v39 = vor.u32 %v458_v27, %v454_v9  ;;  %v469_v40 = vrot.slane %v467_v28, 4  ;;  %v472_v31 = vrot.slane %v470_v29, 5  ;;  %10788 = vmatprep.subr.bf16.mxu1 %v12030_v16  ;;  %v12082_v27 = vld [vmem:[%s11880_s7 + $0x4c] sm:$0xf] }
  0x65   : > { %v9435_v19 = vcombine.low %v431_v18, %v441_v38  ;;  %v455_v45 = vsel %vm11926_vm3, %v450_v33, %v454_v9  ;;  %v478_v47 = vrot.slane %v476_v35, 5  ;;  %v482_v48 = vrot.slane %v480_v37, 4  ;;  %v12091_v33 = vld [vmem:[%s11880_s7 + $0x50] sm:$0x1] }
  0x66   : > { %v460_v49 = vrot.slane %v459_v39, 4  ;;  %v473_v50 = vor.u32 %v472_v31, %v469_v40  ;;  %v486_v52 = vshll.u32 %v12046_v30, 16  ;;  %v9468_v53 = vcombine.low %v11974_v1, %v11980_v17  ;;  %v12075_v1 = vld [vmem:[%s11880_s7 + $0x48] sm:$0xf]  ;;  %v12096_v40 = vld [vmem:[%s11880_s7 + $0x54] sm:$0xf] }
  0x67   : > { %10692 = vmatprep.mubr.msk.bf16.mxu0 %vm811_vm2, %v9435_v19  ;;  %v483_v54 = vor.u32 %v482_v48, %v478_v47  ;;  %v491_v56 = vshrl.u32 %v12053_v41, 16  ;;  %v494_v58 = vshll.u32 %v12053_v41, 16  ;;  %v500_v60 = vshll.u32 %v12056_v2, 16  ;;  %v12099_v31 = vld [vmem:[%s11880_s7 + $0x58] sm:$0xf] }
  0x68   : > { %v465_v61 = vsel %vm11926_vm3, %v460_v49, %v464_v34  ;;  %v474_v0 = vrot.slane %v473_v50, 4  ;;  %v488_v5 = vrot.slane %v486_v52, 5  ;;  %v504_v6 = vshrl.u32 %v12056_v2, 16  ;;  %v12105_v48 = vld [vmem:[%s11880_s7 + $0x5c] sm:$0x1] }
  0x69   : > { %v9436_v24 = vcombine.low %v455_v45, %v465_v61  ;;  %v484_v8 = vrot.slane %v483_v54, 4  ;;  %v493_v9 = vrot.slane %v491_v56, 4  ;;  %v496_v12 = vrot.slane %v494_v58, 5 }
  0x6a   : > { %10723 = vmatmul.mubr.msk.bf16.vlgmr.msra.gmra.mxu1 %vm811_vm2, %v9467_v23  ;;  %v479_v18 = vsel %vm11926_vm3, %v474_v0, %v478_v47  ;;  %v502_v20 = vrot.slane %v500_v60, 5  ;;  %v506_v21 = vrot.slane %v504_v6, 4  ;;  %v510_v26 = vshll.u32 %v12066_v55, 16  ;;  %v12123_v6 = vld [vmem:[%s11880_s7 + $0x60] sm:$0xf] }
  0x6b   : > { %10693 = vmatmul.mubr.msk.bf16.gmra.mxu0 %vm811_vm2, %v9436_v24  ;;  %v489_v28 = vsel %vm11926_vm3, %v484_v8, %v488_v5  ;;  %10726 = vmatprep.mubr.msk.bf16.mxu1 %vm811_vm2, %v9468_v53  ;;  %v497_v23 = vor.u32 %v496_v12, %v493_v9  ;;  %v9469_v29 = vcombine.low %v11992_v32, %v11998_v42  ;;  %v515_v34 = vshrl.u32 %v12075_v1, 16 }
  0x6c   : > { %v9437_v35 = vcombine.low %v479_v18, %v489_v28  ;;  %v507_v37 = vor.u32 %v506_v21, %v502_v20  ;;  %v512_v38 = vrot.slane %v510_v26, 5  ;;  %v518_v39 = vshll.u32 %v12075_v1, 16  ;;  %10789 = vmatpush3.bf16.msra.mxu1 %v12030_v16  ;;  %v12114_v16 = vld [vmem:[%s14963_s2 + $0x28] sm:$0xff]   ;;  %v12131_v28 = vld [vmem:[%s11880_s7 + $0x64] sm:$0xf] }
  0x6d   : > { %v498_v19 = vrot.slane %v497_v23, 4  ;;  %v517_v45 = vrot.slane %v515_v34, 4  ;;  %v524_v47 = vshll.u32 %v12082_v27, 16  ;;  %v528_v32 = vshrl.u32 %v12082_v27, 16  ;;  %10856 = vmatprep.subr.bf16.mxu1 %v12114_v16 }
  0x6e   : > { %10696 = vmatprep.mubr.msk.bf16.mxu0 %vm811_vm2, %v9437_v35  ;;  %v508_v49 = vrot.slane %v507_v37, 4  ;;  %v520_v50 = vrot.slane %v518_v39, 5  ;;  %v534_v52 = vshll.u32 %v12091_v33, 16  ;;  %v9470_v53 = vcombine.low %v12020_v7, %v12025_v13 }
  0x6f   : > { %v503_v54 = vsel %vm11926_vm3, %v498_v19, %v502_v20  ;;  %v526_v56 = vrot.slane %v524_v47, 5  ;;  %v530_v58 = vrot.slane %v528_v32, 4  ;;  %v539_v60 = vshrl.u32 %v12096_v40, 16  ;;  %v12144_v47 = vld [vmem:[%s11880_s7 + $0x6c] sm:$0xf] }
  0x70   : > { %v513_v61 = vsel %vm11926_vm3, %v508_v49, %v512_v38  ;;  %v521_v0 = vor.u32 %v520_v50, %v517_v45  ;;  %v536_v5 = vrot.slane %v534_v52, 5  ;;  %v542_v7 = vshll.u32 %v12096_v40, 16 }
  0x71   : > { %v9438_v24 = vcombine.low %v503_v54, %v513_v61  ;;  %v531_v8 = vor.u32 %v530_v58, %v526_v56  ;;  %v541_v9 = vrot.slane %v539_v60, 4  ;;  %v548_v12 = vshll.u32 %v12099_v31, 16  ;;  %v12152_v58 = vld [vmem:[%s11880_s7 + $0x70] sm:$0xf] }
  0x72   : > { %10727 = vmatmul.mubr.msk.bf16.gmra.mxu1 %vm811_vm2, %v9469_v29  ;;  %v522_v18 = vrot.slane %v521_v0, 4  ;;  %v544_v20 = vrot.slane %v542_v7, 5  ;;  %v552_v21 = vshrl.u32 %v12099_v31, 16  ;;  %v558_v26 = vshll.u32 %v12105_v48, 16  ;;  %v12138_v29 = vld [vmem:[%s11880_s7 + $0x68] sm:$0x1] }
  0x73   : > { %10697 = vmatmul.mubr.msk.bf16.gmra.mxu0 %vm811_vm2, %v9438_v24  ;;  %v532_v23 = vrot.slane %v531_v8, 4  ;;  %10730 = vmatprep.mubr.msk.bf16.mxu1 %vm811_vm2, %v9470_v53  ;;  %v550_v34 = vrot.slane %v548_v12, 5  ;;  %v9471_v35 = vcombine.low %v12053_v41, %v12056_v2  ;;  %v563_v37 = vshrl.u32 %v12123_v6, 16  ;;  %v12158_v7 = vld [vmem:[%s11880_s7 + $0x74] sm:$0x1] }
  0x74   : > { %v527_v38 = vsel %vm11926_vm3, %v522_v18, %v526_v56  ;;  %v545_v39 = vor.u32 %v544_v20, %v541_v9  ;;  %v554_v19 = vrot.slane %v552_v21, 4  ;;  %v560_v45 = vrot.slane %v558_v26, 5  ;;  %v12165_v18 = vld [vmem:[%s11880_s7 + $0x78] sm:$0xf] }
  0x75   : > { %v537_v32 = vsel %vm11926_vm3, %v532_v23, %v536_v5  ;;  %v565_v49 = vrot.slane %v563_v37, 4  ;;  %v566_v41 = vshll.u32 %v12123_v6, 16  ;;  %v572_v50 = vshll.u32 %v12131_v28, 16 }
  0x76   : > { %v9439_v52 = vcombine.low %v527_v38, %v537_v32  ;;  %v546_v53 = vrot.slane %v545_v39, 4  ;;  %v555_v54 = vor.u32 %v554_v19, %v550_v34  ;;  %v576_v56 = vshrl.u32 %v12131_v28, 16  ;;  %v12174_v39 = vld [vmem:[%s11880_s7 + $0x7c] sm:$0xf] }
  0x77   : > { %v568_v60 = vrot.slane %v566_v41, 5  ;;  %v574_v61 = vrot.slane %v572_v50, 5  ;;  %v582_v0 = vshll.u32 %v12138_v29, 16  ;;  %v9472_v5 = vcombine.low %v12075_v1, %v12082_v27  ;;  %v12178_v50 = vld [vmem:[%s11880_s7 + $0x80] sm:$0x1] }
  0x78   : > { %10700 = vmatprep.mubr.msk.bf16.mxu0 %vm811_vm2, %v9439_v52  ;;  %v551_v24 = vsel %vm11926_vm3, %v546_v53, %v550_v34  ;;  %v556_v8 = vrot.slane %v555_v54, 4  ;;  %v578_v9 = vrot.slane %v576_v56, 4  ;;  %v587_v12 = vshrl.u32 %v12144_v47, 16 }
  0x79   : > { %v569_v20 = vor.u32 %v568_v60, %v565_v49  ;;  %v584_v21 = vrot.slane %v582_v0, 5  ;;  %v590_v26 = vshll.u32 %v12144_v47, 16  ;;  %v596_v1 = vshll.u32 %v12152_v58, 16 }
  0x7a   : > { %v561_v23 = vsel %vm11926_vm3, %v556_v8, %v560_v45  ;;  %10731 = vmatmul.mubr.msk.bf16.gmra.mxu1 %vm811_vm2, %v9471_v35  ;;  %v579_v37 = vor.u32 %v578_v9, %v574_v61  ;;  %v589_v34 = vrot.slane %v587_v12, 4  ;;  %v600_v38 = vshrl.u32 %v12152_v58, 16  ;;  %v12195_v12 = vld [vmem:[%s11880_s7 + $0x88] sm:$0xf] }
  0x7b   : > { %v9440_v19 = vcombine.low %v551_v24, %v561_v23  ;;  %v570_v32 = vrot.slane %v569_v20, 4  ;;  %10734 = vmatprep.mubr.msk.bf16.mxu1 %vm811_vm2, %v9472_v5  ;;  %v592_v49 = vrot.slane %v590_v26, 5  ;;  %v598_v41 = vrot.slane %v596_v1, 5  ;;  %v12189_v5 = vld [vmem:[%s11880_s7 + $0x84] sm:$0xf] }
  0x7c   : > { %v580_v52 = vrot.slane %v579_v37, 4  ;;  %v602_v45 = vrot.slane %v600_v38, 4  ;;  %v606_v35 = vshll.u32 %v12158_v7, 16  ;;  %v9473_v53 = vcombine.low %v12096_v40, %v12099_v31  ;;  %v12198_v23 = vld [vmem:[%s11880_s7 + $0x8c] sm:$0x1] }
  0x7d   : > { %10701 = vmatmul.mubr.msk.bf16.gmra.mxu0 %vm811_vm2, %v9440_v19  ;;  %v575_v54 = vsel %vm11926_vm3, %v570_v32, %v574_v61  ;;  %v593_v56 = vor.u32 %v592_v49, %v589_v34  ;;  %v611_v60 = vshrl.u32 %v12165_v18, 16  ;;  %v614_v0 = vshll.u32 %v12165_v18, 16 }
  0x7e   : > { %v585_v24 = vsel %vm11926_vm3, %v580_v52, %v584_v21  ;;  %v603_v8 = vor.u32 %v602_v45, %v598_v41  ;;  %v608_v9 = vrot.slane %v606_v35, 5  ;;  %v620_v40 = vshll.u32 %v12174_v39, 16  ;;  %v12209_v45 = vld [vmem:[%s11880_s7 + $0x90] sm:$0xf] }
  0x7f   : > { %v9441_v20 = vcombine.low %v575_v54, %v585_v24  ;;  %v594_v26 = vrot.slane %v593_v56, 4  ;;  %v613_v61 = vrot.slane %v611_v60, 4  ;;  %v616_v1 = vrot.slane %v614_v0, 5 }
  0x80   : > { %v604_v37 = vrot.slane %v603_v8, 4  ;;  %v622_v34 = vrot.slane %v620_v40, 5  ;;  %v624_v38 = vshrl.u32 %v12174_v39, 16  ;;  %v630_v19 = vshll.u32 %v12178_v50, 16  ;;  %v12218_v8 = vld [vmem:[%s11880_s7 + $0x94] sm:$0xf] }
  0x81   : > { %10704 = vmatprep.mubr.msk.bf16.mxu0 %vm811_vm2, %v9441_v20  ;;  %v599_v21 = vsel %vm11926_vm3, %v594_v26, %v598_v41  ;;  %v617_v32 = vor.u32 %v616_v1, %v613_v61  ;;  %v9474_v49 = vcombine.low %v12123_v6, %v12131_v28  ;;  %v635_v52 = vshrl.u32 %v12189_v5, 16 }
  0x82   : > { %v609_v35 = vsel %vm11926_vm3, %v604_v37, %v608_v9  ;;  %10735 = vmatmul.mubr.msk.bf16.gmra.mxu1 %vm811_vm2, %v9473_v53  ;;  %v626_v54 = vrot.slane %v624_v38, 4  ;;  %v632_v56 = vrot.slane %v630_v19, 5  ;;  %v638_v60 = vshll.u32 %v12189_v5, 16  ;;  %v12228_v37 = vld [vmem:[%s11880_s7 + $0x98] sm:$0x1] }
  0x83   : > { %v9442_v0 = vcombine.low %v599_v21, %v609_v35  ;;  %v618_v41 = vrot.slane %v617_v32, 4  ;;  %10738 = vmatprep.mubr.msk.bf16.mxu1 %vm811_vm2, %v9474_v49  ;;  %v637_v24 = vrot.slane %v635_v52, 4  ;;  %v644_v6 = vshll.u32 %v12195_v12, 16  ;;  %v12232_v52 = vld [vmem:[%s11880_s7 + $0x9c] sm:$0xf] }
  0x84   : > { %v627_v40 = vor.u32 %v626_v54, %v622_v34  ;;  %v640_v20 = vrot.slane %v638_v60, 5  ;;  %v648_v9 = vshrl.u32 %v12195_v12, 16  ;;  %v654_v53 = vshll.u32 %v12198_v23, 16 }
  0x85   : > { %10705 = vmatmul.mubr.msk.bf16.gmra.mxu0 %vm811_vm2, %v9442_v0  ;;  %v623_v26 = vsel %vm11926_vm3, %v618_v41, %v622_v34  ;;  %v646_v61 = vrot.slane %v644_v6, 5  ;;  %v9475_v1 = vcombine.low %v12144_v47, %v12152_v58  ;;  %v659_v38 = vshrl.u32 %v12209_v45, 16  ;;  %v12238_v0 = vld [vmem:[%s11880_s7 + $0xa0] sm:$0xf] }
  0x86   : > { %v628_v19 = vrot.slane %v627_v40, 4  ;;  %v641_v21 = vor.u32 %v640_v20, %v637_v24  ;;  %v650_v32 = vrot.slane %v648_v9, 4  ;;  %v656_v49 = vrot.slane %v654_v53, 5  ;;  %v12244_v40 = vld [vmem:[%s11880_s7 + $0xa4] sm:$0x1] }
  0x87   : > { %v661_v35 = vrot.slane %v659_v38, 4  ;;  %v662_v54 = vshll.u32 %v12209_v45, 16  ;;  %v668_v34 = vshll.u32 %v12218_v8, 16  ;;  %v672_v60 = vshrl.u32 %v12218_v8, 16 }
  0x88   : > { %v633_v47 = vsel %vm11926_vm3, %v628_v19, %v632_v56  ;;  %v642_v41 = vrot.slane %v641_v21, 4  ;;  %v651_v6 = vor.u32 %v650_v32, %v646_v61  ;;  %v678_v24 = vshll.u32 %v12228_v37, 16 }
  0x89   : > { %v9443_v20 = vcombine.low %v623_v26, %v633_v47  ;;  %v664_v9 = vrot.slane %v662_v54, 5  ;;  %v670_v53 = vrot.slane %v668_v34, 5  ;;  %v674_v38 = vrot.slane %v672_v60, 4  ;;  %v1316_v34 = vld [vmem:[%s11880_s7] sm:$0xe] }
  0x8a   : > { %v647_v10 = vsel %vm11926_vm3, %v642_v41, %v646_v61  ;;  %v652_v62 = vrot.slane %v651_v6, 4  ;;  %10739 = vmatmul.mubr.msk.bf16.gmra.mxu1 %vm811_vm2, %v9475_v1  ;;  %v680_v59 = vrot.slane %v678_v24, 5  ;;  %v9476_v56 = vcombine.low %v12165_v18, %v12174_v39  ;;  %v1317_v6 = vld [vmem:[%s11880_s7 + $0xc] sm:$0xe] }
  0x8b   : > { %10708 = vmatprep.mubr.msk.bf16.mxu0 %vm811_vm2, %v9443_v20  ;;  %v665_v19 = vor.u32 %v664_v9, %v661_v35  ;;  %v675_v21 = vor.u32 %v674_v38, %v670_v53  ;;  %v683_v26 = vshrl.u32 %v12232_v52, 16  ;;  %v686_v32 = vshll.u32 %v12232_v52, 16 }
  0x8c   : > { %v657_v54 = vsel %vm11926_vm3, %v652_v62, %v656_v49  ;;  %10742 = vmatprep.mubr.msk.bf16.mxu1 %vm811_vm2, %v9476_v56  ;;  %v692_v61 = vshll.u32 %v12238_v0, 16  ;;  %v696_v1 = vshrl.u32 %v12238_v0, 16  ;;  %v702_v18 = vshll.u32 %v12244_v40, 16 }
  0x8d   : > { %v9444_v60 = vcombine.low %v647_v10, %v657_v54  ;;  %v666_v47 = vrot.slane %v665_v19, 4  ;;  %v676_v35 = vrot.slane %v675_v21, 4  ;;  %v685_v41 = vrot.slane %v683_v26, 4 }
  0x8e   : > { %v688_v24 = vrot.slane %v686_v32, 5  ;;  %v694_v20 = vrot.slane %v692_v61, 5  ;;  %v698_v9 = vrot.slane %v696_v1, 4  ;;  %v704_v62 = vrot.slane %v702_v18, 5  ;;  %v1318_v32 = vld [vmem:[%s11880_s7 + $0x18] sm:$0xe] }
  0x8f   : > { %10709 = vmatmul.mubr.msk.bf16.gmra.mxu0 %vm811_vm2, %v9444_v60  ;;  %v671_v49 = vsel %vm11926_vm3, %v666_v47, %v670_v53  ;;  %v681_v38 = vsel %vm11926_vm3, %v676_v35, %v680_v59  ;;  %v9477_v10 = vcombine.low %v12189_v5, %v12195_v12  ;;  %v9478_v56 = vcombine.low %v12209_v45, %v12218_v8  ;;  %v1319_v1 = vld [vmem:[%s11880_s7 + $0x24] sm:$0xe] }
  0x90   : > { %v9445_v19 = vcombine.low %v671_v49, %v681_v38  ;;  %v689_v21 = vor.u32 %v688_v24, %v685_v41  ;;  %v699_v26 = vor.u32 %v698_v9, %v694_v20  ;;  %vm1364_vm4 = vcmask 1042432  }
  0x91   : > { %v1470_v54 = vrot.slane %v11911_v15, 5  ;;  %vm1365_vm5 = vcmask 1046532   ;;  %v9499_v61 = vrot.slane %v1316_v34, 9  ;;  %v1369_v53 = vrot.slane %v11893_v3, 5 }
  0x92   : > { %10712 = vmatprep.mubr.msk.bf16.mxu0 %vm811_vm2, %v9445_v19  ;;  %v690_v59 = vrot.slane %v689_v21, 4  ;;  %v700_v5 = vrot.slane %v699_v26, 4  ;;  %10743 = vmatmul.mubr.msk.bf16.gmra.mxu1 %vm811_vm2, %v9477_v10  ;;  %vm12277_vm6 = vmor %vm1364_vm4, %vm1365_vm5  ;;  %v9500_v18 = vrot.slane %v1317_v6, 9  ;;  %v14985_v60 = vrot.slane %v11941_v36, 5  ;;  %v1320_v10 = vld [vmem:[%s11880_s7 + $0x30] sm:$0xe] }
  0x93   : > { %10746 = vmatprep.mubr.msk.bf16.mxu1 %vm811_vm2, %v9478_v56  ;;  %v1370_v3 = vsel %vm12277_vm6, %v9499_v61, %v1369_v53  ;;  %v1371_v34 = vrot.slane %v1369_v53, 4  ;;  %v9501_v35 = vrot.slane %v1318_v32, 9  ;;  %v14987_v49 = vrot.slane %v11949_v44, 5  ;;  %v1321_v36 = vld [vmem:[%s11880_s7 + $0x3c] sm:$0xe] }
  0x94   : > { %v1378_v47 = vrot.slane %v14985_v60, 4  ;;  %v695_v41 = vsel %vm11926_vm3, %v690_v59, %v694_v20  ;;  %v705_v24 = vsel %vm11926_vm3, %v700_v5, %v704_v62  ;;  %v14986_v9 = vmov %v14985_v60 }
  0x95   : > { %v1377_v6 = vsel %vm12277_vm6, %v9500_v18, %v14986_v9  ;;  %v9446_v56 = vcombine.low %v695_v41, %v705_v24  ;;  %v14988_v19 = vrot.slane %v11896_v4, 5  ;;  %v1383_v62 = vrot.slane %v11980_v17, 5 }
  0x96   : > { %v1380_v38 = vsel %vm12277_vm6, %v1378_v47, %v14987_v49  ;;  %v9479_v32 = vcombine.low %v12232_v52, %v12238_v0  ;;  %v1386_v44 = vrot.slane %v11987_v22, 5  ;;  %v9502_v61 = vrot.slane %v1319_v1, 9  ;;  %v1322_v1 = vld [vmem:[%s11880_s7 + $0x48] sm:$0xe] }
  0x97   : > { %v1373_v20 = vsel %vm12277_vm6, %v1371_v34, %v14988_v19  ;;  %v9518_v21 = vcombine.low %v1377_v6, %v1380_v38  ;;  %10713 = vmatmul.mubr.msk.bf16.gmra.mxu0 %vm811_vm2, %v9446_v56  ;;  %v9480_v4 = vcombine.low %v11905_v11, %v11908_v14  ;;  %v1385_v53 = vrot.slane %v1383_v62, 4  ;;  %v1324_v6 = vld [vmem:[%s11880_s7 + $0x60] sm:$0xe]  ;;  %v1325_v19 = vld [vmem:[%s11880_s7 + $0x6c] sm:$0xe] }
  0x98   : > { %v9517_v26 = vcombine.low %v1370_v3, %v1373_v20  ;;  %v1390_v59 = vrot.slane %v11998_v42, 5  ;;  %v1393_v5 = vrot.slane %v12012_v57, 5  ;;  %v9503_v17 = vrot.slane %v1320_v10, 9  ;;  %v1323_v3 = vld [vmem:[%s11880_s7 + $0x54] sm:$0xe] }
  0x99   : > { %v1397_v18 = vrot.slane %v12025_v13, 5  ;;  %v1400_v52 = vrot.slane %v12046_v30, 5  ;;  %v9504_v22 = vrot.slane %v1321_v36, 9  ;;  %v1384_v60 = vsel %vm12277_vm6, %v9501_v35, %v1383_v62  ;;  %v12358_v20 = vld [vmem:[%s14963_s2 + $0x30] sm:$0xff]  }
  0x9a   : > { %10756 = vmatprep.mubr.msk.bf16.mxu0 %vm811_vm2, %v9517_v26  ;;  %v1387_v11 = vsel %vm12277_vm6, %v1385_v53, %v1386_v44  ;;  %v1392_v14 = vrot.slane %v1390_v59, 4  ;;  %v1404_v42 = vrot.slane %v12056_v2, 5  ;;  %10747 = vmatmul.mubr.msk.bf16.gmra.mxu1 %vm811_vm2, %v9479_v32  ;;  %v9481_v57 = vcombine.low %v11953_v46, %v11959_v51 }
  0x9b   : > { %v12327_v13 = vsel %vm12277_vm6, %v9502_v61, %v1390_v59  ;;  %v1399_v30 = vrot.slane %v1397_v18, 4  ;;  %v1407_v47 = vrot.slane %v12066_v55, 5  ;;  %10750 = vmatprep.mubr.msk.bf16.mxu1 %vm811_vm2, %v9480_v4  ;;  %v12338_v34 = vsel %vm12277_vm6, %v9503_v17, %v1397_v18  ;;  %v1326_v59 = vld [vmem:[%s11880_s7 + $0x78] sm:$0xe]  ;;  %v1327_v18 = vld [vmem:[%s11880_s7 + $0x84] sm:$0xe] }
  0x9c   : > { %v12334_v2 = vsel %vm12277_vm6, %v1392_v14, %v1393_v5  ;;  %v1406_v46 = vrot.slane %v1404_v42, 4  ;;  %v9505_v35 = vrot.slane %v1322_v1, 9  ;;  %v9519_v41 = vcombine.low %v1384_v60, %v1387_v11 }
  0x9d   : > { %v12342_v24 = vsel %vm12277_vm6, %v1399_v30, %v1400_v52  ;;  %v1411_v55 = vrot.slane %v12082_v27, 5  ;;  %v1414_v9 = vrot.slane %v12091_v33, 5  ;;  %v9520_v49 = vcombine.low %v12327_v13, %v12334_v2 }
  0x9e   : > { %v12351_v38 = vsel %vm12277_vm6, %v9504_v22, %v1404_v42  ;;  %v9506_v10 = vrot.slane %v1323_v3, 9  ;;  %v1418_v56 = vrot.slane %v12099_v31, 5  ;;  %v9521_v27 = vcombine.low %v12338_v34, %v12342_v24  ;;  %v11465_v31 = vld [vmem:[%s11880_s7 + $0xc] sm:$0xff]   ;;  %v11466_v34 = vld [vmem:[%s11880_s7 + $0x18] sm:$0xff]   ;;  %v11467_v24 = vld [vmem:[%s11880_s7 + $0x24] sm:$0xff]  }
  0x9f   : > { %v12364_v33 = vsel %vm12277_vm6, %v1406_v46, %v1407_v47  ;;  %v1413_v62 = vrot.slane %v1411_v55, 4  ;;  %v1421_v36 = vrot.slane %v12105_v48, 5  ;;  %10757 = vmatmul.mubr.msk.bf16.vlgmr.msra.gmra.mxu0 %vm811_vm2, %v9518_v21  ;;  %v12371_v26 = vsel %vm12277_vm6, %v9505_v35, %v1411_v55  ;;  %v1328_v42 = vld [vmem:[%s11880_s7 + $0x90] sm:$0xe]  ;;  %v1329_v47 = vld [vmem:[%s11880_s7 + $0x9c] sm:$0xe] }
  0xa0   : > { %v1420_v32 = vrot.slane %v1418_v56, 4  ;;  %v9507_v44 = vrot.slane %v1324_v6, 9  ;;  %v1425_v61 = vrot.slane %v12131_v28, 5  ;;  %10823 = vmatpush3.bf16.msra.mxu0 %v12003_v43  ;;  %10760 = vmatprep.mubr.msk.bf16.mxu0 %vm811_vm2, %v9519_v41  ;;  %v1428_v48 = vrot.slane %v12138_v29, 5 }
  0xa1   : > { %v12378_v4 = vsel %vm12277_vm6, %v1413_v62, %v1414_v9  ;;  %v9508_v21 = vrot.slane %v1325_v19, 9  ;;  %v1432_v53 = vrot.slane %v12152_v58, 5  ;;  %v9522_v5 = vcombine.low %v12351_v38, %v12364_v33  ;;  %10890 = vmatprep.subr.bf16.mxu0 %v12358_v20  ;;  %v1331_v19 = vld [vmem:[%s11880_s7 + $0xb4] sm:$0xe] }
  0xa2   : > { %v12387_v28 = vsel %vm12277_vm6, %v9506_v10, %v1418_v56  ;;  %v12391_v43 = vsel %vm12277_vm6, %v1420_v32, %v1421_v36  ;;  %v1427_v17 = vrot.slane %v1425_v61, 4  ;;  %10751 = vmatmul.mubr.msk.bf16.gmra.mxu1 %vm811_vm2, %v9481_v57  ;;  %v9523_v29 = vcombine.low %v12371_v26, %v12378_v4  ;;  %v1330_v10 = vld [vmem:[%s11880_s7 + $0xa8] sm:$0xe]  ;;  %v9617_v32 = vld [vmem:[%s11880_s7 + $0xc] sm:$0xf] }
  0xa3   : > { %v12400_v58 = vsel %vm12277_vm6, %v9507_v44, %v1425_v61  ;;  %v1434_v52 = vrot.slane %v1432_v53, 4  ;;  %v1435_v22 = vrot.slane %v12158_v7, 5  ;;  %10790 = vmatprep.mubr.msk.bf16.mxu1 %vm811_vm2, %v11465_v31  ;;  %v9509_v60 = vrot.slane %v1326_v59, 9  ;;  %v12477_v59 = vld [vmem:[%s11880_s7 + $0x10] sm:$0xf] }
  0xa4   : > { %v12406_v1 = vsel %vm12277_vm6, %v1427_v17, %v1428_v48  ;;  %v1439_v11 = vrot.slane %v12174_v39, 5  ;;  %v1442_v14 = vrot.slane %v12178_v50, 5  ;;  %v9524_v57 = vcombine.low %v12387_v28, %v12391_v43  ;;  %v12541_v4 = vld [vmem:[%s11880_s7 + $0x28] sm:$0xf]  ;;  %v12575_v43 = vld [vmem:[%s11880_s7 + $0x38] sm:$0x1] }
  0xa5   : > { %v12415_v7 = vsel %vm12277_vm6, %v9508_v21, %v1432_v53  ;;  %v9510_v13 = vrot.slane %v1327_v18, 9  ;;  %v1446_v30 = vrot.slane %v12195_v12, 5  ;;  %v9525_v3 = vcombine.low %v12400_v58, %v12406_v1  ;;  %v11666_v21 = vld [vmem:[%s11880_s7 + $0xac] sm:$0xf]  ;;  %v9629_v1 = vld [vmem:[%s11880_s7 + $0x3c] sm:$0xf] }
  0xa6   : > { %v12423_v39 = vsel %vm12277_vm6, %v1434_v52, %v1435_v22  ;;  %v1441_v50 = vrot.slane %v1439_v11, 4  ;;  %v1449_v2 = vrot.slane %v12198_v23, 5  ;;  %v12429_v46 = vsel %vm12277_vm6, %v9509_v60, %v1439_v11  ;;  %v12489_v22 = vld [vmem:[%s11880_s7 + $0x14] sm:$0x1] }
  0xa7   : > { %v1448_v35 = vrot.slane %v1446_v30, 4  ;;  %v9511_v12 = vrot.slane %v1328_v42, 9  ;;  %v1453_v41 = vrot.slane %v12218_v8, 5  ;;  %10761 = vmatmul.mubr.msk.bf16.gmra.mxu0 %vm811_vm2, %v9520_v49  ;;  %v1456_v23 = vrot.slane %v12228_v37, 5 }
  0xa8   : > { %v12436_v55 = vsel %vm12277_vm6, %v1441_v50, %v1442_v14  ;;  %v9512_v9 = vrot.slane %v1329_v47, 9  ;;  %v1460_v6 = vrot.slane %v12238_v0, 5  ;;  %10764 = vmatprep.mubr.msk.bf16.mxu0 %vm811_vm2, %v9521_v27  ;;  %v9526_v8 = vcombine.low %v12415_v7, %v12423_v39  ;;  %v12456_v0 = vld [vmem:[%s14963_s2 + $0x38] sm:$0xff]   ;;  %v12617_v39 = vld [vmem:[%s11880_s7 + $0x4c] sm:$0xf] }
  0xa9   : > { %v12446_v49 = vsel %vm12277_vm6, %v9510_v13, %v1446_v30  ;;  %v12450_v56 = vsel %vm12277_vm6, %v1448_v35, %v1449_v2  ;;  %v1455_v37 = vrot.slane %v1453_v41, 4  ;;  %v9527_v27 = vcombine.low %v12429_v46, %v12436_v55  ;;  %v11468_v13 = vld [vmem:[%s11880_s7 + $0x30] sm:$0xff]   ;;  %v9620_v50 = vld [vmem:[%s11880_s7 + $0x18] sm:$0xf]  ;;  %v11469_v2 = vld [vmem:[%s11880_s7 + $0x3c] sm:$0xff]  }
  0xaa   : > { %v12462_v62 = vsel %vm12277_vm6, %v9511_v12, %v1453_v41  ;;  %v1462_v36 = vrot.slane %v1460_v6, 4  ;;  %v1463_v31 = vrot.slane %v12244_v40, 5  ;;  %10791 = vmatmul.mubr.msk.bf16.vlgmr.msra.gmra.mxu1 %vm811_vm2, %v11466_v34  ;;  %v12473_v61 = vsel %vm12277_vm6, %v9512_v9, %v1460_v6  ;;  %v12508_v41 = vld [vmem:[%s11880_s7 + $0x1c] sm:$0xf] }
  0xab   : > { %v12469_v44 = vsel %vm12277_vm6, %v1455_v37, %v1456_v23  ;;  %v9513_v48 = vrot.slane %v1330_v10, 9  ;;  %v1467_v53 = vrot.slane %v11666_v21, 5  ;;  %10794 = vmatprep.mubr.msk.bf16.mxu1 %vm811_vm2, %v11467_v24  ;;  %v9528_v40 = vcombine.low %v12446_v49, %v12450_v56  ;;  %10857 = vmatpush3.bf16.msra.mxu1 %v12114_v16  ;;  %v12525_v10 = vld [vmem:[%s11880_s7 + $0x20] sm:$0x1]  ;;  %v9623_v37 = vld [vmem:[%s11880_s7 + $0x24] sm:$0xf] }
  0xac   : > { %v12484_v17 = vsel %vm12277_vm6, %v1462_v36, %v1463_v31  ;;  %v9514_v18 = vrot.slane %v1331_v19, 9  ;;  %v1474_v52 = vrot.slane %v11959_v51, 5  ;;  %v9529_v60 = vcombine.low %v12462_v62, %v12469_v44  ;;  %10924 = vmatprep.subr.bf16.mxu1 %v12456_v0 }
  0xad   : > { %v1469_v11 = vrot.slane %v1467_v53, 4  ;;  %v1477_v14 = vrot.slane %v11970_v63, 5  ;;  %v2189_v42 = vshrl.u32 %v9617_v32, 16  ;;  %v9530_v30 = vcombine.low %v12473_v61, %v12484_v17 }
  0xae   : > { %v1476_v51 = vrot.slane %v1474_v52, 4  ;;  %v2192_v16 = vshll.u32 %v9617_v32, 16  ;;  %v2198_v47 = vshll.u32 %v12477_v59, 16  ;;  %v12503_v34 = vsel %vm12277_vm6, %v9513_v48, %v1467_v53 }
  0xaf   : > { %v2191_v63 = vrot.slane %v2189_v42, 4  ;;  %v2202_v35 = vshrl.u32 %v12477_v59, 16  ;;  %v2208_v12 = vshll.u32 %v12489_v22, 16  ;;  %10765 = vmatmul.mubr.msk.bf16.gmra.mxu0 %vm811_vm2, %v9522_v5  ;;  %v12518_v24 = vsel %vm12277_vm6, %v1469_v11, %v1470_v54 }
  0xb0   : > { %v12522_v23 = vsel %vm12277_vm6, %v9514_v18, %v1474_v52  ;;  %v2194_v9 = vrot.slane %v2192_v16, 5  ;;  %v2200_v6 = vrot.slane %v2198_v47, 5  ;;  %10768 = vmatprep.mubr.msk.bf16.mxu0 %vm811_vm2, %v9523_v29  ;;  %v12534_v15 = vsel %vm12277_vm6, %v1476_v51, %v1477_v14 }
  0xb1   : > { %v2204_v54 = vrot.slane %v2202_v35, 4  ;;  %v2210_v38 = vrot.slane %v2208_v12, 5  ;;  %v2213_v33 = vshrl.u32 %v9620_v50, 16  ;;  %v2216_v19 = vshll.u32 %v9620_v50, 16  ;;  %v12547_v50 = vld [vmem:[%s11880_s7 + $0x2c] sm:$0x1] }
  0xb2   : > { %v2195_v5 = vor.u32 %v2194_v9, %v2191_v63  ;;  %v2222_v36 = vshll.u32 %v12508_v41, 16  ;;  %v2226_v31 = vshrl.u32 %v12508_v41, 16  ;;  %10795 = vmatmul.mubr.msk.bf16.gmra.mxu1 %vm811_vm2, %v11468_v13  ;;  %v2232_v26 = vshll.u32 %v12525_v10, 16  ;;  %v11470_v35 = vld [vmem:[%s11880_s7 + $0x48] sm:$0xff]  }
  0xb3   : > { %v2205_v32 = vor.u32 %v2204_v54, %v2200_v6  ;;  %v2215_v48 = vrot.slane %v2213_v33, 4  ;;  %v2237_v29 = vshrl.u32 %v9623_v37, 16  ;;  %10798 = vmatprep.mubr.msk.bf16.mxu1 %vm811_vm2, %v11469_v2  ;;  %v2218_v53 = vrot.slane %v2216_v19, 5  ;;  %v9626_v2 = vld [vmem:[%s11880_s7 + $0x30] sm:$0xf] }
  0xb4   : > { %v2196_v21 = vrot.slane %v2195_v5, 4  ;;  %v2224_v18 = vrot.slane %v2222_v36, 5  ;;  %v2228_v52 = vrot.slane %v2226_v31, 4  ;;  %v9531_v11 = vcombine.low %v12503_v34, %v12518_v24  ;;  %v11471_v5 = vld [vmem:[%s11880_s7 + $0x54] sm:$0xff]   ;;  %v9641_v34 = vld [vmem:[%s11880_s7 + $0x6c] sm:$0xf] }
  0xb5   : > { %v2206_v14 = vrot.slane %v2205_v32, 4  ;;  %v2239_v42 = vrot.slane %v2237_v29, 4  ;;  %v2240_v13 = vshll.u32 %v9623_v37, 16  ;;  %v2219_v51 = vor.u32 %v2218_v53, %v2215_v48  ;;  %v12558_v37 = vld [vmem:[%s11880_s7 + $0x34] sm:$0xf] }
  0xb6   : > { %v2229_v16 = vor.u32 %v2228_v52, %v2224_v18  ;;  %v2234_v47 = vrot.slane %v2232_v26, 5  ;;  %v2246_v63 = vshll.u32 %v12541_v4, 16  ;;  %v9532_v12 = vcombine.low %v12522_v23, %v12534_v15  ;;  %v12732_v24 = vld [vmem:[%s11880_s7 + $0x70] sm:$0xf]  ;;  %v9644_v15 = vld [vmem:[%s11880_s7 + $0x78] sm:$0xf] }
  0xb7   : > { %v2201_v9 = vsel %vm11926_vm3, %v2196_v21, %v2200_v6  ;;  %v2242_v54 = vrot.slane %v2240_v13, 5  ;;  %v2250_v33 = vshrl.u32 %v12541_v4, 16  ;;  %10769 = vmatmul.mubr.msk.bf16.gmra.mxu0 %vm811_vm2, %v9524_v57  ;;  %v2211_v19 = vsel %vm11926_vm3, %v2206_v14, %v2210_v38 }
  0xb8   : > { %v2220_v36 = vrot.slane %v2219_v51, 4  ;;  %v2230_v31 = vrot.slane %v2229_v16, 4  ;;  %v12567_v32 = vrot.slane %v2246_v63, 5  ;;  %10772 = vmatprep.mubr.msk.bf16.mxu0 %vm811_vm2, %v9525_v3  ;;  %v2256_v28 = vshll.u32 %v12547_v50, 16  ;;  %v12594_v16 = vld [vmem:[%s11880_s7 + $0x44] sm:$0x1] }
  0xb9   : > { %v2243_v6 = vor.u32 %v2242_v54, %v2239_v42  ;;  %v2252_v48 = vrot.slane %v2250_v33, 4  ;;  %v2261_v57 = vshrl.u32 %v9626_v2, 16  ;;  %v2264_v29 = vshll.u32 %v9626_v2, 16  ;;  %v11472_v63 = vld [vmem:[%s11880_s7 + $0x60] sm:$0xff]   ;;  %v11473_v33 = vld [vmem:[%s11880_s7 + $0x6c] sm:$0xff]  }
  0xba   : > { %v2225_v38 = vsel %vm11926_vm3, %v2220_v36, %v2224_v18  ;;  %v2235_v26 = vsel %vm11926_vm3, %v2230_v31, %v2234_v47  ;;  %v2270_v58 = vshll.u32 %v12558_v37, 16  ;;  %10799 = vmatmul.mubr.msk.bf16.gmra.mxu1 %vm811_vm2, %v11470_v35  ;;  %v12584_v3 = vcombine.low %v2201_v9, %v2211_v19  ;;  %v12588_v18 = vld [vmem:[%s11880_s7 + $0x40] sm:$0xf]  ;;  %v9700_v47 = vld [vmem:[%s11880_s7 + $0xc] sm:$0xe] }
  0xbb   : > { %v2244_v21 = vrot.slane %v2243_v6, 4  ;;  %v2253_v53 = vor.u32 %v2252_v48, %v12567_v32  ;;  %v2263_v52 = vrot.slane %v2261_v57, 4  ;;  %10802 = vmatprep.mubr.msk.bf16.mxu1 %vm811_vm2, %v11471_v5  ;;  %v2266_v14 = vrot.slane %v2264_v29, 5 }
  0xbc   : > { %v2272_v42 = vrot.slane %v2270_v58, 5  ;;  %v2274_v13 = vshrl.u32 %v12558_v37, 16  ;;  %v2280_v51 = vshll.u32 %v12575_v43, 16  ;;  %v12598_v2 = vcombine.low %v2225_v38, %v2235_v26  ;;  %v9632_v58 = vld [vmem:[%s11880_s7 + $0x48] sm:$0xf] }
  0xbd   : > { %v2258_v35 = vrot.slane %v2256_v28, 5  ;;  %v2285_v9 = vshrl.u32 %v9629_v1, 16  ;;  %v2288_v54 = vshll.u32 %v9629_v1, 16  ;;  %v2254_v19 = vrot.slane %v2253_v53, 4 }
  0xbe   : > { %v2267_v36 = vor.u32 %v2266_v14, %v2263_v52  ;;  %v2276_v5 = vrot.slane %v2274_v13, 4  ;;  %v2294_v31 = vshll.u32 %v12588_v18, 16  ;;  %v2282_v6 = vrot.slane %v2280_v51, 5  ;;  %v12625_v51 = vld [vmem:[%s11880_s7 + $0x50] sm:$0x1] }
  0xbf   : > { %v2287_v48 = vrot.slane %v2285_v9, 4  ;;  %v2290_v57 = vrot.slane %v2288_v54, 5  ;;  %v2298_v29 = vshrl.u32 %v12588_v18, 16  ;;  %10773 = vmatmul.mubr.msk.bf16.gmra.mxu0 %vm811_vm2, %v9526_v8  ;;  %v2249_v28 = vsel %vm11926_vm3, %v2244_v21, %v12567_v32 }
  0xc0   : > { %v2268_v38 = vrot.slane %v2267_v36, 4  ;;  %v2277_v26 = vor.u32 %v2276_v5, %v2272_v42  ;;  %v2296_v1 = vrot.slane %v2294_v31, 5  ;;  %10776 = vmatprep.mubr.msk.bf16.mxu0 %vm811_vm2, %v9527_v27  ;;  %v2304_v14 = vshll.u32 %v12594_v16, 16  ;;  %v11474_v31 = vld [vmem:[%s11880_s7 + $0x78] sm:$0xff]  }
  0xc1   : > { %v2291_v53 = vor.u32 %v2290_v57, %v2287_v48  ;;  %v2300_v52 = vrot.slane %v2298_v29, 4  ;;  %v9716_v7 = vrot.slane %v9700_v47, 9  ;;  %v2259_v8 = vsel %vm11926_vm3, %v2254_v19, %v2258_v35  ;;  %v11475_v29 = vld [vmem:[%s11880_s7 + $0x84] sm:$0xff]  }
  0xc2   : > { %v2278_v32 = vrot.slane %v2277_v26, 4  ;;  %v2936_v21 = vrot.slane %v12477_v59, 5  ;;  %v2939_v13 = vrot.slane %v12489_v22, 5  ;;  %10803 = vmatmul.mubr.msk.bf16.gmra.mxu1 %vm811_vm2, %v11472_v63  ;;  %v2306_v27 = vrot.slane %v2304_v14, 5  ;;  %v9701_v63 = vld [vmem:[%s11880_s7 + $0x18] sm:$0xe] }
  0xc3   : > { %v2292_v46 = vrot.slane %v2291_v53, 4  ;;  %v2301_v55 = vor.u32 %v2300_v52, %v2296_v1  ;;  %v2309_v47 = vshrl.u32 %v9632_v58, 16  ;;  %10806 = vmatprep.mubr.msk.bf16.mxu1 %vm811_vm2, %v11473_v33  ;;  %v2273_v35 = vsel %vm11926_vm3, %v2268_v38, %v2272_v42  ;;  %v9635_v33 = vld [vmem:[%s11880_s7 + $0x54] sm:$0xf]  ;;  %v12656_v53 = vld [vmem:[%s11880_s7 + $0x58] sm:$0xf] }
  0xc4   : > { %v2283_v59 = vsel %vm11926_vm3, %v2278_v32, %v2282_v6  ;;  %v2938_v22 = vrot.slane %v2936_v21, 4  ;;  %v2312_v9 = vshll.u32 %v9632_v58, 16  ;;  %v12633_v54 = vcombine.low %v2249_v28, %v2259_v8 }
  0xc5   : > { %v2302_v19 = vrot.slane %v2301_v55, 4  ;;  %v12637_v36 = vsel %vm12277_vm6, %v9716_v7, %v2936_v21  ;;  %v2311_v5 = vrot.slane %v2309_v47, 4  ;;  %v2318_v48 = vshll.u32 %v12617_v39, 16 }
  0xc6   : > { %v12643_v42 = vsel %vm12277_vm6, %v2938_v22, %v2939_v13  ;;  %v2314_v6 = vrot.slane %v2312_v9, 5  ;;  %v2322_v57 = vshrl.u32 %v12617_v39, 16  ;;  %v12648_v58 = vcombine.low %v2273_v35, %v2283_v59  ;;  %v9638_v22 = vld [vmem:[%s11880_s7 + $0x60] sm:$0xf] }
  0xc7   : > { %v2297_v28 = vsel %vm11926_vm3, %v2292_v46, %v2296_v1  ;;  %v2307_v38 = vsel %vm11926_vm3, %v2302_v19, %v2306_v27  ;;  %v2328_v26 = vshll.u32 %v12625_v51, 16  ;;  %10777 = vmatmul.mubr.msk.bf16.gmra.mxu0 %vm811_vm2, %v9528_v40  ;;  %v9734_v52 = vcombine.low %v12637_v36, %v12643_v42  ;;  %v12665_v1 = vld [vmem:[%s11880_s7 + $0x5c] sm:$0x1]  ;;  %v9702_v27 = vld [vmem:[%s11880_s7 + $0x24] sm:$0xe] }
  0xc8   : > { %v2315_v14 = vor.u32 %v2314_v6, %v2311_v5  ;;  %v2320_v7 = vrot.slane %v2318_v48, 5  ;;  %v2324_v8 = vrot.slane %v2322_v57, 4  ;;  %10780 = vmatprep.mubr.msk.bf16.mxu0 %vm811_vm2, %v9529_v60  ;;  %v9717_v32 = vrot.slane %v9701_v63, 9 }
  0xc9   : > { %v2943_v21 = vrot.slane %v12508_v41, 5  ;;  %v2946_v49 = vrot.slane %v12525_v10, 5  ;;  %v2333_v56 = vshrl.u32 %v9635_v33, 16  ;;  %v2336_v46 = vshll.u32 %v9635_v33, 16  ;;  %v11476_v33 = vld [vmem:[%s11880_s7 + $0x90] sm:$0xff]  }
  0xca   : > { %v2316_v40 = vrot.slane %v2315_v14, 4  ;;  %v2325_v13 = vor.u32 %v2324_v8, %v2320_v7  ;;  %v2342_v55 = vshll.u32 %v12656_v53, 16  ;;  %10807 = vmatmul.mubr.msk.bf16.gmra.mxu1 %vm811_vm2, %v11474_v31  ;;  %v2330_v47 = vrot.slane %v2328_v26, 5  ;;  %v12704_v8 = vld [vmem:[%s11880_s7 + $0x68] sm:$0x1] }
  0xcb   : > { %v2945_v62 = vrot.slane %v2943_v21, 4  ;;  %v2335_v44 = vrot.slane %v2333_v56, 4  ;;  %v2346_v60 = vshrl.u32 %v12656_v53, 16  ;;  %10810 = vmatprep.mubr.msk.bf16.mxu1 %vm811_vm2, %v11475_v29  ;;  %v12678_v41 = vcombine.low %v2297_v28, %v2307_v38  ;;  %v12697_v29 = vld [vmem:[%s11880_s7 + $0x64] sm:$0xf] }
  0xcc   : > { %v2326_v10 = vrot.slane %v2325_v13, 4  ;;  %v2338_v35 = vrot.slane %v2336_v46, 5  ;;  %v12680_v59 = vrot.slane %v2342_v55, 5  ;;  %v12685_v9 = vsel %vm12277_vm6, %v9717_v32, %v2943_v21 }
  0xcd   : > { %v2348_v63 = vrot.slane %v2346_v60, 4  ;;  %v2352_v19 = vshll.u32 %v12665_v1, 16  ;;  %v9718_v5 = vrot.slane %v9702_v27, 9  ;;  %v2321_v31 = vsel %vm11926_vm3, %v2316_v40, %v2320_v7  ;;  %v9703_v7 = vld [vmem:[%s11880_s7 + $0x30] sm:$0xe] }
  0xce   : > { %v12693_v6 = vsel %vm12277_vm6, %v2945_v62, %v2946_v49  ;;  %v2339_v48 = vor.u32 %v2338_v35, %v2335_v44  ;;  %v2950_v57 = vrot.slane %v12541_v4, 5  ;;  %v2331_v28 = vsel %vm11926_vm3, %v2326_v10, %v2330_v47  ;;  %v11478_v4 = vld [vmem:[%s11880_s7 + $0x9c] sm:$0xff]  }
  0xcf   : > { %v2349_v38 = vor.u32 %v2348_v63, %v12680_v59  ;;  %v2354_v26 = vrot.slane %v2352_v19, 5  ;;  %v2953_v14 = vrot.slane %v12547_v50, 5  ;;  %10781 = vmatmul.mubr.msk.bf16.gmra.mxu0 %vm811_vm2, %v9530_v30  ;;  %v2357_v56 = vshrl.u32 %v9638_v22, 16 }
  0xd0   : > { %v2340_v32 = vrot.slane %v2339_v48, 4  ;;  %v12714_v21 = vsel %vm12277_vm6, %v9718_v5, %v2950_v57  ;;  %v2952_v49 = vrot.slane %v2950_v57, 4  ;;  %10784 = vmatprep.mubr.msk.bf16.mxu0 %vm811_vm2, %v9531_v11  ;;  %v2360_v40 = vshll.u32 %v9638_v22, 16  ;;  %v11480_v22 = vld [vmem:[%s11880_s7 + $0xa8] sm:$0xff]   ;;  %v12749_v48 = vld [vmem:[%s11880_s7 + $0x74] sm:$0x1] }
  0xd1   : > { %v2350_v50 = vrot.slane %v2349_v38, 4  ;;  %v2366_v61 = vshll.u32 %v12697_v29, 16  ;;  %v2370_v17 = vshrl.u32 %v12697_v29, 16  ;;  %v12722_v30 = vcombine.low %v2321_v31, %v2331_v28 }
  0xd2   : > { %v9735_v13 = vcombine.low %v12685_v9, %v12693_v6  ;;  %v12728_v46 = vsel %vm12277_vm6, %v2952_v49, %v2953_v14  ;;  %v2359_v55 = vrot.slane %v2357_v56, 4  ;;  %10811 = vmatmul.mubr.msk.bf16.gmra.mxu1 %vm811_vm2, %v11476_v33  ;;  %v2345_v11 = vsel %vm11926_vm3, %v2340_v32, %v12680_v59  ;;  %v11481_v33 = vld [vmem:[%s11880_s7 + $0xb4] sm:$0xff]   ;;  %v9704_v32 = vld [vmem:[%s11880_s7 + $0x3c] sm:$0xe] }
  0xd3   : > { %v2362_v27 = vrot.slane %v2360_v40, 5  ;;  %v2368_v47 = vrot.slane %v2366_v61, 5  ;;  %v2376_v62 = vshll.u32 %v12704_v8, 16  ;;  %10814 = vmatprep.mubr.msk.bf16.mxu1 %vm811_vm2, %v11478_v4  ;;  %v2355_v44 = vsel %vm11926_vm3, %v2350_v50, %v2354_v26 }
  0xd4   : > { %v9736_v60 = vcombine.low %v12714_v21, %v12728_v46  ;;  %v2372_v10 = vrot.slane %v2370_v17, 4  ;;  %v9719_v35 = vrot.slane %v9703_v7, 9  ;;  %v2957_v59 = vrot.slane %v12558_v37, 5 }
  0xd5   : > { %v2363_v63 = vor.u32 %v2362_v27, %v2359_v55  ;;  %v2960_v19 = vrot.slane %v12575_v43, 5  ;;  %v2381_v5 = vshrl.u32 %v9641_v34, 16  ;;  %v2384_v57 = vshll.u32 %v9641_v34, 16  ;;  %v12775_v34 = vld [vmem:[%s11880_s7 + $0x7c] sm:$0xf] }
  0xd6   : > { %v2373_v31 = vor.u32 %v2372_v10, %v2368_v47  ;;  %v2390_v28 = vshll.u32 %v12732_v24, 16  ;;  %v2394_v38 = vshrl.u32 %v12732_v24, 16  ;;  %v2378_v14 = vrot.slane %v2376_v62, 5 }
  0xd7   : > { %v2364_v26 = vrot.slane %v2363_v63, 4  ;;  %v2959_v7 = vrot.slane %v2957_v59, 4  ;;  %v2383_v4 = vrot.slane %v2381_v5, 4  ;;  %10785 = vmatmul.mubr.msk.bf16.gmra.mxu0 %vm811_vm2, %v9532_v12  ;;  %v2386_v43 = vrot.slane %v2384_v57, 5 }
  0xd8   : > { %v2374_v37 = vrot.slane %v2373_v31, 4  ;;  %v2392_v49 = vrot.slane %v2390_v28, 5  ;;  %v2396_v56 = vrot.slane %v2394_v38, 4  ;;  %10824 = vmatprep.mubr.msk.bf16.mxu0 %vm811_vm2, %v12584_v3  ;;  %v12760_v50 = vcombine.low %v2345_v11, %v2355_v44 }
  0xd9   : > { %v2369_v40 = vsel %vm11926_vm3, %v2364_v26, %v2368_v47  ;;  %v12766_v61 = vsel %vm12277_vm6, %v9719_v35, %v2957_v59  ;;  %v2400_v23 = vshll.u32 %v12749_v48, 16  ;;  %v12772_v12 = vsel %vm12277_vm6, %v2959_v7, %v2960_v19  ;;  %v12784_v35 = vld [vmem:[%s11880_s7 + $0x80] sm:$0x1] }
  0xda   : > { %v2387_v17 = vor.u32 %v2386_v43, %v2383_v4  ;;  %v2397_v3 = vor.u32 %v2396_v56, %v2392_v49  ;;  %v9720_v55 = vrot.slane %v9704_v32, 9  ;;  %10815 = vmatmul.mubr.msk.bf16.gmra.mxu1 %vm811_vm2, %v11480_v22  ;;  %v2379_v11 = vsel %vm11926_vm3, %v2374_v37, %v2378_v14  ;;  %v11482_v19 = vld [vmem:[%s11880_s7 + $0xc0] sm:$0xff]   ;;  %v12809_v43 = vld [vmem:[%s11880_s7 + $0x88] sm:$0xf] }
  0xdb   : > { %v2402_v27 = vrot.slane %v2400_v23, 5  ;;  %v2964_v47 = vrot.slane %v12588_v18, 5  ;;  %v2967_v62 = vrot.slane %v12594_v16, 5  ;;  %10818 = vmatprep.mubr.msk.bf16.mxu1 %vm811_vm2, %v11481_v33  ;;  %v2405_v63 = vshrl.u32 %v9644_v15, 16  ;;  %v9705_v16 = vld [vmem:[%s11880_s7 + $0x48] sm:$0xe] }
  0xdc   : > { %v2388_v44 = vrot.slane %v2387_v17, 4  ;;  %v2398_v10 = vrot.slane %v2397_v3, 4  ;;  %v2408_v59 = vshll.u32 %v9644_v15, 16  ;;  %v9737_v22 = vcombine.low %v12766_v61, %v12772_v12  ;;  %v12795_v33 = vld [vmem:[%s14963_s2 + $0x40] sm:$0xff]   ;;  %v12819_v17 = vld [vmem:[%s11880_s7 + $0x8c] sm:$0x1] }
  0xdd   : > { %v2966_v5 = vrot.slane %v2964_v47, 4  ;;  %v2414_v31 = vshll.u32 %v12775_v34, 16  ;;  %v2418_v18 = vshrl.u32 %v12775_v34, 16  ;;  %v12797_v57 = vcombine.low %v2369_v40, %v2379_v11  ;;  %v9647_v14 = vld [vmem:[%s11880_s7 + $0x84] sm:$0xf] }
  0xde   : > { %v12801_v28 = vsel %vm12277_vm6, %v9720_v55, %v2964_v47  ;;  %v2407_v38 = vrot.slane %v2405_v63, 4  ;;  %v2410_v26 = vrot.slane %v2408_v59, 5  ;;  %v2393_v7 = vsel %vm11926_vm3, %v2388_v44, %v2392_v49 }
  0xdf   : > { %v2403_v4 = vsel %vm11926_vm3, %v2398_v10, %v2402_v27  ;;  %v2416_v32 = vrot.slane %v2414_v31, 5  ;;  %v2420_v37 = vrot.slane %v2418_v18, 4  ;;  %10825 = vmatmul.mubr.msk.bf16.vlgmr.msra.gmra.mxu0 %vm811_vm2, %v12598_v2  ;;  %v12815_v56 = vsel %vm12277_vm6, %v2966_v5, %v2967_v62  ;;  %v9650_v5 = vld [vmem:[%s11880_s7 + $0x90] sm:$0xf] }
  0xe0   : > { %v2411_v40 = vor.u32 %v2410_v26, %v2407_v38  ;;  %v2424_v23 = vshll.u32 %v12784_v35, 16  ;;  %v9721_v15 = vrot.slane %v9705_v16, 9  ;;  %10891 = vmatpush3.bf16.msra.mxu0 %v12358_v20  ;;  %10828 = vmatprep.mubr.msk.bf16.mxu0 %vm811_vm2, %v12633_v54  ;;  %v2971_v3 = vrot.slane %v12617_v39, 5  ;;  %v9706_v39 = vld [vmem:[%s11880_s7 + $0x54] sm:$0xe] }
  0xe1   : > { %v2421_v49 = vor.u32 %v2420_v37, %v2416_v32  ;;  %v2974_v2 = vrot.slane %v12625_v51, 5  ;;  %v2429_v55 = vshrl.u32 %v9647_v14, 16  ;;  %v2432_v47 = vshll.u32 %v9647_v14, 16  ;;  %10958 = vmatprep.subr.bf16.mxu0 %v12795_v33  ;;  %v12861_v37 = vld [vmem:[%s11880_s7 + $0x98] sm:$0x1] }
  0xe2   : > { %v2412_v11 = vrot.slane %v2411_v40, 4  ;;  %v2426_v27 = vrot.slane %v2424_v23, 5  ;;  %v2438_v62 = vshll.u32 %v12809_v43, 16  ;;  %10819 = vmatmul.mubr.msk.bf16.gmra.mxu1 %vm811_vm2, %v11482_v19  ;;  %v12829_v20 = vcombine.low %v2393_v7, %v2403_v4 }
  0xe3   : > { %v2422_v54 = vrot.slane %v2421_v49, 4  ;;  %v2973_v44 = vrot.slane %v2971_v3, 4  ;;  %v2431_v10 = vrot.slane %v2429_v55, 4  ;;  %10858 = vmatprep.mubr.msk.bf16.mxu1 %vm811_vm2, %v9734_v52  ;;  %v2434_v63 = vrot.slane %v2432_v47, 5  ;;  %v12850_v52 = vld [vmem:[%s11880_s7 + $0x94] sm:$0xf] }
  0xe4   : > { %v2417_v51 = vsel %vm11926_vm3, %v2412_v11, %v2416_v32  ;;  %v2440_v59 = vrot.slane %v2438_v62, 5  ;;  %v2442_v19 = vshrl.u32 %v12809_v43, 16  ;;  %v9738_v31 = vcombine.low %v12801_v28, %v12815_v56 }
  0xe5   : > { %v2427_v18 = vsel %vm11926_vm3, %v2422_v54, %v2426_v27  ;;  %v12846_v36 = vsel %vm12277_vm6, %v9721_v15, %v2971_v3  ;;  %v2448_v42 = vshll.u32 %v12819_v17, 16  ;;  %v12854_v16 = vsel %vm12277_vm6, %v2973_v44, %v2974_v2  ;;  %v9707_v2 = vld [vmem:[%s11880_s7 + $0x60] sm:$0xe] }
  0xe6   : > { %v2435_v38 = vor.u32 %v2434_v63, %v2431_v10  ;;  %v2444_v26 = vrot.slane %v2442_v19, 4  ;;  %v9722_v14 = vrot.slane %v9706_v39, 9  ;;  %v12856_v7 = vcombine.low %v2417_v51, %v2427_v18  ;;  %v9653_v39 = vld [vmem:[%s11880_s7 + $0x9c] sm:$0xf]  ;;  %v12896_v63 = vld [vmem:[%s11880_s7 + $0xa0] sm:$0xf] }
  0xe7   : > { %v2978_v4 = vrot.slane %v12656_v53, 5  ;;  %v2981_v32 = vrot.slane %v12665_v1, 5  ;;  %v2453_v40 = vshrl.u32 %v9650_v5, 16  ;;  %10829 = vmatmul.mubr.msk.bf16.gmra.mxu0 %vm811_vm2, %v12648_v58  ;;  %v2456_v49 = vshll.u32 %v9650_v5, 16  ;;  %v12899_v19 = vld [vmem:[%s11880_s7 + $0xa4] sm:$0x1] }
  0xe8   : > { %v2436_v23 = vrot.slane %v2435_v38, 4  ;;  %v2445_v15 = vor.u32 %v2444_v26, %v2440_v59  ;;  %v2462_v3 = vshll.u32 %v12850_v52, 16  ;;  %10832 = vmatprep.mubr.msk.bf16.mxu0 %vm811_vm2, %v12678_v41  ;;  %v2450_v55 = vrot.slane %v2448_v42, 5  ;;  %v9708_v38 = vld [vmem:[%s11880_s7 + $0x6c] sm:$0xe] }
  0xe9   : > { %v2980_v53 = vrot.slane %v2978_v4, 4  ;;  %v2455_v11 = vrot.slane %v2453_v40, 4  ;;  %v2466_v1 = vshrl.u32 %v12850_v52, 16  ;;  %v9739_v27 = vcombine.low %v12846_v36, %v12854_v16 }
  0xea   : > { %v2446_v58 = vrot.slane %v2445_v15, 4  ;;  %v2458_v47 = vrot.slane %v2456_v49, 5  ;;  %v12872_v62 = vrot.slane %v2462_v3, 5  ;;  %10859 = vmatmul.mubr.msk.bf16.vlgmr.msra.gmra.mxu1 %vm811_vm2, %v9735_v13  ;;  %v12880_v41 = vsel %vm12277_vm6, %v9722_v14, %v2978_v4  ;;  %v12925_v49 = vld [vmem:[%s11880_s7 + $0xac] sm:$0xf] }
  0xeb   : > { %v2468_v54 = vrot.slane %v2466_v1, 4  ;;  %v2472_v44 = vshll.u32 %v12861_v37, 16  ;;  %v9723_v10 = vrot.slane %v9707_v2, 9  ;;  %10862 = vmatprep.mubr.msk.bf16.mxu1 %vm811_vm2, %v9736_v60  ;;  %v2441_v9 = vsel %vm11926_vm3, %v2436_v23, %v2440_v59  ;;  %10925 = vmatpush3.bf16.msra.mxu1 %v12456_v0 }
  0xec   : > { %v12892_v6 = vsel %vm12277_vm6, %v2980_v53, %v2981_v32  ;;  %v2459_v13 = vor.u32 %v2458_v47, %v2455_v11  ;;  %v2985_v51 = vrot.slane %v12697_v29, 5  ;;  %v2451_v21 = vsel %vm11926_vm3, %v2446_v58, %v2450_v55  ;;  %v9656_v32 = vld [vmem:[%s11880_s7 + $0xa8] sm:$0xf] }
  0xed   : > { %v2469_v46 = vor.u32 %v2468_v54, %v12872_v62  ;;  %v2474_v60 = vrot.slane %v2472_v44, 5  ;;  %v2988_v59 = vrot.slane %v12704_v8, 5  ;;  %v2477_v42 = vshrl.u32 %v9653_v39, 16  ;;  %v12948_v44 = vld [vmem:[%s11880_s7 + $0xb0] sm:$0x1] }
  0xee   : > { %v2460_v5 = vrot.slane %v2459_v13, 4  ;;  %v12908_v29 = vsel %vm12277_vm6, %v9723_v10, %v2985_v51  ;;  %v2987_v18 = vrot.slane %v2985_v51, 4  ;;  %v2480_v14 = vshll.u32 %v9653_v39, 16 }
  0xef   : > { %v2470_v26 = vrot.slane %v2469_v46, 4  ;;  %v2486_v0 = vshll.u32 %v12896_v63, 16  ;;  %v2490_v4 = vshrl.u32 %v12896_v63, 16  ;;  %10833 = vmatmul.mubr.msk.bf16.gmra.mxu0 %vm811_vm2, %v12722_v30  ;;  %v12916_v8 = vcombine.low %v2441_v9, %v2451_v21 }
  0xf0   : > { %v9740_v40 = vcombine.low %v12880_v41, %v12892_v6  ;;  %v12922_v23 = vsel %vm12277_vm6, %v2987_v18, %v2988_v59  ;;  %v2479_v15 = vrot.slane %v2477_v42, 4  ;;  %10836 = vmatprep.mubr.msk.bf16.mxu0 %vm811_vm2, %v12760_v50  ;;  %v2465_v30 = vsel %vm11926_vm3, %v2460_v5, %v12872_v62 }
  0xf1   : > { %v2482_v3 = vrot.slane %v2480_v14, 5  ;;  %v2488_v2 = vrot.slane %v2486_v0, 5  ;;  %v2496_v55 = vshll.u32 %v12899_v19, 16  ;;  %v2475_v53 = vsel %vm11926_vm3, %v2470_v26, %v2474_v60  ;;  %v9659_v60 = vld [vmem:[%s11880_s7 + $0xb4] sm:$0xf] }
  0xf2   : > { %v9741_v11 = vcombine.low %v12908_v29, %v12922_v23  ;;  %v2492_v1 = vrot.slane %v2490_v4, 4  ;;  %v9724_v58 = vrot.slane %v9708_v38, 9  ;;  %10863 = vmatmul.mubr.msk.bf16.gmra.mxu1 %vm811_vm2, %v9737_v22  ;;  %v2992_v47 = vrot.slane %v12732_v24, 5  ;;  %v12970_v38 = vld [vmem:[%s11880_s7 + $0xb8] sm:$0xf] }
  0xf3   : > { %v2483_v50 = vor.u32 %v2482_v3, %v2479_v15  ;;  %v2995_v62 = vrot.slane %v12749_v48, 5  ;;  %v2501_v41 = vshrl.u32 %v9656_v32, 16  ;;  %10866 = vmatprep.mubr.msk.bf16.mxu1 %vm811_vm2, %v9738_v31  ;;  %v2504_v10 = vshll.u32 %v9656_v32, 16  ;;  %v9709_v48 = vld [vmem:[%s11880_s7 + $0x78] sm:$0xe] }
  0xf4   : > { %v2493_v54 = vor.u32 %v2492_v1, %v2488_v2  ;;  %v2510_v61 = vshll.u32 %v12925_v49, 16  ;;  %v2514_v12 = vshrl.u32 %v12925_v49, 16  ;;  %v2498_v39 = vrot.slane %v2496_v55, 5  ;;  %v12979_v15 = vld [vmem:[%s11880_s7 + $0xbc] sm:$0x1] }
  0xf5   : > { %v2484_v22 = vrot.slane %v2483_v50, 4  ;;  %v2994_v24 = vrot.slane %v2992_v47, 4  ;;  %v2503_v9 = vrot.slane %v2501_v41, 4  ;;  %v2506_v13 = vrot.slane %v2504_v10, 5  ;;  %v9710_v55 = vld [vmem:[%s11880_s7 + $0x84] sm:$0xe] }
  0xf6   : > { %v2494_v6 = vrot.slane %v2493_v54, 4  ;;  %v2512_v28 = vrot.slane %v2510_v61, 5  ;;  %v2516_v56 = vrot.slane %v2514_v12, 4  ;;  %v12953_v31 = vcombine.low %v2465_v30, %v2475_v53  ;;  %v13003_v41 = vld [vmem:[%s11880_s7 + $0xc4] sm:$0xf] }
  0xf7   : > { %v2489_v51 = vsel %vm11926_vm3, %v2484_v22, %v2488_v2  ;;  %v12959_v21 = vsel %vm12277_vm6, %v9724_v58, %v2992_v47  ;;  %v2520_v46 = vshll.u32 %v12948_v44, 16  ;;  %10837 = vmatmul.mubr.msk.bf16.gmra.mxu0 %vm811_vm2, %v12797_v57  ;;  %v12967_v59 = vsel %vm12277_vm6, %v2994_v24, %v2995_v62 }
  0xf8   : > { %v2507_v5 = vor.u32 %v2506_v13, %v2503_v9  ;;  %v2517_v18 = vor.u32 %v2516_v56, %v2512_v28  ;;  %v9725_v42 = vrot.slane %v9709_v48, 9  ;;  %10840 = vmatprep.mubr.msk.bf16.mxu0 %vm811_vm2, %v12829_v20  ;;  %v2499_v26 = vsel %vm11926_vm3, %v2494_v6, %v2498_v39  ;;  %v13015_v6 = vld [vmem:[%s11880_s7 + $0xc8] sm:$0x1] }
  0xf9   : > { %v2522_v14 = vrot.slane %v2520_v46, 5  ;;  %v2999_v0 = vrot.slane %v12775_v34, 5  ;;  %v3002_v57 = vrot.slane %v12784_v35, 5  ;;  %v2525_v30 = vshrl.u32 %v9659_v60, 16 }
  0xfa   : > { %v2508_v4 = vrot.slane %v2507_v5, 4  ;;  %v2518_v32 = vrot.slane %v2517_v18, 4  ;;  %v2528_v3 = vshll.u32 %v9659_v60, 16  ;;  %10867 = vmatmul.mubr.msk.bf16.gmra.mxu1 %vm811_vm2, %v9739_v27  ;;  %v9742_v20 = vcombine.low %v12959_v21, %v12967_v59  ;;  %v9662_v27 = vld [vmem:[%s11880_s7 + $0xc0] sm:$0xf] }
  0xfb   : > { %v3001_v2 = vrot.slane %v2999_v0, 4  ;;  %v2534_v34 = vshll.u32 %v12970_v38, 16  ;;  %v2538_v35 = vshrl.u32 %v12970_v38, 16  ;;  %10870 = vmatprep.mubr.msk.bf16.mxu1 %vm811_vm2, %v9740_v40  ;;  %v12991_v53 = vcombine.low %v2489_v51, %v2499_v26  ;;  %v9711_v21 = vld [vmem:[%s11880_s7 + $0x90] sm:$0xe] }
  0xfc   : > { %v12995_v1 = vsel %vm12277_vm6, %v9725_v42, %v2999_v0  ;;  %v2527_v36 = vrot.slane %v2525_v30, 4  ;;  %v2530_v16 = vrot.slane %v2528_v3, 5  ;;  %v2513_v58 = vsel %vm11926_vm3, %v2508_v4, %v2512_v28  ;;  %v9712_v5 = vld [vmem:[%s11880_s7 + $0x9c] sm:$0xe]  ;;  %v9713_v0 = vld [vmem:[%s11880_s7 + $0xa8] sm:$0xe] }
  0xfd   : > { %v2523_v50 = vsel %vm11926_vm3, %v2518_v32, %v2522_v14  ;;  %v2536_v47 = vrot.slane %v2534_v34, 5  ;;  %v2540_v62 = vrot.slane %v2538_v35, 4  ;;  %v13007_v40 = vsel %vm12277_vm6, %v3001_v2, %v3002_v57  ;;  %v9714_v3 = vld [vmem:[%s11880_s7 + $0xb4] sm:$0xe] }
  0xfe   : > { %v2531_v54 = vor.u32 %v2530_v16, %v2527_v36  ;;  %v2544_v10 = vshll.u32 %v12979_v15, 16  ;;  %v9726_v61 = vrot.slane %v9710_v55, 9  ;;  %v3006_v22 = vrot.slane %v12809_v43, 5 }
  0xff   : > { %v2541_v12 = vor.u32 %v2540_v62, %v2536_v47  ;;  %v3009_v39 = vrot.slane %v12819_v17, 5  ;;  %v2549_v24 = vshrl.u32 %v9662_v27, 16  ;;  %10841 = vmatmul.mubr.msk.bf16.gmra.mxu0 %vm811_vm2, %v12856_v7  ;;  %v2552_v13 = vshll.u32 %v9662_v27, 16  ;;  %v9715_v27 = vld [vmem:[%s11880_s7 + $0xc0] sm:$0xe] }
 0x100   : > { %v2532_v9 = vrot.slane %v2531_v54, 4  ;;  %v2546_v48 = vrot.slane %v2544_v10, 5  ;;  %v2558_v28 = vshll.u32 %v13003_v41, 16  ;;  %10844 = vmatprep.mubr.msk.bf16.mxu0 %vm811_vm2, %v12916_v8  ;;  %v13020_v56 = vcombine.low %v2513_v58, %v2523_v50  ;;  %v9834_v62 = vld [vmem:[%s11880_s7 + $0x18] sm:$0xf] }
 0x101   : > { %v2542_v43 = vrot.slane %v2541_v12, 4  ;;  %v3008_v51 = vrot.slane %v3006_v22, 4  ;;  %v2551_v17 = vrot.slane %v2549_v24, 4  ;;  %v9743_v7 = vcombine.low %v12995_v1, %v13007_v40  ;;  %v13068_v10 = vld [vmem:[%s11880_s7 + $0x1c] sm:$0xf] }
 0x102   : > { %v2554_v46 = vrot.slane %v2552_v13, 5  ;;  %v2560_v60 = vrot.slane %v2558_v28, 5  ;;  %v2562_v59 = vshrl.u32 %v13003_v41, 16  ;;  %10871 = vmatmul.mubr.msk.bf16.gmra.mxu1 %vm811_vm2, %v9741_v11  ;;  %v2537_v8 = vsel %vm11926_vm3, %v2532_v9, %v2536_v47  ;;  %v13086_v13 = vld [vmem:[%s11880_s7 + $0x20] sm:$0x1] }
 0x103   : > { %v2547_v18 = vsel %vm11926_vm3, %v2542_v43, %v2546_v48  ;;  %v3007_v42 = vsel %vm12277_vm6, %v9726_v61, %v3006_v22  ;;  %v2568_v26 = vshll.u32 %v13015_v6, 16  ;;  %10874 = vmatprep.mubr.msk.bf16.mxu1 %vm811_vm2, %v9742_v20  ;;  %v3010_v14 = vsel %vm12277_vm6, %v3008_v51, %v3009_v39  ;;  %v9837_v28 = vld [vmem:[%s11880_s7 + $0x24] sm:$0xf] }
 0x104   : > { %v2555_v29 = vor.u32 %v2554_v46, %v2551_v17  ;;  %v2564_v23 = vrot.slane %v2562_v59, 4  ;;  %v9727_v11 = vrot.slane %v9711_v21, 9  ;;  %v3013_v4 = vrot.slane %v12850_v52, 5  ;;  %v13091_v21 = vld [vmem:[%s11880_s7 + $0x28] sm:$0xf] }
 0x105   : > { %v2570_v57 = vrot.slane %v2568_v26, 5  ;;  %v3016_v32 = vrot.slane %v12861_v37, 5  ;;  %v9728_v30 = vrot.slane %v9712_v5, 9  ;;  %v3020_v35 = vrot.slane %v12896_v63, 5 }
 0x106   : > { %v2556_v2 = vrot.slane %v2555_v29, 4  ;;  %v2565_v34 = vor.u32 %v2564_v23, %v2560_v60  ;;  %v3023_v20 = vrot.slane %v12899_v19, 5  ;;  %v9744_v55 = vcombine.low %v3007_v42, %v3010_v14 }
 0x107   : > { %v3015_v1 = vrot.slane %v3013_v4, 4  ;;  %v9729_v36 = vrot.slane %v9713_v0, 9  ;;  %v3027_v16 = vrot.slane %v12925_v49, 5  ;;  %10845 = vmatmul.mubr.msk.bf16.gmra.mxu0 %vm811_vm2, %v12953_v31  ;;  %v3014_v63 = vsel %vm12277_vm6, %v9727_v11, %v3013_v4 }
 0x108   : > { %v2561_v52 = vsel %vm11926_vm3, %v2556_v2, %v2560_v60  ;;  %v2566_v37 = vrot.slane %v2565_v34, 4  ;;  %v3022_v58 = vrot.slane %v3020_v35, 4  ;;  %10848 = vmatprep.mubr.msk.bf16.mxu0 %vm811_vm2, %v12991_v53  ;;  %v9681_v19 = vcombine.low %v2537_v8, %v2547_v18  ;;  %v13106_v8 = vld [vmem:[%s11880_s7 + $0x2c] sm:$0x1] }
 0x109   : > { %v3017_v49 = vsel %vm12277_vm6, %v3015_v1, %v3016_v32  ;;  %v3029_v50 = vrot.slane %v3027_v16, 4  ;;  %v3030_v47 = vrot.slane %v12948_v44, 5  ;;  %v3021_v40 = vsel %vm12277_vm6, %v9728_v30, %v3020_v35  ;;  %v9840_v30 = vld [vmem:[%s11880_s7 + $0x30] sm:$0xf] }
 0x10a   : > { %v2571_v31 = vsel %vm11926_vm3, %v2566_v37, %v2570_v57  ;;  %v3024_v54 = vsel %vm12277_vm6, %v3022_v58, %v3023_v20  ;;  %v9730_v53 = vrot.slane %v9714_v3, 9  ;;  %10875 = vmatmul.mubr.msk.bf16.gmra.mxu1 %vm811_vm2, %v9743_v7  ;;  %v9745_v44 = vcombine.low %v3014_v63, %v3017_v49  ;;  %v11484_v3 = vld [vmem:[%s11880_s7 + $0x18] sm:$0xff]  }
 0x10b   : > { %v13071_v61 = vcombine.low %v2561_v52, %v2571_v31  ;;  %v13075_v12 = vsel %vm12277_vm6, %v9729_v36, %v3027_v16  ;;  %v3034_v22 = vrot.slane %v12970_v38, 5  ;;  %10878 = vmatprep.mubr.msk.bf16.mxu1 %vm811_vm2, %v9744_v55  ;;  %v13081_v39 = vsel %vm12277_vm6, %v3029_v50, %v3030_v47  ;;  %v13134_v55 = vld [vmem:[%s11880_s7 + $0x34] sm:$0xf]  ;;  %v13138_v52 = vld [vmem:[%s11880_s7 + $0x38] sm:$0x1] }
 0x10c   : > { %v3037_v24 = vrot.slane %v12979_v15, 5  ;;  %v9731_v9 = vrot.slane %v9715_v27, 9  ;;  %v3041_v48 = vrot.slane %v13003_v41, 5  ;;  %v9746_v43 = vcombine.low %v3021_v40, %v3024_v54  ;;  %v9843_v37 = vld [vmem:[%s11880_s7 + $0x3c] sm:$0xf]  ;;  %v11494_v40 = vld [vmem:[%s11880_s7 + $0x84] sm:$0xff]  }
 0x10d   : > { %v3036_v51 = vrot.slane %v3034_v22, 4  ;;  %v3044_v17 = vrot.slane %v13015_v6, 5  ;;  %v3756_v38 = vshrl.u32 %v9834_v62, 16  ;;  %v13095_v7 = vsel %vm12277_vm6, %v9730_v53, %v3034_v22  ;;  %v9844_v22 = vld [vmem:[%s11880_s7 + $0x40] sm:$0xf] }
 0x10e   : > { %v3043_v46 = vrot.slane %v3041_v48, 4  ;;  %v3759_v15 = vshll.u32 %v9834_v62, 16  ;;  %v3765_v60 = vshll.u32 %v13068_v10, 16  ;;  %v9747_v41 = vcombine.low %v13075_v12, %v13081_v39  ;;  %v9849_v12 = vld [vmem:[%s11880_s7 + $0x54] sm:$0xf] }
 0x10f   : > { %v13102_v59 = vsel %vm12277_vm6, %v3036_v51, %v3037_v24  ;;  %v3758_v5 = vrot.slane %v3756_v38, 4  ;;  %v3769_v6 = vshrl.u32 %v13068_v10, 16  ;;  %10849 = vmatmul.mubr.msk.bf16.gmra.mxu0 %vm811_vm2, %v13020_v56  ;;  %v13112_v18 = vsel %vm12277_vm6, %v9731_v9, %v3041_v48  ;;  %v9846_v51 = vld [vmem:[%s11880_s7 + $0x48] sm:$0xf]  ;;  %v11487_v39 = vld [vmem:[%s11880_s7 + $0x30] sm:$0xff]  }
 0x110   : > { %v13116_v42 = vsel %vm12277_vm6, %v3043_v46, %v3044_v17  ;;  %v3761_v26 = vrot.slane %v3759_v15, 5  ;;  %v13118_v14 = vrot.slane %v3765_v60, 5  ;;  %10852 = vmatprep.mubr.msk.bf16.mxu0 %vm811_vm2, %v9681_v19  ;;  %v9748_v29 = vcombine.low %v13095_v7, %v13102_v59 }
 0x111   : > { %v3771_v23 = vrot.slane %v3769_v6, 4  ;;  %v3775_v56 = vshll.u32 %v13086_v13, 16  ;;  %v3780_v11 = vshrl.u32 %v9837_v28, 16  ;;  %v3783_v57 = vshll.u32 %v9837_v28, 16 }
 0x112   : > { %v3762_v0 = vor.u32 %v3761_v26, %v3758_v5  ;;  %v3789_v4 = vshll.u32 %v13091_v21, 16  ;;  %v3793_v32 = vshrl.u32 %v13091_v21, 16  ;;  %10879 = vmatmul.mubr.msk.bf16.gmra.mxu1 %vm811_vm2, %v9745_v44  ;;  %v9749_v2 = vcombine.low %v13112_v18, %v13116_v42 }
 0x113   : > { %v3772_v34 = vor.u32 %v3771_v23, %v13118_v14  ;;  %v3782_v35 = vrot.slane %v3780_v11, 4  ;;  %v3799_v20 = vshll.u32 %v13106_v8, 16  ;;  %10882 = vmatprep.mubr.msk.bf16.mxu1 %vm811_vm2, %v9746_v43  ;;  %v3785_v36 = vrot.slane %v3783_v57, 5  ;;  %v13152_v43 = vld [vmem:[%s11880_s7 + $0x44] sm:$0x1] }
 0x114   : > { %v3763_v1 = vrot.slane %v3762_v0, 4  ;;  %v3791_v16 = vrot.slane %v3789_v4, 5  ;;  %v3795_v27 = vrot.slane %v3793_v32, 4  ;;  %v3777_v58 = vrot.slane %v3775_v56, 5  ;;  %v13172_v56 = vld [vmem:[%s11880_s7 + $0x4c] sm:$0xf] }
 0x115   : > { %v3773_v63 = vrot.slane %v3772_v34, 4  ;;  %v3804_v49 = vshrl.u32 %v9840_v30, 16  ;;  %v3786_v50 = vor.u32 %v3785_v36, %v3782_v35  ;;  %v3801_v62 = vrot.slane %v3799_v20, 5  ;;  %v9848_v32 = vld [vmem:[%s11880_s7 + $0x50] sm:$0x1] }
 0x116   : > { %v3796_v47 = vor.u32 %v3795_v27, %v3791_v16  ;;  %v3807_v31 = vshll.u32 %v9840_v30, 16  ;;  %v3813_v53 = vshll.u32 %v13134_v55, 16  ;;  %v3817_v44 = vshrl.u32 %v13134_v55, 16 }
 0x117   : > { %v3806_v54 = vrot.slane %v3804_v49, 4  ;;  %10853 = vmatmul.mubr.msk.bf16.gmra.mxu0 %vm811_vm2, %v13071_v61  ;;  %v3768_v24 = vsel %vm11926_vm3, %v3763_v1, %v13118_v14  ;;  %v3787_v9 = vrot.slane %v3786_v50, 4  ;;  %v3823_v7 = vshll.u32 %v13138_v52, 16  ;;  %v11486_v61 = vld [vmem:[%s11880_s7 + $0x24] sm:$0xff]  }
 0x118   : > { %v3797_v48 = vrot.slane %v3796_v47, 4  ;;  %v3809_v28 = vrot.slane %v3807_v31, 5  ;;  %10892 = vmatprep.mubr.msk.bf16.mxu0 %vm811_vm2, %v11484_v3  ;;  %v13156_v17 = vrot.slane %v3813_v53, 5  ;;  %v3819_v38 = vrot.slane %v3817_v44, 4 }
 0x119   : > { %v3828_v46 = vshrl.u32 %v9843_v37, 16  ;;  %v3778_v15 = vsel %vm11926_vm3, %v3773_v63, %v3777_v58  ;;  %v3792_v60 = vsel %vm11926_vm3, %v3787_v9, %v3791_v16  ;;  %v3831_v5 = vshll.u32 %v9843_v37, 16  ;;  %v9850_v58 = vld [vmem:[%s11880_s7 + $0x58] sm:$0xf] }
 0x11a   : > { %v3810_v59 = vor.u32 %v3809_v28, %v3806_v54  ;;  %10883 = vmatmul.mubr.msk.bf16.gmra.mxu1 %vm811_vm2, %v9747_v41  ;;  %v3802_v6 = vsel %vm11926_vm3, %v3797_v48, %v3801_v62  ;;  %v3820_v26 = vor.u32 %v3819_v38, %v13156_v17  ;;  %v3825_v14 = vrot.slane %v3823_v7, 5  ;;  %v13194_v54 = vld [vmem:[%s11880_s7 + $0x5c] sm:$0x1] }
 0x11b   : > { %v3830_v23 = vrot.slane %v3828_v46, 4  ;;  %10886 = vmatprep.mubr.msk.bf16.mxu1 %vm811_vm2, %v9748_v29  ;;  %v3833_v0 = vrot.slane %v3831_v5, 5  ;;  %v3837_v57 = vshll.u32 %v9844_v22, 16  ;;  %v3841_v4 = vshrl.u32 %v9844_v22, 16  ;;  %v11489_v5 = vld [vmem:[%s11880_s7 + $0x48] sm:$0xff]  }
 0x11c   : > { %v3811_v11 = vrot.slane %v3810_v59, 4  ;;  %v9884_v41 = vcombine.low %v3768_v24, %v3778_v15  ;;  %v3821_v30 = vrot.slane %v3820_v26, 4  ;;  %v3847_v3 = vshll.u32 %v13152_v43, 16 }
 0x11d   : > { %v3852_v34 = vshrl.u32 %v9846_v51, 16  ;;  %v13181_v20 = vcombine.low %v3792_v60, %v3802_v6  ;;  %v3834_v1 = vor.u32 %v3833_v0, %v3830_v23  ;;  %v3839_v29 = vrot.slane %v3837_v57, 5  ;;  %v13210_v60 = vld [vmem:[%s11880_s7 + $0x64] sm:$0xf] }
 0x11e   : > { %v13179_v35 = vpop.f32.mrf.mxu0  ;;  %v3843_v36 = vrot.slane %v3841_v4, 4  ;;  %v3816_v16 = vsel %vm11926_vm3, %v3811_v11, %v13156_v17  ;;  %v3849_v27 = vrot.slane %v3847_v3, 5  ;;  %v3855_v63 = vshll.u32 %v9846_v51, 16  ;;  %v9852_v17 = vld [vmem:[%s11880_s7 + $0x60] sm:$0xf] }
 0x11f   : > { %v3854_v37 = vrot.slane %v3852_v34, 4  ;;  %10893 = vmatmul.mubr.msk.bf16.vlgmr.msra.gmra.mxu0 %vm811_vm2, %v11486_v61  ;;  %v3826_v50 = vsel %vm11926_vm3, %v3821_v30, %v3825_v14  ;;  %v3835_v47 = vrot.slane %v3834_v1, 4  ;;  %v3861_v31 = vshll.u32 %v13172_v56, 16 }
 0x120   : > { %v13188_v49 = vpop.f32.mrf.mxu0  ;;  %v3844_v62 = vor.u32 %v3843_v36, %v3839_v29  ;;  %10959 = vmatpush3.bf16.msra.mxu0 %v12795_v33  ;;  %10896 = vmatprep.mubr.msk.bf16.mxu0 %vm811_vm2, %v11487_v39  ;;  %v3857_v53 = vrot.slane %v3855_v63, 5  ;;  %v3865_v44 = vshrl.u32 %v13172_v56, 16  ;;  %v3871_v22 = vshll.u32 %v9848_v32, 16  ;;  %v11488_v33 = vld [vmem:[%s11880_s7 + $0x3c] sm:$0xff]  }
 0x121   : > { %v3876_v24 = vshrl.u32 %v9849_v12, 16  ;;  %v3840_v9 = vsel %vm11926_vm3, %v3835_v47, %v3839_v29  ;;  %v3863_v28 = vrot.slane %v3861_v31, 5  ;;  %v3879_v51 = vshll.u32 %v9849_v12, 16 }
 0x122   : > { %v3845_v48 = vrot.slane %v3844_v62, 4  ;;  %v13202_v38 = vpop.f32.mrf.mxu1  ;;  %10887 = vmatmul.mubr.msk.bf16.gmra.mxu1 %vm811_vm2, %v9749_v2  ;;  %v3858_v7 = vor.u32 %v3857_v53, %v3854_v37  ;;  %v3867_v46 = vrot.slane %v3865_v44, 4  ;;  %v3873_v61 = vrot.slane %v3871_v22, 5  ;;  %v13212_v59 = vpop.f32.mrf.mxu0  ;;  %v13219_v2 = vld [vmem:[%s11880_s7 + $0x68] sm:$0x1]  ;;  %v11490_v44 = vld [vmem:[%s11880_s7 + $0x54] sm:$0xff]  }
 0x123   : > { %v3878_v15 = vrot.slane %v3876_v24, 4  ;;  %10926 = vmatprep.mubr.msk.bf16.mxu1 %vm811_vm2, %v9884_v41  ;;  %v3881_v26 = vrot.slane %v3879_v51, 5  ;;  %v3885_v18 = vshll.u32 %v9850_v58, 16  ;;  %v3889_v42 = vshrl.u32 %v9850_v58, 16  ;;  %v9855_v41 = vld [vmem:[%s11880_s7 + $0x6c] sm:$0xf] }
 0x124   : > { %v3850_v6 = vsel %vm11926_vm3, %v3845_v48, %v3849_v27  ;;  %v13221_v14 = vpop.f32.mrf.mxu1  ;;  %v9886_v23 = vcombine.low %v3816_v16, %v3826_v50  ;;  %v3859_v11 = vrot.slane %v3858_v7, 4  ;;  %v3868_v0 = vor.u32 %v3867_v46, %v3863_v28  ;;  %v13232_v36 = vpop.f32.mrf.mxu0  ;;  %v13236_v58 = vld [vmem:[%s11880_s7 + $0x70] sm:$0xf]  ;;  %v9858_v51 = vld [vmem:[%s11880_s7 + $0x78] sm:$0xf] }
 0x125   : > { %v3895_v57 = vshll.u32 %v13194_v54, 16  ;;  %v13224_v4 = vcombine.low %v3840_v9, %v3850_v6  ;;  %v3882_v32 = vor.u32 %v3881_v26, %v3878_v15  ;;  %v3887_v12 = vrot.slane %v3885_v18, 5  ;;  %v11491_v6 = vld [vmem:[%s11880_s7 + $0x60] sm:$0xff]  }
 0x126   : > { %v3891_v39 = vrot.slane %v3889_v42, 4  ;;  %v13227_v30 = vpop.f32.mrf.mxu1  ;;  %v3864_v3 = vsel %vm11926_vm3, %v3859_v11, %v3863_v28  ;;  %v3869_v34 = vrot.slane %v3868_v0, 4  ;;  %v3900_v29 = vshrl.u32 %v9852_v17, 16  ;;  %v13251_v28 = vld [vmem:[%s11880_s7 + $0x74] sm:$0x1] }
 0x127   : > { %v3897_v1 = vrot.slane %v3895_v57, 5  ;;  %10897 = vmatmul.mubr.msk.bf16.gmra.mxu0 %vm811_vm2, %v11488_v33  ;;  %v3883_v16 = vrot.slane %v3882_v32, 4  ;;  %v3903_v37 = vshll.u32 %v9852_v17, 16  ;;  %v3909_v63 = vshll.u32 %v13210_v60, 16 }
 0x128   : > { %v3892_v27 = vor.u32 %v3891_v39, %v3887_v12  ;;  %v13238_v50 = vpop.f32.mrf.mxu1  ;;  %10900 = vmatprep.mubr.msk.bf16.mxu0 %vm811_vm2, %v11489_v5  ;;  %v3874_v47 = vsel %vm11926_vm3, %v3869_v34, %v3873_v61  ;;  %v3902_v62 = vrot.slane %v3900_v29, 4  ;;  %v3913_v31 = vshrl.u32 %v13210_v60, 16  ;;  %v13271_v34 = vld [vmem:[%s11880_s7 + $0x7c] sm:$0xf] }
 0x129   : > { %14989 = vst [vmem:[#allocation14_spill] sm:$0xff] %v13238_v50  ;;  %v3919_v53 = vshll.u32 %v13219_v2, 16  ;;  %v13246_v22 = vcombine.low %v3864_v3, %v3874_v47  ;;  %v3888_v24 = vsel %vm11926_vm3, %v3883_v16, %v3887_v12  ;;  %v3905_v48 = vrot.slane %v3903_v37, 5 }
 0x12a   : > { %v3893_v9 = vrot.slane %v3892_v27, 4  ;;  %v10724_v17 = vpop.f32.mrf.mxu1  ;;  %10927 = vmatmul.mubr.msk.bf16.vlgmr.msra.gmra.mxu1 %vm811_vm2, %v13181_v20  ;;  %v3911_v33 = vrot.slane %v3909_v63, 5  ;;  %v3915_v7 = vrot.slane %v3913_v31, 4  ;;  %v3924_v61 = vshrl.u32 %v9855_v41, 16  ;;  %v9861_v63 = vld [vmem:[%s11880_s7 + $0x84] sm:$0xf] }
 0x12b   : > { %v3921_v46 = vrot.slane %v3919_v53, 5  ;;  %v10694_v15 = vpop.f32.mrf.mxu0  ;;  %v13257_v5 = vadd.f32 %v10724_v17, %v13179_v35  ;;  %10930 = vmatprep.mubr.msk.bf16.mxu1 %vm811_vm2, %v9886_v23  ;;  %v3906_v18 = vor.u32 %v3905_v48, %v3902_v62  ;;  %v3927_v42 = vshll.u32 %v9855_v41, 16 }
 0x12c   : > { %v3898_v26 = vsel %vm11926_vm3, %v3893_v9, %v3897_v1  ;;  %v1189_v11 = vpop.f32.mrf.mxu1  ;;  %v3916_v0 = vor.u32 %v3915_v7, %v3911_v33  ;;  %v3926_v57 = vrot.slane %v3924_v61, 4  ;;  %v3933_v32 = vshll.u32 %v13236_v58, 16  ;;  %v13274_v1 = vld [vmem:[%s11880_s7 + $0x80] sm:$0x1]  ;;  %v11492_v61 = vld [vmem:[%s11880_s7 + $0x6c] sm:$0xff]  }
 0x12d   : > { %v13263_v20 = vcombine.low %v3888_v24, %v3898_v26  ;;  %v910_v35 = vpop.f32.mrf.mxu0  ;;  %v13267_v12 = vadd.f32 %v1189_v11, %v13188_v49  ;;  %v3907_v39 = vrot.slane %v3906_v18, 4  ;;  %v3929_v3 = vrot.slane %v3927_v42, 5  ;;  %v13294_v42 = vld [vmem:[%s11880_s7 + $0x88] sm:$0xf] }
 0x12e   : > { %v3937_v23 = vshrl.u32 %v13236_v58, 16  ;;  %v10725_v41 = vpop.f32.mrf.mxu1  ;;  %v3917_v29 = vrot.slane %v3916_v0, 4  ;;  %v3935_v16 = vrot.slane %v3933_v32, 5  ;;  %v3943_v27 = vshll.u32 %v13251_v28, 16  ;;  %v13302_v0 = vld [vmem:[%s11880_s7 + $0x8c] sm:$0x1] }
 0x12f   : > { %v3948_v37 = vshrl.u32 %v9858_v51, 16  ;;  %10901 = vmatmul.mubr.msk.bf16.gmra.mxu0 %vm811_vm2, %v11490_v44  ;;  %v10695_v49 = vpop.f32.mrf.mxu0  ;;  %v13280_v47 = vadd.f32 %v10725_v41, %v13212_v59  ;;  %v3912_v62 = vsel %vm11926_vm3, %v3907_v39, %v3911_v33  ;;  %v3930_v31 = vor.u32 %v3929_v3, %v3926_v57  ;;  %14990 = vst [vmem:[#allocation15_spill] sm:$0xff] %v13302_v0 }
 0x130   : > { %v3939_v53 = vrot.slane %v3937_v23, 4  ;;  %v1192_v24 = vpop.f32.mrf.mxu1  ;;  %10904 = vmatprep.mubr.msk.bf16.mxu0 %vm811_vm2, %v11491_v6  ;;  %v3922_v9 = vsel %vm11926_vm3, %v3917_v29, %v3921_v46  ;;  %v3945_v48 = vrot.slane %v3943_v27, 5  ;;  %v3951_v44 = vshll.u32 %v9858_v51, 16  ;;  %v9864_v23 = vld [vmem:[%s11880_s7 + $0x90] sm:$0xf]  ;;  %v11493_v29 = vld [vmem:[%s11880_s7 + $0x78] sm:$0xff]  }
 0x131   : > { %v3950_v17 = vrot.slane %v3948_v37, 4  ;;  %v913_v7 = vpop.f32.mrf.mxu0  ;;  %v13288_v59 = vadd.f32 %v1192_v24, %v13232_v36  ;;  %v13291_v26 = vcombine.low %v3912_v62, %v3922_v9  ;;  %v3931_v33 = vrot.slane %v3930_v31, 4 }
 0x132   : > { %v3940_v18 = vor.u32 %v3939_v53, %v3935_v16  ;;  %v10728_v6 = vpop.f32.mrf.mxu1  ;;  %10931 = vmatmul.mubr.msk.bf16.gmra.mxu1 %vm811_vm2, %v13224_v4  ;;  %v3953_v46 = vrot.slane %v3951_v44, 5  ;;  %v3957_v51 = vshll.u32 %v13271_v34, 16  ;;  %v3961_v11 = vshrl.u32 %v13271_v34, 16  ;;  %v13317_v44 = vld [vmem:[%s11880_s7 + $0x94] sm:$0xf] }
 0x133   : > { %v3967_v36 = vshll.u32 %v13274_v1, 16  ;;  %v10698_v57 = vpop.f32.mrf.mxu0  ;;  %v13304_v32 = vadd.f32 %v10728_v6, %v10694_v15  ;;  %10934 = vmatprep.mubr.msk.bf16.mxu1 %vm811_vm2, %v13246_v22  ;;  %v3936_v39 = vsel %vm11926_vm3, %v3931_v33, %v3935_v16  ;;  %v3972_v3 = vshrl.u32 %v9861_v63, 16 }
 0x134   : > { %v3941_v4 = vrot.slane %v3940_v18, 4  ;;  %v1205_v41 = vpop.f32.mrf.mxu1  ;;  %v3954_v27 = vor.u32 %v3953_v46, %v3950_v17  ;;  %v3959_v37 = vrot.slane %v3957_v51, 5  ;;  %v3963_v62 = vrot.slane %v3961_v11, 4  ;;  %v13328_v11 = vld [vmem:[%s11880_s7 + $0x98] sm:$0x1] }
 0x135   : > { %v3969_v31 = vrot.slane %v3967_v36, 5  ;;  %v926_v53 = vpop.f32.mrf.mxu0  ;;  %v13312_v24 = vadd.f32 %v1205_v41, %v910_v35  ;;  %v3974_v15 = vrot.slane %v3972_v3, 4  ;;  %v3975_v9 = vshll.u32 %v9861_v63, 16  ;;  %14991 = vst [vmem:[#allocation16_spill] sm:$0xff] %v13328_v11 }
 0x136   : > { %v3946_v22 = vsel %vm11926_vm3, %v3941_v4, %v3945_v48  ;;  %v10729_v16 = vpop.f32.mrf.mxu1  ;;  %v3955_v18 = vrot.slane %v3954_v27, 4  ;;  %v3964_v17 = vor.u32 %v3963_v62, %v3959_v37  ;;  %v3981_v6 = vshll.u32 %v13294_v42, 16 }
 0x137   : > { %v13319_v33 = vcombine.low %v3936_v39, %v3946_v22  ;;  %10905 = vmatmul.mubr.msk.bf16.gmra.mxu0 %vm811_vm2, %v11492_v61  ;;  %v10699_v35 = vpop.f32.mrf.mxu0  ;;  %v13323_v46 = vadd.f32 %v10729_v16, %v10695_v49  ;;  %v3977_v51 = vrot.slane %v3975_v9, 5  ;;  %v3985_v48 = vshrl.u32 %v13294_v42, 16  ;;  %v9867_v49 = vld [vmem:[%s11880_s7 + $0x9c] sm:$0xf] }
 0x138   : > { %v3991_v63 = vshll.u32 %v13302_v0, 16  ;;  %v1208_v36 = vpop.f32.mrf.mxu1  ;;  %10908 = vmatprep.mubr.msk.bf16.mxu0 %vm811_vm2, %v11493_v29  ;;  %v3960_v39 = vsel %vm11926_vm3, %v3955_v18, %v3959_v37  ;;  %v3965_v4 = vrot.slane %v3964_v17, 4  ;;  %v3983_v61 = vrot.slane %v3981_v6, 5  ;;  %v13343_v6 = vld [vmem:[%s11880_s7 + $0xa0] sm:$0xf] }
 0x139   : > { %v3996_v3 = vshrl.u32 %v9864_v23, 16  ;;  %v929_v41 = vpop.f32.mrf.mxu0  ;;  %v13334_v27 = vadd.f32 %v1208_v36, %v913_v7  ;;  %v3978_v62 = vor.u32 %v3977_v51, %v3974_v15  ;;  %v3987_v22 = vrot.slane %v3985_v48, 4  ;;  %v11495_v15 = vld [vmem:[%s11880_s7 + $0x90] sm:$0xff]  }
 0x13a   : > { %v3993_v9 = vrot.slane %v3991_v63, 5  ;;  %v10732_v16 = vpop.f32.mrf.mxu1  ;;  %10935 = vmatmul.mubr.msk.bf16.gmra.mxu1 %vm811_vm2, %v13263_v20  ;;  %v3970_v29 = vsel %vm11926_vm3, %v3965_v4, %v3969_v31  ;;  %v3999_v18 = vshll.u32 %v9864_v23, 16  ;;  %v4005_v17 = vshll.u32 %v13317_v44, 16 }
 0x13b   : > { %v3998_v37 = vrot.slane %v3996_v3, 4  ;;  %v13345_v7 = vadd.f32 %v10732_v16, %v10698_v57  ;;  %10938 = vmatprep.mubr.msk.bf16.mxu1 %vm811_vm2, %v13291_v26  ;;  %v9892_v51 = vcombine.low %v3960_v39, %v3970_v29  ;;  %v3979_v48 = vrot.slane %v3978_v62, 4  ;;  %v13353_v3 = vld [vmem:[%s11880_s7 + $0xa4] sm:$0x1]  ;;  %v9870_v62 = vld [vmem:[%s11880_s7 + $0xa8] sm:$0xf] }
 0x13c   : > { %v3988_v20 = vor.u32 %v3987_v22, %v3983_v61  ;;  %v1221_v63 = vpop.f32.mrf.mxu1  ;;  %v4001_v36 = vrot.slane %v3999_v18, 5  ;;  %v4007_v31 = vrot.slane %v4005_v17, 5  ;;  %v4009_v4 = vshrl.u32 %v13317_v44, 16  ;;  %14992 = vst [vmem:[#allocation17_spill] sm:$0xff] %v13353_v3 }
 0x13d   : > { %v4015_v23 = vshll.u32 %v13328_v11, 16  ;;  %v10702_v19 = vpop.f32.mrf.mxu0  ;;  %v13355_v57 = vadd.f32 %v1221_v63, %v926_v53  ;;  %v3984_v16 = vsel %vm11926_vm3, %v3979_v48, %v3983_v61  ;;  %v4020_v39 = vshrl.u32 %v9867_v49, 16  ;;  %v13367_v48 = vld [vmem:[%s11880_s7 + $0xac] sm:$0xf] }
 0x13e   : > { %v3989_v26 = vrot.slane %v3988_v20, 4  ;;  %v10733_v22 = vpop.f32.mrf.mxu1  ;;  %v4002_v29 = vor.u32 %v4001_v36, %v3998_v37  ;;  %v4011_v18 = vrot.slane %v4009_v4, 4  ;;  %v4023_v50 = vshll.u32 %v9867_v49, 16 }
 0x13f   : > { %14993 = vst [vmem:[#allocation18_spill] sm:$0xff] %v13355_v57  ;;  %v4017_v17 = vrot.slane %v4015_v23, 5  ;;  %10909 = vmatmul.mubr.msk.bf16.gmra.mxu0 %vm811_vm2, %v11494_v40  ;;  %v942_v11 = vpop.f32.mrf.mxu0  ;;  %v13361_v0 = vadd.f32 %v10733_v22, %v10699_v35  ;;  %v4022_v63 = vrot.slane %v4020_v39, 4  ;;  %v4029_v61 = vshll.u32 %v13343_v6, 16  ;;  %v13377_v39 = vld [vmem:[%s11880_s7 + $0xb0] sm:$0x1] }
 0x140   : > { %v3994_v53 = vsel %vm11926_vm3, %v3989_v26, %v3993_v9  ;;  %v1224_v20 = vpop.f32.mrf.mxu1  ;;  %10912 = vmatprep.mubr.msk.bf16.mxu0 %vm811_vm2, %v11495_v15  ;;  %v4003_v49 = vrot.slane %v4002_v29, 4  ;;  %v4012_v40 = vor.u32 %v4011_v18, %v4007_v31  ;;  %v4025_v36 = vrot.slane %v4023_v50, 5  ;;  %v9917_v29 = vld [vmem:[%s11880_s7 + $0x18] sm:$0xe]  ;;  %v11497_v57 = vld [vmem:[%s11880_s7 + $0xa8] sm:$0xff]  }
 0x141   : > { %14994 = vst [vmem:[#allocation19_spill] sm:$0xff] %v13361_v0  ;;  %v13370_v37 = vcombine.low %v3984_v16, %v3994_v53  ;;  %v10703_v35 = vpop.f32.mrf.mxu0  ;;  %v13372_v4 = vadd.f32 %v1224_v20, %v929_v41  ;;  %v4031_v23 = vrot.slane %v4029_v61, 5  ;;  %v4033_v9 = vshrl.u32 %v13343_v6, 16  ;;  %v11496_v61 = vld [vmem:[%s11880_s7 + $0x9c] sm:$0xff]  }
 0x142   : > { %v4039_v26 = vshll.u32 %v13353_v3, 16  ;;  %v10736_v22 = vpop.f32.mrf.mxu1  ;;  %10939 = vmatmul.mubr.msk.bf16.gmra.mxu1 %vm811_vm2, %v13319_v33  ;;  %v4008_v15 = vsel %vm11926_vm3, %v4003_v49, %v4007_v31  ;;  %v4013_v50 = vrot.slane %v4012_v40, 4  ;;  %v4026_v16 = vor.u32 %v4025_v36, %v4022_v63  ;;  %v9873_v40 = vld [vmem:[%s11880_s7 + $0xb4] sm:$0xf] }
 0x143   : > { %14995 = vst [vmem:[#allocation20_spill] sm:$0xff] %v13372_v4  ;;  %v4044_v41 = vshrl.u32 %v9870_v62, 16  ;;  %v945_v18 = vpop.f32.mrf.mxu0  ;;  %v13384_v53 = vadd.f32 %v10736_v22, %v10702_v19  ;;  %10942 = vmatprep.mubr.msk.bf16.mxu1 %vm811_vm2, %v9892_v51  ;;  %v4035_v20 = vrot.slane %v4033_v9, 4  ;;  %v4047_v3 = vshll.u32 %v9870_v62, 16 }
 0x144   : > { %v4041_v4 = vrot.slane %v4039_v26, 5  ;;  %v1237_v0 = vpop.f32.mrf.mxu1  ;;  %v4018_v33 = vsel %vm11926_vm3, %v4013_v50, %v4017_v17  ;;  %v4027_v31 = vrot.slane %v4026_v16, 4  ;;  %v4053_v63 = vshll.u32 %v13367_v48, 16 }
 0x145   : > { %14996 = vst [vmem:[#allocation21_spill] sm:$0xff] %v13384_v53  ;;  %v4046_v49 = vrot.slane %v4044_v41, 4  ;;  %v10706_v36 = vpop.f32.mrf.mxu0  ;;  %v13393_v19 = vadd.f32 %v1237_v0, %v942_v11  ;;  %v9894_v22 = vcombine.low %v4008_v15, %v4018_v33  ;;  %v4036_v53 = vor.u32 %v4035_v20, %v4031_v23  ;;  %v13403_v15 = vld [vmem:[%s11880_s7 + $0xb8] sm:$0xf] }
 0x146   : > { %v4049_v51 = vrot.slane %v4047_v3, 5  ;;  %v10737_v9 = vpop.f32.mrf.mxu1  ;;  %v4032_v62 = vsel %vm11926_vm3, %v4027_v31, %v4031_v23  ;;  %v4055_v26 = vrot.slane %v4053_v63, 5  ;;  %v4057_v17 = vshrl.u32 %v13367_v48, 16  ;;  %v13410_v63 = vld [vmem:[%s11880_s7 + $0xbc] sm:$0x1] }
 0x147   : > { %14997 = vst [vmem:[#allocation22_spill] sm:$0xff] %v13393_v19  ;;  %v4063_v50 = vshll.u32 %v13377_v39, 16  ;;  %10913 = vmatmul.mubr.msk.bf16.gmra.mxu0 %vm811_vm2, %v11496_v61  ;;  %v958_v16 = vpop.f32.mrf.mxu0  ;;  %v13400_v41 = vadd.f32 %v10737_v9, %v10703_v35  ;;  %v4037_v0 = vrot.slane %v4036_v53, 4  ;;  %v9933_v3 = vrot.slane %v9917_v29, 9  ;;  %v11498_v53 = vld [vmem:[%s11880_s7 + $0xb4] sm:$0xff]  }
 0x148   : > { %v4050_v11 = vor.u32 %v4049_v51, %v4046_v49  ;;  %v1240_v20 = vpop.f32.mrf.mxu1  ;;  %10916 = vmatprep.mubr.msk.bf16.mxu0 %vm811_vm2, %v11497_v57  ;;  %v4059_v33 = vrot.slane %v4057_v17, 4  ;;  %v4503_v31 = vrot.slane %v13068_v10, 5  ;;  %v4506_v61 = vrot.slane %v13086_v13, 5  ;;  %v9918_v23 = vld [vmem:[%s11880_s7 + $0x24] sm:$0xe] }
 0x149   : > { %14998 = vst [vmem:[#allocation23_spill] sm:$0xff] %v13400_v41  ;;  %v10707_v35 = vpop.f32.mrf.mxu0  ;;  %v13412_v9 = vadd.f32 %v1240_v20, %v945_v18  ;;  %v4042_v29 = vsel %vm11926_vm3, %v4037_v0, %v4041_v4  ;;  %v4068_v51 = vshrl.u32 %v9873_v40, 16  ;;  %v4065_v17 = vrot.slane %v4063_v50, 5 }
 0x14a   : > { %v4051_v49 = vrot.slane %v4050_v11, 4  ;;  %v10740_v57 = vpop.f32.mrf.mxu1  ;;  %10943 = vmatmul.mubr.msk.bf16.gmra.mxu1 %vm811_vm2, %v13370_v37  ;;  %v9895_v10 = vcombine.low %v4032_v62, %v4042_v29  ;;  %v4060_v13 = vor.u32 %v4059_v33, %v4055_v26  ;;  %v4505_v41 = vrot.slane %v4503_v31, 4  ;;  %v11499_v37 = vld [vmem:[%s11880_s7 + $0xc0] sm:$0xff]  }
 0x14b   : > { %14999 = vst [vmem:[#allocation24_spill] sm:$0xff] %v13412_v9  ;;  %v13420_v18 = vpop.f32.mrf.mxu0  ;;  %v13422_v20 = vadd.f32 %v10740_v57, %v10706_v36  ;;  %10946 = vmatprep.mubr.msk.bf16.mxu1 %vm811_vm2, %v9894_v22  ;;  %v13427_v4 = vsel %vm12277_vm6, %v9933_v3, %v4503_v31  ;;  %v4070_v0 = vrot.slane %v4068_v51, 4  ;;  %v4071_v11 = vshll.u32 %v9873_v40, 16  ;;  %v9876_v9 = vld [vmem:[%s11880_s7 + $0xc0] sm:$0xf] }
 0x14c   : > { %15000 = vst [vmem:[#allocation25_spill] sm:$0xff] %v13420_v18  ;;  %v1253_v19 = vpop.f32.mrf.mxu1  ;;  %v4056_v62 = vsel %vm11926_vm3, %v4051_v49, %v4055_v26  ;;  %v4061_v50 = vrot.slane %v4060_v13, 4  ;;  %v4077_v33 = vshll.u32 %v13403_v15, 16  ;;  %v4081_v36 = vshrl.u32 %v13403_v15, 16  ;;  %v13436_v29 = vld [vmem:[%s11880_s7 + $0xc4] sm:$0xf] }
 0x14d   : > { %15001 = vst [vmem:[#allocation26_spill] sm:$0xff] %v13422_v20  ;;  %v13438_v22 = vadd.f32 %v1253_v19, %v958_v16  ;;  %v13442_v3 = vsel %vm12277_vm6, %v4505_v41, %v4506_v61  ;;  %v4073_v40 = vrot.slane %v4071_v11, 5  ;;  %v4087_v31 = vshll.u32 %v13410_v63, 16  ;;  %v13451_v61 = vld [vmem:[%s11880_s7 + $0xc8] sm:$0x1] }
 0x14e   : > { %v10741_v51 = vpop.f32.mrf.mxu1  ;;  %v4066_v26 = vsel %vm11926_vm3, %v4061_v50, %v4065_v17  ;;  %v4079_v49 = vrot.slane %v4077_v33, 5  ;;  %v4083_v57 = vrot.slane %v4081_v36, 4  ;;  %v9934_v13 = vrot.slane %v9918_v23, 9  ;;  %v9919_v36 = vld [vmem:[%s11880_s7 + $0x30] sm:$0xe] }
 0x14f   : > { %15002 = vst [vmem:[#allocation27_spill] sm:$0xff] %v13438_v22  ;;  %v10710_v18 = vpop.f32.mrf.mxu0  ;;  %10917 = vmatmul.mubr.msk.bf16.gmra.mxu0 %vm811_vm2, %v11498_v53  ;;  %v13448_v19 = vadd.f32 %v10741_v51, %v10707_v35  ;;  %v9896_v16 = vcombine.low %v4056_v62, %v4066_v26  ;;  %v4074_v22 = vor.u32 %v4073_v40, %v4070_v0  ;;  %v4089_v41 = vrot.slane %v4087_v31, 5 }
 0x150   : > { %v13453_v11 = vpop.f32.mrf.mxu1  ;;  %10920 = vmatprep.mubr.msk.bf16.mxu0 %vm811_vm2, %v11499_v37  ;;  %v4084_v17 = vor.u32 %v4083_v57, %v4079_v49  ;;  %v15005_v50 = vrot.slane %v13091_v21, 5  ;;  %v4092_v23 = vshrl.u32 %v9876_v9, 16  ;;  %v9951_v35 = vcombine.low %v13427_v4, %v13442_v3 }
 0x151   : > { %15003 = vst [vmem:[#allocation28_spill] sm:$0xff] %v13448_v19  ;;  %15004 = vst [vmem:[#allocation29_spill] sm:$0xff] %v13453_v11  ;;  %v974_v53 = vpop.f32.mrf.mxu0  ;;  %v4075_v0 = vrot.slane %v4074_v22, 4  ;;  %v4095_v62 = vshll.u32 %v9876_v9, 16  ;;  %v4101_v40 = vshll.u32 %v13436_v29, 16  ;;  %v11500_v9 = vld [vmem:[%s11880_s7 + $0xcc] sm:$0xff]  }
 0x152   : > { %v4512_v33 = vrot.slane %v15005_v50, 4  ;;  %v10744_v31 = vpop.f32.mrf.mxu1  ;;  %10947 = vmatmul.mubr.msk.bf16.gmra.mxu1 %vm811_vm2, %v9895_v10  ;;  %v4085_v37 = vrot.slane %v4084_v17, 4  ;;  %v15006_v51 = vmov %v15005_v50  ;;  %v4094_v57 = vrot.slane %v4092_v23, 4  ;;  %v9879_v11 = vld [vmem:[%s11880_s7 + $0xcc] sm:$0xf] }
 0x153   : > { %v13467_v26 = vsel %vm12277_vm6, %v9934_v13, %v15006_v51  ;;  %v4105_v50 = vshrl.u32 %v13436_v29, 16  ;;  %v10711_v4 = vpop.f32.mrf.mxu0  ;;  %v13471_v22 = vadd.f32 %v10744_v31, %v10710_v18  ;;  %10950 = vmatprep.mubr.msk.bf16.mxu1 %vm811_vm2, %v9896_v16  ;;  %v4080_v10 = vsel %vm11926_vm3, %v4075_v0, %v4079_v49  ;;  %v13484_v17 = vld [vmem:[%s11880_s7 + $0xd0] sm:$0xf] }
 0x154   : > { %v15008_v3 = vrot.slane %v13106_v8, 5  ;;  %v4097_v13 = vrot.slane %v4095_v62, 5  ;;  %v1269_v23 = vpop.f32.mrf.mxu1  ;;  %v4090_v18 = vsel %vm11926_vm3, %v4085_v37, %v4089_v41  ;;  %v4103_v31 = vrot.slane %v4101_v40, 5 }
 0x155   : > { %15007 = vst [vmem:[#allocation30_spill] sm:$0xff] %v13471_v22  ;;  %v4107_v51 = vrot.slane %v4105_v50, 4  ;;  %v4111_v16 = vshll.u32 %v13451_v61, 16  ;;  %v13489_v22 = vpop.f32.mrf.mxu0  ;;  %v13491_v49 = vadd.f32 %v1269_v23, %v974_v53  ;;  %v9897_v8 = vcombine.low %v4080_v10, %v4090_v18  ;;  %v13499_v53 = vld [vmem:[%s11880_s7 + $0xd4] sm:$0x1] }
 0x156   : > { %v13481_v21 = vsel %vm12277_vm6, %v4512_v33, %v15008_v3  ;;  %15009 = vst [vmem:[#allocation31_spill] sm:$0xff] %v13489_v22  ;;  %v4098_v33 = vor.u32 %v4097_v13, %v4094_v57  ;;  %v9935_v0 = vrot.slane %v9919_v36, 9  ;;  %v10745_v62 = vpop.f32.mrf.mxu1  ;;  %v4517_v20 = vrot.slane %v13134_v55, 5  ;;  %v9920_v57 = vld [vmem:[%s11880_s7 + $0x3c] sm:$0xe] }
 0x157   : > { %v4108_v3 = vor.u32 %v4107_v51, %v4103_v31  ;;  %v4113_v19 = vrot.slane %v4111_v16, 5  ;;  %v4520_v41 = vrot.slane %v13138_v52, 5  ;;  %v10714_v40 = vpop.f32.mrf.mxu0  ;;  %10921 = vmatmul.mubr.msk.bf16.gmra.mxu0 %vm811_vm2, %v11500_v9  ;;  %v13496_v37 = vadd.f32 %v10745_v62, %v10711_v4  ;;  %v9921_v9 = vld [vmem:[%s11880_s7 + $0x48] sm:$0xe] }
 0x158   : > { %v4099_v50 = vrot.slane %v4098_v33, 4  ;;  %v4116_v23 = vshrl.u32 %v9879_v11, 16  ;;  %v4119_v10 = vshll.u32 %v9879_v11, 16  ;;  %v13502_v36 = vpop.f32.mrf.mxu1  ;;  %10960 = vmatprep.mubr.msk.bf16.mxu0 %vm811_vm2, %v9951_v35  ;;  %v4518_v55 = vsel %vm12277_vm6, %v9935_v0, %v4517_v20 }
 0x159   : > { %15010 = vst [vmem:[#allocation32_spill] sm:$0xff] %v13496_v37  ;;  %15011 = vst [vmem:[#allocation33_spill] sm:$0xff] %v13502_v36  ;;  %v4109_v13 = vrot.slane %v4108_v3, 4  ;;  %v4519_v52 = vrot.slane %v4517_v20, 4  ;;  %v4125_v18 = vshll.u32 %v13484_v17, 16  ;;  %v990_v4 = vpop.f32.mrf.mxu0  ;;  %v9952_v51 = vcombine.low %v13467_v26, %v13481_v21 }
 0x15a   : > { %v4104_v11 = vsel %vm11926_vm3, %v4099_v50, %v4103_v31  ;;  %v4118_v16 = vrot.slane %v4116_v23, 4  ;;  %v4121_v33 = vrot.slane %v4119_v10, 5  ;;  %v10748_v62 = vpop.f32.mrf.mxu1  ;;  %10951 = vmatmul.mubr.msk.bf16.gmra.mxu1 %vm811_vm2, %v9897_v8  ;;  %v4129_v3 = vshrl.u32 %v13484_v17, 16  ;;  %v11667_v37 = vld [vmem:[%s11880_s7 + $0x40] sm:$0xf] }
 0x15b   : > { %v4114_v35 = vsel %vm11926_vm3, %v4109_v13, %v4113_v19  ;;  %v4521_v20 = vsel %vm12277_vm6, %v4519_v52, %v4520_v41  ;;  %v4127_v0 = vrot.slane %v4125_v18, 5  ;;  %v10715_v36 = vpop.f32.mrf.mxu0  ;;  %v13519_v26 = vadd.f32 %v10748_v62, %v10714_v40 }
 0x15c   : > { %v9898_v21 = vcombine.low %v4104_v11, %v4114_v35  ;;  %v9953_v31 = vcombine.low %v4518_v55, %v4521_v20  ;;  %v4122_v50 = vor.u32 %v4121_v33, %v4118_v16  ;;  %v1285_v23 = vpop.f32.mrf.mxu1  ;;  %v4131_v10 = vrot.slane %v4129_v3, 4  ;;  %v9922_v11 = vld [vmem:[%s11880_s7 + $0x54] sm:$0xe] }
 0x15d   : > { %v4135_v8 = vshll.u32 %v13499_v53, 16  ;;  %v9936_v22 = vrot.slane %v9920_v57, 9  ;;  %v4524_v19 = vrot.slane %v11667_v37, 5  ;;  %v13523_v13 = vpop.f32.mrf.mxu0  ;;  %v13525_v41 = vadd.f32 %v1285_v23, %v990_v4  ;;  %v9923_v23 = vld [vmem:[%s11880_s7 + $0x60] sm:$0xe] }
 0x15e   : > { %10954 = vmatprep.mubr.msk.bf16.mxu1 %vm811_vm2, %v9898_v21  ;;  %v4123_v52 = vrot.slane %v4122_v50, 4  ;;  %v9937_v40 = vrot.slane %v9921_v9, 9  ;;  %v4531_v18 = vrot.slane %v13172_v56, 5  ;;  %v10749_v55 = vpop.f32.mrf.mxu1  ;;  %v4132_v16 = vor.u32 %v4131_v10, %v4127_v0 }
 0x15f   : > { %v4137_v33 = vrot.slane %v4135_v8, 5  ;;  %v4526_v62 = vrot.slane %v4524_v19, 4  ;;  %v10758_v57 = vpop.f32.mrf.mxu0  ;;  %10961 = vmatmul.mubr.msk.bf16.vlgmr.msra.gmra.mxu0 %vm811_vm2, %v9952_v51  ;;  %v13531_v37 = vadd.f32 %v10749_v55, %v10715_v36  ;;  %v4525_v9 = vsel %vm12277_vm6, %v9936_v22, %v4524_v19  ;;  %v11668_v51 = vld [vmem:[%s11880_s7 + $0x50] sm:$0x1] }
 0x160   : > { %v4128_v4 = vsel %vm11926_vm3, %v4123_v52, %v4127_v0  ;;  %v4533_v56 = vrot.slane %v4531_v18, 4  ;;  %v1747_v35 = vadd.f32 %v10758_v57, %v13257_v5  ;;  %v13538_v20 = vpop.f32.mrf.mxu1  ;;  %10964 = vmatprep.mubr.msk.bf16.mxu0 %vm811_vm2, %v9953_v31  ;;  %v4133_v3 = vrot.slane %v4132_v16, 4  ;;  %v11669_v5 = vld [vmem:[%s11880_s7 + $0x58] sm:$0xf] }
 0x161   : > { %v15012_v21 = vrot.slane %v13152_v43, 5  ;;  %v4534_v50 = vrot.slane %v11668_v51, 5  ;;  %v4541_v0 = vrot.slane %v13194_v54, 5  ;;  %v1618_v10 = vpop.f32.mrf.mxu0  ;;  %v4532_v22 = vsel %vm12277_vm6, %v9937_v40, %v4531_v18 }
 0x162   : > { %v4538_v8 = vrot.slane %v11669_v5, 5  ;;  %v1745_v19 = vadd.f32 %v1618_v10, %v13267_v12  ;;  %v10752_v31 = vpop.f32.mrf.mxu1  ;;  %v4138_v43 = vsel %vm11926_vm3, %v4133_v3, %v4137_v33  ;;  %v9938_v55 = vrot.slane %v9922_v11, 9 }
 0x163   : > { %v4528_v36 = vsel %vm12277_vm6, %v4526_v62, %v15012_v21  ;;  %v4535_v52 = vsel %vm12277_vm6, %v4533_v56, %v4534_v50  ;;  %v10759_v16 = vpop.f32.mrf.mxu0  ;;  %v13557_v54 = vadd.f32 %v10752_v31, %v13202_v38  ;;  %v9899_v62 = vcombine.low %v4128_v4, %v4138_v43  ;;  %v9924_v56 = vld [vmem:[%s11880_s7 + $0x6c] sm:$0xe] }
 0x164   : > { %v9954_v57 = vcombine.low %v4525_v9, %v4528_v36  ;;  %v1748_v40 = vadd.f32 %v10759_v16, %v13280_v47  ;;  %v1301_v18 = vpop.f32.mrf.mxu1  ;;  %v9955_v21 = vcombine.low %v4532_v22, %v4535_v52  ;;  %v4540_v12 = vrot.slane %v4538_v8, 4 }
 0x165   : > { %v4545_v51 = vrot.slane %v13210_v60, 5  ;;  %v1621_v10 = vpop.f32.mrf.mxu0  ;;  %10955 = vmatmul.mubr.msk.bf16.gmra.mxu1 %vm811_vm2, %v9899_v62  ;;  %v13563_v33 = vadd.f32 %v1301_v18, %v13221_v14  ;;  %v9939_v11 = vrot.slane %v9923_v23, 9  ;;  %v4548_v38 = vrot.slane %v13219_v2, 5  ;;  %v9925_v23 = vld [vmem:[%s11880_s7 + $0x78] sm:$0xe] }
 0x166   : > { %v13568_v4 = vadd.f32 %v1621_v10, %v13288_v59  ;;  %v10753_v47 = vpop.f32.mrf.mxu1  ;;  %v4552_v36 = vrot.slane %v13236_v58, 5  ;;  %v4539_v2 = vsel %vm12277_vm6, %v9938_v55, %v4538_v8  ;;  %v4542_v59 = vsel %vm12277_vm6, %v4540_v12, %v4541_v0  ;;  %v9926_v62 = vld [vmem:[%s11880_s7 + $0x84] sm:$0xe] }
 0x167   : > { %v4547_v9 = vrot.slane %v4545_v51, 4  ;;  %v10762_v3 = vpop.f32.mrf.mxu0  ;;  %10965 = vmatmul.mubr.msk.bf16.gmra.mxu0 %vm811_vm2, %v9954_v57  ;;  %v13572_v60 = vadd.f32 %v10753_v47, %v13227_v30  ;;  %v4546_v30 = vsel %vm12277_vm6, %v9939_v11, %v4545_v51  ;;  %v9940_v43 = vrot.slane %v9924_v56, 9  ;;  %v9927_v51 = vld [vmem:[%s11880_s7 + $0x90] sm:$0xe] }
 0x168   : > { %v1751_v14 = vadd.f32 %v10762_v3, %v13304_v32  ;;  %v13576_v50 = vpop.f32.mrf.mxu1  ;;  %10968 = vmatprep.mubr.msk.bf16.mxu0 %vm811_vm2, %v9955_v21  ;;  %v4559_v32 = vrot.slane %v13271_v34, 5  ;;  %v9956_v0 = vcombine.low %v4539_v2, %v4542_v59  ;;  %v4554_v55 = vrot.slane %v4552_v36, 4 }
 0x169   : > { %v1634_v22 = vpop.f32.mrf.mxu0  ;;  %v4549_v58 = vsel %vm12277_vm6, %v4547_v9, %v4548_v38  ;;  %v4555_v16 = vrot.slane %v13251_v28, 5  ;;  %v9941_v12 = vrot.slane %v9925_v23, 9  ;;  %v4562_v34 = vrot.slane %v13274_v1, 5  ;;  %v13601_v38 = vld [vmem:[%s11880_s7 + $0x9c] sm:$0xe] }
 0x16a   : > { %v1749_v5 = vadd.f32 %v1634_v22, %v13312_v24  ;;  %v10792_v31 = vpop.f32.mrf.mxu1  ;;  %v9957_v21 = vcombine.low %v4546_v30, %v4549_v58  ;;  %v4561_v11 = vrot.slane %v4559_v32, 4  ;;  %v9942_v9 = vrot.slane %v9926_v62, 9  ;;  %v13621_v23 = vld [vmem:[%s11880_s7 + $0xa8] sm:$0xe]  ;;  %v13628_v58 = vld [vmem:[%s11880_s7 + $0xb4] sm:$0xe] }
 0x16b   : > { %v10763_v52 = vpop.f32.mrf.mxu0  ;;  %v13590_v8 = vadd.f32 %v10792_v31, %v1747_v35  ;;  %v4566_v35 = vrot.slane %v13294_v42, 5  ;;  %v14971_v59 = vrot.slane %v13343_v6, 5  ;;  %v9943_v30 = vrot.slane %v9927_v51, 9  ;;  %v15015_v31 = vld [vmem:[#allocation18_spill] sm:$0xff]  ;;  %v13638_v51 = vld [vmem:[%s11880_s7 + $0xc0] sm:$0xe] }
 0x16c   : > { %v1752_v57 = vadd.f32 %v10763_v52, %v13323_v46  ;;  %v1981_v18 = vpop.f32.mrf.mxu1  ;;  %v4573_v46 = vrot.slane %v13317_v44, 5  ;;  %v15014_v44 = vld [vmem:[#allocation15_spill] sm:$0xff]  ;;  %v9944_v62 = vrot.slane %v13601_v38, 9  ;;  %v13645_v38 = vld [vmem:[%s11880_s7 + $0xcc] sm:$0xe]  ;;  %vm5084_vm7 = vcmask 1040384  }
 0x16d   : > { %v1637_v24 = vpop.f32.mrf.mxu0  ;;  %v13597_v10 = vadd.f32 %v1981_v18, %v1745_v19  ;;  %v4553_v19 = vsel %vm12277_vm6, %v9940_v43, %v4552_v36  ;;  %v4569_v2 = vrot.slane %v15014_v44, 5  ;;  %v4560_v36 = vsel %vm12277_vm6, %v9941_v12, %v4559_v32 }
 0x16e   : > { %v13604_v28 = vadd.f32 %v1637_v24, %v13334_v27  ;;  %v10793_v56 = vpop.f32.mrf.mxu1  ;;  %v4556_v27 = vsel %vm12277_vm6, %v4554_v55, %v4555_v16  ;;  %v4568_v22 = vrot.slane %v4566_v35, 4  ;;  %v15016_v55 = vld [vmem:[#allocation16_spill] sm:$0xff]  ;;  %v4587_v12 = vrot.slane %v13367_v48, 5  ;;  %v15017_v24 = vld [vmem:[#allocation19_spill] sm:$0xff] }
 0x16f   : > { %v10766_v47 = vpop.f32.mrf.mxu0  ;;  %10969 = vmatmul.mubr.msk.bf16.gmra.mxu0 %vm811_vm2, %v9956_v0  ;;  %v13608_v1 = vadd.f32 %v10793_v56, %v1748_v40  ;;  %v4575_v0 = vrot.slane %v4573_v46, 4  ;;  %v4576_v16 = vrot.slane %v15016_v55, 5  ;;  %v9958_v32 = vcombine.low %v4553_v19, %v4556_v27  ;;  %v15019_v55 = vld [vmem:[#allocation20_spill] sm:$0xff] }
 0x170   : > { %15013 = vst [vmem:[#allocation34_spill] sm:$0xff] %v13604_v28  ;;  %v1755_v42 = vadd.f32 %v10766_v47, %v13345_v7  ;;  %v13613_v3 = vpop.f32.mrf.mxu1  ;;  %10972 = vmatprep.mubr.msk.bf16.mxu0 %vm811_vm2, %v9957_v21  ;;  %v4563_v7 = vsel %vm12277_vm6, %v4561_v11, %v4562_v34  ;;  %v14970_v34 = vrot.slane %v13403_v15, 5  ;;  %v4582_v44 = vrot.slane %v14971_v59, 4 }
 0x171   : > { %v1650_v40 = vpop.f32.mrf.mxu0  ;;  %v9959_v47 = vcombine.low %v4560_v36, %v4563_v7  ;;  %v4567_v48 = vsel %vm12277_vm6, %v9942_v9, %v4566_v35  ;;  %v9945_v19 = vrot.slane %v13621_v23, 9  ;;  %v4590_v27 = vrot.slane %v13377_v39, 5  ;;  %v15021_v23 = vld [vmem:[#allocation21_spill] sm:$0xff] }
 0x172   : > { %v1753_v43 = vadd.f32 %v1650_v40, %v15015_v31  ;;  %v10796_v52 = vpop.f32.mrf.mxu1  ;;  %v15018_v40 = vld [vmem:[#allocation17_spill] sm:$0xff]  ;;  %v4574_v7 = vsel %vm12277_vm6, %v9943_v30, %v4573_v46  ;;  %v4570_v35 = vsel %vm12277_vm6, %v4568_v22, %v4569_v2  ;;  %v4589_v39 = vrot.slane %v4587_v12, 4 }
 0x173   : > { %v10767_v18 = vpop.f32.mrf.mxu0  ;;  %v13633_v21 = vadd.f32 %v10796_v52, %v1751_v14  ;;  %v4583_v31 = vrot.slane %v15018_v40, 5  ;;  %v14972_v40 = vrot.slane %v13436_v29, 5  ;;  %v4596_v9 = vrot.slane %v14970_v34, 4 }
 0x174   : > { %v1756_v11 = vadd.f32 %v10767_v18, %v15017_v24  ;;  %v1997_v56 = vpop.f32.mrf.mxu1  ;;  %v9946_v24 = vrot.slane %v13628_v58, 9  ;;  %v4577_v46 = vsel %vm12277_vm6, %v4575_v0, %v4576_v16  ;;  %v4597_v30 = vrot.slane %v13410_v63, 5 }
 0x175   : > { %v1653_v14 = vpop.f32.mrf.mxu0  ;;  %v13647_v52 = vadd.f32 %v1997_v56, %v1749_v5  ;;  %v4603_v2 = vrot.slane %v14972_v40, 4  ;;  %v4604_v22 = vrot.slane %v13451_v61, 5  ;;  %v9960_v0 = vcombine.low %v4567_v48, %v4570_v35  ;;  %v15026_v48 = vld [vmem:[#allocation26_spill] sm:$0xff] }
 0x176   : > { %v13654_v18 = vadd.f32 %v1653_v14, %v15019_v55  ;;  %v10797_v36 = vpop.f32.mrf.mxu1  ;;  %v4611_v16 = vrot.slane %v13499_v53, 5  ;;  %v9961_v61 = vcombine.low %v4574_v7, %v4577_v46  ;;  %v15027_v53 = vrot.slane %v13343_v6, 5  ;;  %v15028_v7 = vld [vmem:[#allocation27_spill] sm:$0xff] }
 0x177   : > { %v10770_v5 = vpop.f32.mrf.mxu0  ;;  %10973 = vmatmul.mubr.msk.bf16.gmra.mxu0 %vm811_vm2, %v9958_v32  ;;  %v13661_v56 = vadd.f32 %v10797_v36, %v1752_v57  ;;  %v9947_v57 = vrot.slane %v13638_v51, 9  ;;  %v4608_v36 = vrot.slane %v13484_v17, 5  ;;  %v15024_v51 = vld [vmem:[#allocation23_spill] sm:$0xff]  ;;  %v11501_v17 = vld [vmem:[#allocation7 + $0x78] sm:$0xff]   ;;  %vm5085_vm8 = vsmask.f32 256 }
 0x178   : > { %15020 = vst [vmem:[#allocation15_spill] sm:$0xff] %v13654_v18  ;;  %v1759_v14 = vadd.f32 %v10770_v5, %v15021_v23  ;;  %v13668_v55 = vpop.f32.mrf.mxu1  ;;  %10976 = vmatprep.mubr.msk.bf16.mxu0 %vm811_vm2, %v9959_v47  ;;  %v15023_v5 = vld [vmem:[#allocation22_spill] sm:$0xff]  ;;  %10992 = vmatprep.subr.bf16.mxu1 %v11501_v17  ;;  %vm13838_vm9 = vmand %vm5084_vm7, %vm5085_vm8 }
 0x179   : > { %15022 = vst [vmem:[#allocation18_spill] sm:$0xff] %v13668_v55  ;;  %v1666_v58 = vpop.f32.mrf.mxu0  ;;  %v4610_v63 = vrot.slane %v4608_v36, 4  ;;  %v15025_v55 = vld [vmem:[#allocation24_spill] sm:$0xff]  ;;  %10993 = vmatpush3.bf16.msra.mxu1 %v11501_v17 }
 0x17a   : > { %v1757_v23 = vadd.f32 %v1666_v58, %v15023_v5  ;;  %v10800_v47 = vpop.f32.mrf.mxu1 }
 0x17b   : > { %v10771_v34 = vpop.f32.mrf.mxu0  ;;  %v13681_v59 = vadd.f32 %v10800_v47, %v1755_v42 }
 0x17c   : > { %v1760_v40 = vadd.f32 %v10771_v34, %v15024_v51  ;;  %v2013_v25 = vpop.f32.mrf.mxu1 }
 0x17d   : > { %v1669_v18 = vpop.f32.mrf.mxu0  ;;  %v13687_v32 = vadd.f32 %v2013_v25, %v1753_v43  ;;  %v4581_v25 = vsel %vm12277_vm6, %v9944_v62, %v15027_v53  ;;  %v4584_v43 = vsel %vm12277_vm6, %v4582_v44, %v4583_v31 }
 0x17e   : > { %v13690_v28 = vadd.f32 %v1669_v18, %v15025_v55  ;;  %v10801_v58 = vpop.f32.mrf.mxu1  ;;  %v4588_v18 = vsel %vm12277_vm6, %v9945_v19, %v4587_v12  ;;  %v9962_v6 = vcombine.low %v4581_v25, %v4584_v43 }
 0x17f   : > { %v10774_v5 = vpop.f32.mrf.mxu0  ;;  %10977 = vmatmul.mubr.msk.bf16.gmra.mxu0 %vm811_vm2, %v9960_v0  ;;  %v13693_v42 = vadd.f32 %v10801_v58, %v1756_v11  ;;  %v4591_v11 = vsel %vm12277_vm6, %v4589_v39, %v4590_v27  ;;  %v15030_v27 = vld [vmem:[#allocation30_spill] sm:$0xff] }
 0x180   : > { %v1763_v35 = vadd.f32 %v10774_v5, %v15026_v48  ;;  %v13696_v47 = vpop.f32.mrf.mxu1  ;;  %10980 = vmatprep.mubr.msk.bf16.mxu0 %vm811_vm2, %v9961_v61  ;;  %v15029_v61 = vld [vmem:[#allocation28_spill] sm:$0xff]  ;;  %v9963_v5 = vcombine.low %v4588_v18, %v4591_v11  ;;  %v4605_v18 = vsel %vm12277_vm6, %v4603_v2, %v4604_v22 }
 0x181   : > { %v1682_v34 = vpop.f32.mrf.mxu0 }
 0x182   : > { %v1761_v55 = vadd.f32 %v1682_v34, %v15028_v7  ;;  %v10804_v46 = vpop.f32.mrf.mxu1  ;;  %v15032_v34 = vrot.slane %v13436_v29, 5 }
 0x183   : > { %v10775_v0 = vpop.f32.mrf.mxu0  ;;  %v13710_v51 = vadd.f32 %v10804_v46, %v1759_v14  ;;  %v15031_v14 = vrot.slane %v13403_v15, 5 }
 0x184   : > { %v1764_v58 = vadd.f32 %v10775_v0, %v15029_v61  ;;  %v2029_v62 = vpop.f32.mrf.mxu1 }
 0x185   : > { %v13713_v48 = vpop.f32.mrf.mxu0  ;;  %v13715_v44 = vadd.f32 %v2029_v62, %v1757_v23  ;;  %v4595_v25 = vsel %vm12277_vm6, %v9946_v24, %v15031_v14  ;;  %v4598_v23 = vsel %vm12277_vm6, %v4596_v9, %v4597_v30  ;;  %v15033_v24 = vld [vmem:[#allocation32_spill] sm:$0xff] }
 0x186   : > { %v10805_v31 = vpop.f32.mrf.mxu1  ;;  %v9964_v0 = vcombine.low %v4595_v25, %v4598_v23 }
 0x187   : > { %v10778_v12 = vpop.f32.mrf.mxu0  ;;  %10981 = vmatmul.mubr.msk.bf16.gmra.mxu0 %vm811_vm2, %v9962_v6  ;;  %v13718_v19 = vadd.f32 %v10805_v31, %v1760_v40  ;;  %v4602_v40 = vsel %vm12277_vm6, %v9947_v57, %v15032_v34 }
 0x188   : > { %v1767_v39 = vadd.f32 %v10778_v12, %v15030_v27  ;;  %v13721_v53 = vpop.f32.mrf.mxu1  ;;  %10984 = vmatprep.mubr.msk.bf16.mxu0 %vm811_vm2, %v9963_v5  ;;  %v9965_v9 = vcombine.low %v4602_v40, %v4605_v18  ;;  %v4612_v5 = vsel %vm12277_vm6, %v4610_v63, %v4611_v16 }
 0x189   : > { %v1698_v43 = vpop.f32.mrf.mxu0 }
 0x18a   : > { %v1765_v11 = vadd.f32 %v1698_v43, %v13491_v49  ;;  %v10808_v7 = vpop.f32.mrf.mxu1 }
 0x18b   : > { %v10779_v46 = vpop.f32.mrf.mxu0  ;;  %v13737_v15 = vadd.f32 %v10808_v7, %v1763_v35  ;;  %v15034_v35 = vrot.slane %v13645_v38, 9 }
 0x18c   : > { %v1768_v6 = vadd.f32 %v10779_v46, %v15033_v24  ;;  %v2045_v61 = vpop.f32.mrf.mxu1  ;;  %v11502_v46 = vld [vmem:[#allocation7 + $0x70] sm:$0xff]  }
 0x18d   : > { %v13740_v30 = vpop.f32.mrf.mxu0  ;;  %v13742_v29 = vadd.f32 %v2045_v61, %v1761_v55  ;;  %v4609_v55 = vsel %vm12277_vm6, %v15034_v35, %v4608_v36  ;;  %10994 = vmatprep.subr.bf16.mxu1 %v11502_v46 }
 0x18e   : > { %v10809_v62 = vpop.f32.mrf.mxu1  ;;  %v9966_v14 = vcombine.low %v4609_v55, %v4612_v5  ;;  %10995 = vmatpush3.bf16.msra.mxu1 %v11502_v46 }
 0x18f   : > { %v10782_v57 = vpop.f32.mrf.mxu0  ;;  %10985 = vmatmul.mubr.msk.bf16.gmra.mxu0 %vm811_vm2, %v9964_v0  ;;  %v13745_v2 = vadd.f32 %v10809_v62, %v1764_v58 }
 0x190   : > { %v1771_v49 = vadd.f32 %v10782_v57, %v13519_v26  ;;  %v13748_v22 = vpop.f32.mrf.mxu1  ;;  %10988 = vmatprep.mubr.msk.bf16.mxu0 %vm811_vm2, %v9965_v9 }
 0x191   : > { %v1714_v31 = vpop.f32.mrf.mxu0 }
 0x192   : > { %v1769_v58 = vadd.f32 %v1714_v31, %v13525_v41  ;;  %v10812_v12 = vpop.f32.mrf.mxu1 }
 0x193   : > { %v10783_v27 = vpop.f32.mrf.mxu0  ;;  %v13760_v26 = vadd.f32 %v10812_v12, %v1767_v39 }
 0x194   : > { %v1772_v25 = vadd.f32 %v10783_v27, %v13531_v37  ;;  %v2061_v23 = vpop.f32.mrf.mxu1 }
 0x195   : > { %v13763_v43 = vpop.f32.mrf.mxu0  ;;  %v13765_v38 = vadd.f32 %v2061_v23, %v1765_v11 }
 0x196   : > { %v10813_v36 = vpop.f32.mrf.mxu1 }
 0x197   : > { %v10786_v45 = vpop.f32.mrf.mxu0  ;;  %10989 = vmatmul.mubr.msk.bf16.gmra.mxu0 %vm811_vm2, %v9966_v14  ;;  %v13768_v63 = vadd.f32 %v10813_v36, %v1768_v6 }
 0x198   : > { %v1775_v41 = vadd.f32 %v10786_v45, %v13557_v54  ;;  %v13771_v16 = vpop.f32.mrf.mxu1 }
 0x199   : > { %v1730_v39 = vpop.f32.mrf.mxu0 }
 0x19a   : > { %v1773_v37 = vadd.f32 %v1730_v39, %v13563_v33  ;;  %v10816_v34 = vpop.f32.mrf.mxu1 }
 0x19b   : > { %v10787_v40 = vpop.f32.mrf.mxu0  ;;  %v13774_v18 = vadd.f32 %v10816_v34, %v1771_v49 }
 0x19c   : > { %v1776_v11 = vadd.f32 %v10787_v40, %v13572_v60  ;;  %v2077_v7 = vpop.f32.mrf.mxu1 }
 0x19d   : > { %v13777_v0 = vpop.f32.mrf.mxu0  ;;  %v13779_v24 = vadd.f32 %v2077_v7, %v1769_v58  ;;  %v4976_v7 = vld [vmem:[#allocation2] ss:$2 sm:$0xff] }
 0x19e   : > { %v10817_v6 = vpop.f32.mrf.mxu1 }
 0x19f   : > { %v10826_v54 = vpop.f32.mrf.mxu0  ;;  %v13781_v61 = vadd.f32 %v10817_v6, %v1772_v25  ;;  %v11503_v6 = vld [vmem:[#allocation7 + $0x68] sm:$0xff]  }
 0x1a0   : > { %v13784_v33 = vadd.f32 %v10826_v54, %v13590_v8  ;;  %v13786_v9 = vpop.f32.mrf.mxu1  ;;  %v10263_v54 = vpack.c.bf16 %v4976_v7, %v4976_v7  ;;  %10996 = vmatprep.subr.bf16.mxu1 %v11503_v6 }
 0x1a1   : > { %v2711_v62 = vpop.f32.mrf.mxu0  ;;  %10997 = vmatpush3.bf16.msra.mxu1 %v11503_v6  ;;  %v11507_v6 = vld [vmem:[#allocation7 + $0xb0] sm:$0xff]  }
 0x1a2   : > { %v13789_v60 = vadd.f32 %v2711_v62, %v13597_v10  ;;  %v10820_v57 = vpop.f32.mrf.mxu1  ;;  %5083 = vst [vmem:[#allocation3] sm:$0xf] %v10263_v54 }
 0x1a3   : > { %v10827_v49 = vpop.f32.mrf.mxu0  ;;  %v13791_v35 = vadd.f32 %v10820_v57, %v1775_v41 }
 0x1a4   : > { %v13794_v55 = vadd.f32 %v10827_v49, %v13608_v1  ;;  %v2093_v5 = vpop.f32.mrf.mxu1  ;;  %v11506_v49 = vld [vmem:[#allocation7 + $0xb8] sm:$0xff]  }
 0x1a5   : > { %v13796_v31 = vpop.f32.mrf.mxu0  ;;  %v13798_v58 = vadd.f32 %v2093_v5, %v1773_v37  ;;  %v4978_v5 = vld [vmem:[#allocation2 + $0x10] ss:$2 sm:$0x1]  ;;  %11040 = vmatprep.subr.bf16.mxu0 %v11506_v49 }
 0x1a6   : > { %v10821_v8 = vpop.f32.mrf.mxu1  ;;  %11041 = vmatpush3.bf16.msra.mxu0 %v11506_v49 }
 0x1a7   : > { %v10830_v12 = vpop.f32.mrf.mxu0  ;;  %v13800_v27 = vadd.f32 %v10821_v8, %v1776_v11  ;;  %11042 = vmatprep.subr.bf16.mxu0 %v11507_v6 }
 0x1a8   : > { %v13803_v14 = vadd.f32 %v10830_v12, %v13633_v21  ;;  %v13805_v10 = vpop.f32.mrf.mxu1  ;;  %v10264_v12 = vpack.c.bf16 %v4978_v5, %v4978_v5 }
 0x1a9   : > { %v2727_v25 = vpop.f32.mrf.mxu0 }
 0x1aa   : > { %v13808_v23 = vadd.f32 %v2727_v25, %v13647_v52  ;;  %v13810_v1 = vpop.f32.mrf.mxu1  ;;  %v5123_v52 = vld [vmem:[#allocation2 + $0x1] ss:$2 sm:$0xff]  ;;  %11043 = vmatpush3.bf16.msra.mxu0 %v11507_v6 }
 0x1ab   : > { %v10831_v17 = vpop.f32.mrf.mxu0  ;;  %v10281_v11 = vpack.c.bf16 %v5123_v52, %v5123_v52 }
 0x1ac   : > { %v13813_v36 = vadd.f32 %v10831_v17, %v13661_v56  ;;  %v13815_v45 = vpop.f32.mrf.mxu1  ;;  %v11504_v17 = vld [vmem:[#allocation7 + $0x60] sm:$0xff]  }
 0x1ad   : > { %v13817_v41 = vpop.f32.mrf.mxu0  ;;  %5230 = vst [vmem:[#allocation4] sm:$0xf] %v10281_v11  ;;  %v5129_v11 = vld [vmem:[#allocation2 + $0x41] ss:$2 sm:$0x1]  ;;  %10998 = vmatprep.subr.bf16.mxu1 %v11504_v17 }
 0x1ae   : > { %v13819_v39 = vpop.f32.mrf.mxu1  ;;  %v10284_v5 = vpack.c.bf16 %v5129_v11, %v5129_v11  ;;  %10999 = vmatpush3.bf16.msra.mxu1 %v11504_v17  ;;  %v11508_v11 = vld [vmem:[#allocation7 + $0x50] sm:$0xff]  }
 0x1af   : > { %v10834_v21 = vpop.f32.mrf.mxu0 }
 0x1b0   : > { %v13822_v37 = vadd.f32 %v10834_v21, %v13681_v59  ;;  %v13824_v34 = vpop.f32.mrf.mxu1  ;;  %v5125_v21 = vld [vmem:[#allocation2 + $0x11] ss:$2 sm:$0x1] }
 0x1b1   : > { %v2743_v40 = vpop.f32.mrf.mxu0  ;;  %v10282_v7 = vpack.c.bf16 %v5125_v21, %v5125_v21 }
 0x1b2   : > { %15035 = vst [vmem:[#allocation16_spill] sm:$0xff] %v13822_v37  ;;  %v13827_v46 = vadd.f32 %v2743_v40, %v13687_v32  ;;  %v13829_v56 = vpop.f32.mrf.mxu1 }
 0x1b3   : > { %v10835_v62 = vpop.f32.mrf.mxu0 }
 0x1b4   : > { %15036 = vst [vmem:[#allocation19_spill] sm:$0xff] %v13827_v46  ;;  %v13832_v59 = vadd.f32 %v10835_v62, %v13693_v42  ;;  %v13834_v57 = vpop.f32.mrf.mxu1  ;;  %v5087_v42 = vld [vmem:[#allocation3 + $0x4] sm:$0x1]  ;;  %v5235_v46 = vld [vmem:[#allocation4 + $0xc] sm:$0x1] }
 0x1b5   : > { %v13836_v8 = vpop.f32.mrf.mxu0  ;;  %v5088_v40 = vsel %vm13838_vm9, %v10264_v12, %v5087_v42  ;;  %v5236_v21 = vsel %vm13838_vm9, %v10284_v5, %v5235_v46  ;;  %v11511_v5 = vld [vmem:[#allocation7 + $0xa0] sm:$0xff]  }
 0x1b6   : > { %15037 = vst [vmem:[#allocation17_spill] sm:$0xff] %v13832_v59  ;;  %v13842_v25 = vpop.f32.mrf.mxu1  ;;  %5089 = vst [vmem:[#allocation3 + $0x4] sm:$0x1] %v5088_v40  ;;  %v5231_v59 = vld [vmem:[#allocation4 + $0x4] sm:$0x1] }
 0x1b7   : > { %v10838_v52 = vpop.f32.mrf.mxu0  ;;  %v5232_v49 = vsel %vm13838_vm9, %v10282_v7, %v5231_v59  ;;  %5237 = vst [vmem:[#allocation4 + $0xc] sm:$0x1] %v5236_v21 }
 0x1b8   : > { %v13847_v54 = vadd.f32 %v10838_v52, %v13710_v51  ;;  %v13849_v62 = vpop.f32.mrf.mxu1  ;;  %v11505_v51 = vld [vmem:[#allocation7 + $0x58] sm:$0xff]   ;;  %5233 = vst [vmem:[#allocation4 + $0x4] sm:$0x1] %v5232_v49 }
 0x1b9   : > { %v2759_v37 = vpop.f32.mrf.mxu0  ;;  %11000 = vmatprep.subr.bf16.mxu1 %v11505_v51 }
 0x1ba   : > { %15040 = vst [vmem:[#allocation20_spill] sm:$0xff] %v13847_v54  ;;  %v13854_v12 = vadd.f32 %v2759_v37, %v13715_v44  ;;  %v13856_v42 = vpop.f32.mrf.mxu1  ;;  %11001 = vmatpush3.bf16.msra.mxu1 %v11505_v51  ;;  %v11510_v44 = vld [vmem:[#allocation7 + $0xa8] sm:$0xff]  }
 0x1bb   : > { %v10839_v52 = vpop.f32.mrf.mxu0  ;;  %11044 = vmatprep.subr.bf16.mxu0 %v11510_v44  ;;  %11002 = vmatprep.subr.bf16.mxu1 %v11508_v11 }
 0x1bc   : > { %15041 = vst [vmem:[#allocation21_spill] sm:$0xff] %v13854_v12  ;;  %v13861_v40 = vadd.f32 %v10839_v52, %v13718_v19  ;;  %v13863_v17 = vpop.f32.mrf.mxu1  ;;  %11045 = vmatpush3.bf16.msra.mxu0 %v11510_v44  ;;  %v11512_v52 = vld [vmem:[#allocation7 + $0x48] sm:$0xff]   ;;  %v11513_v44 = vld [vmem:[#allocation7 + $0x98] sm:$0xff]  }
 0x1bd   : > { %v13865_v59 = vpop.f32.mrf.mxu0  ;;  %11046 = vmatprep.subr.bf16.mxu0 %v11511_v5 }
 0x1be   : > { %15042 = vst [vmem:[#allocation22_spill] sm:$0xff] %v13861_v40  ;;  %v13867_v37 = vpop.f32.mrf.mxu1  ;;  %11003 = vmatpush3.bf16.msra.mxu1 %v11508_v11 }
 0x1bf   : > { %v10842_v7 = vpop.f32.mrf.mxu0  ;;  %11004 = vmatprep.subr.bf16.mxu1 %v11512_v52 }
 0x1c0   : > { %v13870_v46 = vadd.f32 %v10842_v7, %v13737_v15  ;;  %v13872_v6 = vpop.f32.mrf.mxu1  ;;  %11047 = vmatpush3.bf16.msra.mxu0 %v11511_v5 }
 0x1c1   : > { %v2775_v19 = vpop.f32.mrf.mxu0  ;;  %11048 = vmatprep.subr.bf16.mxu0 %v11513_v44 }
 0x1c2   : > { %15043 = vst [vmem:[#allocation23_spill] sm:$0xff] %v13870_v46  ;;  %v13875_v49 = vadd.f32 %v2775_v19, %v13742_v29  ;;  %v13877_v51 = vpop.f32.mrf.mxu1  ;;  %11005 = vmatpush3.bf16.msra.mxu1 %v11512_v52  ;;  %v11515_v46 = vld [vmem:[#allocation7 + $0x90] sm:$0xff]  }
 0x1c3   : > { %15045 = vst [vmem:[#allocation26_spill] sm:$0xff] %v13877_v51  ;;  %v10843_v21 = vpop.f32.mrf.mxu0 }
 0x1c4   : > { %15044 = vst [vmem:[#allocation24_spill] sm:$0xff] %v13875_v49  ;;  %v13880_v40 = vadd.f32 %v10843_v21, %v13745_v2  ;;  %v13882_v15 = vpop.f32.mrf.mxu1  ;;  %11049 = vmatpush3.bf16.msra.mxu0 %v11513_v44  ;;  %v11514_v2 = vld [vmem:[#allocation7 + $0x40] sm:$0xff]  }
 0x1c5   : > { %15047 = vst [vmem:[#allocation28_spill] sm:$0xff] %v13882_v15  ;;  %v13884_v7 = vpop.f32.mrf.mxu0  ;;  %11006 = vmatprep.subr.bf16.mxu1 %v11514_v2  ;;  %11050 = vmatprep.subr.bf16.mxu0 %v11515_v46 }
 0x1c6   : > { %15046 = vst [vmem:[#allocation27_spill] sm:$0xff] %v13880_v40  ;;  %15048 = vst [vmem:[#allocation30_spill] sm:$0xff] %v13884_v7  ;;  %v13886_v11 = vpop.f32.mrf.mxu1  ;;  %11007 = vmatpush3.bf16.msra.mxu1 %v11514_v2 }
 0x1c7   : > { %15049 = vst [vmem:[#allocation32_spill] sm:$0xff] %v13886_v11  ;;  %v10846_v29 = vpop.f32.mrf.mxu0 }
 0x1c8   : > { %v13889_v19 = vadd.f32 %v10846_v29, %v13760_v26  ;;  %v13891_v49 = vpop.f32.mrf.mxu1  ;;  %11051 = vmatpush3.bf16.msra.mxu0 %v11515_v46  ;;  %v11517_v29 = vld [vmem:[#allocation7 + $0x88] sm:$0xff]   ;;  %v13917_v46 = vld [vmem:[#allocation7 + $0x38] sm:$0xff]  }
 0x1c9   : > { %15051 = vst [vmem:[#allocation36_spill] sm:$0xff] %v13891_v49  ;;  %v2791_v21 = vpop.f32.mrf.mxu0  ;;  %11052 = vmatprep.subr.bf16.mxu0 %v11517_v29  ;;  %15062 = vst [vmem:[#allocation47_spill] sm:$0xff] %v13917_v46  ;;  %11016 = vmatprep.subr.bf16.mxu1 %v13917_v46 }
 0x1ca   : > { %15050 = vst [vmem:[#allocation35_spill] sm:$0xff] %v13889_v19  ;;  %v13894_v40 = vadd.f32 %v2791_v21, %v13765_v38  ;;  %v13896_v5 = vpop.f32.mrf.mxu1 }
 0x1cb   : > { %15053 = vst [vmem:[#allocation38_spill] sm:$0xff] %v13896_v5  ;;  %v10847_v15 = vpop.f32.mrf.mxu0 }
 0x1cc   : > { %15052 = vst [vmem:[#allocation37_spill] sm:$0xff] %v13894_v40  ;;  %v13899_v52 = vadd.f32 %v10847_v15, %v13768_v63  ;;  %v13901_v11 = vpop.f32.mrf.mxu1  ;;  %11053 = vmatpush3.bf16.msra.mxu0 %v11517_v29 }
 0x1cd   : > { %15055 = vst [vmem:[#allocation40_spill] sm:$0xff] %v13901_v11  ;;  %v13903_v26 = vpop.f32.mrf.mxu0 }
 0x1ce   : > { %15054 = vst [vmem:[#allocation39_spill] sm:$0xff] %v13899_v52  ;;  %15056 = vst [vmem:[#allocation41_spill] sm:$0xff] %v13903_v26  ;;  %v13905_v44 = vpop.f32.mrf.mxu1  ;;  %v11518_v52 = vld [vmem:[#allocation7 + $0x80] sm:$0xff]  }
 0x1cf   : > { %15057 = vst [vmem:[#allocation42_spill] sm:$0xff] %v13905_v44  ;;  %v10850_v38 = vpop.f32.mrf.mxu0  ;;  %11054 = vmatprep.subr.bf16.mxu0 %v11518_v52 }
 0x1d0   : > { %v13908_v21 = vadd.f32 %v10850_v38, %v13774_v18  ;;  %v13910_v40 = vpop.f32.mrf.mxu1  ;;  %11055 = vmatpush3.bf16.msra.mxu0 %v11518_v52 }
 0x1d1   : > { %15059 = vst [vmem:[#allocation44_spill] sm:$0xff] %v13910_v40  ;;  %v2807_v2 = vpop.f32.mrf.mxu0  ;;  %v5243_v40 = vld [vmem:[#allocation4 + $0x1c] sm:$0x1] }
 0x1d2   : > { %15058 = vst [vmem:[#allocation43_spill] sm:$0xff] %v13908_v21  ;;  %v13913_v63 = vadd.f32 %v2807_v2, %v13779_v24  ;;  %v13915_v15 = vpop.f32.mrf.mxu1 }
 0x1d3   : > { %15061 = vst [vmem:[#allocation46_spill] sm:$0xff] %v13915_v15  ;;  %v10851_v19 = vpop.f32.mrf.mxu0 }
 0x1d4   : > { %15060 = vst [vmem:[#allocation45_spill] sm:$0xff] %v13913_v63  ;;  %v13920_v44 = vadd.f32 %v10851_v19, %v13781_v61  ;;  %v13922_v26 = vpop.f32.mrf.mxu1 }
 0x1d5   : > { %15064 = vst [vmem:[#allocation49_spill] sm:$0xff] %v13922_v26  ;;  %v13924_v18 = vpop.f32.mrf.mxu0 }
 0x1d6   : > { %15063 = vst [vmem:[#allocation48_spill] sm:$0xff] %v13920_v44  ;;  %15065 = vst [vmem:[#allocation50_spill] sm:$0xff] %v13924_v18  ;;  %v13927_v29 = vpop.f32.mrf.mxu1 }
 0x1d7   : > { %15066 = vst [vmem:[#allocation51_spill] sm:$0xff] %v13927_v29  ;;  %v10854_v24 = vpop.f32.mrf.mxu0 }
 0x1d8   : > { %v13930_v38 = vadd.f32 %v10854_v24, %v13791_v35  ;;  %v13932_v2 = vpop.f32.mrf.mxu1  ;;  %v11523_v35 = vld [vmem:[#allocation7 + $0x138] sm:$0xff]  }
 0x1d9   : > { %15068 = vst [vmem:[#allocation53_spill] sm:$0xff] %v13932_v2  ;;  %v2823_v63 = vpop.f32.mrf.mxu0  ;;  %11088 = vmatprep.subr.bf16.mxu0 %v11523_v35  ;;  %v5239_v2 = vld [vmem:[#allocation4 + $0x14] sm:$0x1] }
 0x1da   : > { %15067 = vst [vmem:[#allocation52_spill] sm:$0xff] %v13930_v38  ;;  %v13935_v61 = vadd.f32 %v2823_v63, %v13798_v58  ;;  %v13937_v19 = vpop.f32.mrf.mxu1 }
 0x1db   : > { %15070 = vst [vmem:[#allocation55_spill] sm:$0xff] %v13937_v19  ;;  %v10855_v44 = vpop.f32.mrf.mxu0 }
 0x1dc   : > { %15069 = vst [vmem:[#allocation54_spill] sm:$0xff] %v13935_v61  ;;  %v13940_v21 = vadd.f32 %v10855_v44, %v13800_v27  ;;  %v13942_v52 = vpop.f32.mrf.mxu1 }
 0x1dd   : > { %15072 = vst [vmem:[#allocation57_spill] sm:$0xff] %v13942_v52  ;;  %v13944_v46 = vpop.f32.mrf.mxu0 }
 0x1de   : > { %15071 = vst [vmem:[#allocation56_spill] sm:$0xff] %v13940_v21  ;;  %15073 = vst [vmem:[#allocation58_spill] sm:$0xff] %v13944_v46  ;;  %v13946_v29 = vpop.f32.mrf.mxu1  ;;  %v5133_v21 = vld [vmem:[#allocation2 + $0x71] ss:$2 sm:$0x1] }
 0x1df   : > { %15074 = vst [vmem:[#allocation59_spill] sm:$0xff] %v13946_v29  ;;  %v13948_v24 = vpop.f32.mrf.mxu0  ;;  %v10286_v29 = vpack.c.bf16 %v5133_v21, %v5133_v21 }
 0x1e0   : > { %v13950_v38 = vpop.f32.mrf.mxu1 }
 0x1e1   : > { %15075 = vst [vmem:[#allocation60_spill] sm:$0xff] %v13950_v38  ;;  %v13952_v58 = vpop.f32.mrf.mxu0  ;;  %v5240_v35 = vsel %vm13838_vm9, %v10286_v29, %v5239_v2  ;;  %v5412_v29 = vld [vmem:[#allocation2 + $0x29] ss:$2 sm:$0x1] }
 0x1e2   : > { %v13954_v63 = vpop.f32.mrf.mxu1  ;;  %5241 = vst [vmem:[#allocation4 + $0x14] sm:$0x1] %v5240_v35 }
 0x1e3   : > { %15076 = vst [vmem:[#allocation61_spill] sm:$0xff] %v13954_v63  ;;  %v13956_v61 = vpop.f32.mrf.mxu0 }
 0x1e4   : > { %v13958_v27 = vpop.f32.mrf.mxu1 }
 0x1e5   : > { %15077 = vst [vmem:[#allocation62_spill] sm:$0xff] %v13958_v27  ;;  %v13960_v44 = vpop.f32.mrf.mxu0 }
 0x1e6   : > { %v13962_v52 = vpop.f32.mrf.mxu1 }
 0x1e7   : > { %15078 = vst [vmem:[#allocation63_spill] sm:$0xff] %v13962_v52  ;;  %v13964_v19 = vpop.f32.mrf.mxu0  ;;  %v5137_v52 = vld [vmem:[#allocation2 + $0xa1] ss:$2 sm:$0x1] }
 0x1e8   : > { %15079 = vst [vmem:[#allocation64_spill] sm:$0xff] %v13964_v19  ;;  %v13966_v46 = vpop.f32.mrf.mxu1 }
 0x1e9   : > { %15080 = vst [vmem:[#allocation65_spill] sm:$0xff] %v13966_v46  ;;  %v13970_v38 = vpop.f32.mrf.mxu0  ;;  %v10288_v46 = vpack.c.bf16 %v5137_v52, %v5137_v52 }
 0x1ea   : > { %15081 = vst [vmem:[#allocation66_spill] sm:$0xff] %v13970_v38  ;;  %v13972_v63 = vpop.f32.mrf.mxu1 }
 0x1eb   : > { %v13974_v27 = vpop.f32.mrf.mxu0  ;;  %v5244_v35 = vsel %vm13838_vm9, %v10288_v46, %v5243_v40  ;;  %v5247_v46 = vld [vmem:[#allocation4 + $0x24] sm:$0x1] }
 0x1ec   : > { %15082 = vst [vmem:[#allocation67_spill] sm:$0xff] %v13974_v27  ;;  %v13976_v26 = vpop.f32.mrf.mxu1  ;;  %v10318_v27 = vpack.c.bf16 %v5412_v29, %v5412_v29  ;;  %5245 = vst [vmem:[#allocation4 + $0x1c] sm:$0x1] %v5244_v35  ;;  %v5416_v29 = vld [vmem:[#allocation2 + $0x59] ss:$2 sm:$0x1] }
 0x1ed   : > { %v13978_v15 = vpop.f32.mrf.mxu0 }
 0x1ee   : > { %15083 = vst [vmem:[#allocation68_spill] sm:$0xff] %v13978_v15  ;;  %v13980_v21 = vpop.f32.mrf.mxu1  ;;  %v5518_v15 = vld [vmem:[#allocation6 + $0x4] sm:$0x1] }
 0x1ef   : > { %v13982_v18 = vpop.f32.mrf.mxu0 }
 0x1f0   : > { %15084 = vst [vmem:[#allocation69_spill] sm:$0xff] %v13982_v18  ;;  %v13984_v11 = vpop.f32.mrf.mxu1  ;;  %v5519_v18 = vsel %vm13838_vm9, %v10318_v27, %v5518_v15  ;;  %v10320_v27 = vpack.c.bf16 %v5416_v29, %v5416_v29 }
 0x1f1   : > { %15085 = vst [vmem:[#allocation70_spill] sm:$0xff] %v13984_v11  ;;  %v13986_v2 = vpop.f32.mrf.mxu0  ;;  %5520 = vst [vmem:[#allocation6 + $0x4] sm:$0x1] %v5519_v18  ;;  %v5522_v18 = vld [vmem:[#allocation6 + $0xc] sm:$0x1] }
 0x1f2   : > { %15086 = vst [vmem:[#allocation71_spill] sm:$0xff] %v13986_v2  ;;  %v13990_v5 = vpop.f32.mrf.mxu1  ;;  %v5141_v2 = vld [vmem:[#allocation2 + $0xd1] ss:$2 sm:$0x1] }
 0x1f3   : > { %15087 = vst [vmem:[#allocation72_spill] sm:$0xff] %v13990_v5  ;;  %v13992_v49 = vpop.f32.mrf.mxu0  ;;  %v10290_v40 = vpack.c.bf16 %v5141_v2, %v5141_v2 }
 0x1f4   : > { %15088 = vst [vmem:[#allocation73_spill] sm:$0xff] %v13992_v49  ;;  %v13996_v52 = vpop.f32.mrf.mxu1 }
 0x1f5   : > { %15089 = vst [vmem:[#allocation74_spill] sm:$0xff] %v13996_v52  ;;  %v13998_v38 = vpop.f32.mrf.mxu0  ;;  %v5248_v15 = vsel %vm13838_vm9, %v10290_v40, %v5247_v46  ;;  %v5251_v52 = vld [vmem:[#allocation4 + $0x2c] sm:$0x1] }
 0x1f6   : > { %15090 = vst [vmem:[#allocation75_spill] sm:$0xff] %v13998_v38  ;;  %v14000_v12 = vpop.f32.mrf.mxu1  ;;  %5249 = vst [vmem:[#allocation4 + $0x24] sm:$0x1] %v5248_v15  ;;  %v5523_v38 = vsel %vm13838_vm9, %v10320_v27, %v5522_v18  ;;  %v5149_v27 = vld [vmem:[#allocation2 + $0x131] ss:$2 sm:$0x1] }
 0x1f7   : > { %15091 = vst [vmem:[#allocation76_spill] sm:$0xff] %v14000_v12  ;;  %v14002_v7 = vpop.f32.mrf.mxu0  ;;  %5524 = vst [vmem:[#allocation6 + $0xc] sm:$0x1] %v5523_v38  ;;  %v5145_v12 = vld [vmem:[#allocation2 + $0x101] ss:$2 sm:$0x1] }
 0x1f8   : > { %15092 = vst [vmem:[#allocation77_spill] sm:$0xff] %v14002_v7  ;;  %v14006_v5 = vpop.f32.mrf.mxu1 }
 0x1f9   : > { %v14004_v35 = vpop.f32.mrf.mxu0  ;;  %15094 = vst [vmem:[#allocation79_spill] sm:$0xff] %v14006_v5  ;;  %v10292_v5 = vpack.c.bf16 %v5145_v12, %v5145_v12  ;;  %v5255_v12 = vld [vmem:[#allocation4 + $0x34] sm:$0x1] }
 0x1fa   : > { %15093 = vst [vmem:[#allocation78_spill] sm:$0xff] %v14004_v35  ;;  %v14016_v2 = vpop.f32.mrf.mxu1 }
 0x1fb   : > { %v14010_v49 = vpop.f32.mrf.mxu0  ;;  %15097 = vst [vmem:[#allocation82_spill] sm:$0xff] %v14016_v2  ;;  %v5252_v46 = vsel %vm13838_vm9, %v10292_v5, %v5251_v52  ;;  %v15118_v2 = vld [vmem:[#allocation31_spill] sm:$0xff] }
 0x1fc   : > { %15095 = vst [vmem:[#allocation80_spill] sm:$0xff] %v14010_v49  ;;  %v14022_v40 = vpop.f32.mrf.mxu1  ;;  %5253 = vst [vmem:[#allocation4 + $0x2c] sm:$0x1] %v5252_v46 }
 0x1fd   : > { %v14014_v7 = vpop.f32.mrf.mxu0  ;;  %15100 = vst [vmem:[#allocation85_spill] sm:$0xff] %v14022_v40 }
 0x1fe   : > { %15096 = vst [vmem:[#allocation81_spill] sm:$0xff] %v14014_v7  ;;  %v14028_v38 = vpop.f32.mrf.mxu1 }
 0x1ff   : > { %v14018_v35 = vpop.f32.mrf.mxu0  ;;  %15102 = vst [vmem:[#allocation87_spill] sm:$0xff] %v14028_v38 }
 0x200   : > { %15098 = vst [vmem:[#allocation83_spill] sm:$0xff] %v14018_v35  ;;  %v10294_v35 = vpack.c.bf16 %v5149_v27, %v5149_v27  ;;  %v14034_v7 = vpop.f32.mrf.mxu1  ;;  %v5259_v27 = vld [vmem:[#allocation4 + $0x3c] sm:$0x1] }
 0x201   : > { %v14020_v11 = vpop.f32.mrf.mxu0  ;;  %15105 = vst [vmem:[#allocation90_spill] sm:$0xff] %v14034_v7 }
 0x202   : > { %15099 = vst [vmem:[#allocation84_spill] sm:$0xff] %v14020_v11  ;;  %v5256_v49 = vsel %vm13838_vm9, %v10294_v35, %v5255_v12  ;;  %v14042_v52 = vpop.f32.mrf.mxu1  ;;  %v5876_v35 = vld [vmem:[#allocation3] sm:$0xf] }
 0x203   : > { %v14026_v29 = vpop.f32.mrf.mxu0  ;;  %5257 = vst [vmem:[#allocation4 + $0x34] sm:$0x1] %v5256_v49  ;;  %15108 = vst [vmem:[#allocation93_spill] sm:$0xff] %v14042_v52  ;;  %v5896_v52 = vshll.u32 %v5876_v35, 16 }
 0x204   : > { %15101 = vst [vmem:[#allocation86_spill] sm:$0xff] %v14026_v29  ;;  %v14048_v38 = vpop.f32.mrf.mxu1 }
 0x205   : > { %v14030_v15 = vpop.f32.mrf.mxu0  ;;  %15111 = vst [vmem:[#allocation96_spill] sm:$0xff] %v14048_v38  ;;  %v15119_v38 = vld [vmem:[#allocation33_spill] sm:$0xff] }
 0x206   : > { %15103 = vst [vmem:[#allocation88_spill] sm:$0xff] %v14030_v15  ;;  %v5153_v15 = vld [vmem:[#allocation2 + $0x161] ss:$2 sm:$0x1]  ;;  %v14056_v12 = vpop.f32.mrf.mxu1  ;;  %v1273_v19 = vadd.f32 %v15119_v38, %v15118_v2  ;;  %v5526_v38 = vld [vmem:[#allocation6 + $0x14] sm:$0x1] }
 0x207   : > { %v14032_v18 = vpop.f32.mrf.mxu0  ;;  %15114 = vst [vmem:[#allocation99_spill] sm:$0xff] %v14056_v12  ;;  %v15121_v12 = vld [vmem:[#allocation34_spill] sm:$0xff] }
 0x208   : > { %15104 = vst [vmem:[#allocation89_spill] sm:$0xff] %v14032_v18  ;;  %v10296_v18 = vpack.c.bf16 %v5153_v15, %v5153_v15  ;;  %v15117_v15 = vld [vmem:[#allocation29_spill] sm:$0xff] }
 0x209   : > { %v14036_v11 = vpop.f32.mrf.mxu0 }
 0x20a   : > { %15106 = vst [vmem:[#allocation91_spill] sm:$0xff] %v14036_v11  ;;  %v5260_v11 = vsel %vm13838_vm9, %v10296_v18, %v5259_v27  ;;  %v5420_v18 = vld [vmem:[#allocation2 + $0x89] ss:$2 sm:$0x1]  ;;  %v15120_v27 = vld [vmem:[#allocation14_spill] sm:$0xff] }
 0x20b   : > { %v14040_v5 = vpop.f32.mrf.mxu0  ;;  %5261 = vst [vmem:[#allocation4 + $0x3c] sm:$0x1] %v5260_v11  ;;  %v1305_v11 = vadd.f32 %v13576_v50, %v15120_v27  ;;  %v10322_v54 = vpack.c.bf16 %v5420_v18, %v5420_v18  ;;  %v14080_v27 = vpop.f32.mrf.mxu1 }
 0x20c   : > { %15107 = vst [vmem:[#allocation92_spill] sm:$0xff] %v14040_v5 }
 0x20d   : > { %v14044_v46 = vpop.f32.mrf.mxu0  ;;  %v1774_v50 = vadd.f32 %v13777_v0, %v1305_v11  ;;  %v5877_v0 = vld [vmem:[#allocation3 + $0x4] sm:$0x1] }
 0x20e   : > { %15109 = vst [vmem:[#allocation94_spill] sm:$0xff] %v14044_v46  ;;  %v5893_v46 = vshrl.u32 %v5876_v35, 16 }
 0x20f   : > { %v14046_v29 = vpop.f32.mrf.mxu0 }
 0x210   : > { %15110 = vst [vmem:[#allocation95_spill] sm:$0xff] %v14046_v29  ;;  %v15116_v29 = vld [vmem:[#allocation25_spill] sm:$0xff] }
 0x211   : > { %v14050_v7 = vpop.f32.mrf.mxu0  ;;  %v1257_v40 = vadd.f32 %v15117_v15, %v15116_v29  ;;  %v15123_v15 = vld [vmem:[#allocation15_spill] sm:$0xff] }
 0x212   : > { %15112 = vst [vmem:[#allocation97_spill] sm:$0xff] %v14050_v7  ;;  %v1289_v7 = vadd.f32 %v13538_v20, %v13523_v13  ;;  %v2117_v2 = vadd.f32 %v13696_v47, %v15123_v15  ;;  %v1766_v13 = vadd.f32 %v13740_v30, %v1273_v19 }
 0x213   : > { %v14054_v49 = vpop.f32.mrf.mxu0  ;;  %v1762_v29 = vadd.f32 %v13713_v48, %v1257_v40  ;;  %v2121_v48 = vadd.f32 %v13721_v53, %v13690_v28  ;;  %v3312_v28 = vadd.f32 %v13815_v45, %v13789_v60  ;;  %v5902_v40 = vshll.u32 %v5877_v0, 16 }
 0x214   : > { %15113 = vst [vmem:[#allocation98_spill] sm:$0xff] %v14054_v49  ;;  %v2109_v49 = vadd.f32 %v13613_v3, %v13568_v4  ;;  %v1770_v20 = vadd.f32 %v13763_v43, %v1289_v7  ;;  %v5895_v3 = vrot.slane %v5893_v46, 4  ;;  %v3314_v43 = vadd.f32 %v13810_v1, %v13784_v33  ;;  %v14114_v1 = vpop.f32.mrf.mxu1 }
 0x215   : > { %v14058_v5 = vpop.f32.mrf.mxu0  ;;  %v2125_v47 = vadd.f32 %v13748_v22, %v1762_v29  ;;  %v14093_v7 = vadd.f32 %v13771_v16, %v1766_v13  ;;  %v3315_v33 = vadd.f32 %v13819_v39, %v13794_v55  ;;  %v3319_v55 = vadd.f32 %v13842_v25, %v13813_v36 }
 0x216   : > { %15115 = vst [vmem:[#allocation100_spill] sm:$0xff] %v14058_v5  ;;  %v15122_v5 = vld [vmem:[#allocation18_spill] sm:$0xff]  ;;  %v2839_v30 = vadd.f32 %v13796_v31, %v2109_v49  ;;  %v14096_v19 = vadd.f32 %v13786_v9, %v1770_v20  ;;  %v3677_v16 = vadd.f32 %v13948_v24, %v3314_v43  ;;  %v3318_v9 = vadd.f32 %v13829_v56, %v13803_v14  ;;  %v15124_v56 = vld [vmem:[#allocation16_spill] sm:$0xff]  ;;  %v15125_v24 = vld [vmem:[#allocation19_spill] sm:$0xff]  ;;  %v14137_v18 = vpop.f32.mrf.mxu1 }
 0x217   : > { %v2113_v51 = vadd.f32 %v15122_v5, %v15121_v12  ;;  %v14072_v35 = vpop.f32.mrf.mxu0  ;;  %v5898_v5 = vrot.slane %v5896_v52, 5  ;;  %v5527_v12 = vsel %vm13838_vm9, %v10322_v54, %v5526_v38  ;;  %v14099_v54 = vadd.f32 %v13805_v10, %v1774_v50  ;;  %v5424_v14 = vld [vmem:[#allocation2 + $0xb9] ss:$2 sm:$0x1]  ;;  %v5530_v49 = vld [vmem:[#allocation6 + $0x1c] sm:$0x1] }
 0x218   : > { %5528 = vst [vmem:[#allocation6 + $0x14] sm:$0x1] %v5527_v12  ;;  %v3313_v31 = vadd.f32 %v13824_v34, %v2839_v30  ;;  %v3316_v10 = vadd.f32 %v13834_v57, %v13808_v23  ;;  %v3675_v39 = vadd.f32 %v13952_v58, %v3312_v28  ;;  %v4407_v34 = vadd.f32 %v13972_v63, %v3677_v16  ;;  %v15127_v38 = vld [vmem:[#allocation20_spill] sm:$0xff]  ;;  %v15128_v50 = vld [vmem:[#allocation26_spill] sm:$0xff] }
 0x219   : > { %v14082_v4 = vpop.f32.mrf.mxu0  ;;  %v2843_v22 = vadd.f32 %v13817_v41, %v2113_v51  ;;  %v5899_v45 = vor.u32 %v5898_v5, %v5895_v3  ;;  %v2847_v41 = vadd.f32 %v13836_v8, %v2117_v2  ;;  %v14123_v51 = vld [vmem:[#allocation4] sm:$0xf]  ;;  %v14128_v57 = vadd.f32 %v13856_v42, %v15124_v56  ;;  %v15126_v2 = vld [vmem:[#allocation17_spill] sm:$0xff]  ;;  %v15135_v16 = vld [vmem:[#allocation32_spill] sm:$0xff] }
 0x21a   : > { %v14132_v52 = vadd.f32 %v13863_v17, %v15125_v24  ;;  %v10324_v46 = vpack.c.bf16 %v5424_v14, %v5424_v14  ;;  %v2851_v36 = vadd.f32 %v13865_v59, %v2121_v48  ;;  %v3678_v25 = vadd.f32 %v13956_v61, %v3315_v33  ;;  %v15131_v28 = vld [vmem:[#allocation30_spill] sm:$0xff]  ;;  %v15133_v33 = vld [vmem:[#allocation28_spill] sm:$0xff] }
 0x21b   : > { %v14103_v53 = vpop.f32.mrf.mxu0  ;;  %v3317_v23 = vadd.f32 %v13849_v62, %v2843_v22  ;;  %v4405_v58 = vadd.f32 %v13976_v26, %v3675_v39  ;;  %v14139_v11 = vrot.slane %v5899_v45, 4  ;;  %v14141_v42 = vrot.slane %v5902_v40, 5  ;;  %v15132_v22 = vld [vmem:[#allocation21_spill] sm:$0xff]  ;;  %v14171_v40 = vpop.f32.mrf.mxu1  ;;  %v15138_v56 = vld [vmem:[#allocation72_spill] sm:$0xff] }
 0x21c   : > { %v6175_v17 = vshrl.u32 %v14123_v51, 16  ;;  %v5531_v29 = vsel %vm13838_vm9, %v10324_v46, %v5530_v49  ;;  %v3676_v59 = vadd.f32 %v13960_v44, %v3313_v31  ;;  %v4408_v61 = vadd.f32 %v13980_v21, %v3678_v25  ;;  %v15129_v44 = vld [vmem:[#allocation64_spill] sm:$0xff]  ;;  %v15130_v21 = vld [vmem:[#allocation70_spill] sm:$0xff] }
 0x21d   : > { %v14116_v60 = vpop.f32.mrf.mxu0  ;;  %5532 = vst [vmem:[#allocation6 + $0x1c] sm:$0x1] %v5531_v29  ;;  %v14150_v13 = vadd.f32 %v13867_v37, %v15126_v2  ;;  %v14153_v20 = vadd.f32 %v13872_v6, %v2847_v41  ;;  %v14157_v3 = vadd.f32 %v15128_v50, %v15127_v38  ;;  %v3681_v48 = vadd.f32 %v15129_v44, %v3318_v9  ;;  %v15134_v31 = vld [vmem:[#allocation22_spill] sm:$0xff]  ;;  %v5428_v46 = vld [vmem:[#allocation2 + $0xe9] ss:$2 sm:$0x1] }
 0x21e   : > { %v4406_v30 = vadd.f32 %v15130_v21, %v3676_v59  ;;  %v2855_v37 = vadd.f32 %v15131_v28, %v2125_v47  ;;  %v14165_v6 = vadd.f32 %v15133_v33, %v15132_v22  ;;  %v14169_v45 = vadd.f32 %v15135_v16, %v15134_v31  ;;  %v15139_v25 = vld [vmem:[#allocation36_spill] sm:$0xff]  ;;  %v15141_v49 = vld [vmem:[#allocation38_spill] sm:$0xff]  ;;  %v14201_v33 = vpop.f32.mrf.mxu1 }
 0x21f   : > { %v10962_v8 = vpop.f32.mrf.mxu0  ;;  %v5905_v39 = vsel %vm11926_vm3, %v14139_v11, %v14141_v42  ;;  %v4411_v47 = vadd.f32 %v15138_v56, %v3681_v48  ;;  %v15142_v29 = vld [vmem:[#allocation24_spill] sm:$0xff]  ;;  %v15145_v38 = vld [vmem:[#allocation74_spill] sm:$0xff] }
 0x220   : > { %v4881_v63 = vadd.f32 %v10962_v8, %v4407_v34  ;;  %v15137_v34 = vld [vmem:[#allocation66_spill] sm:$0xff]  ;;  %v15143_v59 = vld [vmem:[#allocation40_spill] sm:$0xff] }
 0x221   : > { %v4752_v62 = vpop.f32.mrf.mxu0  ;;  %v3679_v14 = vadd.f32 %v15137_v34, %v3316_v10  ;;  %v15144_v10 = vld [vmem:[#allocation67_spill] sm:$0xff]  ;;  %v5534_v48 = vld [vmem:[#allocation6 + $0x24] sm:$0x1] }
 0x222   : > { %v4913_v15 = vmax.f32 %v4881_v63, 0.0  ;;  %v4879_v26 = vadd.f32 %v4752_v62, %v4405_v58  ;;  %v14180_v58 = vadd.f32 %v15139_v25, %v2851_v36  ;;  %v15140_v63 = vld [vmem:[#allocation23_spill] sm:$0xff]  ;;  %v3682_v2 = vadd.f32 %v15144_v10, %v3319_v55  ;;  %v15146_v36 = vld [vmem:[#allocation41_spill] sm:$0xff]  ;;  %v15149_v28 = vld [vmem:[#allocation44_spill] sm:$0xff] }
 0x223   : > { %v10963_v5 = vpop.f32.mrf.mxu0  ;;  %v14184_v62 = vadd.f32 %v15141_v49, %v15140_v63  ;;  %v4409_v50 = vadd.f32 %v15145_v38, %v3679_v14  ;;  %v2859_v21 = vadd.f32 %v15146_v36, %v14093_v7  ;;  %v14199_v22 = vadd.f32 %v15149_v28, %v2855_v37  ;;  %v15150_v16 = vld [vmem:[#allocation68_spill] sm:$0xff]  ;;  %v15154_v37 = vld [vmem:[#allocation46_spill] sm:$0xff]  ;;  %v15155_v25 = vld [vmem:[#allocation37_spill] sm:$0xff] }
 0x224   : > { %4946 = vst [vmem:[#allocation2 + $0x31] sm:$0xff] %v4913_v15  ;;  %v4911_v43 = vmax.f32 %v4879_v26, 0.0  ;;  %v4882_v0 = vadd.f32 %v10963_v5, %v4408_v61  ;;  %v14188_v61 = vadd.f32 %v15143_v59, %v15142_v29  ;;  %v10326_v26 = vpack.c.bf16 %v5428_v46, %v5428_v46  ;;  %v15151_v34 = vld [vmem:[#allocation76_spill] sm:$0xff]  ;;  %v15156_v63 = vld [vmem:[#allocation49_spill] sm:$0xff]  ;;  %v15157_v29 = vld [vmem:[#allocation39_spill] sm:$0xff] }
 0x225   : > { %v4755_v41 = vpop.f32.mrf.mxu0  ;;  %v4412_v14 = vadd.f32 %v15151_v34, %v3682_v2  ;;  %v14215_v49 = vadd.f32 %v15156_v63, %v15155_v25  ;;  %v15158_v59 = vld [vmem:[#allocation51_spill] sm:$0xff]  ;;  %v15167_v34 = vld [vmem:[#allocation48_spill] sm:$0xff] }
 0x226   : > { %4944 = vst [vmem:[#allocation2 + $0x19] sm:$0xff] %v4911_v43  ;;  %v4914_v24 = vmax.f32 %v4882_v0, 0.0  ;;  %v4880_v8 = vadd.f32 %v4755_v41, %v4406_v30  ;;  %v15147_v30 = vld [vmem:[#allocation27_spill] sm:$0xff]  ;;  %v15148_v43 = vld [vmem:[#allocation42_spill] sm:$0xff]  ;;  %v5535_v55 = vsel %vm13838_vm9, %v10326_v26, %v5534_v48  ;;  %v3680_v41 = vadd.f32 %v15150_v16, %v3317_v23  ;;  %v15159_v26 = vld [vmem:[#allocation69_spill] sm:$0xff] }
 0x227   : > { %v10966_v15 = vpop.f32.mrf.mxu0  ;;  %v14196_v0 = vadd.f32 %v15148_v43, %v15147_v30  ;;  %5536 = vst [vmem:[#allocation6 + $0x24] sm:$0x1] %v5535_v55  ;;  %v14219_v23 = vadd.f32 %v15158_v59, %v15157_v29  ;;  %v3685_v10 = vadd.f32 %v15159_v26, %v14128_v57  ;;  %v15160_v2 = vld [vmem:[#allocation79_spill] sm:$0xff]  ;;  %v15162_v48 = vld [vmem:[#allocation53_spill] sm:$0xff]  ;;  %v14237_v57 = vpop.f32.mrf.mxu1 }
 0x228   : > { %4947 = vst [vmem:[#allocation2 + $0x39] sm:$0xff] %v4914_v24  ;;  %v4912_v5 = vmax.f32 %v4880_v8, 0.0  ;;  %v4885_v44 = vadd.f32 %v10966_v15, %v4411_v47  ;;  %v15152_v47 = vld [vmem:[#allocation50_spill] sm:$0xff]  ;;  %v15153_v8 = vld [vmem:[#allocation35_spill] sm:$0xff]  ;;  %v4410_v38 = vadd.f32 %v15160_v2, %v3680_v41  ;;  %v14227_v36 = vadd.f32 %v15162_v48, %v2859_v21  ;;  %v15166_v55 = vld [vmem:[#allocation57_spill] sm:$0xff] }
 0x229   : > { %v4768_v31 = vpop.f32.mrf.mxu0  ;;  %v2863_v24 = vadd.f32 %v15152_v47, %v14096_v19  ;;  %v14211_v46 = vadd.f32 %v15154_v37, %v15153_v8  ;;  %v15163_v30 = vld [vmem:[#allocation43_spill] sm:$0xff]  ;;  %v5091_v47 = vld [vmem:[#allocation3 + $0xc] sm:$0x1]  ;;  %v5432_v37 = vld [vmem:[#allocation2 + $0x119] ss:$2 sm:$0x1] }
 0x22a   : > { %4945 = vst [vmem:[#allocation2 + $0x21] sm:$0xff] %v4912_v5  ;;  %v4917_v56 = vmax.f32 %v4885_v44, 0.0  ;;  %v4883_v7 = vadd.f32 %v4768_v31, %v4409_v50  ;;  %v15161_v5 = vld [vmem:[#allocation58_spill] sm:$0xff]  ;;  %v15164_v43 = vld [vmem:[#allocation55_spill] sm:$0xff]  ;;  %v15165_v31 = vld [vmem:[#allocation45_spill] sm:$0xff] }
 0x22b   : > { %v10967_v15 = vpop.f32.mrf.mxu0  ;;  %v2867_v44 = vadd.f32 %v15161_v5, %v14099_v54  ;;  %v14231_v28 = vadd.f32 %v15164_v43, %v15163_v30  ;;  %v14235_v16 = vadd.f32 %v15166_v55, %v15165_v31  ;;  %v15170_v25 = vld [vmem:[#allocation71_spill] sm:$0xff]  ;;  %v15171_v29 = vld [vmem:[#allocation73_spill] sm:$0xff]  ;;  %v10328_v43 = vpack.c.bf16 %v5432_v37, %v5432_v37 }
 0x22c   : > { %4950 = vst [vmem:[#allocation2 + $0x61] sm:$0xff] %v4917_v56  ;;  %v4915_v19 = vmax.f32 %v4883_v7, 0.0  ;;  %v4886_v50 = vadd.f32 %v10967_v15, %v4412_v14  ;;  %v15168_v56 = vld [vmem:[#allocation59_spill] sm:$0xff]  ;;  %v15169_v7 = vld [vmem:[#allocation82_spill] sm:$0xff]  ;;  %v3683_v63 = vadd.f32 %v15170_v25, %v14132_v52  ;;  %v3686_v59 = vadd.f32 %v15171_v29, %v14150_v13  ;;  %v5538_v55 = vld [vmem:[#allocation6 + $0x2c] sm:$0x1]  ;;  %v14252_v13 = vpop.f32.mrf.mxu1 }
 0x22d   : > { %v4771_v41 = vpop.f32.mrf.mxu0  ;;  %v14241_v14 = vadd.f32 %v15168_v56, %v15167_v34  ;;  %v4415_v54 = vadd.f32 %v15169_v7, %v3685_v10  ;;  %v15172_v15 = vld [vmem:[#allocation75_spill] sm:$0xff]  ;;  %v5539_v37 = vsel %vm13838_vm9, %v10328_v43, %v5538_v55 }
 0x22e   : > { %4948 = vst [vmem:[#allocation2 + $0x49] sm:$0xff] %v4915_v19  ;;  %v4918_v21 = vmax.f32 %v4886_v50, 0.0  ;;  %v4884_v8 = vadd.f32 %v4771_v41, %v4410_v38  ;;  %v3684_v26 = vadd.f32 %v15172_v15, %v14153_v20  ;;  %v5374_v48 = vld [vmem:[#allocation5 + $0x4] sm:$0x1]  ;;  %v15173_v41 = vld [vmem:[#allocation85_spill] sm:$0xff] }
 0x22f   : > { %v4980_v2 = vld [vmem:[#allocation2 + $0x30] ss:$2 sm:$0xff]  ;;  %v4982_v5 = vld [vmem:[#allocation2 + $0x40] ss:$2 sm:$0x1]  ;;  %v10970_v30 = vpop.f32.mrf.mxu0  ;;  %v4413_v52 = vadd.f32 %v15173_v41, %v3683_v63 }
 0x230   : > { %v10265_v10 = vpack.c.bf16 %v4980_v2, %v4980_v2  ;;  %v10266_v31 = vpack.c.bf16 %v4982_v5, %v4982_v5  ;;  %v5127_v19 = vld [vmem:[#allocation2 + $0x31] ss:$2 sm:$0xff]  ;;  %4951 = vst [vmem:[#allocation2 + $0x69] sm:$0xff] %v4918_v21  ;;  %v4916_v38 = vmax.f32 %v4884_v8, 0.0  ;;  %v4889_v50 = vadd.f32 %v10970_v30, %v4415_v54  ;;  %v15174_v34 = vld [vmem:[#allocation87_spill] sm:$0xff]  ;;  %v15176_v5 = vld [vmem:[#allocation52_spill] sm:$0xff] }
 0x231   : > { %v4416_v56 = vadd.f32 %v15174_v34, %v3686_v59  ;;  %v10283_v7 = vpack.c.bf16 %v5127_v19, %v5127_v19  ;;  %v5266_v20 = vld [vmem:[#allocation2 + $0x18] ss:$2 sm:$0xff]  ;;  %v5268_v25 = vld [vmem:[#allocation2 + $0x28] ss:$2 sm:$0x1]  ;;  %v4784_v29 = vpop.f32.mrf.mxu0  ;;  %v15177_v30 = vld [vmem:[#allocation61_spill] sm:$0xff] }
 0x232   : > { %5090 = vst [vmem:[#allocation3 + $0x8] sm:$0xf] %v10265_v10  ;;  %v5092_v21 = vsel %vm13838_vm9, %v10266_v31, %v5091_v47  ;;  %v10299_v8 = vpack.c.bf16 %v5266_v20, %v5266_v20  ;;  %v10300_v54 = vpack.c.bf16 %v5268_v25, %v5268_v25  ;;  %v5410_v15 = vld [vmem:[#allocation2 + $0x19] ss:$2 sm:$0xff]  ;;  %4949 = vst [vmem:[#allocation2 + $0x51] sm:$0xff] %v4916_v38  ;;  %v4921_v63 = vmax.f32 %v4889_v50, 0.0 }
 0x233   : > { %5540 = vst [vmem:[#allocation6 + $0x2c] sm:$0x1] %v5539_v37  ;;  %v15175_v59 = vld [vmem:[#allocation60_spill] sm:$0xff]  ;;  %v14263_v19 = vadd.f32 %v15177_v30, %v15176_v5  ;;  %5093 = vst [vmem:[#allocation3 + $0xc] sm:$0x1] %v5092_v21  ;;  %v10317_v43 = vpack.c.bf16 %v5410_v15, %v5410_v15  ;;  %v4887_v10 = vadd.f32 %v4784_v29, %v4413_v52  ;;  %v10971_v55 = vpop.f32.mrf.mxu0  ;;  %v15178_v47 = vld [vmem:[#allocation77_spill] sm:$0xff] }
 0x234   : > { %v14259_v2 = vadd.f32 %v15175_v59, %v2863_v24  ;;  %5234 = vst [vmem:[#allocation4 + $0x8] sm:$0xf] %v10283_v7  ;;  %v3689_v31 = vadd.f32 %v15178_v47, %v14157_v3  ;;  %v15179_v41 = vld [vmem:[#allocation90_spill] sm:$0xff]  ;;  %5373 = vst [vmem:[#allocation5] sm:$0xf] %v10299_v8  ;;  %v5375_v38 = vsel %vm13838_vm9, %v10300_v54, %v5374_v48  ;;  %v15182_v37 = vld [vmem:[#allocation56_spill] sm:$0xff]  ;;  %v14281_v3 = vpop.f32.mrf.mxu1 }
 0x235   : > { %v4414_v34 = vadd.f32 %v15179_v41, %v3684_v26  ;;  %4954 = vst [vmem:[#allocation2 + $0x91] sm:$0xff] %v4921_v63  ;;  %v4890_v24 = vadd.f32 %v10971_v55, %v4416_v56  ;;  %v15180_v50 = vld [vmem:[#allocation54_spill] sm:$0xff]  ;;  %v15183_v7 = vld [vmem:[#allocation63_spill] sm:$0xff]  ;;  %v15184_v52 = vld [vmem:[#allocation65_spill] sm:$0xff]  ;;  %v4919_v26 = vmax.f32 %v4887_v10, 0.0  ;;  %v4787_v8 = vpop.f32.mrf.mxu0 }
 0x236   : > { %v15181_v20 = vld [vmem:[#allocation62_spill] sm:$0xff]  ;;  %v14276_v21 = vadd.f32 %v15183_v7, %v15182_v37  ;;  %v14279_v29 = vadd.f32 %v15184_v52, %v2867_v44  ;;  %5376 = vst [vmem:[#allocation5 + $0x4] sm:$0x1] %v5375_v38  ;;  %5517 = vst [vmem:[#allocation6] sm:$0xf] %v10317_v43  ;;  %v15186_v54 = vld [vmem:[#allocation93_spill] sm:$0xff] }
 0x237   : > { %v14272_v25 = vadd.f32 %v15181_v20, %v15180_v50  ;;  %v15185_v48 = vld [vmem:[#allocation78_spill] sm:$0xff]  ;;  %v4419_v15 = vadd.f32 %v15186_v54, %v3689_v31  ;;  %v5095_v63 = vld [vmem:[#allocation3 + $0x14] sm:$0x1]  ;;  %v4922_v59 = vmax.f32 %v4890_v24, 0.0  ;;  %v4888_v5 = vadd.f32 %v4787_v8, %v4414_v34  ;;  %v15187_v55 = vld [vmem:[#allocation80_spill] sm:$0xff]  ;;  %4952 = vst [vmem:[#allocation2 + $0x79] sm:$0xff] %v4919_v26 }
 0x238   : > { %v3687_v56 = vadd.f32 %v15185_v48, %v14165_v6  ;;  %v5436_v30 = vld [vmem:[#allocation2 + $0x149] ss:$2 sm:$0x1]  ;;  %v3690_v47 = vadd.f32 %v15187_v55, %v14169_v45  ;;  %v15188_v44 = vld [vmem:[#allocation81_spill] sm:$0xff]  ;;  %v15189_v38 = vld [vmem:[#allocation83_spill] sm:$0xff]  ;;  %v10974_v6 = vpop.f32.mrf.mxu0  ;;  %v14294_v55 = vpop.f32.mrf.mxu1 }
 0x239   : > { %v3688_v41 = vadd.f32 %v15188_v44, %v14180_v58  ;;  %v3693_v43 = vadd.f32 %v15189_v38, %v14184_v62  ;;  %v4984_v10 = vld [vmem:[#allocation2 + $0x60] ss:$2 sm:$0xff]  ;;  %v4986_v50 = vld [vmem:[#allocation2 + $0x70] ss:$2 sm:$0x1]  ;;  %v10330_v37 = vpack.c.bf16 %v5436_v30, %v5436_v30  ;;  %4955 = vst [vmem:[#allocation2 + $0x99] sm:$0xff] %v4922_v59  ;;  %v4893_v52 = vadd.f32 %v10974_v6, %v4419_v15 }
 0x23a   : > { %v5378_v20 = vld [vmem:[#allocation5 + $0xc] sm:$0x1]  ;;  %v10267_v31 = vpack.c.bf16 %v4984_v10, %v4984_v10  ;;  %v10268_v7 = vpack.c.bf16 %v4986_v50, %v4986_v50  ;;  %v5131_v24 = vld [vmem:[#allocation2 + $0x61] ss:$2 sm:$0xff]  ;;  %v4920_v34 = vmax.f32 %v4888_v5, 0.0  ;;  %v4800_v12 = vpop.f32.mrf.mxu0 }
 0x23b   : > { %v5542_v8 = vld [vmem:[#allocation6 + $0x34] sm:$0x1]  ;;  %v15190_v45 = vld [vmem:[#allocation96_spill] sm:$0xff]  ;;  %v15191_v54 = vld [vmem:[#allocation99_spill] sm:$0xff]  ;;  %v10285_v62 = vpack.c.bf16 %v5131_v24, %v5131_v24  ;;  %v4418_v50 = vadd.f32 %v14080_v27, %v3688_v41 }
 0x23c   : > { %v4417_v48 = vadd.f32 %v15190_v45, %v3687_v56  ;;  %v4420_v58 = vadd.f32 %v15191_v54, %v3690_v47  ;;  %v5270_v44 = vld [vmem:[#allocation2 + $0x48] ss:$2 sm:$0xff]  ;;  %v5272_v38 = vld [vmem:[#allocation2 + $0x58] ss:$2 sm:$0x1]  ;;  %v5543_v26 = vsel %vm13838_vm9, %v10330_v37, %v5542_v8  ;;  %v5096_v59 = vsel %vm13838_vm9, %v10268_v7, %v5095_v63  ;;  %4953 = vst [vmem:[#allocation2 + $0x81] sm:$0xff] %v4920_v34  ;;  %v10975_v37 = vpop.f32.mrf.mxu0 }
 0x23d   : > { %5094 = vst [vmem:[#allocation3 + $0x10] sm:$0xf] %v10267_v31  ;;  %v10301_v5 = vpack.c.bf16 %v5270_v44, %v5270_v44  ;;  %v10302_v15 = vpack.c.bf16 %v5272_v38, %v5272_v38  ;;  %v5414_v30 = vld [vmem:[#allocation2 + $0x49] ss:$2 sm:$0xff]  ;;  %v4925_v56 = vmax.f32 %v4893_v52, 0.0 }
 0x23e   : > { %5544 = vst [vmem:[#allocation6 + $0x34] sm:$0x1] %v5543_v26  ;;  %v15192_v47 = vld [vmem:[#allocation84_spill] sm:$0xff]  ;;  %5097 = vst [vmem:[#allocation3 + $0x14] sm:$0x1] %v5096_v59  ;;  %v10319_v6 = vpack.c.bf16 %v5414_v30, %v5414_v30  ;;  %v4891_v24 = vadd.f32 %v4800_v12, %v4417_v48  ;;  %v4894_v7 = vadd.f32 %v10975_v37, %v4420_v58  ;;  %v14310_v48 = vpop.f32.mrf.mxu1 }
 0x23f   : > { %v3691_v10 = vadd.f32 %v15192_v47, %v14188_v61  ;;  %5238 = vst [vmem:[#allocation4 + $0x10] sm:$0xf] %v10285_v62  ;;  %v11509_v31 = vld [vmem:[#allocation4] ss:$8 sps:$4 sm:$0xff]   ;;  %5377 = vst [vmem:[#allocation5 + $0x8] sm:$0xf] %v10301_v5  ;;  %v5379_v63 = vsel %vm13838_vm9, %v10302_v15, %v5378_v20  ;;  %v4423_v12 = vadd.f32 %v14114_v1, %v3693_v43  ;;  %v4803_v20 = vpop.f32.mrf.mxu0 }
 0x240   : > { %v5878_v8 = vld [vmem:[#allocation3 + $0x8] sm:$0xf]  ;;  %4958 = vst [vmem:[#allocation2 + $0xc1] sm:$0xff] %v4925_v56  ;;  %v5879_v34 = vld [vmem:[#allocation3 + $0xc] sm:$0x1]  ;;  %v15194_v27 = vld [vmem:[#allocation88_spill] sm:$0xff]  ;;  %11008 = vmatprep.mubr.bf16.mxu1 %v11509_v31  ;;  %v4892_v38 = vadd.f32 %v4803_v20, %v4418_v50 }
 0x241   : > { %v5907_v52 = vshrl.u32 %v5878_v8, 16  ;;  %v5910_v45 = vshll.u32 %v5878_v8, 16  ;;  %v15193_v61 = vld [vmem:[#allocation86_spill] sm:$0xff]  ;;  %v3692_v41 = vadd.f32 %v15194_v27, %v14199_v22  ;;  %5380 = vst [vmem:[#allocation5 + $0xc] sm:$0x1] %v5379_v63  ;;  %v4923_v62 = vmax.f32 %v4891_v24, 0.0  ;;  %v10978_v47 = vpop.f32.mrf.mxu0 }
 0x242   : > { %v3694_v54 = vadd.f32 %v15193_v61, %v14196_v0  ;;  %5521 = vst [vmem:[#allocation6 + $0x8] sm:$0xf] %v10319_v6  ;;  %v5099_v44 = vld [vmem:[#allocation3 + $0x1c] sm:$0x1]  ;;  %v4926_v58 = vmax.f32 %v4894_v7, 0.0  ;;  %v15195_v5 = vld [vmem:[#allocation89_spill] sm:$0xff]  ;;  %v4421_v63 = vadd.f32 %v14137_v18, %v3691_v10  ;;  %v14324_v7 = vpop.f32.mrf.mxu1 }
 0x243   : > { %v5909_v26 = vrot.slane %v5907_v52, 4  ;;  %v5912_v59 = vrot.slane %v5910_v45, 5  ;;  %v3697_v0 = vadd.f32 %v15195_v5, %v14211_v46  ;;  %v15196_v15 = vld [vmem:[#allocation91_spill] sm:$0xff]  ;;  %v15197_v1 = vld [vmem:[#allocation92_spill] sm:$0xff]  ;;  %v4988_v30 = vld [vmem:[#allocation2 + $0x90] ss:$2 sm:$0xff]  ;;  %v4897_v46 = vadd.f32 %v10978_v47, %v4423_v12  ;;  %v4816_v61 = vpop.f32.mrf.mxu0 }
 0x244   : > { %v14316_v22 = vadd.f32 %v15196_v15, %v14215_v49  ;;  %v14320_v43 = vadd.f32 %v15197_v1, %v14219_v23  ;;  %v4990_v56 = vld [vmem:[#allocation2 + $0xa0] ss:$2 sm:$0x1]  ;;  %4956 = vst [vmem:[#allocation2 + $0xa9] sm:$0xff] %v4923_v62  ;;  %v5916_v6 = vshll.u32 %v5879_v34, 16  ;;  %v10269_v24 = vpack.c.bf16 %v4988_v30, %v4988_v30  ;;  %4959 = vst [vmem:[#allocation2 + $0xc9] sm:$0xff] %v4926_v58 }
 0x245   : > { %v10270_v50 = vpack.c.bf16 %v4990_v56, %v4990_v56  ;;  %v5135_v37 = vld [vmem:[#allocation2 + $0x91] ss:$2 sm:$0xff]  ;;  %v5382_v31 = vld [vmem:[#allocation5 + $0x14] sm:$0x1]  ;;  %v4924_v8 = vmax.f32 %v4892_v38, 0.0  ;;  %v4424_v49 = vadd.f32 %v14171_v40, %v3694_v54  ;;  %v5913_v27 = vor.u32 %v5912_v59, %v5909_v26  ;;  %v10979_v10 = vpop.f32.mrf.mxu0  ;;  %v14334_v56 = vpop.f32.mrf.mxu1 }
 0x246   : > { %v10287_v23 = vpack.c.bf16 %v5135_v37, %v5135_v37  ;;  %v5274_v52 = vld [vmem:[#allocation2 + $0x78] ss:$2 sm:$0xff]  ;;  %v5276_v45 = vld [vmem:[#allocation2 + $0x88] ss:$2 sm:$0x1]  ;;  %v4929_v12 = vmax.f32 %v4897_v46, 0.0  ;;  %v4895_v40 = vadd.f32 %v4816_v61, %v4421_v63  ;;  %v4422_v26 = vadd.f32 %v14201_v33, %v3692_v41 }
 0x247   : > { %5098 = vst [vmem:[#allocation3 + $0x18] sm:$0xf] %v10269_v24  ;;  %v5100_v34 = vsel %vm13838_vm9, %v10270_v50, %v5099_v44  ;;  %v10303_v62 = vpack.c.bf16 %v5274_v52, %v5274_v52  ;;  %v10304_v20 = vpack.c.bf16 %v5276_v45, %v5276_v45  ;;  %v5418_v58 = vld [vmem:[#allocation2 + $0x79] ss:$2 sm:$0xff]  ;;  %4957 = vst [vmem:[#allocation2 + $0xb1] sm:$0xff] %v4924_v8  ;;  %v5914_v54 = vrot.slane %v5913_v27, 4 }
 0x248   : > { %5101 = vst [vmem:[#allocation3 + $0x1c] sm:$0x1] %v5100_v34  ;;  %5242 = vst [vmem:[#allocation4 + $0x18] sm:$0xf] %v10287_v23  ;;  %v10321_v18 = vpack.c.bf16 %v5418_v58, %v5418_v58  ;;  %v5918_v38 = vrot.slane %v5916_v6, 5  ;;  %v4898_v59 = vadd.f32 %v10979_v10, %v4424_v49  ;;  %v4427_v30 = vadd.f32 %v14237_v57, %v3697_v0  ;;  %v4819_v6 = vpop.f32.mrf.mxu0  ;;  %v15198_v0 = vld [vmem:[#allocation94_spill] sm:$0xff] }
 0x249   : > { %v5880_v5 = vld [vmem:[#allocation3 + $0x10] sm:$0xf]  ;;  %v14328_v15 = vld [vmem:[#allocation3 + $0x14] sm:$0x1]  ;;  %5381 = vst [vmem:[#allocation5 + $0x10] sm:$0xf] %v10303_v62  ;;  %v5383_v44 = vsel %vm13838_vm9, %v10304_v20, %v5382_v31  ;;  %v4896_v37 = vadd.f32 %v4819_v6, %v4422_v26  ;;  %v3696_v8 = vadd.f32 %v15198_v0, %v14227_v36  ;;  %v14358_v20 = vpop.f32.mrf.mxu1 }
 0x24a   : > { %4962 = vst [vmem:[#allocation2 + $0xf1] sm:$0xff] %v4929_v12  ;;  %v5921_v1 = vshrl.u32 %v5880_v5, 16  ;;  %5384 = vst [vmem:[#allocation5 + $0x14] sm:$0x1] %v5383_v44  ;;  %v4927_v47 = vmax.f32 %v4895_v40, 0.0  ;;  %v5919_v24 = vsel %vm11926_vm3, %v5914_v54, %v5918_v38  ;;  %v5924_v50 = vshll.u32 %v5880_v5, 16  ;;  %v10982_v61 = vpop.f32.mrf.mxu0 }
 0x24b   : > { %5525 = vst [vmem:[#allocation6 + $0x10] sm:$0xf] %v10321_v18  ;;  %v5103_v33 = vld [vmem:[#allocation3 + $0x24] sm:$0x1]  ;;  %v4930_v41 = vmax.f32 %v4898_v59, 0.0  ;;  %v10080_v31 = vcombine.low %v5905_v39, %v5919_v24  ;;  %v5930_v57 = vshll.u32 %v14328_v15, 16  ;;  %v4901_v36 = vadd.f32 %v10982_v61, %v4427_v30 }
 0x24c   : > { %v15199_v46 = vld [vmem:[#allocation95_spill] sm:$0xff]  ;;  %v15200_v49 = vld [vmem:[#allocation97_spill] sm:$0xff]  ;;  %4960 = vst [vmem:[#allocation2 + $0xd9] sm:$0xff] %v4927_v47  ;;  %v14352_v27 = vrot.slane %v5921_v1, 4  ;;  %v5386_v34 = vld [vmem:[#allocation5 + $0x1c] sm:$0x1]  ;;  %v4832_v40 = vpop.f32.mrf.mxu0  ;;  %v4426_v26 = vadd.f32 %v14294_v55, %v3696_v8 }
 0x24d   : > { %v3701_v63 = vadd.f32 %v15199_v46, %v14231_v28  ;;  %v14350_v23 = vadd.f32 %v15200_v49, %v14235_v16  ;;  %v4992_v52 = vld [vmem:[#allocation2 + $0xc0] ss:$2 sm:$0xff]  ;;  %v4994_v45 = vld [vmem:[#allocation2 + $0xd0] ss:$2 sm:$0x1]  ;;  %4963 = vst [vmem:[#allocation2 + $0xf9] sm:$0xff] %v4930_v41  ;;  %11056 = vmatprep.mubr.bf16.mxu0 %v10080_v31  ;;  %v4425_v28 = vadd.f32 %v14252_v13, %v14316_v22 }
 0x24e   : > { %v10271_v11 = vpack.c.bf16 %v4992_v52, %v4992_v52  ;;  %v10272_v42 = vpack.c.bf16 %v4994_v45, %v4994_v45  ;;  %v5139_v39 = vld [vmem:[#allocation2 + $0xc1] ss:$2 sm:$0xff]  ;;  %v4928_v62 = vmax.f32 %v4896_v37, 0.0  ;;  %v4428_v16 = vadd.f32 %v14281_v3, %v14320_v43  ;;  %v5278_v12 = vld [vmem:[#allocation2 + $0xa8] ss:$2 sm:$0xff]  ;;  %v15201_v3 = vld [vmem:[#allocation98_spill] sm:$0xff]  ;;  %v10983_v1 = vpop.f32.mrf.mxu0 }
 0x24f   : > { %v10289_v58 = vpack.c.bf16 %v5139_v39, %v5139_v39  ;;  %v5280_v18 = vld [vmem:[#allocation2 + $0xb8] ss:$2 sm:$0x1]  ;;  %v14360_v10 = vrot.slane %v5924_v50, 5  ;;  %v10305_v38 = vpack.c.bf16 %v5278_v12, %v5278_v12  ;;  %v5422_v15 = vld [vmem:[#allocation2 + $0xa9] ss:$2 sm:$0xff]  ;;  %v3702_v43 = vadd.f32 %v15201_v3, %v14241_v14  ;;  %v14372_v14 = vpop.f32.mrf.mxu1 }
 0x250   : > { %5102 = vst [vmem:[#allocation3 + $0x20] sm:$0xf] %v10271_v11  ;;  %v5104_v54 = vsel %vm13838_vm9, %v10272_v42, %v5103_v33  ;;  %v10306_v5 = vpack.c.bf16 %v5280_v18, %v5280_v18  ;;  %4961 = vst [vmem:[#allocation2 + $0xe1] sm:$0xff] %v4928_v62  ;;  %v4933_v13 = vmax.f32 %v4901_v36, 0.0  ;;  %v14364_v22 = vld [vmem:[#allocation7 + $0x30] sm:$0xff]   ;;  %v10323_v44 = vpack.c.bf16 %v5422_v15, %v5422_v15  ;;  %v4835_v31 = vpop.f32.mrf.mxu0  ;;  %v11521_v61 = vld [vmem:[#allocation7 + $0x28] sm:$0xff]  }
 0x251   : > { %5105 = vst [vmem:[#allocation3 + $0x24] sm:$0x1] %v5104_v54  ;;  %5246 = vst [vmem:[#allocation4 + $0x20] sm:$0xf] %v10289_v58  ;;  %v4899_v59 = vadd.f32 %v4832_v40, %v4425_v28  ;;  %v11516_v30 = vld [vmem:[#allocation4 + $0x10] ss:$8 sps:$4 sm:$0xff]   ;;  %v4431_v24 = vadd.f32 %v14310_v48, %v3701_v63  ;;  %v4902_v33 = vadd.f32 %v10983_v1, %v4428_v16 }
 0x252   : > { %v5882_v47 = vld [vmem:[#allocation3 + $0x18] sm:$0xf]  ;;  %v5883_v6 = vld [vmem:[#allocation3 + $0x1c] sm:$0x1]  ;;  %5385 = vst [vmem:[#allocation5 + $0x18] sm:$0xf] %v10305_v38  ;;  %v5387_v50 = vsel %vm13838_vm9, %v10306_v5, %v5386_v34  ;;  %11009 = vmatmul.mubr.bf16.vlgmr.msra.gmra.mxu1 %v11516_v30  ;;  %v5927_v0 = vor.u32 %v14360_v10, %v14352_v27  ;;  %v4900_v63 = vadd.f32 %v4835_v31, %v4426_v26  ;;  %v10986_v36 = vpop.f32.mrf.mxu0 }
 0x253   : > { %4966 = vst [vmem:[#allocation2 + $0x121] sm:$0xff] %v4933_v13  ;;  %v5935_v41 = vshrl.u32 %v5882_v47, 16  ;;  %5388 = vst [vmem:[#allocation5 + $0x1c] sm:$0x1] %v5387_v50  ;;  %v5107_v55 = vld [vmem:[#allocation3 + $0x2c] sm:$0x1]  ;;  %v3705_v39 = vadd.f32 %v14072_v35, %v14263_v19  ;;  %v4429_v34 = vadd.f32 %v14324_v7, %v14350_v23  ;;  %v4432_v40 = vadd.f32 %v14334_v56, %v3702_v43  ;;  %v14387_v35 = vpop.f32.mrf.mxu1 }
 0x254   : > { %5529 = vst [vmem:[#allocation6 + $0x18] sm:$0xf] %v10323_v44  ;;  %v4931_v37 = vmax.f32 %v4899_v59, 0.0  ;;  %v14376_v8 = vrot.slane %v5930_v57, 5  ;;  %v5938_v48 = vshll.u32 %v5882_v47, 16  ;;  %v4934_v46 = vmax.f32 %v4902_v33, 0.0  ;;  %v4848_v10 = vpop.f32.mrf.mxu0 }
 0x255   : > { %v15202_v49 = vld [vmem:[#allocation47_spill] sm:$0xff]  ;;  %v5937_v52 = vrot.slane %v5935_v41, 4  ;;  %v5944_v45 = vshll.u32 %v5883_v6, 16  ;;  %v15203_v11 = vld [vmem:[#allocation100_spill] sm:$0xff]  ;;  %v4996_v27 = vld [vmem:[#allocation2 + $0xf0] ss:$2 sm:$0xff]  ;;  %v4903_v43 = vadd.f32 %v4848_v10, %v4429_v34 }
 0x256   : > { %11017 = vmatpush3.bf16.msra.mxu1 %v15202_v49  ;;  %v3700_v42 = vadd.f32 %v15203_v11, %v14259_v2  ;;  %v4998_v57 = vld [vmem:[#allocation2 + $0x100] ss:$2 sm:$0x1]  ;;  %v5390_v62 = vld [vmem:[#allocation5 + $0x24] sm:$0x1]  ;;  %4964 = vst [vmem:[#allocation2 + $0x109] sm:$0xff] %v4931_v37  ;;  %v10273_v16 = vpack.c.bf16 %v4996_v27, %v4996_v27  ;;  %v4905_v2 = vadd.f32 %v10986_v36, %v4431_v24  ;;  %v10987_v44 = vpop.f32.mrf.mxu0 }
 0x257   : > { %v5940_v28 = vrot.slane %v5938_v48, 5  ;;  %11018 = vmatprep.subr.bf16.mxu1 %v14364_v22  ;;  %v10274_v58 = vpack.c.bf16 %v4998_v57, %v4998_v57  ;;  %v5143_v12 = vld [vmem:[#allocation2 + $0xf1] ss:$2 sm:$0xff]  ;;  %4967 = vst [vmem:[#allocation2 + $0x129] sm:$0xff] %v4934_v46  ;;  %v4932_v18 = vmax.f32 %v4900_v63, 0.0  ;;  %v5928_v54 = vrot.slane %v5927_v0, 4 }
 0x258   : > { %v10291_v19 = vpack.c.bf16 %v5143_v12, %v5143_v12  ;;  %v5282_v7 = vld [vmem:[#allocation2 + $0xd8] ss:$2 sm:$0xff]  ;;  %v5284_v23 = vld [vmem:[#allocation2 + $0xe8] ss:$2 sm:$0x1]  ;;  %v4937_v26 = vmax.f32 %v4905_v2, 0.0  ;;  %v4430_v6 = vadd.f32 %v14358_v20, %v3700_v42  ;;  %v4906_v50 = vadd.f32 %v10987_v44, %v4432_v40 }
 0x259   : > { %v5941_v38 = vor.u32 %v5940_v28, %v5937_v52  ;;  %5106 = vst [vmem:[#allocation3 + $0x28] sm:$0xf] %v10273_v16  ;;  %v5108_v5 = vsel %vm13838_vm9, %v10274_v58, %v5107_v55  ;;  %v10307_v15 = vpack.c.bf16 %v5282_v7, %v5282_v7  ;;  %v10308_v13 = vpack.c.bf16 %v5284_v23, %v5284_v23  ;;  %v5426_v3 = vld [vmem:[#allocation2 + $0xd9] ss:$2 sm:$0xff]  ;;  %v11524_v30 = vld [vmem:[#allocation7 + $0x20] sm:$0xff]   ;;  %v4851_v55 = vpop.f32.mrf.mxu0  ;;  %v11670_v2 = vld [vmem:[#allocation7 + $0x138] sm:$0xff]  }
 0x25a   : > { %4965 = vst [vmem:[#allocation2 + $0x111] sm:$0xff] %v4932_v18  ;;  %11019 = vmatpush3.bf16.msra.mxu1 %v14364_v22  ;;  %5109 = vst [vmem:[#allocation3 + $0x2c] sm:$0x1] %v5108_v5  ;;  %v10325_v56 = vpack.c.bf16 %v5426_v3, %v5426_v3  ;;  %v5946_v1 = vrot.slane %v5944_v45, 5  ;;  %v5884_v47 = vld [vmem:[#allocation3 + $0x20] sm:$0xf]  ;;  %v10957_v22 = vpop.f32.mrf.mxu1  ;;  %v5933_v37 = vsel %vm11926_vm3, %v5928_v54, %v14376_v8 }
 0x25b   : > { %5250 = vst [vmem:[#allocation4 + $0x28] sm:$0xf] %v10291_v19  ;;  %v5942_v59 = vrot.slane %v5941_v38, 4  ;;  %11020 = vmatprep.subr.bf16.mxu1 %v11521_v61  ;;  %5389 = vst [vmem:[#allocation5 + $0x20] sm:$0xf] %v10307_v15  ;;  %v5391_v24 = vsel %vm13838_vm9, %v10308_v13, %v5390_v62  ;;  %v5949_v33 = vshrl.u32 %v5884_v47, 16  ;;  %v4435_v0 = vadd.f32 %v14372_v14, %v3705_v39  ;;  %v10990_v39 = vpop.f32.mrf.mxu0 }
 0x25c   : > { %4970 = vst [vmem:[#allocation2 + $0x151] sm:$0xff] %v4937_v26  ;;  %5392 = vst [vmem:[#allocation5 + $0x24] sm:$0x1] %v5391_v24  ;;  %v4935_v41 = vmax.f32 %v4903_v43, 0.0  ;;  %v5952_v20 = vshll.u32 %v5884_v47, 16  ;;  %v4938_v46 = vmax.f32 %v4906_v50, 0.0  ;;  %v4904_v63 = vadd.f32 %v4851_v55, %v4430_v6 }
 0x25d   : > { %5533 = vst [vmem:[#allocation6 + $0x20] sm:$0xf] %v10325_v56  ;;  %v5947_v31 = vsel %vm11926_vm3, %v5942_v59, %v5946_v1  ;;  %v5111_v48 = vld [vmem:[#allocation3 + $0x34] sm:$0x1]  ;;  %v14401_v45 = vld [vmem:[#allocation7 + $0x18] sm:$0xff]   ;;  %v3703_v11 = vadd.f32 %v14082_v4, %v14272_v25  ;;  %v3706_v8 = vadd.f32 %v14103_v53, %v14276_v21  ;;  %v3704_v42 = vadd.f32 %v14116_v60, %v14279_v29  ;;  %v14411_v25 = vld [vmem:[#allocation7 + $0x128] sm:$0xff]   ;;  %v4393_v29 = vpop.f32.mrf.mxu1  ;;  %v4864_v18 = vpop.f32.mrf.mxu0 }
 0x25e   : > { %v10081_v49 = vcombine.low %v5933_v37, %v5947_v31  ;;  %11021 = vmatpush3.bf16.msra.mxu1 %v11521_v61  ;;  %v11525_v52 = vld [vmem:[#allocation7 + $0x130] sm:$0xff]   ;;  %v5002_v27 = vld [vmem:[#allocation2 + $0x130] ss:$2 sm:$0x1]  ;;  %v5394_v14 = vld [vmem:[#allocation5 + $0x2c] sm:$0x1]  ;;  %v4909_v4 = vadd.f32 %v10990_v39, %v4435_v0 }
 0x25f   : > { %v5000_v34 = vld [vmem:[#allocation2 + $0x120] ss:$2 sm:$0xff]  ;;  %4968 = vst [vmem:[#allocation2 + $0x139] sm:$0xff] %v4935_v41  ;;  %11022 = vmatprep.subr.bf16.mxu1 %v11524_v30  ;;  %v14409_v57 = vrot.slane %v5949_v33, 4  ;;  %v10276_v62 = vpack.c.bf16 %v5002_v27, %v5002_v27  ;;  %v5147_v36 = vld [vmem:[#allocation2 + $0x121] ss:$2 sm:$0xff]  ;;  %v4433_v60 = vadd.f32 %v14387_v35, %v3703_v11  ;;  %v4436_v21 = vadd.f32 %v10957_v22, %v3706_v8  ;;  %v10991_v15 = vpop.f32.mrf.mxu0 }
 0x260   : > { %v10275_v61 = vpack.c.bf16 %v5000_v34, %v5000_v34  ;;  %4971 = vst [vmem:[#allocation2 + $0x159] sm:$0xff] %v4938_v46  ;;  %v4936_v28 = vmax.f32 %v4904_v63, 0.0  ;;  %11057 = vmatmul.mubr.bf16.vlgmr.msra.gmra.mxu0 %v10081_v49  ;;  %v14413_v53 = vld [vmem:[#allocation3 + $0x24] sm:$0x1]  ;;  %v10293_v16 = vpack.c.bf16 %v5147_v36, %v5147_v36  ;;  %v5954_v40 = vrot.slane %v5952_v20, 5  ;;  %v11528_v35 = vld [vmem:[#allocation7 + $0x10] sm:$0xff]  }
 0x261   : > { %v5286_v58 = vld [vmem:[#allocation2 + $0x108] ss:$2 sm:$0xff]  ;;  %v5288_v12 = vld [vmem:[#allocation2 + $0x118] ss:$2 sm:$0x1]  ;;  %11089 = vmatpush3.bf16.msra.mxu0 %v11670_v2  ;;  %v5112_v19 = vsel %vm13838_vm9, %v10276_v62, %v5111_v48  ;;  %v4941_v54 = vmax.f32 %v4909_v4, 0.0  ;;  %v4907_v5 = vadd.f32 %v4864_v18, %v4433_v60  ;;  %v4434_v56 = vadd.f32 %v4393_v29, %v3704_v42  ;;  %v4867_v6 = vpop.f32.mrf.mxu0 }
 0x262   : > { %5110 = vst [vmem:[#allocation3 + $0x30] sm:$0xf] %v10275_v61  ;;  %v10309_v7 = vpack.c.bf16 %v5286_v58, %v5286_v58  ;;  %v10310_v23 = vpack.c.bf16 %v5288_v12, %v5288_v12  ;;  %v5430_v10 = vld [vmem:[#allocation2 + $0x109] ss:$2 sm:$0xff]  ;;  %4969 = vst [vmem:[#allocation2 + $0x141] sm:$0xff] %v4936_v28  ;;  %11023 = vmatpush3.bf16.msra.mxu1 %v11524_v30  ;;  %11090 = vmatprep.subr.bf16.mxu0 %v11525_v52  ;;  %v5958_v50 = vshll.u32 %v14413_v53, 16 }
 0x263   : > { %5113 = vst [vmem:[#allocation3 + $0x34] sm:$0x1] %v5112_v19  ;;  %5254 = vst [vmem:[#allocation4 + $0x30] sm:$0xf] %v10293_v16  ;;  %v10327_v38 = vpack.c.bf16 %v5430_v10, %v5430_v10  ;;  %v11522_v13 = vld [vmem:[#allocation4 + $0x20] ss:$8 sps:$4 sm:$0xff]   ;;  %11024 = vmatprep.subr.bf16.mxu1 %v14401_v45  ;;  %v4910_v44 = vadd.f32 %v10991_v15, %v4436_v21  ;;  %v5955_v24 = vor.u32 %v5954_v40, %v14409_v57 }
 0x264   : > { %v5886_v3 = vld [vmem:[#allocation3 + $0x28] sm:$0xf]  ;;  %v5887_v26 = vld [vmem:[#allocation3 + $0x2c] sm:$0x1]  ;;  %5393 = vst [vmem:[#allocation5 + $0x28] sm:$0xf] %v10309_v7  ;;  %v5395_v43 = vsel %vm13838_vm9, %v10310_v23, %v5394_v14  ;;  %11012 = vmatprep.mubr.bf16.mxu1 %v11522_v13  ;;  %v4908_v41 = vadd.f32 %v4867_v6, %v4434_v56 }
 0x265   : > { %4974 = vst [vmem:[#allocation2 + $0x181] sm:$0xff] %v4941_v54  ;;  %v5963_v59 = vshrl.u32 %v5886_v3, 16  ;;  %v14421_v1 = vld [vmem:[#allocation4 + $0x8] sm:$0xf]  ;;  %5396 = vst [vmem:[#allocation5 + $0x2c] sm:$0x1] %v5395_v43  ;;  %11091 = vmatpush3.bf16.msra.mxu0 %v11525_v52 }
 0x266   : > { %5537 = vst [vmem:[#allocation6 + $0x28] sm:$0xf] %v10327_v38  ;;  %v5115_v30 = vld [vmem:[#allocation3 + $0x3c] sm:$0x1]  ;;  %v4939_v47 = vmax.f32 %v4907_v5, 0.0  ;;  %v5966_v33 = vshll.u32 %v5886_v3, 16  ;;  %11025 = vmatpush3.bf16.msra.mxu1 %v14401_v45  ;;  %11092 = vmatprep.subr.bf16.mxu0 %v14411_v25 }
 0x267   : > { %v4942_v22 = vmax.f32 %v4910_v44, 0.0  ;;  %v5965_v55 = vrot.slane %v5963_v59, 4  ;;  %v5972_v37 = vshll.u32 %v5887_v26, 16  ;;  %v11529_v31 = vld [vmem:[#allocation7 + $0x120] sm:$0xff]   ;;  %v11530_v20 = vld [vmem:[#allocation7 + $0x8] sm:$0xff]   ;;  %11026 = vmatprep.subr.bf16.mxu1 %v11528_v35  ;;  %v4940_v8 = vmax.f32 %v4908_v41, 0.0 }
 0x268   : > { %v5004_v0 = vld [vmem:[#allocation2 + $0x150] ss:$2 sm:$0xff]  ;;  %v5006_v48 = vld [vmem:[#allocation2 + $0x160] ss:$2 sm:$0x1]  ;;  %4972 = vst [vmem:[#allocation2 + $0x169] sm:$0xff] %v4939_v47 }
 0x269   : > { %v5398_v46 = vld [vmem:[#allocation5 + $0x34] sm:$0x1]  ;;  %v5968_v63 = vrot.slane %v5966_v33, 5  ;;  %v10277_v49 = vpack.c.bf16 %v5004_v0, %v5004_v0  ;;  %v10278_v52 = vpack.c.bf16 %v5006_v48, %v5006_v48  ;;  %v5151_v11 = vld [vmem:[#allocation2 + $0x151] ss:$2 sm:$0xff]  ;;  %4975 = vst [vmem:[#allocation2 + $0x189] sm:$0xff] %v4942_v22  ;;  %11093 = vmatpush3.bf16.msra.mxu0 %v14411_v25 }
 0x26a   : > { %v11532_v42 = vld [vmem:[#allocation7 + $0x118] sm:$0xff]   ;;  %v6189_v45 = vshrl.u32 %v14421_v1, 16  ;;  %v10295_v34 = vpack.c.bf16 %v5151_v11, %v5151_v11  ;;  %v5290_v27 = vld [vmem:[#allocation2 + $0x138] ss:$2 sm:$0xff]  ;;  %v5956_v39 = vrot.slane %v5955_v24, 4  ;;  %4973 = vst [vmem:[#allocation2 + $0x171] sm:$0xff] %v4940_v8  ;;  %11027 = vmatpush3.bf16.msra.mxu1 %v11528_v35  ;;  %11094 = vmatprep.subr.bf16.mxu0 %v11529_v31 }
 0x26b   : > { %v5292_v14 = vld [vmem:[#allocation2 + $0x148] ss:$2 sm:$0x1]  ;;  %v5969_v57 = vor.u32 %v5968_v63, %v5965_v55  ;;  %5114 = vst [vmem:[#allocation3 + $0x38] sm:$0xf] %v10277_v49  ;;  %v5116_v61 = vsel %vm13838_vm9, %v10278_v52, %v5115_v30  ;;  %v10311_v62 = vpack.c.bf16 %v5290_v27, %v5290_v27  ;;  %v5960_v60 = vrot.slane %v5958_v50, 5  ;;  %11028 = vmatprep.subr.bf16.mxu1 %v11530_v20 }
 0x26c   : > { %v10312_v36 = vpack.c.bf16 %v5292_v14, %v5292_v14  ;;  %v5434_v28 = vld [vmem:[#allocation2 + $0x139] ss:$2 sm:$0xff]  ;;  %5117 = vst [vmem:[#allocation3 + $0x3c] sm:$0x1] %v5116_v61  ;;  %5258 = vst [vmem:[#allocation4 + $0x38] sm:$0xf] %v10295_v34 }
 0x26d   : > { %v5888_v4 = vld [vmem:[#allocation3 + $0x30] sm:$0xf]  ;;  %v10329_v53 = vpack.c.bf16 %v5434_v28, %v5434_v28  ;;  %v5970_v21 = vrot.slane %v5969_v57, 4  ;;  %v5974_v29 = vrot.slane %v5972_v37, 5  ;;  %v11534_v16 = vld [vmem:[#allocation7] sm:$0xff]   ;;  %v5961_v18 = vsel %vm11926_vm3, %v5956_v39, %v5960_v60  ;;  %11095 = vmatpush3.bf16.msra.mxu0 %v11529_v31  ;;  %v14438_v10 = vld [vmem:[#allocation7 + $0xf8] sm:$0xff]  }
 0x26e   : > { %5397 = vst [vmem:[#allocation5 + $0x30] sm:$0xf] %v10311_v62  ;;  %v5399_v25 = vsel %vm13838_vm9, %v10312_v36, %v5398_v46  ;;  %v5977_v58 = vshrl.u32 %v5888_v4, 16  ;;  %v5980_v12 = vshll.u32 %v5888_v4, 16  ;;  %v6192_v40 = vshll.u32 %v14421_v1, 16  ;;  %11029 = vmatpush3.bf16.msra.mxu1 %v11530_v20  ;;  %11096 = vmatprep.subr.bf16.mxu0 %v11532_v42  ;;  %v11535_v23 = vld [vmem:[#allocation7 + $0x110] sm:$0xff]  }
 0x26f   : > { %5400 = vst [vmem:[#allocation5 + $0x34] sm:$0x1] %v5399_v25  ;;  %5541 = vst [vmem:[#allocation6 + $0x30] sm:$0xf] %v10329_v53  ;;  %v5975_v2 = vsel %vm11926_vm3, %v5970_v21, %v5974_v29  ;;  %v5119_v19 = vld [vmem:[#allocation3 + $0x44] sm:$0x1]  ;;  %11030 = vmatprep.subr.bf16.mxu1 %v11534_v16 }
 0x270   : > { %v10082_v7 = vcombine.low %v5961_v18, %v5975_v2  ;;  %v6177_v54 = vrot.slane %v6175_v17, 4  ;;  %v15204_v35 = vshll.u32 %v14123_v51, 16  ;;  %v5008_v5 = vld [vmem:[#allocation2 + $0x180] ss:$2 sm:$0xff]  ;;  %v5402_v13 = vld [vmem:[#allocation5 + $0x3c] sm:$0x1] }
 0x271   : > { %v5010_v15 = vld [vmem:[#allocation2 + $0x190] ss:$2 sm:$0x1]  ;;  %v14444_v3 = vrot.slane %v6189_v45, 4  ;;  %v10279_v26 = vpack.c.bf16 %v5008_v5, %v5008_v5  ;;  %v5155_v43 = vld [vmem:[#allocation2 + $0x181] ss:$2 sm:$0xff]  ;;  %11097 = vmatpush3.bf16.msra.mxu0 %v11532_v42 }
 0x272   : > { %v6180_v38 = vrot.slane %v15204_v35, 5  ;;  %v10280_v56 = vpack.c.bf16 %v5010_v15, %v5010_v15  ;;  %11060 = vmatprep.mubr.bf16.mxu0 %v10082_v7  ;;  %v11538_v44 = vld [vmem:[#allocation7 + $0x108] sm:$0xff]   ;;  %v5979_v59 = vrot.slane %v5977_v58, 4  ;;  %v5982_v1 = vrot.slane %v5980_v12, 5  ;;  %v5294_v6 = vld [vmem:[#allocation2 + $0x168] ss:$2 sm:$0xff]  ;;  %11031 = vmatpush3.bf16.msra.mxu1 %v11534_v16 }
 0x273   : > { %v6159_v30 = vld [vmem:[#allocation4 + $0x4] sm:$0x1]  ;;  %v10297_v47 = vpack.c.bf16 %v5155_v43, %v5155_v43  ;;  %v5296_v17 = vld [vmem:[#allocation2 + $0x178] ss:$2 sm:$0x1]  ;;  %v6194_v50 = vrot.slane %v6192_v40, 5  ;;  %v10313_v22 = vpack.c.bf16 %v5294_v6, %v5294_v6  ;;  %11098 = vmatprep.subr.bf16.mxu0 %v11535_v23  ;;  %11064 = vmatprep.subr.bf16.mxu1 %v14438_v10 }
 0x274   : > { %v11533_v24 = vld [vmem:[#allocation3] ss:$8 sps:$4 sm:$0xff]   ;;  %v5889_v51 = vld [vmem:[#allocation3 + $0x34] sm:$0x1]  ;;  %5118 = vst [vmem:[#allocation3 + $0x40] sm:$0xf] %v10279_v26  ;;  %v5120_v33 = vsel %vm13838_vm9, %v10280_v56, %v5119_v19  ;;  %v10314_v41 = vpack.c.bf16 %v5296_v17, %v5296_v17  ;;  %v5983_v46 = vor.u32 %v5982_v1, %v5979_v59  ;;  %v6181_v11 = vor.u32 %v6180_v38, %v6177_v54 }
 0x275   : > { %v5438_v55 = vld [vmem:[#allocation2 + $0x169] ss:$2 sm:$0xff]  ;;  %5121 = vst [vmem:[#allocation3 + $0x44] sm:$0x1] %v5120_v33  ;;  %5262 = vst [vmem:[#allocation4 + $0x40] sm:$0xf] %v10297_v47  ;;  %11099 = vmatpush3.bf16.msra.mxu0 %v11535_v23  ;;  %v6195_v61 = vor.u32 %v6194_v50, %v14444_v3 }
 0x276   : > { %v11531_v37 = vld [vmem:[#allocation4 + $0x30] ss:$8 sps:$4 sm:$0xff]   ;;  %v10331_v31 = vpack.c.bf16 %v5438_v55, %v5438_v55  ;;  %v5891_v0 = vld [vmem:[#allocation3 + $0x3c] sm:$0x1]  ;;  %5401 = vst [vmem:[#allocation5 + $0x38] sm:$0xf] %v10313_v22  ;;  %v5403_v48 = vsel %vm13838_vm9, %v10314_v41, %v5402_v13  ;;  %11100 = vmatprep.subr.bf16.mxu0 %v11538_v44 }
 0x277   : > { %v5890_v20 = vld [vmem:[#allocation3 + $0x38] sm:$0xf]  ;;  %11013 = vmatmul.mubr.bf16.gmra.mxu1 %v11531_v37  ;;  %5404 = vst [vmem:[#allocation5 + $0x3c] sm:$0x1] %v5403_v48  ;;  %v6161_v52 = vld [vmem:[#allocation4 + $0xc] sm:$0x1] }
 0x278   : > { %v5991_v63 = vshrl.u32 %v5890_v20, 16  ;;  %v5994_v49 = vshll.u32 %v5890_v20, 16  ;;  %5545 = vst [vmem:[#allocation6 + $0x38] sm:$0xf] %v10331_v31  ;;  %11032 = vmatprep.mubr.bf16.mxu1 %v11533_v24  ;;  %v6184_v8 = vshll.u32 %v6159_v30, 16  ;;  %v5986_v42 = vshll.u32 %v5889_v51, 16 }
 0x279   : > { %v6000_v27 = vshll.u32 %v5891_v0, 16  ;;  %v11542_v14 = vld [vmem:[#allocation7 + $0x100] sm:$0xff]   ;;  %v5984_v39 = vrot.slane %v5983_v46, 4  ;;  %v6198_v62 = vshll.u32 %v6161_v52, 16  ;;  %v6782_v36 = vld [vmem:[#allocation5 + $0x8] sm:$0xf]  ;;  %11101 = vmatpush3.bf16.msra.mxu0 %v11538_v44 }
 0x27a   : > { %v5993_v45 = vrot.slane %v5991_v63, 4  ;;  %v5996_v34 = vrot.slane %v5994_v49, 5  ;;  %v11541_v28 = vld [vmem:[#allocation7 + $0xf0] sm:$0xff]   ;;  %v6182_v4 = vrot.slane %v6181_v11, 4  ;;  %v6186_v53 = vrot.slane %v6184_v8, 5  ;;  %11102 = vmatprep.subr.bf16.mxu0 %v11542_v14  ;;  %v11545_v58 = vld [vmem:[#allocation7 + $0x1b8] sm:$0xff]  }
 0x27b   : > { %v6780_v60 = vld [vmem:[#allocation5] sm:$0xf]  ;;  %v5988_v29 = vrot.slane %v5986_v42, 5  ;;  %v6002_v25 = vrot.slane %v6000_v27, 5  ;;  %v11539_v12 = vld [vmem:[#allocation3 + $0x20] ss:$8 sps:$4 sm:$0xff]  }
 0x27c   : > { %v5997_v57 = vor.u32 %v5996_v34, %v5993_v45  ;;  %v11537_v21 = vld [vmem:[#allocation3 + $0x10] ss:$8 sps:$4 sm:$0xff]   ;;  %v6811_v18 = vshrl.u32 %v6782_v36, 16  ;;  %v6814_v2 = vshll.u32 %v6782_v36, 16  ;;  %v6196_v7 = vrot.slane %v6195_v61, 4  ;;  %v11543_v38 = vld [vmem:[#allocation7 + $0xe8] sm:$0xff]  }
 0x27d   : > { %v5989_v40 = vsel %vm11926_vm3, %v5984_v39, %v5988_v29  ;;  %v6200_v23 = vrot.slane %v6198_v62, 5  ;;  %v14456_v54 = vld [vmem:[#allocation4 + $0x14] sm:$0x1]  ;;  %v6797_v5 = vshrl.u32 %v6780_v60, 16  ;;  %v6800_v15 = vshll.u32 %v6780_v60, 16  ;;  %11103 = vmatpush3.bf16.msra.mxu0 %v11542_v14  ;;  %v11548_v1 = vld [vmem:[#allocation7 + $0xe0] sm:$0xff]  }
 0x27e   : > { %v5998_v16 = vrot.slane %v5997_v57, 4  ;;  %v11540_v13 = vld [vmem:[#allocation5] ss:$8 sps:$4 sm:$0xff]   ;;  %v14459_v3 = vld [vmem:[#allocation4 + $0x1c] sm:$0x1]  ;;  %11136 = vmatprep.subr.bf16.mxu0 %v11545_v58  ;;  %v6813_v26 = vrot.slane %v6811_v18, 4  ;;  %v6187_v43 = vsel %vm11926_vm3, %v6182_v4, %v6186_v53 }
 0x27f   : > { %11033 = vmatmul.mubr.bf16.vlgmr.msra.gmra.mxu1 %v11537_v21  ;;  %v6816_v56 = vrot.slane %v6814_v2, 5  ;;  %v6212_v44 = vshll.u32 %v14456_v54, 16  ;;  %v14466_v59 = vld [vmem:[#allocation4 + $0x24] sm:$0x1]  ;;  %v6799_v30 = vrot.slane %v6797_v5, 4  ;;  %v6802_v47 = vrot.slane %v6800_v15, 5 }
 0x280   : > { %v6003_v19 = vsel %vm11926_vm3, %v5998_v16, %v6002_v25  ;;  %11065 = vmatpush3.bf16.msra.mxu1 %v14438_v10  ;;  %11036 = vmatprep.mubr.bf16.mxu1 %v11539_v12  ;;  %v6201_v10 = vsel %vm11926_vm3, %v6196_v7, %v6200_v23  ;;  %v6226_v6 = vshll.u32 %v14459_v3, 16  ;;  %v11544_v17 = vld [vmem:[#allocation3 + $0x30] ss:$8 sps:$4 sm:$0xff]   ;;  %v6783_v24 = vld [vmem:[#allocation5 + $0xc] sm:$0x1]  ;;  %v6240_v55 = vshll.u32 %v14466_v59, 16 }
 0x281   : > { %v10083_v35 = vcombine.low %v5989_v40, %v6003_v19  ;;  %11066 = vmatprep.subr.bf16.mxu1 %v11541_v28  ;;  %v10092_v51 = vcombine.low %v6187_v43, %v6201_v10  ;;  %v11549_v50 = vld [vmem:[#allocation7 + $0x1b0] sm:$0xff]   ;;  %v6817_v22 = vor.u32 %v6816_v56, %v6813_v26  ;;  %v6164_v41 = vld [vmem:[#allocation4 + $0x18] sm:$0xf]  ;;  %v6162_v31 = vld [vmem:[#allocation4 + $0x10] sm:$0xf]  ;;  %v6803_v0 = vor.u32 %v6802_v47, %v6799_v30 }
 0x282   : > { %v6781_v33 = vld [vmem:[#allocation5 + $0x4] sm:$0x1]  ;;  %v11546_v37 = vld [vmem:[#allocation5 + $0x10] ss:$8 sps:$4 sm:$0xff]   ;;  %v11550_v20 = vld [vmem:[#allocation7 + $0xd8] sm:$0xff]   ;;  %v6820_v48 = vshll.u32 %v6783_v24, 16 }
 0x283   : > { %11061 = vmatmul.mubr.bf16.gmra.mxu0 %v10083_v35  ;;  %v6168_v46 = vld [vmem:[#allocation4 + $0x28] sm:$0xf]  ;;  %v6217_v49 = vshrl.u32 %v6164_v41, 16  ;;  %v6220_v52 = vshll.u32 %v6164_v41, 16  ;;  %v6169_v11 = vld [vmem:[#allocation4 + $0x2c] sm:$0x1] }
 0x284   : > { %11104 = vmatprep.mubr.bf16.mxu0 %v11540_v13  ;;  %11067 = vmatpush3.bf16.msra.mxu1 %v11541_v28  ;;  %v11547_v63 = vld [vmem:[#allocation5 + $0x20] ss:$8 sps:$4 sm:$0xff]   ;;  %v6806_v8 = vshll.u32 %v6781_v33, 16  ;;  %v6818_v42 = vrot.slane %v6817_v22, 4  ;;  %v6203_v45 = vshrl.u32 %v6162_v31, 16  ;;  %v6206_v34 = vshll.u32 %v6162_v31, 16 }
 0x285   : > { %11068 = vmatprep.subr.bf16.mxu1 %v11543_v38  ;;  %v6166_v27 = vld [vmem:[#allocation4 + $0x20] sm:$0xf]  ;;  %v6245_v14 = vshrl.u32 %v6168_v46, 16  ;;  %v6248_v39 = vshll.u32 %v6168_v46, 16  ;;  %v6804_v61 = vrot.slane %v6803_v0, 4  ;;  %v6822_v62 = vrot.slane %v6820_v48, 5 }
 0x286   : > { %v11551_v57 = vld [vmem:[#allocation7 + $0x1a8] sm:$0xff]   ;;  %v11553_v36 = vld [vmem:[#allocation7 + $0xd0] sm:$0xff]   ;;  %v6171_v28 = vld [vmem:[#allocation4 + $0x34] sm:$0x1]  ;;  %v6219_v4 = vrot.slane %v6217_v49, 4  ;;  %v6222_v53 = vrot.slane %v6220_v52, 5 }
 0x287   : > { %11037 = vmatmul.mubr.bf16.gmra.mxu1 %v11544_v17  ;;  %v6231_v60 = vshrl.u32 %v6166_v27, 16  ;;  %v6234_v21 = vshll.u32 %v6166_v27, 16  ;;  %v6808_v29 = vrot.slane %v6806_v8, 5  ;;  %v6823_v16 = vsel %vm11926_vm3, %v6818_v42, %v6822_v62  ;;  %v11552_v19 = vld [vmem:[#allocation5 + $0x30] ss:$8 sps:$4 sm:$0xff]  }
 0x288   : > { %11069 = vmatpush3.bf16.msra.mxu1 %v11543_v38  ;;  %11080 = vmatprep.mubr.bf16.mxu1 %v10092_v51  ;;  %v6254_v25 = vshll.u32 %v6169_v11, 16  ;;  %v6205_v12 = vrot.slane %v6203_v45, 4  ;;  %v6208_v18 = vrot.slane %v6206_v34, 5  ;;  %v6247_v2 = vrot.slane %v6245_v14, 4  ;;  %v11554_v23 = vld [vmem:[#allocation7 + $0x1a0] sm:$0xff]   ;;  %v11555_v5 = vld [vmem:[#allocation7 + $0xc8] sm:$0xff]  }
 0x289   : > { %11070 = vmatprep.subr.bf16.mxu1 %v11548_v1  ;;  %v6250_v40 = vrot.slane %v6248_v39, 5  ;;  %v6809_v7 = vsel %vm11926_vm3, %v6804_v61, %v6808_v29  ;;  %v6268_v35 = vshll.u32 %v6171_v28, 16  ;;  %v6223_v15 = vor.u32 %v6222_v53, %v6219_v4  ;;  %v6170_v56 = vld [vmem:[#allocation4 + $0x30] sm:$0xf]  ;;  %v6786_v47 = vld [vmem:[#allocation5 + $0x18] sm:$0xf] }
 0x28a   : > { %v10128_v38 = vcombine.low %v6809_v7, %v6823_v16  ;;  %v6233_v13 = vrot.slane %v6231_v60, 4  ;;  %v6236_v26 = vrot.slane %v6234_v21, 5  ;;  %v14476_v43 = vrot.slane %v6212_v44, 5  ;;  %v6790_v54 = vld [vmem:[#allocation5 + $0x28] sm:$0xf]  ;;  %v11557_v41 = vld [vmem:[#allocation7 + $0xc0] sm:$0xff]  }
 0x28b   : > { %11105 = vmatmul.mubr.bf16.vlgmr.msra.gmra.mxu0 %v11546_v37  ;;  %v14480_v10 = vrot.slane %v6226_v6, 5  ;;  %v6209_v17 = vor.u32 %v6208_v18, %v6205_v12  ;;  %v14484_v24 = vrot.slane %v6240_v55, 5  ;;  %v6251_v51 = vor.u32 %v6250_v40, %v6247_v2  ;;  %v11556_v44 = vld [vmem:[#allocation7 + $0x198] sm:$0xff]   ;;  %v6784_v22 = vld [vmem:[#allocation5 + $0x10] sm:$0xf]  ;;  %v11558_v45 = vld [vmem:[#allocation7 + $0x190] sm:$0xff]  }
 0x28c   : > { %11137 = vmatpush3.bf16.msra.mxu0 %v11545_v58  ;;  %11108 = vmatprep.mubr.bf16.mxu0 %v11547_v63  ;;  %v6172_v58 = vld [vmem:[#allocation4 + $0x38] sm:$0xf]  ;;  %v6259_v3 = vshrl.u32 %v6170_v56, 16  ;;  %v6262_v6 = vshll.u32 %v6170_v56, 16  ;;  %v14488_v33 = vrot.slane %v6268_v35, 5  ;;  %v6224_v37 = vrot.slane %v6223_v15, 4 }
 0x28d   : > { %11071 = vmatpush3.bf16.msra.mxu1 %v11548_v1  ;;  %11138 = vmatprep.subr.bf16.mxu0 %v11549_v50  ;;  %v6273_v1 = vshrl.u32 %v6172_v58, 16  ;;  %v6276_v30 = vshll.u32 %v6172_v58, 16  ;;  %v6237_v31 = vor.u32 %v6236_v26, %v6233_v13  ;;  %v6842_v59 = vshll.u32 %v6786_v47, 16  ;;  %v6788_v55 = vld [vmem:[#allocation5 + $0x20] sm:$0xf]  ;;  %v11559_v61 = vld [vmem:[#allocation7 + $0x178] sm:$0xff]  }
 0x28e   : > { %11072 = vmatprep.subr.bf16.mxu1 %v11550_v20  ;;  %v6867_v46 = vshrl.u32 %v6790_v54, 16  ;;  %v6870_v63 = vshll.u32 %v6790_v54, 16  ;;  %v6210_v49 = vrot.slane %v6209_v17, 4  ;;  %v6252_v52 = vrot.slane %v6251_v51, 4  ;;  %v6173_v11 = vld [vmem:[#allocation4 + $0x3c] sm:$0x1] }
 0x28f   : > { %v6275_v0 = vrot.slane %v6273_v1, 4  ;;  %v6278_v48 = vrot.slane %v6276_v30, 5  ;;  %v6825_v8 = vshrl.u32 %v6784_v22, 16  ;;  %v6828_v42 = vshll.u32 %v6784_v22, 16  ;;  %v6794_v29 = vld [vmem:[#allocation5 + $0x38] sm:$0xf] }
 0x290   : > { %11139 = vmatpush3.bf16.msra.mxu0 %v11549_v50  ;;  %v14486_v50 = vrot.slane %v6254_v25, 5  ;;  %v6261_v34 = vrot.slane %v6259_v3, 4  ;;  %v6264_v27 = vrot.slane %v6262_v6, 5  ;;  %v6853_v14 = vshrl.u32 %v6788_v55, 16  ;;  %v11560_v58 = vld [vmem:[#allocation7 + $0x188] sm:$0xff]   ;;  %v11561_v12 = vld [vmem:[#allocation7 + $0x170] sm:$0xff]  }
 0x291   : > { %11073 = vmatpush3.bf16.msra.mxu1 %v11550_v20  ;;  %11140 = vmatprep.subr.bf16.mxu0 %v11551_v57  ;;  %v6839_v20 = vshrl.u32 %v6786_v47, 16  ;;  %v6856_v39 = vshll.u32 %v6788_v55, 16  ;;  %v6238_v62 = vrot.slane %v6237_v31, 4  ;;  %v6844_v28 = vrot.slane %v6842_v59, 5  ;;  %v6785_v18 = vld [vmem:[#allocation5 + $0x14] sm:$0x1] }
 0x292   : > { %11074 = vmatprep.subr.bf16.mxu1 %v11553_v36  ;;  %v6279_v4 = vor.u32 %v6278_v48, %v6275_v0  ;;  %v6282_v53 = vshll.u32 %v6173_v11, 16  ;;  %v6869_v60 = vrot.slane %v6867_v46, 4  ;;  %v6872_v21 = vrot.slane %v6870_v63, 5  ;;  %v6791_v26 = vld [vmem:[#allocation5 + $0x2c] sm:$0x1]  ;;  %v11562_v3 = vld [vmem:[#allocation7 + $0x180] sm:$0xff]  }
 0x293   : > { %11109 = vmatmul.mubr.bf16.gmra.mxu0 %v11552_v19  ;;  %v6215_v16 = vsel %vm11926_vm3, %v6210_v49, %v14476_v43  ;;  %v6257_v25 = vsel %vm11926_vm3, %v6252_v52, %v14486_v50  ;;  %v6827_v2 = vrot.slane %v6825_v8, 4  ;;  %v6830_v40 = vrot.slane %v6828_v42, 5  ;;  %v6789_v50 = vld [vmem:[#allocation5 + $0x24] sm:$0x1] }
 0x294   : > { %11141 = vmatpush3.bf16.msra.mxu0 %v11551_v57  ;;  %11152 = vmatprep.mubr.bf16.mxu0 %v10128_v38  ;;  %v6229_v57 = vsel %vm11926_vm3, %v6224_v37, %v14480_v10  ;;  %v6265_v7 = vor.u32 %v6264_v27, %v6261_v34  ;;  %v6855_v35 = vrot.slane %v6853_v14, 4  ;;  %v6858_v38 = vrot.slane %v6856_v39, 5  ;;  %v5440_v55 = vld [vmem:[#allocation2 + $0x179] ss:$2 sm:$0x1] }
 0x295   : > { %11075 = vmatpush3.bf16.msra.mxu1 %v11553_v36  ;;  %11142 = vmatprep.subr.bf16.mxu0 %v11554_v23  ;;  %v6841_v36 = vrot.slane %v6839_v20, 4  ;;  %v10093_v19 = vcombine.low %v6215_v16, %v6229_v57  ;;  %v6243_v15 = vsel %vm11926_vm3, %v6238_v62, %v14484_v24  ;;  %v6895_v56 = vshrl.u32 %v6794_v29, 16  ;;  %v11563_v24 = vld [vmem:[#allocation7 + $0x168] sm:$0xff]   ;;  %v5546_v8 = vld [vmem:[#allocation6 + $0x3c] sm:$0x1]  ;;  %v11565_v62 = vld [vmem:[#allocation7 + $0x238] sm:$0xff]  }
 0x296   : > { %11076 = vmatprep.subr.bf16.mxu1 %v11555_v5  ;;  %v6898_v43 = vshll.u32 %v6794_v29, 16  ;;  %v10094_v10 = vcombine.low %v6243_v15, %v6257_v25  ;;  %v6280_v1 = vrot.slane %v6279_v4, 4  ;;  %v6284_v30 = vrot.slane %v6282_v53, 5  ;;  %v6795_v27 = vld [vmem:[#allocation5 + $0x3c] sm:$0x1] }
 0x297   : > { %v6845_v13 = vor.u32 %v6844_v28, %v6841_v36  ;;  %v6873_v47 = vor.u32 %v6872_v21, %v6869_v60  ;;  %v6831_v17 = vor.u32 %v6830_v40, %v6827_v2  ;;  %v6266_v6 = vrot.slane %v6265_v7, 4  ;;  %v11566_v36 = vld [vmem:[#allocation7 + $0x160] sm:$0xff]   ;;  %v11568_v40 = vld [vmem:[#allocation7 + $0x158] sm:$0xff]  }
 0x298   : > { %11143 = vmatpush3.bf16.msra.mxu0 %v11554_v23  ;;  %v6787_v23 = vld [vmem:[#allocation5 + $0x1c] sm:$0x1]  ;;  %v6834_v22 = vshll.u32 %v6785_v18, 16  ;;  %v6876_v37 = vshll.u32 %v6791_v26, 16  ;;  %v6897_v20 = vrot.slane %v6895_v56, 4  ;;  %v6900_v59 = vrot.slane %v6898_v43, 5 }
 0x299   : > { %11077 = vmatpush3.bf16.msra.mxu1 %v11555_v5  ;;  %11144 = vmatprep.subr.bf16.mxu0 %v11556_v44  ;;  %v6792_v5 = vld [vmem:[#allocation5 + $0x30] sm:$0xf]  ;;  %v6848_v51 = vshll.u32 %v6787_v23, 16  ;;  %v6846_v31 = vrot.slane %v6845_v13, 4  ;;  %v6285_v0 = vsel %vm11926_vm3, %v6280_v1, %v6284_v30  ;;  %v6862_v48 = vshll.u32 %v6789_v50, 16  ;;  %v11567_v18 = vld [vmem:[#allocation7 + $0x230] sm:$0xff]  }
 0x29a   : > { %11078 = vmatprep.subr.bf16.mxu1 %v11557_v41  ;;  %v6881_v54 = vshrl.u32 %v6792_v5, 16  ;;  %v6874_v46 = vrot.slane %v6873_v47, 4  ;;  %v6832_v63 = vrot.slane %v6831_v17, 4  ;;  %v6271_v42 = vsel %vm11926_vm3, %v6266_v6, %v14488_v33  ;;  %v11564_v4 = vld [vmem:[#allocation6] ss:$8 sps:$4 sm:$0xff]   ;;  %v11571_v13 = vld [vmem:[#allocation7 + $0x150] sm:$0xff]  }
 0x29b   : > { %v6850_v49 = vrot.slane %v6848_v51, 5  ;;  %v6878_v34 = vrot.slane %v6876_v37, 5  ;;  %v10332_v14 = vpack.c.bf16 %v5440_v55, %v5440_v55  ;;  %v10095_v39 = vcombine.low %v6271_v42, %v6285_v0  ;;  %v6793_v21 = vld [vmem:[#allocation5 + $0x34] sm:$0x1]  ;;  %v11570_v1 = vld [vmem:[#allocation3 + $0x8] ss:$8 sps:$4 sm:$0xff]  }
 0x29c   : > { %11145 = vmatpush3.bf16.msra.mxu0 %v11556_v44  ;;  %v6884_v44 = vshll.u32 %v6792_v5, 16  ;;  %v6883_v52 = vrot.slane %v6881_v54, 4  ;;  %v6836_v57 = vrot.slane %v6834_v22, 5  ;;  %v6901_v28 = vor.u32 %v6900_v59, %v6897_v20  ;;  %v11572_v43 = vld [vmem:[#allocation7 + $0x220] sm:$0xff]   ;;  %v11573_v30 = vld [vmem:[#allocation7 + $0x148] sm:$0xff]   ;;  %v11574_v50 = vld [vmem:[#allocation7 + $0x218] sm:$0xff]  }
 0x29d   : > { %11079 = vmatpush3.bf16.msra.mxu1 %v11557_v41  ;;  %11146 = vmatprep.subr.bf16.mxu0 %v11558_v45  ;;  %v6859_v41 = vor.u32 %v6858_v38, %v6855_v35  ;;  %v6864_v53 = vrot.slane %v6862_v48, 5  ;;  %v6879_v60 = vsel %vm11926_vm3, %v6874_v46, %v6878_v34  ;;  %v5547_v33 = vsel %vm13838_vm9, %v10332_v14, %v5546_v8  ;;  %v11569_v38 = vld [vmem:[#allocation7 + $0x228] sm:$0xff]   ;;  %v7062_v47 = vld [vmem:[#allocation6] sm:$0xf]  ;;  %v11575_v54 = vld [vmem:[#allocation7 + $0x140] sm:$0xff]  }
 0x29e   : > { %11112 = vmatprep.subr.bf16.mxu1 %v11559_v61  ;;  %v6886_v11 = vrot.slane %v6884_v44, 5  ;;  %v6837_v29 = vsel %vm11926_vm3, %v6832_v63, %v6836_v57  ;;  %v6904_v25 = vshll.u32 %v6795_v27, 16  ;;  %5548 = vst [vmem:[#allocation6 + $0x3c] sm:$0x1] %v5547_v33  ;;  %v6902_v7 = vrot.slane %v6901_v28, 4  ;;  %v11584_v28 = vld [vmem:[#allocation7 + $0x1e8] sm:$0xff]  }
 0x29f   : > { %v7079_v44 = vshrl.u32 %v7062_v47, 16  ;;  %v7065_v6 = vld [vmem:[#allocation6 + $0xc] sm:$0x1]  ;;  %v5298_v37 = vld [vmem:[#allocation2 + $0x198] ss:$2 sm:$0xff] }
 0x2a0   : > { %11147 = vmatpush3.bf16.msra.mxu0 %v11558_v45  ;;  %11081 = vmatmul.mubr.bf16.vlgmr.msra.gmra.mxu1 %v10093_v19  ;;  %v6860_v45 = vrot.slane %v6859_v41, 4  ;;  %v6887_v16 = vor.u32 %v6886_v11, %v6883_v52  ;;  %v6890_v19 = vshll.u32 %v6793_v21, 16  ;;  %v6906_v35 = vrot.slane %v6904_v25, 5  ;;  %v11576_v41 = vld [vmem:[#allocation7 + $0x210] sm:$0xff]   ;;  %v7063_v55 = vld [vmem:[#allocation6 + $0x4] sm:$0x1] }
 0x2a1   : > { %11084 = vmatprep.mubr.bf16.mxu1 %v10094_v10  ;;  %11113 = vmatpush3.bf16.msra.mxu1 %v11559_v61  ;;  %v6851_v61 = vsel %vm11926_vm3, %v6846_v31, %v6850_v49  ;;  %v7064_v10 = vld [vmem:[#allocation6 + $0x8] sm:$0xf]  ;;  %v11578_v31 = vld [vmem:[#allocation7 + $0x1f8] sm:$0xff]   ;;  %v7081_v20 = vrot.slane %v7079_v44, 4  ;;  %v7102_v48 = vshll.u32 %v7065_v6, 16  ;;  %v10315_v63 = vpack.c.bf16 %v5298_v37, %v5298_v37  ;;  %v11580_v49 = vld [vmem:[#allocation7 + $0x208] sm:$0xff]  }
 0x2a2   : > { %11148 = vmatprep.subr.bf16.mxu0 %v11560_v58  ;;  %11114 = vmatprep.subr.bf16.mxu1 %v11561_v12  ;;  %v6888_v23 = vrot.slane %v6887_v16, 4  ;;  %v6892_v5 = vrot.slane %v6890_v19, 5  ;;  %v6907_v15 = vsel %vm11926_vm3, %v6902_v7, %v6906_v35  ;;  %v7093_v17 = vshrl.u32 %v7064_v10, 16  ;;  %v7688_v46 = vld [vmem:[#allocation3 + $0x10] sm:$0xf]  ;;  %v11588_v7 = vld [vmem:[#allocation7 + $0x1e0] sm:$0xff]  }
 0x2a3   : > { %v7096_v51 = vshll.u32 %v7064_v10, 16  ;;  %v11577_v52 = vld [vmem:[#allocation6 + $0x10] ss:$8 sps:$4 sm:$0xff]   ;;  %v7088_v42 = vshll.u32 %v7063_v55, 16  ;;  %5405 = vst [vmem:[#allocation5 + $0x40] sm:$0xf] %v10315_v63 }
 0x2a4   : > { %11149 = vmatpush3.bf16.msra.mxu0 %v11560_v58  ;;  %v10129_v58 = vcombine.low %v6837_v29, %v6851_v61  ;;  %v6893_v26 = vsel %vm11926_vm3, %v6888_v23, %v6892_v5  ;;  %v11581_v11 = vld [vmem:[#allocation7 + $0x1f0] sm:$0xff]   ;;  %v11579_v34 = vld [vmem:[#allocation6 + $0x20] ss:$8 sps:$4 sm:$0xff]   ;;  %v7717_v27 = vshrl.u32 %v7688_v46, 16  ;;  %v7720_v14 = vshll.u32 %v7688_v46, 16 }
 0x2a5   : > { %11115 = vmatpush3.bf16.msra.mxu1 %v11561_v12  ;;  %11150 = vmatprep.subr.bf16.mxu0 %v11562_v3  ;;  %v6865_v12 = vsel %vm11926_vm3, %v6860_v45, %v6864_v53  ;;  %v10131_v56 = vcombine.low %v6893_v26, %v6907_v15  ;;  %v7098_v22 = vrot.slane %v7096_v51, 5  ;;  %v7686_v45 = vld [vmem:[#allocation3 + $0x8] sm:$0xf]  ;;  %v7104_v57 = vrot.slane %v7102_v48, 5  ;;  %v11582_v61 = vld [vmem:[#allocation7 + $0x200] sm:$0xff]   ;;  %v11589_v51 = vld [vmem:[#allocation7 + $0x2b0] sm:$0xff]  }
 0x2a6   : > { %11116 = vmatprep.subr.bf16.mxu1 %v11563_v24  ;;  %v10130_v2 = vcombine.low %v6865_v12, %v6879_v60  ;;  %v7090_v53 = vrot.slane %v7088_v42, 5  ;;  %v7719_v60 = vrot.slane %v7717_v27, 4  ;;  %v7722_v21 = vrot.slane %v7720_v14, 5  ;;  %v7066_v33 = vld [vmem:[#allocation6 + $0x10] sm:$0xf]  ;;  %v11593_v27 = vld [vmem:[#allocation7 + $0x1d0] sm:$0xff]  }
 0x2a7   : > { %v7068_v29 = vld [vmem:[#allocation6 + $0x18] sm:$0xf]  ;;  %v5157_v12 = vld [vmem:[#allocation2 + $0x191] ss:$2 sm:$0x1]  ;;  %v7107_v23 = vshrl.u32 %v7066_v33, 16 }
 0x2a8   : > { %11151 = vmatpush3.bf16.msra.mxu0 %v11562_v3  ;;  %11085 = vmatmul.mubr.bf16.gmra.mxu1 %v10095_v39  ;;  %v7082_v3 = vshll.u32 %v7062_v47, 16  ;;  %v11583_v16 = vld [vmem:[#allocation6 + $0x30] ss:$8 sps:$4 sm:$0xff]   ;;  %v7110_v35 = vshll.u32 %v7066_v33, 16  ;;  %v7070_v5 = vld [vmem:[#allocation6 + $0x20] sm:$0xf] }
 0x2a9   : > { %11117 = vmatpush3.bf16.msra.mxu1 %v11563_v24  ;;  %11128 = vmatprep.mubr.bf16.mxu1 %v11564_v4  ;;  %v7095_v24 = vrot.slane %v7093_v17, 4  ;;  %v7687_v26 = vld [vmem:[#allocation3 + $0xc] sm:$0x1]  ;;  %v14525_v10 = vld [vmem:[#allocation6 + $0x1c] sm:$0x1]  ;;  %v7135_v44 = vshrl.u32 %v7070_v5, 16 }
 0x2aa   : > { %11184 = vmatprep.subr.bf16.mxu0 %v11565_v62  ;;  %11118 = vmatprep.subr.bf16.mxu1 %v11566_v36  ;;  %v7084_v59 = vrot.slane %v7082_v3, 5  ;;  %v7072_v47 = vld [vmem:[#allocation6 + $0x28] sm:$0xf]  ;;  %v5263_v17 = vld [vmem:[#allocation4 + $0x44] sm:$0x1]  ;;  %v7138_v3 = vshll.u32 %v7070_v5, 16 }
 0x2ab   : > { %11153 = vmatmul.mubr.bf16.vlgmr.msra.gmra.mxu0 %v10129_v58  ;;  %v7099_v0 = vor.u32 %v7098_v22, %v7095_v24  ;;  %v11586_v58 = vld [vmem:[#allocation7 + $0x2b8] sm:$0xff]   ;;  %v11587_v6 = vld [vmem:[#allocation3 + $0x28] ss:$8 sps:$4 sm:$0xff]   ;;  %v7712_v22 = vshll.u32 %v7687_v26, 16  ;;  %v7112_v37 = vrot.slane %v7110_v35, 5  ;;  %v7130_v63 = vshll.u32 %v14525_v10, 16 }
 0x2ac   : > { %11156 = vmatprep.mubr.bf16.mxu0 %v10130_v2  ;;  %11185 = vmatpush3.bf16.msra.mxu0 %v11565_v62  ;;  %v7085_v8 = vor.u32 %v7084_v59, %v7081_v20  ;;  %v7703_v62 = vshrl.u32 %v7686_v45, 16  ;;  %v11590_v24 = vld [vmem:[#allocation7 + $0x1d8] sm:$0xff]   ;;  %v11592_v48 = vld [vmem:[#allocation7 + $0x2a8] sm:$0xff]   ;;  %v7073_v42 = vld [vmem:[#allocation6 + $0x2c] sm:$0x1] }
 0x2ad   : > { %11119 = vmatpush3.bf16.msra.mxu1 %v11566_v36  ;;  %11186 = vmatprep.subr.bf16.mxu0 %v11567_v18  ;;  %v7100_v39 = vrot.slane %v7099_v0, 4  ;;  %v7706_v36 = vshll.u32 %v7686_v45, 16  ;;  %v7071_v55 = vld [vmem:[#allocation6 + $0x24] sm:$0x1]  ;;  %v7137_v45 = vrot.slane %v7135_v44, 4 }
 0x2ae   : > { %11120 = vmatprep.subr.bf16.mxu1 %v11568_v40  ;;  %v7086_v4 = vrot.slane %v7085_v8, 4  ;;  %v7705_v2 = vrot.slane %v7703_v62, 4  ;;  %v7144_v14 = vshll.u32 %v7071_v55, 16  ;;  %v11591_v33 = vld [vmem:[#allocation3 + $0x38] ss:$8 sps:$4 sm:$0xff]  }
 0x2af   : > { %v7105_v25 = vsel %vm11926_vm3, %v7100_v39, %v7104_v57  ;;  %v7074_v39 = vld [vmem:[#allocation6 + $0x30] sm:$0xf]  ;;  %v7076_v57 = vld [vmem:[#allocation6 + $0x38] sm:$0xf]  ;;  %v11596_v35 = vld [vmem:[#allocation7 + $0x298] sm:$0xff]  }
 0x2b0   : > { %11187 = vmatpush3.bf16.msra.mxu0 %v11567_v18  ;;  %v7689_v18 = vld [vmem:[#allocation3 + $0x14] sm:$0x1]  ;;  %v7091_v19 = vsel %vm11926_vm3, %v7086_v4, %v7090_v53  ;;  %v7696_v26 = vld [vmem:[#allocation3 + $0x30] sm:$0xf] }
 0x2b1   : > { %11121 = vmatpush3.bf16.msra.mxu1 %v11568_v40  ;;  %11188 = vmatprep.subr.bf16.mxu0 %v11569_v38  ;;  %v7708_v40 = vrot.slane %v7706_v36, 5  ;;  %v10140_v15 = vcombine.low %v7091_v19, %v7105_v25  ;;  %v14534_v19 = vrot.slane %v7144_v14, 5 }
 0x2b2   : > { %11122 = vmatprep.subr.bf16.mxu1 %v11571_v13 }
 0x2b3   : > { %11157 = vmatmul.mubr.bf16.gmra.mxu0 %v10131_v56  ;;  %v7723_v56 = vor.u32 %v7722_v21, %v7719_v60  ;;  %v7158_v21 = vshll.u32 %v7073_v42, 16 }
 0x2b4   : > { %11189 = vmatpush3.bf16.msra.mxu0 %v11569_v38  ;;  %11200 = vmatprep.mubr.bf16.mxu0 %v11570_v1  ;;  %v7121_v38 = vshrl.u32 %v7068_v29, 16  ;;  %v7124_v1 = vshll.u32 %v7068_v29, 16 }
 0x2b5   : > { %11123 = vmatpush3.bf16.msra.mxu1 %v11571_v13  ;;  %11190 = vmatprep.subr.bf16.mxu0 %v11572_v43  ;;  %v11585_v13 = vld [vmem:[#allocation3 + $0x18] ss:$8 sps:$4 sm:$0xff]   ;;  %v14538_v10 = vrot.slane %v7158_v21, 5  ;;  %v7693_v21 = vld [vmem:[#allocation3 + $0x24] sm:$0x1] }
 0x2b6   : > { %11124 = vmatprep.subr.bf16.mxu1 %v11573_v30  ;;  %v7123_v20 = vrot.slane %v7121_v38, 4  ;;  %v7126_v59 = vrot.slane %v7124_v1, 5  ;;  %v7166_v1 = vshll.u32 %v7074_v39, 16 }
 0x2b8   : > { %11191 = vmatpush3.bf16.msra.mxu0 %v11572_v43  ;;  %v7067_v43 = vld [vmem:[#allocation6 + $0x14] sm:$0x1] }
 0x2b9   : > { %11125 = vmatpush3.bf16.msra.mxu1 %v11573_v30  ;;  %11192 = vmatprep.subr.bf16.mxu0 %v11574_v50  ;;  %v10298_v30 = vpack.c.bf16 %v5157_v12, %v5157_v12  ;;  %v7116_v46 = vshll.u32 %v7067_v43, 16  ;;  %v7177_v12 = vshrl.u32 %v7076_v57, 16 }
 0x2ba   : > { %11126 = vmatprep.subr.bf16.mxu1 %v11575_v54 }
 0x2bb   : > { %v5264_v0 = vsel %vm13838_vm9, %v10298_v30, %v5263_v17  ;;  %v7118_v4 = vrot.slane %v7116_v46, 5 }
 0x2bc   : > { %11193 = vmatpush3.bf16.msra.mxu0 %v11574_v50  ;;  %v7709_v50 = vor.u32 %v7708_v40, %v7705_v2  ;;  %5265 = vst [vmem:[#allocation4 + $0x44] sm:$0x1] %v5264_v0  ;;  %v11595_v2 = vld [vmem:[#allocation7 + $0x1c8] sm:$0xff]   ;;  %v7132_v40 = vrot.slane %v7130_v63, 5 }
 0x2bd   : > { %11127 = vmatpush3.bf16.msra.mxu1 %v11575_v54  ;;  %11194 = vmatprep.subr.bf16.mxu0 %v11576_v41  ;;  %v7726_v54 = vshll.u32 %v7689_v18, 16 }
 0x2be   : > { %11160 = vmatprep.subr.bf16.mxu1 %v11578_v31 }
 0x2bf   : > { %v7728_v8 = vrot.slane %v7726_v54, 5 }
 0x2c0   : > { %11195 = vmatpush3.bf16.msra.mxu0 %v11576_v41  ;;  %11129 = vmatmul.mubr.bf16.vlgmr.msra.gmra.mxu1 %v11577_v52  ;;  %v7109_v41 = vrot.slane %v7107_v23, 4  ;;  %v7152_v52 = vshll.u32 %v7072_v47, 16  ;;  %v7180_v23 = vshll.u32 %v7076_v57, 16 }
 0x2c1   : > { %11132 = vmatprep.mubr.bf16.mxu1 %v11579_v34  ;;  %11161 = vmatpush3.bf16.msra.mxu1 %v11578_v31  ;;  %v7724_v31 = vrot.slane %v7723_v56, 4  ;;  %v7140_v34 = vrot.slane %v7138_v3, 5  ;;  %v11597_v56 = vld [vmem:[#allocation7 + $0x1c0] sm:$0xff]  }
 0x2c2   : > { %11196 = vmatprep.subr.bf16.mxu0 %v11580_v49  ;;  %11162 = vmatprep.subr.bf16.mxu1 %v11581_v11  ;;  %v7113_v36 = vor.u32 %v7112_v37, %v7109_v41  ;;  %v7154_v60 = vrot.slane %v7152_v52, 5  ;;  %v7182_v54 = vrot.slane %v7180_v23, 5  ;;  %v7776_v41 = vshll.u32 %v7696_v26, 16  ;;  %v5300_v37 = vld [vmem:[#allocation2 + $0x1a8] ss:$2 sm:$0x1] }
 0x2c3   : > { %v7729_v62 = vsel %vm11926_vm3, %v7724_v31, %v7728_v8  ;;  %v7141_v25 = vor.u32 %v7140_v34, %v7137_v45  ;;  %v7700_v45 = vld [vmem:[#allocation3 + $0x40] sm:$0xf]  ;;  %v10316_v34 = vpack.c.bf16 %v5300_v37, %v5300_v37 }
 0x2c4   : > { %11197 = vmatpush3.bf16.msra.mxu0 %v11580_v49  ;;  %v7149_v49 = vshrl.u32 %v7072_v47, 16  ;;  %v7114_v38 = vrot.slane %v7113_v36, 4  ;;  %v7778_v57 = vrot.slane %v7776_v41, 5 }
 0x2c5   : > { %11163 = vmatpush3.bf16.msra.mxu1 %v11581_v11  ;;  %11198 = vmatprep.subr.bf16.mxu0 %v11582_v61  ;;  %v7710_v11 = vrot.slane %v7709_v50, 4  ;;  %v7142_v30 = vrot.slane %v7141_v25, 4  ;;  %v7694_v50 = vld [vmem:[#allocation3 + $0x28] sm:$0xf] }
 0x2c6   : > { %11164 = vmatprep.subr.bf16.mxu1 %v11584_v28  ;;  %v7151_v53 = vrot.slane %v7149_v49, 4  ;;  %v7759_v46 = vshrl.u32 %v7694_v50, 16  ;;  %v7762_v63 = vshll.u32 %v7694_v50, 16  ;;  %v5406_v49 = vld [vmem:[#allocation5 + $0x44] sm:$0x1]  ;;  %v11600_v25 = vld [vmem:[#allocation7 + $0x288] sm:$0xff]  }
 0x2c8   : > { %11199 = vmatpush3.bf16.msra.mxu0 %v11582_v61  ;;  %11133 = vmatmul.mubr.bf16.gmra.mxu1 %v11583_v16  ;;  %v7714_v61 = vrot.slane %v7712_v22, 5  ;;  %v11594_v16 = vld [vmem:[#allocation7 + $0x2a0] sm:$0xff]   ;;  %v7155_v43 = vor.u32 %v7154_v60, %v7151_v53  ;;  %v7147_v53 = vsel %vm11926_vm3, %v7142_v30, %v14534_v19 }
 0x2c9   : > { %11165 = vmatpush3.bf16.msra.mxu1 %v11584_v28  ;;  %11176 = vmatprep.mubr.bf16.mxu1 %v10140_v15  ;;  %v7127_v28 = vor.u32 %v7126_v59, %v7123_v20  ;;  %v7690_v15 = vld [vmem:[#allocation3 + $0x18] sm:$0xf]  ;;  %v7077_v20 = vld [vmem:[#allocation6 + $0x3c] sm:$0x1]  ;;  %v7168_v59 = vrot.slane %v7166_v1, 5  ;;  %v11602_v1 = vld [vmem:[#allocation7 + $0x280] sm:$0xff]  }
 0x2ca   : > { %11232 = vmatprep.subr.bf16.mxu0 %v11586_v58  ;;  %11166 = vmatprep.subr.bf16.mxu1 %v11588_v7  ;;  %v7715_v29 = vsel %vm11926_vm3, %v7710_v11, %v7714_v61  ;;  %v7156_v31 = vrot.slane %v7155_v43, 4  ;;  %v7731_v55 = vshrl.u32 %v7690_v15, 16  ;;  %v7734_v0 = vshll.u32 %v7690_v15, 16  ;;  %v11599_v11 = vld [vmem:[#allocation7 + $0x278] sm:$0xff]   ;;  %v5442_v61 = vld [vmem:[#allocation2 + $0x199] ss:$2 sm:$0xff] }
 0x2cb   : > { %11201 = vmatmul.mubr.bf16.vlgmr.msra.gmra.mxu0 %v11585_v13  ;;  %v10176_v18 = vcombine.low %v7715_v29, %v7729_v62  ;;  %v7128_v5 = vrot.slane %v7127_v28, 4  ;;  %v7692_v13 = vld [vmem:[#allocation3 + $0x20] sm:$0xf]  ;;  %v7186_v14 = vshll.u32 %v7077_v20, 16  ;;  %v7764_v29 = vrot.slane %v7762_v63, 5 }
 0x2cc   : > { %11204 = vmatprep.mubr.bf16.mxu0 %v11587_v6  ;;  %11233 = vmatpush3.bf16.msra.mxu0 %v11586_v58  ;;  %v7163_v58 = vshrl.u32 %v7074_v39, 16  ;;  %v7745_v44 = vshrl.u32 %v7692_v13, 16  ;;  %v7748_v3 = vshll.u32 %v7692_v13, 16  ;;  %v7773_v6 = vshrl.u32 %v7696_v26, 16  ;;  %v7691_v15 = vld [vmem:[#allocation3 + $0x1c] sm:$0x1] }
 0x2cd   : > { %11167 = vmatpush3.bf16.msra.mxu1 %v11588_v7  ;;  %11234 = vmatprep.subr.bf16.mxu0 %v11589_v51  ;;  %v14536_v7 = vld [vmem:[#allocation6 + $0x34] sm:$0x1]  ;;  %v7133_v22 = vsel %vm11926_vm3, %v7128_v5, %v7132_v40  ;;  %v7161_v62 = vsel %vm11926_vm3, %v7156_v31, %v14538_v10  ;;  %v7733_v36 = vrot.slane %v7731_v55, 4  ;;  %v7736_v28 = vrot.slane %v7734_v0, 5  ;;  %v11604_v63 = vld [vmem:[#allocation4 + $0x8] ss:$8 sps:$4 sm:$0xff]  }
 0x2ce   : > { %11168 = vmatprep.subr.bf16.mxu1 %v11590_v24  ;;  %v14540_v47 = vrot.slane %v7163_v58, 4  ;;  %v7172_v17 = vshll.u32 %v14536_v7, 16  ;;  %v7747_v8 = vrot.slane %v7745_v44, 4  ;;  %v7750_v42 = vrot.slane %v7748_v3, 5  ;;  %v11601_v58 = vld [vmem:[#allocation7 + $0x270] sm:$0xff]  }
 0x2cf   : > { %v7775_v39 = vrot.slane %v7773_v6, 4  ;;  %v7804_v40 = vshll.u32 %v7700_v45, 16  ;;  %v10333_v23 = vpack.c.bf16 %v5442_v61, %v5442_v61  ;;  %v7188_v5 = vrot.slane %v7186_v14, 5 }
 0x2d0   : > { %11235 = vmatpush3.bf16.msra.mxu0 %v11589_v51  ;;  %v7179_v51 = vrot.slane %v7177_v12, 4  ;;  %v7169_v60 = vor.u32 %v7168_v59, %v14540_v47  ;;  %v7751_v12 = vor.u32 %v7750_v42, %v7747_v8  ;;  %v7737_v13 = vor.u32 %v7736_v28, %v7733_v36  ;;  %v11606_v8 = vld [vmem:[#allocation7 + $0x260] sm:$0xff]   ;;  %v11607_v36 = vld [vmem:[#allocation7 + $0x330] sm:$0xff]  }
 0x2d1   : > { %11169 = vmatpush3.bf16.msra.mxu1 %v11590_v24  ;;  %11236 = vmatprep.subr.bf16.mxu0 %v11592_v48  ;;  %v11598_v24 = vld [vmem:[#allocation7 + $0x290] sm:$0xff]   ;;  %v7779_v19 = vor.u32 %v7778_v57, %v7775_v39  ;;  %v7754_v26 = vshll.u32 %v7693_v21, 16  ;;  %5549 = vst [vmem:[#allocation6 + $0x40] sm:$0xf] %v10333_v23  ;;  %v7174_v47 = vrot.slane %v7172_v17, 5  ;;  %v7740_v44 = vshll.u32 %v7691_v15, 16 }
 0x2d2   : > { %11170 = vmatprep.subr.bf16.mxu1 %v11593_v27  ;;  %v7170_v30 = vrot.slane %v7169_v60, 4  ;;  %v7752_v3 = vrot.slane %v7751_v12, 4  ;;  %v7738_v31 = vrot.slane %v7737_v13, 4  ;;  %v5444_v21 = vld [vmem:[#allocation2 + $0x1a9] ss:$2 sm:$0x1] }
 0x2d3   : > { %11205 = vmatmul.mubr.bf16.gmra.mxu0 %v11591_v33  ;;  %v7761_v33 = vrot.slane %v7759_v46, 4  ;;  %v7780_v37 = vrot.slane %v7779_v19, 4  ;;  %v7756_v20 = vrot.slane %v7754_v26, 5  ;;  %v11610_v15 = vld [vmem:[#allocation5 + $0x8] ss:$8 sps:$4 sm:$0xff]   ;;  %v11613_v19 = vld [vmem:[#allocation7 + $0x248] sm:$0xff]  }
 0x2d4   : > { %11237 = vmatpush3.bf16.msra.mxu0 %v11592_v48  ;;  %11248 = vmatprep.mubr.bf16.mxu0 %v10176_v18  ;;  %v7119_v48 = vsel %vm11926_vm3, %v7114_v38, %v7118_v4  ;;  %v5407_v4 = vsel %vm13838_vm9, %v10316_v34, %v5406_v49  ;;  %v7697_v18 = vld [vmem:[#allocation3 + $0x34] sm:$0x1]  ;;  %v7175_v17 = vsel %vm11926_vm3, %v7170_v30, %v7174_v47  ;;  %v7742_v49 = vrot.slane %v7740_v44, 5  ;;  %v7968_v13 = vld [vmem:[#allocation4 + $0x8] sm:$0xf] }
 0x2d5   : > { %11171 = vmatpush3.bf16.msra.mxu1 %v11593_v27  ;;  %11238 = vmatprep.subr.bf16.mxu0 %v11594_v16  ;;  %v10141_v52 = vcombine.low %v7119_v48, %v7133_v22  ;;  %v7183_v27 = vor.u32 %v7182_v54, %v7179_v51  ;;  %5408 = vst [vmem:[#allocation5 + $0x44] sm:$0x1] %v5407_v4  ;;  %v7782_v50 = vshll.u32 %v7697_v18, 16  ;;  %v11603_v54 = vld [vmem:[#allocation7 + $0x268] sm:$0xff]   ;;  %v7701_v48 = vld [vmem:[#allocation3 + $0x44] sm:$0x1] }
 0x2d6   : > { %11172 = vmatprep.subr.bf16.mxu1 %v11595_v2  ;;  %v7765_v51 = vor.u32 %v7764_v29, %v7761_v33  ;;  %v7743_v14 = vsel %vm11926_vm3, %v7738_v31, %v7742_v49  ;;  %v7810_v57 = vshll.u32 %v7701_v48, 16  ;;  %v11608_v4 = vld [vmem:[#allocation7 + $0x258] sm:$0xff]   ;;  %v11617_v31 = vld [vmem:[#allocation4 + $0x18] ss:$8 sps:$4 sm:$0xff]  }
 0x2d7   : > { %v7184_v38 = vrot.slane %v7183_v27, 4  ;;  %v7784_v0 = vrot.slane %v7782_v50, 5  ;;  %v7699_v27 = vld [vmem:[#allocation3 + $0x3c] sm:$0x1] }
 0x2d8   : > { %11239 = vmatpush3.bf16.msra.mxu0 %v11594_v16  ;;  %v7698_v16 = vld [vmem:[#allocation3 + $0x38] sm:$0xf]  ;;  %v7766_v55 = vrot.slane %v7765_v51, 4  ;;  %v7812_v29 = vrot.slane %v7810_v57, 5  ;;  %v11616_v51 = vld [vmem:[#allocation7 + $0x310] sm:$0xff]  }
 0x2d9   : > { %11173 = vmatpush3.bf16.msra.mxu1 %v11595_v2  ;;  %11240 = vmatprep.subr.bf16.mxu0 %v11596_v35  ;;  %v7801_v2 = vshrl.u32 %v7700_v45, 16  ;;  %v7787_v43 = vshrl.u32 %v7698_v16, 16  ;;  %v7790_v10 = vshll.u32 %v7698_v16, 16  ;;  %v7189_v22 = vsel %vm11926_vm3, %v7184_v38, %v7188_v5  ;;  %v5550_v16 = vld [vmem:[#allocation6 + $0x44] sm:$0x1]  ;;  %v11612_v38 = vld [vmem:[#allocation7 + $0x320] sm:$0xff]  }
 0x2da   : > { %11174 = vmatprep.subr.bf16.mxu1 %v11597_v56  ;;  %v10143_v46 = vcombine.low %v7175_v17, %v7189_v22  ;;  %v7785_v34 = vsel %vm11926_vm3, %v7780_v37, %v7784_v0  ;;  %v7970_v5 = vld [vmem:[#allocation4 + $0x10] sm:$0xf]  ;;  %v7971_v50 = vld [vmem:[#allocation4 + $0x14] sm:$0x1] }
 0x2db   : > { %v7803_v6 = vrot.slane %v7801_v2, 4  ;;  %v7789_v59 = vrot.slane %v7787_v43, 4  ;;  %v7792_v7 = vrot.slane %v7790_v10, 5  ;;  %v11611_v2 = vld [vmem:[#allocation7 + $0x250] sm:$0xff]   ;;  %v7999_v26 = vshrl.u32 %v7970_v5, 16  ;;  %v11615_v43 = vld [vmem:[#allocation7 + $0x240] sm:$0xff]  }
 0x2dc   : > { %11241 = vmatpush3.bf16.msra.mxu0 %v11596_v35  ;;  %v10142_v35 = vcombine.low %v7147_v53, %v7161_v62  ;;  %v7796_v53 = vshll.u32 %v7699_v27, 16  ;;  %v8002_v32 = vshll.u32 %v7970_v5, 16  ;;  %v7985_v10 = vshrl.u32 %v7968_v13, 16  ;;  %v8592_v37 = vld [vmem:[#allocation5 + $0x8] sm:$0xf] }
 0x2dd   : > { %11175 = vmatpush3.bf16.msra.mxu1 %v11597_v56  ;;  %11242 = vmatprep.subr.bf16.mxu0 %v11598_v24  ;;  %v7695_v56 = vld [vmem:[#allocation3 + $0x2c] sm:$0x1]  ;;  %v7793_v39 = vor.u32 %v7792_v7, %v7789_v59  ;;  %v8001_v30 = vrot.slane %v7999_v26, 4  ;;  %v8008_v22 = vshll.u32 %v7971_v50, 16  ;;  %v11621_v59 = vld [vmem:[#allocation7 + $0x2f0] sm:$0xff]   ;;  %v8609_v49 = vshrl.u32 %v8592_v37, 16 }
 0x2de   : > { %11208 = vmatprep.subr.bf16.mxu1 %v11599_v11  ;;  %v7768_v41 = vshll.u32 %v7695_v56, 16  ;;  %v7798_v12 = vrot.slane %v7796_v53, 5  ;;  %v11614_v56 = vld [vmem:[#allocation7 + $0x318] sm:$0xff]   ;;  %v8004_v47 = vrot.slane %v8002_v32, 5  ;;  %v7987_v44 = vrot.slane %v7985_v10, 4 }
 0x2df   : > { %v7794_v33 = vrot.slane %v7793_v39, 4  ;;  %v7974_v39 = vld [vmem:[#allocation4 + $0x20] sm:$0xf]  ;;  %v7978_v5 = vld [vmem:[#allocation4 + $0x30] sm:$0xf] }
 0x2e0   : > { %11243 = vmatpush3.bf16.msra.mxu0 %v11598_v24  ;;  %11177 = vmatmul.mubr.bf16.vlgmr.msra.gmra.mxu1 %v10141_v52  ;;  %v7806_v24 = vrot.slane %v7804_v40, 5  ;;  %v7757_v52 = vsel %vm11926_vm3, %v7752_v3, %v7756_v20  ;;  %v7770_v45 = vrot.slane %v7768_v41, 5  ;;  %v8594_v41 = vld [vmem:[#allocation5 + $0x10] sm:$0xf]  ;;  %v11620_v20 = vld [vmem:[#allocation7 + $0x308] sm:$0xff]   ;;  %v8058_v50 = vshll.u32 %v7978_v5, 16 }
 0x2e1   : > { %11180 = vmatprep.mubr.bf16.mxu1 %v10142_v35  ;;  %11209 = vmatpush3.bf16.msra.mxu1 %v11599_v11  ;;  %v11605_v11 = vld [vmem:[#allocation7 + $0x338] sm:$0xff]   ;;  %v10177_v61 = vcombine.low %v7743_v14, %v7757_v52  ;;  %v7799_v23 = vsel %vm11926_vm3, %v7794_v33, %v7798_v12  ;;  %v8623_v0 = vshrl.u32 %v8594_v41, 16  ;;  %v8626_v48 = vshll.u32 %v8594_v41, 16  ;;  %v11625_v12 = vld [vmem:[#allocation5 + $0x18] ss:$8 sps:$4 sm:$0xff]  }
 0x2e2   : > { %11244 = vmatprep.subr.bf16.mxu0 %v11600_v25  ;;  %11210 = vmatprep.subr.bf16.mxu1 %v11601_v58  ;;  %v7807_v42 = vor.u32 %v7806_v24, %v7803_v6  ;;  %v7771_v62 = vsel %vm11926_vm3, %v7766_v55, %v7770_v45  ;;  %v7969_v6 = vld [vmem:[#allocation4 + $0xc] sm:$0x1]  ;;  %v8005_v24 = vor.u32 %v8004_v47, %v8001_v30  ;;  %v11619_v55 = vld [vmem:[#allocation4 + $0x28] ss:$8 sps:$4 sm:$0xff]   ;;  %v8612_v52 = vshll.u32 %v8592_v37, 16 }
 0x2e3   : > { %v10178_v28 = vcombine.low %v7771_v62, %v7785_v34  ;;  %v7994_v17 = vshll.u32 %v7969_v6, 16  ;;  %v7972_v34 = vld [vmem:[#allocation4 + $0x18] sm:$0xf]  ;;  %v8625_v27 = vrot.slane %v8623_v0, 4  ;;  %v8628_v14 = vrot.slane %v8626_v48, 5  ;;  %v11632_v6 = vld [vmem:[#allocation7 + $0x3a8] sm:$0xff]  }
 0x2e4   : > { %11245 = vmatpush3.bf16.msra.mxu0 %v11600_v25  ;;  %v7808_v60 = vrot.slane %v7807_v42, 4  ;;  %v11609_v25 = vld [vmem:[#allocation7 + $0x328] sm:$0xff]   ;;  %v8614_v62 = vrot.slane %v8612_v52, 5  ;;  %v8013_v53 = vshrl.u32 %v7972_v34, 16  ;;  %v7979_v0 = vld [vmem:[#allocation4 + $0x34] sm:$0x1] }
 0x2e5   : > { %11211 = vmatpush3.bf16.msra.mxu1 %v11601_v58  ;;  %11246 = vmatprep.subr.bf16.mxu0 %v11602_v1  ;;  %v10334_v58 = vpack.c.bf16 %v5444_v21, %v5444_v21  ;;  %v7996_v45 = vrot.slane %v7994_v17, 5  ;;  %v11623_v21 = vld [vmem:[#allocation4 + $0x38] ss:$8 sps:$4 sm:$0xff]   ;;  %v7975_v10 = vld [vmem:[#allocation4 + $0x24] sm:$0x1] }
 0x2e6   : > { %11212 = vmatprep.subr.bf16.mxu1 %v11603_v54  ;;  %v7813_v18 = vsel %vm11926_vm3, %v7808_v60, %v7812_v29  ;;  %v8016_v60 = vshll.u32 %v7972_v34, 16  ;;  %v8027_v29 = vshrl.u32 %v7974_v39, 16  ;;  %v7977_v17 = vld [vmem:[#allocation4 + $0x2c] sm:$0x1] }
 0x2e7   : > { %v5551_v40 = vsel %vm13838_vm9, %v10334_v58, %v5550_v16  ;;  %v10179_v35 = vcombine.low %v7799_v23, %v7813_v18  ;;  %v8030_v16 = vshll.u32 %v7974_v39, 16  ;;  %v8593_v18 = vld [vmem:[#allocation5 + $0xc] sm:$0x1]  ;;  %v11629_v23 = vld [vmem:[#allocation7 + $0x3b0] sm:$0xff]   ;;  %v8050_v39 = vshll.u32 %v7977_v17, 16 }
 0x2e8   : > { %11247 = vmatpush3.bf16.msra.mxu0 %v11602_v1  ;;  %11181 = vmatmul.mubr.bf16.gmra.mxu1 %v10143_v46  ;;  %5552 = vst [vmem:[#allocation6 + $0x44] sm:$0x1] %v5551_v40  ;;  %v7988_v1 = vshll.u32 %v7968_v13, 16  ;;  %v8006_v46 = vrot.slane %v8005_v24, 4  ;;  %v11627_v40 = vld [vmem:[#allocation5 + $0x28] ss:$8 sps:$4 sm:$0xff]  }
 0x2e9   : > { %11213 = vmatpush3.bf16.msra.mxu1 %v11603_v54  ;;  %11224 = vmatprep.mubr.bf16.mxu1 %v11604_v63  ;;  %v11618_v54 = vld [vmem:[#allocation7 + $0x2f8] sm:$0xff]   ;;  %v8010_v63 = vrot.slane %v8008_v22, 5  ;;  %v8018_v13 = vrot.slane %v8016_v60, 5  ;;  %v8032_v30 = vrot.slane %v8030_v16, 5  ;;  %v8036_v22 = vshll.u32 %v7975_v10, 16 }
 0x2ea   : > { %11280 = vmatprep.subr.bf16.mxu0 %v11605_v11  ;;  %11214 = vmatprep.subr.bf16.mxu1 %v11606_v8  ;;  %v7990_v3 = vrot.slane %v7988_v1, 5  ;;  %v8029_v1 = vrot.slane %v8027_v29, 4 }
 0x2eb   : > { %11249 = vmatmul.mubr.bf16.vlgmr.msra.gmra.mxu0 %v10177_v61  ;;  %v8011_v57 = vsel %vm11926_vm3, %v8006_v46, %v8010_v63  ;;  %v8611_v61 = vrot.slane %v8609_v49, 4  ;;  %v8060_v46 = vrot.slane %v8058_v50, 5  ;;  %v7980_v63 = vld [vmem:[#allocation4 + $0x38] sm:$0xf]  ;;  %v11631_v49 = vld [vmem:[#allocation5 + $0x38] ss:$8 sps:$4 sm:$0xff]  }
 0x2ec   : > { %11252 = vmatprep.mubr.bf16.mxu0 %v10178_v28  ;;  %11281 = vmatpush3.bf16.msra.mxu0 %v11605_v11  ;;  %v7991_v7 = vor.u32 %v7990_v3, %v7987_v44  ;;  %v11622_v11 = vld [vmem:[#allocation7 + $0x300] sm:$0xff]   ;;  %v8072_v60 = vshll.u32 %v7980_v63, 16 }
 0x2ed   : > { %11215 = vmatpush3.bf16.msra.mxu1 %v11606_v8  ;;  %11282 = vmatprep.subr.bf16.mxu0 %v11607_v36  ;;  %v11624_v8 = vld [vmem:[#allocation7 + $0x2e8] sm:$0xff]   ;;  %v11628_v28 = vld [vmem:[#allocation7 + $0x2e0] sm:$0xff]  }
 0x2ee   : > { %11216 = vmatprep.subr.bf16.mxu1 %v11608_v4  ;;  %v7992_v42 = vrot.slane %v7991_v7, 4  ;;  %v8033_v7 = vor.u32 %v8032_v30, %v8029_v1 }
 0x2f0   : > { %11283 = vmatpush3.bf16.msra.mxu0 %v11607_v36  ;;  %v11626_v36 = vld [vmem:[#allocation7 + $0x3b8] sm:$0xff]   ;;  %v7997_v33 = vsel %vm11926_vm3, %v7992_v42, %v7996_v45  ;;  %v11634_v45 = vld [vmem:[#allocation7 + $0x3a0] sm:$0xff]  }
 0x2f1   : > { %11217 = vmatpush3.bf16.msra.mxu1 %v11608_v4  ;;  %11284 = vmatprep.subr.bf16.mxu0 %v11609_v25  ;;  %v8595_v4 = vld [vmem:[#allocation5 + $0x14] sm:$0x1]  ;;  %v10188_v58 = vcombine.low %v7997_v33, %v8011_v57  ;;  %v8598_v57 = vld [vmem:[#allocation5 + $0x20] sm:$0xf] }
 0x2f2   : > { %11218 = vmatprep.subr.bf16.mxu1 %v11611_v2  ;;  %v8651_v16 = vshrl.u32 %v8598_v57, 16 }
 0x2f3   : > { %11253 = vmatmul.mubr.bf16.gmra.mxu0 %v10179_v35  ;;  %v8615_v35 = vor.u32 %v8614_v62, %v8611_v61  ;;  %v11635_v62 = vld [vmem:[#allocation7 + $0x2c8] sm:$0xff]  }
 0x2f4   : > { %11285 = vmatpush3.bf16.msra.mxu0 %v11609_v25  ;;  %11296 = vmatprep.mubr.bf16.mxu0 %v11610_v15  ;;  %v7976_v25 = vld [vmem:[#allocation4 + $0x28] sm:$0xf]  ;;  %v7973_v15 = vld [vmem:[#allocation4 + $0x1c] sm:$0x1] }
 0x2f5   : > { %11219 = vmatpush3.bf16.msra.mxu1 %v11611_v2  ;;  %11286 = vmatprep.subr.bf16.mxu0 %v11612_v38  ;;  %v8629_v2 = vor.u32 %v8628_v14, %v8625_v27  ;;  %v8041_v26 = vshrl.u32 %v7976_v25, 16  ;;  %v8044_v32 = vshll.u32 %v7976_v25, 16  ;;  %v8022_v3 = vshll.u32 %v7973_v15, 16  ;;  %v8602_v25 = vld [vmem:[#allocation5 + $0x30] sm:$0xf] }
 0x2f6   : > { %11220 = vmatprep.subr.bf16.mxu1 %v11613_v19  ;;  %v8038_v27 = vrot.slane %v8036_v22, 5 }
 0x2f7   : > { %v8630_v47 = vrot.slane %v8629_v2, 4  ;;  %v8043_v41 = vrot.slane %v8041_v26, 4  ;;  %v8046_v37 = vrot.slane %v8044_v32, 5  ;;  %v8596_v2 = vld [vmem:[#allocation5 + $0x18] sm:$0xf]  ;;  %v8074_v32 = vrot.slane %v8072_v60, 5 }
 0x2f8   : > { %11287 = vmatpush3.bf16.msra.mxu0 %v11612_v38  ;;  %v8632_v38 = vshll.u32 %v8595_v4, 16  ;;  %v8069_v4 = vshrl.u32 %v7980_v63, 16  ;;  %v7981_v26 = vld [vmem:[#allocation4 + $0x3c] sm:$0x1]  ;;  %v8637_v1 = vshrl.u32 %v8596_v2, 16  ;;  %v8640_v30 = vshll.u32 %v8596_v2, 16 }
 0x2f9   : > { %11221 = vmatpush3.bf16.msra.mxu1 %v11613_v19  ;;  %11288 = vmatprep.subr.bf16.mxu0 %v11614_v56  ;;  %v8015_v19 = vrot.slane %v8013_v53, 4  ;;  %v8047_v14 = vor.u32 %v8046_v37, %v8043_v41  ;;  %v8078_v22 = vshll.u32 %v7981_v26, 16 }
 0x2fa   : > { %11222 = vmatprep.subr.bf16.mxu1 %v11615_v43  ;;  %v8634_v44 = vrot.slane %v8632_v38, 5  ;;  %v8071_v15 = vrot.slane %v8069_v4, 4  ;;  %v8642_v63 = vrot.slane %v8640_v30, 5  ;;  %v11645_v30 = vld [vmem:[#allocation7 + $0x360] sm:$0xff]  }
 0x2fb   : > { %v8019_v24 = vor.u32 %v8018_v13, %v8015_v19  ;;  %v8600_v19 = vld [vmem:[#allocation5 + $0x28] sm:$0xf] }
 0x2fc   : > { %11289 = vmatpush3.bf16.msra.mxu0 %v11614_v56  ;;  %v11630_v56 = vld [vmem:[#allocation7 + $0x2d8] sm:$0xff]   ;;  %v8075_v37 = vor.u32 %v8074_v32, %v8071_v15 }
 0x2fd   : > { %11223 = vmatpush3.bf16.msra.mxu1 %v11615_v43  ;;  %11290 = vmatprep.subr.bf16.mxu0 %v11616_v51  ;;  %v8618_v43 = vshll.u32 %v8593_v18, 16  ;;  %v8020_v34 = vrot.slane %v8019_v24, 4  ;;  %v8052_v18 = vrot.slane %v8050_v39, 5  ;;  %v11639_v24 = vld [vmem:[#allocation7 + $0x378] sm:$0xff]  }
 0x2fe   : > { %11256 = vmatprep.subr.bf16.mxu1 %v11618_v54 }
 0x300   : > { %11291 = vmatpush3.bf16.msra.mxu0 %v11616_v51  ;;  %11225 = vmatmul.mubr.bf16.vlgmr.msra.gmra.mxu1 %v11617_v31  ;;  %v8055_v51 = vshrl.u32 %v7978_v5, 16  ;;  %v7982_v31 = vld [vmem:[#allocation4 + $0x40] sm:$0xf]  ;;  %v7983_v5 = vld [vmem:[#allocation4 + $0x44] sm:$0x1] }
 0x301   : > { %11228 = vmatprep.mubr.bf16.mxu1 %v11619_v55  ;;  %11257 = vmatpush3.bf16.msra.mxu1 %v11618_v54  ;;  %v8616_v54 = vrot.slane %v8615_v35, 4  ;;  %v8635_v55 = vsel %vm11926_vm3, %v8630_v47, %v8634_v44  ;;  %v8086_v42 = vshll.u32 %v7982_v31, 16  ;;  %v8653_v47 = vrot.slane %v8651_v16, 4 }
 0x302   : > { %11292 = vmatprep.subr.bf16.mxu0 %v11620_v20  ;;  %11258 = vmatprep.subr.bf16.mxu1 %v11621_v59  ;;  %v8057_v48 = vrot.slane %v8055_v51, 4  ;;  %v11638_v51 = vld [vmem:[#allocation7 + $0x390] sm:$0xff]   ;;  %v8092_v50 = vshll.u32 %v7983_v5, 16  ;;  %v8665_v44 = vshrl.u32 %v8600_v19, 16 }
 0x303   : > { %v8088_v29 = vrot.slane %v8086_v42, 5  ;;  %v8607_v5 = vld [vmem:[#allocation5 + $0x44] sm:$0x1] }
 0x304   : > { %11293 = vmatpush3.bf16.msra.mxu0 %v11620_v20  ;;  %v8620_v20 = vrot.slane %v8618_v43, 5  ;;  %v8061_v53 = vor.u32 %v8060_v46, %v8057_v48  ;;  %v8682_v43 = vshll.u32 %v8602_v25, 16  ;;  %v8597_v48 = vld [vmem:[#allocation5 + $0x1c] sm:$0x1]  ;;  %v8639_v46 = vrot.slane %v8637_v1, 4 }
 0x305   : > { %11259 = vmatpush3.bf16.msra.mxu1 %v11621_v59  ;;  %11294 = vmatprep.subr.bf16.mxu0 %v11622_v11  ;;  %v11633_v59 = vld [vmem:[#allocation7 + $0x2d0] sm:$0xff]   ;;  %v8667_v42 = vrot.slane %v8665_v44, 4  ;;  %v11644_v44 = vld [vmem:[#allocation6 + $0x8] ss:$8 sps:$4 sm:$0xff]  }
 0x306   : > { %11260 = vmatprep.subr.bf16.mxu1 %v11624_v8  ;;  %v8621_v52 = vsel %vm11926_vm3, %v8616_v54, %v8620_v20  ;;  %v8062_v13 = vrot.slane %v8061_v53, 4  ;;  %v8684_v20 = vrot.slane %v8682_v43, 5  ;;  %v8643_v4 = vor.u32 %v8642_v63, %v8639_v46 }
 0x307   : > { %v10224_v61 = vcombine.low %v8621_v52, %v8635_v55  ;;  %v11640_v55 = vld [vmem:[#allocation7 + $0x388] sm:$0xff]   ;;  %v8094_v52 = vrot.slane %v8092_v50, 5  ;;  %v8646_v53 = vshll.u32 %v8597_v48, 16  ;;  %v8716_v50 = vshll.u32 %v8607_v5, 16  ;;  %v11650_v5 = vld [vmem:[#allocation6 + $0x18] ss:$8 sps:$4 sm:$0xff]  }
 0x308   : > { %11295 = vmatpush3.bf16.msra.mxu0 %v11622_v11  ;;  %11229 = vmatmul.mubr.bf16.gmra.mxu1 %v11623_v21  ;;  %v8024_v11 = vrot.slane %v8022_v3, 5  ;;  %v11636_v21 = vld [vmem:[#allocation7 + $0x398] sm:$0xff]   ;;  %v8668_v3 = vshll.u32 %v8600_v19, 16  ;;  %v8644_v19 = vrot.slane %v8643_v4, 4 }
 0x309   : > { %11261 = vmatpush3.bf16.msra.mxu1 %v11624_v8  ;;  %11272 = vmatprep.mubr.bf16.mxu1 %v10188_v58  ;;  %v8083_v8 = vshrl.u32 %v7982_v31, 16  ;;  %v11637_v58 = vld [vmem:[#allocation7 + $0x2c0] sm:$0xff]   ;;  %v8648_v32 = vrot.slane %v8646_v53, 5 }
 0x30a   : > { %11328 = vmatprep.subr.bf16.mxu0 %v11626_v36  ;;  %11262 = vmatprep.subr.bf16.mxu1 %v11628_v28 }
 0x30b   : > { %11297 = vmatmul.mubr.bf16.vlgmr.msra.gmra.mxu0 %v11625_v12  ;;  %v8085_v33 = vrot.slane %v8083_v8, 4  ;;  %v8048_v12 = vrot.slane %v8047_v14, 4 }
 0x30c   : > { %11300 = vmatprep.mubr.bf16.mxu0 %v11627_v40  ;;  %11329 = vmatpush3.bf16.msra.mxu0 %v11626_v36  ;;  %v8034_v36 = vrot.slane %v8033_v7, 4  ;;  %v8654_v40 = vshll.u32 %v8598_v57, 16  ;;  %v8606_v7 = vld [vmem:[#allocation5 + $0x40] sm:$0xf] }
 0x30d   : > { %11263 = vmatpush3.bf16.msra.mxu1 %v11628_v28  ;;  %11330 = vmatprep.subr.bf16.mxu0 %v11629_v23  ;;  %v8064_v28 = vshll.u32 %v7979_v0, 16  ;;  %v8089_v10 = vor.u32 %v8088_v29, %v8085_v33  ;;  %v8053_v41 = vsel %vm11926_vm3, %v8048_v12, %v8052_v18  ;;  %v8707_v39 = vshrl.u32 %v8606_v7, 16  ;;  %v11642_v33 = vld [vmem:[#allocation7 + $0x380] sm:$0xff]   ;;  %v11643_v12 = vld [vmem:[#allocation7 + $0x368] sm:$0xff]  }
 0x30e   : > { %11264 = vmatprep.subr.bf16.mxu1 %v11630_v56  ;;  %v8039_v35 = vsel %vm11926_vm3, %v8034_v36, %v8038_v27  ;;  %v8656_v54 = vrot.slane %v8654_v40, 5  ;;  %v8710_v57 = vshll.u32 %v8606_v7, 16 }
 0x30f   : > { %v8066_v38 = vrot.slane %v8064_v28, 5  ;;  %v8090_v0 = vrot.slane %v8089_v10, 4  ;;  %v8076_v28 = vrot.slane %v8075_v37, 4  ;;  %v8709_v40 = vrot.slane %v8707_v39, 4  ;;  %v8605_v10 = vld [vmem:[#allocation5 + $0x3c] sm:$0x1] }
 0x310   : > { %11331 = vmatpush3.bf16.msra.mxu0 %v11629_v23  ;;  %v8025_v23 = vsel %vm11926_vm3, %v8020_v34, %v8024_v11  ;;  %v8599_v11 = vld [vmem:[#allocation5 + $0x24] sm:$0x1]  ;;  %v8657_v8 = vor.u32 %v8656_v54, %v8653_v47  ;;  %v8603_v34 = vld [vmem:[#allocation5 + $0x34] sm:$0x1] }
 0x311   : > { %11265 = vmatpush3.bf16.msra.mxu1 %v11630_v56  ;;  %11332 = vmatprep.subr.bf16.mxu0 %v11632_v6  ;;  %v8679_v56 = vshrl.u32 %v8602_v25, 16  ;;  %v8067_v17 = vsel %vm11926_vm3, %v8062_v13, %v8066_v38  ;;  %v8660_v60 = vshll.u32 %v8599_v11, 16  ;;  %v8095_v29 = vsel %vm11926_vm3, %v8090_v0, %v8094_v52  ;;  %v11658_v54 = vld [vmem:[%s14965_s4] sm:$0xff]  }
 0x312   : > { %11266 = vmatprep.subr.bf16.mxu1 %v11633_v59  ;;  %v8658_v16 = vrot.slane %v8657_v8, 4  ;;  %v11661_v52 = vld [vmem:[%s11875_s26] sm:$0xff]   ;;  %v8876_v8 = vld [vmem:[#allocation6 + $0x10] sm:$0xf] }
 0x313   : > { %11301 = vmatmul.mubr.bf16.gmra.mxu0 %v11631_v49  ;;  %v8681_v31 = vrot.slane %v8679_v56, 4  ;;  %v11641_v49 = vld [vmem:[#allocation7 + $0x370] sm:$0xff]   ;;  %v8662_v13 = vrot.slane %v8660_v60, 5 }
 0x314   : > { %11333 = vmatpush3.bf16.msra.mxu0 %v11632_v6  ;;  %11344 = vmatprep.mubr.bf16.mxu0 %v10224_v61  ;;  %v10189_v6 = vcombine.low %v8025_v23, %v8039_v35  ;;  %v10190_v61 = vcombine.low %v8053_v41, %v8067_v17  ;;  %v8712_v23 = vrot.slane %v8710_v57, 5 }
 0x315   : > { %11267 = vmatpush3.bf16.msra.mxu1 %v11633_v59  ;;  %11334 = vmatprep.subr.bf16.mxu0 %v11634_v45  ;;  %v8604_v59 = vld [vmem:[#allocation5 + $0x38] sm:$0xf]  ;;  %v8685_v36 = vor.u32 %v8684_v20, %v8681_v31  ;;  %v8663_v1 = vsel %vm11926_vm3, %v8658_v16, %v8662_v13  ;;  %v14607_v31 = vpop.f32.mrf.mxu1 }
 0x316   : > { %11268 = vmatprep.subr.bf16.mxu1 %v11635_v62  ;;  %v8693_v27 = vshrl.u32 %v8604_v59, 16  ;;  %v8696_v14 = vshll.u32 %v8604_v59, 16  ;;  %v11646_v59 = vld [vmem:[#allocation7 + $0x358] sm:$0xff]  }
 0x317   : > { %v8686_v38 = vrot.slane %v8685_v36, 4  ;;  %v14609_v48 = vpop.f32.mrf.mxu1 }
 0x318   : > { %11335 = vmatpush3.bf16.msra.mxu0 %v11634_v45  ;;  %v8670_v45 = vrot.slane %v8668_v3, 5  ;;  %v8695_v18 = vrot.slane %v8693_v27, 4  ;;  %v8698_v2 = vrot.slane %v8696_v14, 5  ;;  %v8905_v27 = vshrl.u32 %v8876_v8, 16 }
 0x319   : > { %11269 = vmatpush3.bf16.msra.mxu1 %v11635_v62  ;;  %11336 = vmatprep.subr.bf16.mxu0 %v11636_v21  ;;  %v8080_v62 = vrot.slane %v8078_v22, 5  ;;  %v8702_v22 = vshll.u32 %v8605_v10, 16  ;;  %v8908_v14 = vshll.u32 %v8876_v8, 16 }
 0x31a   : > { %11270 = vmatprep.subr.bf16.mxu1 %v11637_v58  ;;  %v8671_v25 = vor.u32 %v8670_v45, %v8667_v42  ;;  %v8699_v47 = vor.u32 %v8698_v2, %v8695_v18  ;;  %v14616_v42 = vpop.f32.mrf.mxu1  ;;  %v11648_v45 = vld [vmem:[#allocation7 + $0x348] sm:$0xff]   ;;  %v8907_v53 = vrot.slane %v8905_v27, 4  ;;  %v8875_v18 = vld [vmem:[#allocation6 + $0xc] sm:$0x1] }
 0x31b   : > { %v8081_v15 = vsel %vm11926_vm3, %v8076_v28, %v8080_v62  ;;  %v8704_v0 = vrot.slane %v8702_v22, 5  ;;  %v11663_v28 = vld [vmem:[%s11875_s26 + $0x8] sm:$0xff]   ;;  %v8910_v60 = vrot.slane %v8908_v14, 5  ;;  %v8900_v13 = vshll.u32 %v8875_v18, 16 }
 0x31c   : > { %11337 = vmatpush3.bf16.msra.mxu0 %v11636_v21  ;;  %v8601_v21 = vld [vmem:[#allocation5 + $0x2c] sm:$0x1]  ;;  %v10191_v26 = vcombine.low %v8081_v15, %v8095_v29  ;;  %v8672_v56 = vrot.slane %v8671_v25, 4  ;;  %v8700_v7 = vrot.slane %v8699_v47, 4  ;;  %v5711_v39 = vpop.f32.mrf.mxu1  ;;  %v11653_v15 = vld [vmem:[#allocation7 + $0x3f0] sm:$0xff]  }
 0x31d   : > { %11271 = vmatpush3.bf16.msra.mxu1 %v11637_v58  ;;  %11338 = vmatprep.subr.bf16.mxu0 %v11638_v51  ;;  %v8688_v58 = vshll.u32 %v8603_v34, 16  ;;  %v8674_v35 = vshll.u32 %v8601_v21, 16  ;;  %v8874_v34 = vld [vmem:[#allocation6 + $0x8] sm:$0xf]  ;;  %v11651_v25 = vld [vmem:[#allocation7 + $0x3f8] sm:$0xff]  }
 0x31e   : > { %11304 = vmatprep.subr.bf16.mxu1 %v11639_v24  ;;  %v8705_v46 = vsel %vm11926_vm3, %v8700_v7, %v8704_v0  ;;  %v8891_v62 = vshrl.u32 %v8874_v34, 16  ;;  %v8894_v36 = vshll.u32 %v8874_v34, 16  ;;  %v11664_v21 = vld [vmem:[%s11875_s26 + $0x10] sm:$0xff]   ;;  %v8880_v0 = vld [vmem:[#allocation6 + $0x20] sm:$0xf] }
 0x31f   : > { %v8690_v43 = vrot.slane %v8688_v58, 5  ;;  %v8676_v3 = vrot.slane %v8674_v35, 5  ;;  %v11656_v7 = vld [vmem:[#allocation7 + $0x3e0] sm:$0xff]   ;;  %v8933_v34 = vshrl.u32 %v8880_v0, 16  ;;  %v8936_v27 = vshll.u32 %v8880_v0, 16 }
 0x320   : > { %11339 = vmatpush3.bf16.msra.mxu0 %v11638_v51  ;;  %11273 = vmatmul.mubr.bf16.vlgmr.msra.gmra.mxu1 %v10189_v6  ;;  %v8713_v51 = vor.u32 %v8712_v23, %v8709_v40  ;;  %v11058_v57 = vpop.f32.mrf.mxu0  ;;  %v8893_v58 = vrot.slane %v8891_v62, 4  ;;  %v8911_v40 = vor.u32 %v8910_v60, %v8907_v53 }
 0x321   : > { %11276 = vmatprep.mubr.bf16.mxu1 %v10190_v61  ;;  %11305 = vmatpush3.bf16.msra.mxu1 %v11639_v24  ;;  %v8691_v6 = vsel %vm11926_vm3, %v8686_v38, %v8690_v43  ;;  %v8649_v24 = vsel %vm11926_vm3, %v8644_v19, %v8648_v32  ;;  %v8677_v37 = vsel %vm11926_vm3, %v8672_v56, %v8676_v3  ;;  %v11649_v61 = vld [vmem:[#allocation7 + $0x340] sm:$0xff]   ;;  %v11665_v32 = vld [vmem:[%s11875_s26 + $0x18] sm:$0xff]   ;;  %s10335_s26 = sshll.u32 %s11821_s22, 10  ;;  %s14921_s22 = scalar_lea.sflag [#allocation9], %s245_s13 }
 0x322   : > { %11340 = vmatprep.subr.bf16.mxu0 %v11640_v55  ;;  %11306 = vmatprep.subr.bf16.mxu1 %v11641_v49  ;;  %v10225_v41 = vcombine.low %v8649_v24, %v8663_v1  ;;  %v10226_v20 = vcombine.low %v8677_v37, %v8691_v6  ;;  %v8714_v17 = vrot.slane %v8713_v51, 4  ;;  %v6119_v29 = vpop.f32.mrf.mxu0  ;;  %v8912_v43 = vrot.slane %v8911_v40, 4  ;;  %v11655_v51 = vld [vmem:[#allocation7 + $0x3e8] sm:$0xff]   ;;  %v8881_v40 = vld [vmem:[#allocation6 + $0x24] sm:$0x1]  ;;  %s14913_s30 = scalar_lea.hbm %s14966_s5, %s10335_s26 }
 0x324   : > { %11341 = vmatpush3.bf16.msra.mxu0 %v11640_v55  ;;  %v8718_v55 = vrot.slane %v8716_v50, 5  ;;  %v11059_v35 = vpop.f32.mrf.mxu0 }
 0x325   : > { %11307 = vmatpush3.bf16.msra.mxu1 %v11641_v49  ;;  %11342 = vmatprep.subr.bf16.mxu0 %v11642_v33  ;;  %v11647_v49 = vld [vmem:[#allocation7 + $0x350] sm:$0xff]  }
 0x326   : > { %11308 = vmatprep.subr.bf16.mxu1 %v11643_v12  ;;  %v8719_v63 = vsel %vm11926_vm3, %v8714_v17, %v8718_v55 }
 0x327   : > { %v10227_v11 = vcombine.low %v8705_v46, %v8719_v63 }
 0x328   : > { %11343 = vmatpush3.bf16.msra.mxu0 %v11642_v33  ;;  %11277 = vmatmul.mubr.bf16.gmra.mxu1 %v10191_v26  ;;  %v8877_v33 = vld [vmem:[#allocation6 + $0x14] sm:$0x1]  ;;  %v11652_v26 = vld [vmem:[#allocation6 + $0x28] ss:$8 sps:$4 sm:$0xff]  }
 0x329   : > { %11309 = vmatpush3.bf16.msra.mxu1 %v11643_v12  ;;  %11320 = vmatprep.mubr.bf16.mxu1 %v11644_v44  ;;  %v8896_v12 = vrot.slane %v8894_v36, 5  ;;  %v8914_v23 = vshll.u32 %v8877_v33, 16 }
 0x32a   : > { %11310 = vmatprep.subr.bf16.mxu1 %v11645_v30  ;;  %11376 = vmatprep.subr.bf16.mxu0 %v11658_v54 }
 0x32b   : > { %11345 = vmatmul.mubr.bf16.vlgmr.msra.gmra.mxu0 %v10225_v41  ;;  %v8897_v19 = vor.u32 %v8896_v12, %v8893_v58  ;;  %v8916_v10 = vrot.slane %v8914_v23, 5  ;;  %v8938_v58 = vrot.slane %v8936_v27, 5  ;;  %v8889_v27 = vld [vmem:[#allocation6 + $0x44] sm:$0x1] }
 0x32c   : > { %11348 = vmatprep.mubr.bf16.mxu0 %v10226_v20  ;;  %11377 = vmatpush3.bf16.msra.mxu0 %v11658_v54  ;;  %v8902_v54 = vrot.slane %v8900_v13, 5  ;;  %v11654_v20 = vld [vmem:[#allocation6 + $0x38] ss:$8 sps:$4 sm:$0xff]  }
 0x32d   : > { %11311 = vmatpush3.bf16.msra.mxu1 %v11645_v30  ;;  %v6122_v30 = vpop.f32.mrf.mxu0  ;;  %v8898_v50 = vrot.slane %v8897_v19, 4  ;;  %v8917_v22 = vsel %vm11926_vm3, %v8912_v43, %v8916_v10  ;;  %v8888_v19 = vld [vmem:[#allocation6 + $0x40] sm:$0xf]  ;;  %v11660_v43 = vld [vmem:[#allocation7 + $0x3c8] sm:$0xff]   ;;  %v8879_v10 = vld [vmem:[#allocation6 + $0x1c] sm:$0x1] }
 0x32e   : > { %11312 = vmatprep.subr.bf16.mxu1 %v11646_v59 }
 0x331   : > { %11313 = vmatpush3.bf16.msra.mxu1 %v11646_v59  ;;  %v8903_v59 = vsel %vm11926_vm3, %v8898_v50, %v8902_v54 }
 0x332   : > { %11314 = vmatprep.subr.bf16.mxu1 %v11647_v49  ;;  %v10236_v55 = vcombine.low %v8903_v59, %v8917_v22  ;;  %v11662_v59 = vld [vmem:[#allocation7 + $0x3c0] sm:$0xff]  }
 0x333   : > { %11349 = vmatmul.mubr.bf16.gmra.mxu0 %v10227_v11 }
 0x334   : > { %11378 = vmatprep.mubr.msk.bf16.mxu0 %vm811_vm2, %v11661_v52  ;;  %v8884_v52 = vld [vmem:[#allocation6 + $0x30] sm:$0xf] }
 0x335   : > { %11315 = vmatpush3.bf16.msra.mxu1 %v11647_v49  ;;  %v8961_v36 = vshrl.u32 %v8884_v52, 16 }
 0x336   : > { %11316 = vmatprep.subr.bf16.mxu1 %v11648_v45 }
 0x337   : > { %v11014_v4 = vpop.f32.mrf.mxu1 }
 0x339   : > { %11317 = vmatpush3.bf16.msra.mxu1 %v11648_v45  ;;  %v14621_v16 = vpop.f32.mrf.mxu1  ;;  %v8878_v45 = vld [vmem:[#allocation6 + $0x18] sm:$0xf] }
 0x33a   : > { %11318 = vmatprep.subr.bf16.mxu1 %v11649_v61  ;;  %v8919_v53 = vshrl.u32 %v8878_v45, 16  ;;  %v8922_v60 = vshll.u32 %v8878_v45, 16 }
 0x33b   : > { %11379 = vmatmul.mubr.msk.bf16.vlgmr.msra.gmra.mxu0 %vm811_vm2, %v11663_v28  ;;  %v14624_v2 = vpop.f32.mrf.mxu1  ;;  %v8964_v28 = vshll.u32 %v8884_v52, 16 }
 0x33c   : > { %11382 = vmatprep.mubr.msk.bf16.mxu0 %vm811_vm2, %v11664_v21  ;;  %v8921_v13 = vrot.slane %v8919_v53, 4 }
 0x33d   : > { %11319 = vmatpush3.bf16.msra.mxu1 %v11649_v61  ;;  %v14627_v38 = vpop.f32.mrf.mxu1 }
 0x33e   : > { %11352 = vmatprep.subr.bf16.mxu1 %v11651_v25 }
 0x33f   : > { %v11034_v56 = vpop.f32.mrf.mxu1 }
 0x340   : > { %11321 = vmatmul.mubr.bf16.vlgmr.msra.gmra.mxu1 %v11650_v5  ;;  %v5854_v1 = vadd.f32 %v11034_v56, %v14607_v31  ;;  %v8963_v5 = vrot.slane %v8961_v36, 4 }
 0x341   : > { %11324 = vmatprep.mubr.bf16.mxu1 %v11652_v26  ;;  %11353 = vmatpush3.bf16.msra.mxu1 %v11651_v25  ;;  %v5845_v47 = vpop.f32.mrf.mxu1  ;;  %v8935_v25 = vrot.slane %v8933_v34, 4  ;;  %v8924_v26 = vrot.slane %v8922_v60, 5  ;;  %v8998_v60 = vshll.u32 %v8889_v27, 16 }
 0x342   : > { %11354 = vmatprep.subr.bf16.mxu1 %v11653_v15  ;;  %v5846_v44 = vadd.f32 %v5845_v47, %v14609_v48  ;;  %v14632_v3 = vadd.f32 %v11058_v57, %v5854_v1 }
 0x343   : > { %11383 = vmatmul.mubr.msk.bf16.gmra.mxu0 %vm811_vm2, %v11665_v32  ;;  %v11062_v6 = vpop.f32.mrf.mxu0  ;;  %v11035_v24 = vpop.f32.mrf.mxu1  ;;  %v8885_v32 = vld [vmem:[#allocation6 + $0x34] sm:$0x1]  ;;  %v8939_v1 = vor.u32 %v8938_v58, %v8935_v25 }
 0x344   : > { %v5857_v41 = vadd.f32 %v11035_v24, %v14616_v42  ;;  %v14638_v37 = vadd.f32 %v6119_v29, %v5846_v44  ;;  %v11657_v42 = vld [vmem:[#allocation7 + $0x3d8] sm:$0xff]   ;;  %v11659_v29 = vld [vmem:[#allocation7 + $0x3d0] sm:$0xff]   ;;  %v8989_v44 = vshrl.u32 %v8888_v19, 16 }
 0x345   : > { %11355 = vmatpush3.bf16.msra.mxu1 %v11653_v15  ;;  %v5848_v31 = vpop.f32.mrf.mxu1  ;;  %v6135_v46 = vpop.f32.mrf.mxu0  ;;  %v8886_v15 = vld [vmem:[#allocation6 + $0x38] sm:$0xf] }
 0x346   : > { %11356 = vmatprep.subr.bf16.mxu1 %v11655_v51  ;;  %v5849_v17 = vadd.f32 %v5848_v31, %v5711_v39  ;;  %v14642_v48 = vadd.f32 %v11059_v35, %v5857_v41  ;;  %v8882_v39 = vld [vmem:[#allocation6 + $0x28] sm:$0xf]  ;;  %v8975_v50 = vshrl.u32 %v8886_v15, 16  ;;  %v8978_v54 = vshll.u32 %v8886_v15, 16 }
 0x347   : > { %v11038_v63 = vpop.f32.mrf.mxu1  ;;  %v11063_v61 = vpop.f32.mrf.mxu0  ;;  %v8950_v12 = vshll.u32 %v8882_v39, 16  ;;  %v8970_v41 = vshll.u32 %v8885_v32, 16  ;;  %v8925_v31 = vor.u32 %v8924_v26, %v8921_v13  ;;  %v8991_v52 = vrot.slane %v8989_v44, 4 }
 0x348   : > { %11325 = vmatmul.mubr.bf16.gmra.mxu1 %v11654_v20  ;;  %v5870_v49 = vadd.f32 %v11038_v63, %v11014_v4  ;;  %v14644_v11 = vadd.f32 %v6122_v30, %v5849_v17  ;;  %v8942_v30 = vshll.u32 %v8881_v40, 16  ;;  %v8928_v20 = vshll.u32 %v8879_v10, 16 }
 0x349   : > { %11357 = vmatpush3.bf16.msra.mxu1 %v11655_v51  ;;  %11368 = vmatprep.mubr.bf16.mxu1 %v10236_v55  ;;  %v5861_v8 = vpop.f32.mrf.mxu1  ;;  %v6138_v35 = vpop.f32.mrf.mxu0  ;;  %v8952_v47 = vrot.slane %v8950_v12, 5  ;;  %v8883_v51 = vld [vmem:[#allocation6 + $0x2c] sm:$0x1]  ;;  %v8977_v63 = vrot.slane %v8975_v50, 4  ;;  %v8972_v34 = vrot.slane %v8970_v41, 5 }
 0x34a   : > { %11358 = vmatprep.subr.bf16.mxu1 %v11656_v7  ;;  %v5862_v14 = vadd.f32 %v5861_v8, %v14621_v16  ;;  %v14647_v57 = vadd.f32 %v11062_v6, %v5870_v49  ;;  %v8947_v16 = vshrl.u32 %v8882_v39, 16  ;;  %v8992_v6 = vshll.u32 %v8888_v19, 16 }
 0x34b   : > { %v11039_v62 = vpop.f32.mrf.mxu1  ;;  %v11106_v24 = vpop.f32.mrf.mxu0  ;;  %v8944_v17 = vrot.slane %v8942_v30, 5  ;;  %v8956_v0 = vshll.u32 %v8883_v51, 16  ;;  %v8980_v49 = vrot.slane %v8978_v54, 5  ;;  %v8930_v39 = vrot.slane %v8928_v20, 5 }
 0x34c   : > { %v5873_v4 = vadd.f32 %v11039_v62, %v14624_v2  ;;  %v14650_v21 = vadd.f32 %v6135_v46, %v5862_v14  ;;  %v8966_v2 = vrot.slane %v8964_v28, 5  ;;  %v8887_v46 = vld [vmem:[#allocation6 + $0x3c] sm:$0x1]  ;;  %v8994_v8 = vrot.slane %v8992_v6, 5 }
 0x34d   : > { %11359 = vmatpush3.bf16.msra.mxu1 %v11656_v7  ;;  %v5864_v33 = vpop.f32.mrf.mxu1  ;;  %v8940_v7 = vrot.slane %v8939_v1, 4  ;;  %v8926_v14 = vrot.slane %v8925_v31, 4  ;;  %v8958_v62 = vrot.slane %v8956_v0, 5  ;;  %v8984_v36 = vshll.u32 %v8887_v46, 16 }
 0x34e   : > { %11360 = vmatprep.subr.bf16.mxu1 %v11657_v42  ;;  %v5865_v18 = vadd.f32 %v5864_v33, %v14627_v38  ;;  %v14653_v23 = vadd.f32 %v11063_v61, %v5873_v4  ;;  %v8949_v38 = vrot.slane %v8947_v16, 4  ;;  %v8967_v22 = vor.u32 %v8966_v2, %v8963_v5 }
 0x34f   : > { %v8945_v28 = vsel %vm11926_vm3, %v8940_v7, %v8944_v17  ;;  %v8981_v4 = vor.u32 %v8980_v49, %v8977_v63  ;;  %v8995_v53 = vor.u32 %v8994_v8, %v8991_v52  ;;  %v8931_v25 = vsel %vm11926_vm3, %v8926_v14, %v8930_v39 }
 0x350   : > { %v14655_v56 = vadd.f32 %v6138_v35, %v5865_v18  ;;  %v8953_v55 = vor.u32 %v8952_v47, %v8949_v38  ;;  %v8968_v45 = vrot.slane %v8967_v22, 4  ;;  %v10237_v58 = vcombine.low %v8931_v25, %v8945_v28 }
 0x351   : > { %11361 = vmatpush3.bf16.msra.mxu1 %v11657_v42  ;;  %v6571_v42 = vpop.f32.mrf.mxu0  ;;  %v8986_v12 = vrot.slane %v8984_v36, 5  ;;  %v8982_v40 = vrot.slane %v8981_v4, 4  ;;  %v8996_v35 = vrot.slane %v8995_v53, 4  ;;  %v9000_v5 = vrot.slane %v8998_v60, 5 }
 0x352   : > { %11362 = vmatprep.subr.bf16.mxu1 %v11659_v29  ;;  %v8954_v61 = vrot.slane %v8953_v55, 4 }
 0x353   : > { %v11107_v33 = vpop.f32.mrf.mxu0  ;;  %v8987_v32 = vsel %vm11926_vm3, %v8982_v40, %v8986_v12 }
 0x354   : > { %v8959_v16 = vsel %vm11926_vm3, %v8954_v61, %v8958_v62 }
 0x355   : > { %11363 = vmatpush3.bf16.msra.mxu1 %v11659_v29  ;;  %v8973_v29 = vsel %vm11926_vm3, %v8968_v45, %v8972_v34  ;;  %v6574_v2 = vpop.f32.mrf.mxu0 }
 0x356   : > { %11364 = vmatprep.subr.bf16.mxu1 %v11660_v43  ;;  %v10238_v18 = vcombine.low %v8959_v16, %v8973_v29 }
 0x357   : > { %v11110_v1 = vpop.f32.mrf.mxu0 }
 0x359   : > { %11365 = vmatpush3.bf16.msra.mxu1 %v11660_v43  ;;  %v9001_v43 = vsel %vm11926_vm3, %v8996_v35, %v9000_v5 }
 0x35a   : > { %11366 = vmatprep.subr.bf16.mxu1 %v11662_v59 }
 0x35d   : > { %11367 = vmatpush3.bf16.msra.mxu1 %v11662_v59 }
 0x360   : > { %v11082_v15 = vpop.f32.mrf.mxu1  ;;  %11369 = vmatmul.mubr.bf16.vlgmr.msra.gmra.mxu1 %v10237_v58 }
 0x361   : > { %v6434_v19 = vadd.f32 %v11082_v15, %v14632_v3  ;;  %11372 = vmatprep.mubr.bf16.mxu1 %v10238_v18  ;;  %v10239_v3 = vcombine.low %v8987_v32, %v9001_v43 }
 0x362   : > { %v6401_v13 = vpop.f32.mrf.mxu1 }
 0x363   : > { %v6432_v26 = vadd.f32 %v6401_v13, %v14638_v37  ;;  %v14671_v10 = vadd.f32 %v11106_v24, %v6434_v19  ;;  %v6587_v37 = vpop.f32.mrf.mxu0 }
 0x364   : > { %v11083_v30 = vpop.f32.mrf.mxu1 }
 0x365   : > { %v6435_v38 = vadd.f32 %v11083_v30, %v14642_v48  ;;  %v14674_v47 = vadd.f32 %v6571_v42, %v6432_v26  ;;  %v11111_v48 = vpop.f32.mrf.mxu0 }
 0x366   : > { %v6404_v51 = vpop.f32.mrf.mxu1 }
 0x367   : > { %v6433_v50 = vadd.f32 %v6404_v51, %v14644_v11  ;;  %v14677_v54 = vadd.f32 %v11107_v33, %v6435_v38  ;;  %v6590_v55 = vpop.f32.mrf.mxu0 }
 0x368   : > { %v11086_v44 = vpop.f32.mrf.mxu1  ;;  %11373 = vmatmul.mubr.bf16.gmra.mxu1 %v10239_v3 }
 0x369   : > { %v6438_v9 = vadd.f32 %v11086_v44, %v14647_v57  ;;  %v14680_v6 = vadd.f32 %v6574_v2, %v6433_v50 }
 0x36a   : > { %v6417_v24 = vpop.f32.mrf.mxu1 }
 0x36b   : > { %v6436_v22 = vadd.f32 %v6417_v24, %v14650_v21  ;;  %v14683_v41 = vadd.f32 %v11110_v1, %v6438_v9  ;;  %v14693_v0 = vpop.f32.mrf.mxu0 }
 0x36c   : > { %v11087_v31 = vpop.f32.mrf.mxu1 }
 0x36d   : > { %v6439_v20 = vadd.f32 %v11087_v31, %v14653_v23  ;;  %v14686_v59 = vadd.f32 %v6587_v37, %v6436_v22  ;;  %v14695_v46 = vpop.f32.mrf.mxu0 }
 0x36e   : > { %v6420_v11 = vpop.f32.mrf.mxu1 }
 0x36f   : > { %v6437_v7 = vadd.f32 %v6420_v11, %v14655_v56  ;;  %v14689_v17 = vadd.f32 %v11111_v48, %v6439_v20  ;;  %v14697_v21 = vpop.f32.mrf.mxu0 }
 0x371   : > { %v14691_v57 = vadd.f32 %v6590_v55, %v6437_v7  ;;  %v14699_v63 = vpop.f32.mrf.mxu0 }
 0x373   : > { %v14703_v23 = vpop.f32.mrf.mxu0 }
 0x375   : > { %v14707_v56 = vpop.f32.mrf.mxu0 }
 0x377   : > { %v14711_v42 = vpop.f32.mrf.mxu0 }
 0x379   : > { %v14715_v34 = vpop.f32.mrf.mxu0 }
 0x380   : > { %v14701_v49 = vpop.f32.mrf.mxu1 }
 0x382   : > { %v14705_v52 = vpop.f32.mrf.mxu1 }
 0x384   : > { %v14709_v8 = vpop.f32.mrf.mxu1 }
 0x386   : > { %v14713_v45 = vpop.f32.mrf.mxu1 }
 0x388   : > { %v14717_v27 = vpop.f32.mrf.mxu1 }
 0x38a   : > { %v14721_v39 = vpop.f32.mrf.mxu1 }
 0x38b   : > { %v14719_v14 = vpop.f32.mrf.mxu0 }
 0x38c   : > { %v14725_v62 = vpop.f32.mrf.mxu1 }
 0x38d   : > { %v14723_v61 = vpop.f32.mrf.mxu0 }
 0x38e   : > { %v14729_v28 = vpop.f32.mrf.mxu1 }
 0x38f   : > { %v14727_v36 = vpop.f32.mrf.mxu0 }
 0x391   : > { %v14731_v4 = vpop.f32.mrf.mxu0 }
 0x393   : > { %v14733_v60 = vpop.f32.mrf.mxu0 }
 0x395   : > { %v14735_v29 = vpop.f32.mrf.mxu0 }
 0x397   : > { %v14737_v58 = vpop.f32.mrf.mxu0 }
 0x399   : > { %v14741_v12 = vpop.f32.mrf.mxu0 }
 0x39a   : > { %15205 = vst [vmem:[#allocation25_spill] sm:$0xff] %v14741_v12 }
 0x3a0   : > { %v11178_v53 = vpop.f32.mrf.mxu1 }
 0x3a2   : > { %v7305_v33 = vpop.f32.mrf.mxu1 }
 0x3a4   : > { %v11179_v25 = vpop.f32.mrf.mxu1 }
 0x3a6   : > { %v14739_v16 = vpop.f32.mrf.mxu1 }
 0x3a8   : > { %v14743_v18 = vpop.f32.mrf.mxu1 }
 0x3aa   : > { %v14747_v35 = vpop.f32.mrf.mxu1 }
 0x3ab   : > { %v14745_v40 = vpop.f32.mrf.mxu0 }
 0x3ac   : > { %v14751_v2 = vpop.f32.mrf.mxu1 }
 0x3ad   : > { %v14749_v5 = vpop.f32.mrf.mxu0 }
 0x3ae   : > { %v14755_v19 = vpop.f32.mrf.mxu1 }
 0x3af   : > { %v14753_v15 = vpop.f32.mrf.mxu0 }
 0x3b1   : > { %v14757_v13 = vpop.f32.mrf.mxu0 }
 0x3b3   : > { %v14759_v32 = vpop.f32.mrf.mxu0 }
 0x3b4   : > { %15206 = vst [vmem:[#allocation29_spill] sm:$0xff] %v14759_v32 }
 0x3b5   : > { %v14761_v1 = vpop.f32.mrf.mxu0 }
 0x3b6   : > { %15207 = vst [vmem:[#allocation31_spill] sm:$0xff] %v14761_v1 }
 0x3b7   : > { %v14765_v38 = vpop.f32.mrf.mxu0 }
 0x3b8   : > { %15208 = vst [vmem:[#allocation33_spill] sm:$0xff] %v14765_v38 }
 0x3b9   : > { %v14769_v3 = vpop.f32.mrf.mxu0 }
 0x3ba   : > { %15209 = vst [vmem:[#allocation14_spill] sm:$0xff] %v14769_v3 }
 0x3c0   : > { %v11226_v26 = vpop.f32.mrf.mxu1 }
 0x3c2   : > { %v7647_v43 = vpop.f32.mrf.mxu1 }
 0x3c4   : > { %v14763_v30 = vpop.f32.mrf.mxu1 }
 0x3c6   : > { %v14767_v51 = vpop.f32.mrf.mxu1 }
 0x3c8   : > { %v14771_v50 = vpop.f32.mrf.mxu1 }
 0x3ca   : > { %v14775_v44 = vpop.f32.mrf.mxu1 }
 0x3cb   : > { %v14773_v37 = vpop.f32.mrf.mxu0 }
 0x3cc   : > { %v14779_v24 = vpop.f32.mrf.mxu1 }
 0x3cd   : > { %v14777_v9 = vpop.f32.mrf.mxu0  ;;  %15211 = vst [vmem:[#allocation18_spill] sm:$0xff] %v14779_v24 }
 0x3ce   : > { %15210 = vst [vmem:[#allocation34_spill] sm:$0xff] %v14777_v9  ;;  %v14783_v48 = vpop.f32.mrf.mxu1 }
 0x3cf   : > { %v14781_v22 = vpop.f32.mrf.mxu0  ;;  %15213 = vst [vmem:[#allocation16_spill] sm:$0xff] %v14783_v48 }
 0x3d0   : > { %15212 = vst [vmem:[#allocation15_spill] sm:$0xff] %v14781_v22 }
 0x3d1   : > { %v14785_v31 = vpop.f32.mrf.mxu0 }
 0x3d2   : > { %15214 = vst [vmem:[#allocation19_spill] sm:$0xff] %v14785_v31 }
 0x3d3   : > { %v14787_v11 = vpop.f32.mrf.mxu0 }
 0x3d4   : > { %15215 = vst [vmem:[#allocation17_spill] sm:$0xff] %v14787_v11 }
 0x3d5   : > { %v14791_v55 = vpop.f32.mrf.mxu0 }
 0x3d6   : > { %15216 = vst [vmem:[#allocation20_spill] sm:$0xff] %v14791_v55 }
 0x3d7   : > { %v14795_v38 = vpop.f32.mrf.mxu0 }
 0x3d8   : > { %15217 = vst [vmem:[#allocation26_spill] sm:$0xff] %v14795_v38 }
 0x3d9   : > { %v14799_v9 = vpop.f32.mrf.mxu0 }
 0x3da   : > { %15219 = vst [vmem:[#allocation70_spill] sm:$0xff] %v14799_v9  ;;  %v6774_v9 = vadd.f32 %v14701_v49, %v14671_v10 }
 0x3e0   : > { %v11274_v20 = vpop.f32.mrf.mxu1 }
 0x3e2   : > { %v14789_v7 = vpop.f32.mrf.mxu1 }
 0x3e4   : > { %v14793_v3 = vpop.f32.mrf.mxu1 }
 0x3e6   : > { %v14797_v1 = vpop.f32.mrf.mxu1 }
 0x3e7   : > { %15218 = vst [vmem:[#allocation64_spill] sm:$0xff] %v14797_v1 }
 0x3e8   : > { %v14801_v22 = vpop.f32.mrf.mxu1 }
 0x3e9   : > { %15220 = vst [vmem:[#allocation30_spill] sm:$0xff] %v14801_v22  ;;  %v6772_v22 = vadd.f32 %v14705_v52, %v14674_v47  ;;  %v6778_v47 = vadd.f32 %v14717_v27, %v14683_v41 }
 0x3ea   : > { %v14805_v31 = vpop.f32.mrf.mxu1 }
 0x3eb   : > { %v14803_v48 = vpop.f32.mrf.mxu0  ;;  %15222 = vst [vmem:[#allocation28_spill] sm:$0xff] %v14805_v31  ;;  %v7060_v41 = vadd.f32 %v14703_v23, %v6778_v47 }
 0x3ec   : > { %15221 = vst [vmem:[#allocation21_spill] sm:$0xff] %v14803_v48  ;;  %v14809_v11 = vpop.f32.mrf.mxu1 }
 0x3ed   : > { %v14807_v32 = vpop.f32.mrf.mxu0  ;;  %15224 = vst [vmem:[#allocation32_spill] sm:$0xff] %v14809_v11  ;;  %v7054_v11 = vadd.f32 %v14695_v46, %v6772_v22  ;;  %v6779_v46 = vadd.f32 %v14725_v62, %v14689_v17  ;;  %v15229_v22 = vld [vmem:[#allocation25_spill] sm:$0xff] }
 0x3ee   : > { %15223 = vst [vmem:[#allocation22_spill] sm:$0xff] %v14807_v32  ;;  %v14813_v55 = vpop.f32.mrf.mxu1  ;;  %v6775_v32 = vadd.f32 %v14709_v8, %v14677_v54  ;;  %v6776_v54 = vadd.f32 %v14721_v39, %v14686_v59  ;;  %v6777_v59 = vadd.f32 %v14729_v28, %v14691_v57 }
 0x3ef   : > { %v14811_v12 = vpop.f32.mrf.mxu0  ;;  %15226 = vst [vmem:[#allocation66_spill] sm:$0xff] %v14813_v55  ;;  %v6773_v55 = vadd.f32 %v14713_v45, %v14680_v6  ;;  %v7336_v49 = vadd.f32 %v7305_v33, %v7054_v11  ;;  %v7061_v33 = vadd.f32 %v14711_v42, %v6779_v46  ;;  %v15230_v11 = vld [vmem:[#allocation64_spill] sm:$0xff] }
 0x3f0   : > { %15225 = vst [vmem:[#allocation13_spill] sm:$0xff] %v14811_v12  ;;  %v7056_v12 = vadd.f32 %v14693_v0, %v6774_v9  ;;  %v7057_v52 = vadd.f32 %v14697_v21, %v6775_v32  ;;  %v7059_v28 = vadd.f32 %v14715_v34, %v6777_v59 }
 0x3f1   : > { %v14815_v24 = vpop.f32.mrf.mxu0  ;;  %v7055_v0 = vadd.f32 %v14699_v63, %v6773_v55  ;;  %v7507_v21 = vadd.f32 %v14723_v61, %v7336_v49  ;;  %v7058_v63 = vadd.f32 %v14707_v56, %v6776_v54  ;;  %v7343_v56 = vadd.f32 %v14751_v2, %v7061_v33  ;;  %v15231_v55 = vld [vmem:[#allocation29_spill] sm:$0xff]  ;;  %v15234_v54 = vld [vmem:[#allocation31_spill] sm:$0xff] }
 0x3f2   : > { %15227 = vst [vmem:[#allocation72_spill] sm:$0xff] %v14815_v24  ;;  %v7338_v24 = vadd.f32 %v11178_v53, %v7056_v12  ;;  %v7339_v8 = vadd.f32 %v11179_v25, %v7057_v52  ;;  %v7341_v32 = vadd.f32 %v14755_v19, %v7059_v28  ;;  %v15243_v28 = vld [vmem:[#allocation17_spill] sm:$0xff] }
 0x3f3   : > { %v14821_v48 = vpop.f32.mrf.mxu0  ;;  %v7337_v12 = vadd.f32 %v14739_v16, %v7055_v0  ;;  %v7678_v39 = vadd.f32 %v7647_v43, %v7507_v21  ;;  %v7340_v62 = vadd.f32 %v14747_v35, %v7058_v63 }
 0x3f4   : > { %v7509_v6 = vadd.f32 %v14719_v14, %v7338_v24  ;;  %v7342_v14 = vadd.f32 %v14743_v18, %v7060_v41  ;;  %v7510_v17 = vadd.f32 %v14727_v36, %v7339_v8  ;;  %v15228_v24 = vld [vmem:[#allocation18_spill] sm:$0xff] }
 0x3f5   : > { %v14831_v1 = vpop.f32.mrf.mxu0  ;;  %v7508_v61 = vadd.f32 %v14731_v4, %v7337_v12  ;;  %v7960_v42 = vadd.f32 %v14749_v5, %v7678_v39  ;;  %v7511_v43 = vadd.f32 %v14735_v29, %v7340_v62  ;;  %v15237_v12 = vld [vmem:[#allocation28_spill] sm:$0xff]  ;;  %v15240_v39 = vld [vmem:[#allocation21_spill] sm:$0xff] }
 0x3f6   : > { %v7680_v27 = vadd.f32 %v11226_v26, %v7509_v6  ;;  %v7681_v16 = vadd.f32 %v14763_v30, %v7510_v17  ;;  %v7513_v35 = vadd.f32 %v14733_v60, %v7342_v14  ;;  %v15236_v6 = vld [vmem:[#allocation15_spill] sm:$0xff]  ;;  %v15241_v62 = vld [vmem:[#allocation32_spill] sm:$0xff] }
 0x3f7   : > { %v14842_v45 = vpop.f32.mrf.mxu0  ;;  %v7679_v36 = vadd.f32 %v14767_v51, %v7508_v61  ;;  %v7682_v34 = vadd.f32 %v14775_v44, %v7511_v43  ;;  %v7514_v51 = vadd.f32 %v14737_v58, %v7343_v56  ;;  %v15232_v44 = vld [vmem:[#allocation34_spill] sm:$0xff]  ;;  %v15233_v58 = vld [vmem:[#allocation16_spill] sm:$0xff] }
 0x3f8   : > { %v7962_v57 = vadd.f32 %v14745_v40, %v7680_v27  ;;  %v7684_v4 = vadd.f32 %v14771_v50, %v7513_v35  ;;  %v8242_v40 = vadd.f32 %v14789_v7, %v7960_v42  ;;  %v7963_v2 = vadd.f32 %v14753_v15, %v7681_v16  ;;  %v15238_v27 = vld [vmem:[#allocation33_spill] sm:$0xff]  ;;  %v15242_v16 = vld [vmem:[#allocation14_spill] sm:$0xff] }
 0x3f9   : > { %v14854_v25 = vpop.f32.mrf.mxu0  ;;  %v7961_v5 = vadd.f32 %v14757_v13, %v7679_v36  ;;  %v7685_v29 = vadd.f32 %v15228_v24, %v7514_v51  ;;  %v15235_v13 = vld [vmem:[#allocation30_spill] sm:$0xff] }
 0x3fa   : > { %v8244_v26 = vadd.f32 %v11274_v20, %v7962_v57  ;;  %v8245_v60 = vadd.f32 %v14793_v3, %v7963_v2  ;;  %v7512_v20 = vadd.f32 %v15229_v22, %v7341_v32  ;;  %v7966_v15 = vadd.f32 %v15231_v55, %v7684_v4  ;;  %v15245_v32 = vld [vmem:[#allocation66_spill] sm:$0xff] }
 0x3fb   : > { %v11380_v18 = vpop.f32.mrf.mxu0  ;;  %v8243_v7 = vadd.f32 %v15230_v11, %v7961_v5  ;;  %v8413_v49 = vadd.f32 %v15232_v44, %v8242_v40  ;;  %v7964_v3 = vadd.f32 %v15234_v54, %v7682_v34  ;;  %v7967_v21 = vadd.f32 %v15238_v27, %v7685_v29 }
 0x3fc   : > { %v8415_v19 = vadd.f32 %v14773_v37, %v8244_v26  ;;  %v7683_v52 = vadd.f32 %v15233_v58, %v7512_v20  ;;  %v8248_v0 = vadd.f32 %v15235_v13, %v7966_v15  ;;  %v8416_v46 = vadd.f32 %v15236_v6, %v8245_v60  ;;  %v15244_v26 = vld [vmem:[#allocation22_spill] sm:$0xff]  ;;  %v15247_v60 = vld [vmem:[#allocation13_spill] sm:$0xff] }
 0x3fd   : > { %v9238_v9 = vpop.f32.mrf.mxu0  ;;  %v8246_v41 = vadd.f32 %v15237_v12, %v7964_v3  ;;  %v8249_v33 = vadd.f32 %v15241_v62, %v7967_v21  ;;  %v15250_v15 = vld [vmem:[#allocation70_spill] sm:$0xff] }
 0x3fe   : > { %v7965_v61 = vadd.f32 %v15242_v16, %v7683_v52  ;;  %v8419_v36 = vadd.f32 %v15243_v28, %v8248_v0 }
 0x3ff   : > { %v11381_v8 = vpop.f32.mrf.mxu0 }
 0x400   : > { %v11322_v38 = vpop.f32.mrf.mxu1  ;;  %v8247_v43 = vadd.f32 %v15245_v32, %v7965_v61 }
 0x401   : > { %v8586_v47 = vadd.f32 %v11322_v38, %v8415_v19  ;;  %v15239_v38 = vld [vmem:[#allocation19_spill] sm:$0xff]  ;;  %v9241_v56 = vpop.f32.mrf.mxu0  ;;  %v15248_v19 = vld [vmem:[#allocation26_spill] sm:$0xff] }
 0x402   : > { %v14823_v31 = vpop.f32.mrf.mxu1  ;;  %v8414_v14 = vadd.f32 %v15239_v38, %v8243_v7  ;;  %v8420_v24 = vadd.f32 %v15248_v19, %v8249_v33  ;;  %v15249_v7 = vld [vmem:[#allocation72_spill] sm:$0xff] }
 0x403   : > { %v8584_v37 = vadd.f32 %v14823_v31, %v8413_v49  ;;  %v8868_v17 = vadd.f32 %v15240_v39, %v8586_v47  ;;  %v8418_v47 = vadd.f32 %v15250_v15, %v8247_v43 }
 0x404   : > { %v11323_v10 = vpop.f32.mrf.mxu1 }
 0x405   : > { %v8587_v63 = vadd.f32 %v11323_v10, %v8416_v46  ;;  %v8866_v42 = vadd.f32 %v15244_v26, %v8584_v37  ;;  %v15246_v10 = vld [vmem:[#allocation20_spill] sm:$0xff] }
 0x406   : > { %v8556_v53 = vpop.f32.mrf.mxu1  ;;  %v8417_v4 = vadd.f32 %v15246_v10, %v8246_v41 }
 0x407   : > { %v8585_v31 = vadd.f32 %v8556_v53, %v8414_v14  ;;  %v8869_v5 = vadd.f32 %v15247_v60, %v8587_v63  ;;  %v11384_v53 = vpop.f32.mrf.mxu0 }
 0x408   : > { %v11326_v23 = vpop.f32.mrf.mxu1 }
 0x409   : > { %v8590_v2 = vadd.f32 %v11326_v23, %v8419_v36  ;;  %v8867_v55 = vadd.f32 %v15249_v7, %v8585_v31  ;;  %v9254_v52 = vpop.f32.mrf.mxu0 }
 0x40a   : > { %v8569_v30 = vpop.f32.mrf.mxu1 }
 0x40b   : > { %v8588_v22 = vadd.f32 %v8569_v30, %v8417_v4  ;;  %v8872_v58 = vadd.f32 %v14821_v48, %v8590_v2  ;;  %v11385_v6 = vpop.f32.mrf.mxu0 }
 0x40c   : > { %v11327_v50 = vpop.f32.mrf.mxu1 }
 0x40d   : > { %v8591_v23 = vadd.f32 %v11327_v50, %v8420_v24  ;;  %v8870_v13 = vadd.f32 %v14831_v1, %v8588_v22 }
 0x40e   : > { %v8572_v59 = vpop.f32.mrf.mxu1 }
 0x40f   : > { %v8589_v3 = vadd.f32 %v8572_v59, %v8418_v47  ;;  %v9257_v59 = vpop.f32.mrf.mxu0 }
 0x411   : > { %v8871_v41 = vadd.f32 %v14854_v25, %v8589_v3 }
 0x420   : > { %v11370_v57 = vpop.f32.mrf.mxu1 }
 0x421   : > { %v9150_v35 = vadd.f32 %v11370_v57, %v8868_v17 }
 0x422   : > { %v9117_v40 = vpop.f32.mrf.mxu1 }
 0x423   : > { %v9271_v34 = vadd.f32 %v11380_v18, %v9150_v35  ;;  %v9148_v51 = vadd.f32 %v9117_v40, %v8866_v42 }
 0x424   : > { %v11371_v29 = vpop.f32.mrf.mxu1 }
 0x425   : > { %9279 = vst [vmem:[%s11882_s8 + $0x10] sm:$0xff] %v9271_v34  ;;  %v9269_v20 = vadd.f32 %v9238_v9, %v9148_v51  ;;  %v9151_v11 = vadd.f32 %v11371_v29, %v8869_v5 }
 0x426   : > { %v9120_v44 = vpop.f32.mrf.mxu1 }
 0x427   : > { %9277 = vst [vmem:[%s11882_s8] sm:$0xff] %v9269_v20  ;;  %v9272_v18 = vadd.f32 %v11381_v8, %v9151_v11  ;;  %v9149_v49 = vadd.f32 %v9120_v44, %v8867_v55  ;;  %v8873_v8 = vadd.f32 %v14842_v45, %v8591_v23 }
 0x428   : > { %v11374_v54 = vpop.f32.mrf.mxu1 }
 0x429   : > { %9280 = vst [vmem:[%s11882_s8 + $0x18] sm:$0xff] %v9272_v18  ;;  %v9270_v30 = vadd.f32 %v9241_v56, %v9149_v49  ;;  %v9154_v9 = vadd.f32 %v11374_v54, %v8872_v58 }
 0x42a   : > { %v9133_v0 = vpop.f32.mrf.mxu1 }
 0x42b   : > { %9278 = vst [vmem:[%s11882_s8 + $0x8] sm:$0xff] %v9270_v30  ;;  %v9275_v50 = vadd.f32 %v11384_v53, %v9154_v9  ;;  %v9152_v37 = vadd.f32 %v9133_v0, %v8870_v13 }
 0x42c   : > { %v11375_v48 = vpop.f32.mrf.mxu1 }
 0x42d   : > { %9283 = vst [vmem:[%s11882_s8 + $0x30] sm:$0xff] %v9275_v50  ;;  %v9273_v46 = vadd.f32 %v9254_v52, %v9152_v37  ;;  %v9155_v12 = vadd.f32 %v11375_v48, %v8873_v8 }
 0x42e   : > { %v9136_v1 = vpop.f32.mrf.mxu1 }
 0x42f   : > { %9281 = vst [vmem:[%s11882_s8 + $0x20] sm:$0xff] %v9273_v46  ;;  %v9276_v27 = vadd.f32 %v11385_v6, %v9155_v12  ;;  %v9153_v21 = vadd.f32 %v9136_v1, %v8871_v41 }
 0x431   : > { %9284 = vst [vmem:[%s11882_s8 + $0x38] sm:$0xff] %v9276_v27  ;;  %v9274_v45 = vadd.f32 %v9257_v59, %v9153_v21 }
 0x433   : > { %9282 = vst [vmem:[%s11882_s8 + $0x28] sm:$0xff] %v9274_v45 }
 0x434   : > { %11710 = shalt.err (!%p11707_p1)
}
 0x435   : > { %s11711_s13 = scalar_lea.hbm %s14913_s30, 1024  ;;  %s11715_s14 = scalar_lea.hbm %s14966_s5, 2048 }
 0x436   : > { %p11712_p2 = scmp.ne.s32.totalorder %s14913_s30, %s11711_s13  ;;  %p11716_p7 = scmp.lt.s32.totalorder %s14913_s30, %s14966_s5 }
 0x437   : > { %p11717_p6 = scmp.lt.s32.totalorder %s11715_s14, %s11711_s13 }
 0x438   : > { %p11713_p3 = pnand %p11712_p2, %p11838_p5 }
 0x439   : > { %p11718_p8 = por %p11717_p6, %p11716_p7 }
 0x43a   : > { %p11714_p4 = pneg %p11713_p3 }
 0x43c   : > { %p11719_p9 = pnand %p11718_p8, %p11714_p4 }
 0x43e   : > { %11722 = shalt.err (!%p11719_p9)
}
 0x43f   : > { %s11768_s16 = smov 128   ;;  %s11769_s26 = smov 8  }
 0x440   : > { %11393 = dma.vmem_to_hbm [thread:$0]  (%p11838_p5), %s14915_s17, 1024, %s14913_s30, %s14921_s22, %s11768_s16, %s11768_s16, %s11769_s26  }
 0x441 PF: > { %p11405_p10 = scmp.ge.s32.totalorder %s11761_s21, 2  ;;  %s9314_s23 = sand.u32 1, %s11749_s18  }
 0x442   : > { %p15251_p11 = scmp.ne.s32.totalorder %s14977_s29, 0  ;;  %s9315_s25 = scalar_lea.sflag [#allocation9], %s9314_s23 }
 0x444   : > { %p11400_p12 = pnand %p11405_p10, %p15251_p11 }
 0x446   : > { %p11401_p13 = pneg %p11400_p12 }
 0x448   : > { %11744 = dma.done.wait (%p11401_p13), %s9315_s25, 1024  }
 0x449   : > { %11746 = vsyncadd (%p11401_p13), %s9315_s25, 4294966272  ;;  %p16_p0 = scmp.ge.s32.totalorder %s11825_s24, 4   ;;  %s15252_s18 = smov %s11753_s19 }
 0x44a   : > { %s15253_s19 = smov %s11757_s20  ;;  %s15254_s20 = smov %s11836_s27 }
 0x44b   : > { %s15255_s21 = smov %s11825_s24  ;;  %18 = sbr.rel (!%p16_p0) target bundleno = 4 (0x4), region = 187 }
 0x450   :  { %9320 = vsyncpa [#allocation8], 1 }
 0x451   :  { %9322 = vsyncpa [#allocation8 + $0x1], 1 }
 0x452   :  { %9323 = vsyncpa [#allocation9], 1 }
 0x453   :  { %9325 = vsyncpa [#allocation9 + $0x1], 1 }

</bundles_post_ra>
